<compile_context>
chip_gen: v6e
topology: v6e:2x2x1
jax: 0.10.0
libtpu: 0.0.40
codegen_flags: <defaults>
</compile_context>

<pallas_src>
import jax
import jax.numpy as jnp
from jax.experimental import pallas as pl
from jax.experimental.pallas import tpu as pltpu


LAYER_DIMS = [3072, 1024, 512, 256, 128, 64, 10]


def _fused_mlp_kernel(x_ref,
                      w1_ref, s1_ref, b1_ref,
                      w2_ref, s2_ref, b2_ref,
                      w3_ref, s3_ref, b3_ref,
                      w4_ref, s4_ref, b4_ref,
                      w5_ref, s5_ref, b5_ref,
                      w6_ref, s6_ref, b6_ref,
                      o_ref):
    """Whole forward pass: 5x (Linear + ReLU) + Linear + log_softmax.

    Weights arrive as int8; they are upcast to bf16 (exact for int8 range) and
    fed to the MXU with f32 accumulation.  The per-output-channel dequant scale
    is applied to the f32 accumulator, then the f32 bias is added.  All
    intermediate activations live in VMEM/vregs only.
    """
    h = x_ref[...].astype(jnp.bfloat16)

    hidden_layers = (
        (w1_ref, s1_ref, b1_ref),
        (w2_ref, s2_ref, b2_ref),
        (w3_ref, s3_ref, b3_ref),
        (w4_ref, s4_ref, b4_ref),
        (w5_ref, s5_ref, b5_ref),
    )
    for w_ref, s_ref, b_ref in hidden_layers:
        w = w_ref[...].astype(jnp.bfloat16)          # exact int8 -> bf16 upcast
        z = jnp.dot(h, w, preferred_element_type=jnp.float32)
        z = z * s_ref[...] + b_ref[...]              # (B,N)*(1,N)+(1,N), f32
        h = jnp.maximum(z, 0.0).astype(jnp.bfloat16)
        # dropout: identity in eval mode.

    # Final layer + log_softmax(dim=1), fully in f32.
    w6 = w6_ref[...].astype(jnp.bfloat16)
    z = jnp.dot(h, w6, preferred_element_type=jnp.float32)
    z = z * s6_ref[...] + b6_ref[...]
    m = jnp.max(z, axis=-1, keepdims=True)
    s = z - m
    lse = jnp.log(jnp.sum(jnp.exp(s), axis=-1, keepdims=True))
    o_ref[...] = (s - lse).astype(o_ref.dtype)


def fused_classifier_pallas(x_flat, prepared_params):
    """x_flat: (B, 3072) f32.
    prepared_params: list of (w_q int8 (K,N), scale f32 (1,N), b f32 (1,N))."""
    B, K = x_flat.shape
    assert K == LAYER_DIMS[0]
    N_out = LAYER_DIMS[-1]

    inputs = [x_flat]
    for w_q, s, b in prepared_params:
        inputs.extend([w_q, s, b])

    vmem_spec = pl.BlockSpec(memory_space=pltpu.MemorySpace.VMEM)

    return pl.pallas_call(
        _fused_mlp_kernel,
        out_shape=jax.ShapeDtypeStruct((B, N_out), jnp.float32),
        in_specs=[vmem_spec] * len(inputs),
        out_specs=vmem_spec,
        compiler_params=pltpu.CompilerParams(
            vmem_limit_bytes=32 << 20,
        ),
    )(*inputs)


def init_params(key):
    """Deterministic init mimicking nn.Linear (uniform +-1/sqrt(fan_in)), f32.

    Weight layout is (in_features, out_features), i.e. the transpose of the
    PyTorch nn.Linear weight, so the kernel computes y = x @ W + b.
    """
    params = []
    for i in range(len(LAYER_DIMS) - 1):
        kin, kout = LAYER_DIMS[i], LAYER_DIMS[i + 1]
        key, kw, kb = jax.random.split(key, 3)
        bound = 1.0 / jnp.sqrt(kin)
        w = jax.random.uniform(kw, (kin, kout), jnp.float32, -bound, bound)
        b = jax.random.uniform(kb, (kout,), jnp.float32, -bound, bound)
        params.append((w, b))
    return params


def prepare_params(params_f32):
    """One-time symmetric per-output-channel int8 quantization of the weights.

    Returns [(w_q int8 (K,N), scale f32 (1,N), bias f32 (1,N)), ...].
    Halves the HBM weight stream vs bf16; dequant happens in-kernel.
    """
    prepared = []
    for w, b in params_f32:
        amax = jnp.max(jnp.abs(w), axis=0, keepdims=True)       # (1, N)
        scale = jnp.maximum(amax, 1e-12) / 127.0
        w_q = jnp.clip(jnp.round(w / scale), -127.0, 127.0).astype(jnp.int8)
        prepared.append((w_q,
                         scale.astype(jnp.float32),
                         b.reshape(1, -1).astype(jnp.float32)))
    return prepared


@jax.jit
def classifier_forward(x_nchw, prepared_params):
    # glue: flatten NCHW -> (B, 3072), identical to x.view(x.shape[0], -1)
    B = x_nchw.shape[0]
    x = x_nchw.reshape(B, -1)
    return fused_classifier_pallas(x, prepared_params)


def reference_forward(x_nchw, prepared_params):
    """Pure-JAX reference using the exact same int8 weights / dequant math."""
    B = x_nchw.shape[0]
    h = x_nchw.reshape(B, -1).astype(jnp.bfloat16)
    for (w_q, s, b) in prepared_params[:-1]:
        z = jnp.dot(h, w_q.astype(jnp.bfloat16),
                    preferred_element_type=jnp.float32) * s + b
        h = jnp.maximum(z, 0.0).astype(jnp.bfloat16)
    w_q, s, b = prepared_params[-1]
    z = jnp.dot(h, w_q.astype(jnp.bfloat16),
                preferred_element_type=jnp.float32) * s + b
    return jax.nn.log_softmax(z, axis=1)


if __name__ == "__main__":
    key = jax.random.PRNGKey(0)
    kx, kp = jax.random.split(key)

    # CIFAR-shaped input: batch=2, NCHW (2, 3, 32, 32) -> flattens to 3072 features
    x = jax.random.normal(kx, (2, 3, 32, 32), jnp.float32)
    params = init_params(kp)
    prepared = prepare_params(params)

    out = classifier_forward(x, prepared)
    out = jax.block_until_ready(out)

    assert out.shape == (2, 10)
    # log-softmax rows must sum (in prob space) to ~1
    assert bool(jnp.allclose(jnp.sum(jnp.exp(out), axis=1), 1.0, atol=1e-4))
    # match the pure-JAX reference computed with identical int8 weights
    ref = reference_forward(x, prepared)
    assert bool(jnp.allclose(out, ref, atol=2e-2, rtol=2e-2))

    print("KERNEL_OK")
</pallas_src>

<mosaic_0001>
module attributes {stable_mosaic.version = 11 : i64} {
  func.func @_fused_mlp_kernel(%arg0: memref<2x3072xf32, #tpu.memory_space<vmem>>, %arg1: memref<3072x1024xi8, #tpu.memory_space<vmem>>, %arg2: memref<1x1024xf32, #tpu.memory_space<vmem>>, %arg3: memref<1x1024xf32, #tpu.memory_space<vmem>>, %arg4: memref<1024x512xi8, #tpu.memory_space<vmem>>, %arg5: memref<1x512xf32, #tpu.memory_space<vmem>>, %arg6: memref<1x512xf32, #tpu.memory_space<vmem>>, %arg7: memref<512x256xi8, #tpu.memory_space<vmem>>, %arg8: memref<1x256xf32, #tpu.memory_space<vmem>>, %arg9: memref<1x256xf32, #tpu.memory_space<vmem>>, %arg10: memref<256x128xi8, #tpu.memory_space<vmem>>, %arg11: memref<1x128xf32, #tpu.memory_space<vmem>>, %arg12: memref<1x128xf32, #tpu.memory_space<vmem>>, %arg13: memref<128x64xi8, #tpu.memory_space<vmem>>, %arg14: memref<1x64xf32, #tpu.memory_space<vmem>>, %arg15: memref<1x64xf32, #tpu.memory_space<vmem>>, %arg16: memref<64x10xi8, #tpu.memory_space<vmem>>, %arg17: memref<1x10xf32, #tpu.memory_space<vmem>>, %arg18: memref<1x10xf32, #tpu.memory_space<vmem>>, %arg19: memref<2x10xf32, #tpu.memory_space<vmem>>) attributes {dimension_semantics = [], scalar_prefetch = 0 : i64, scratch_operands = 0 : i64, tpu.core_type = #tpu.core_type<tc>} {
    %c0 = arith.constant 0 : index
    %c0_0 = arith.constant 0 : index
    %0 = vector.load %arg0[%c0, %c0_0] : memref<2x3072xf32, #tpu.memory_space<vmem>>, vector<2x3072xf32>
    %1 = arith.truncf %0 : vector<2x3072xf32> to vector<2x3072xbf16>
    %c0_1 = arith.constant 0 : index
    %c0_2 = arith.constant 0 : index
    %2 = vector.load %arg1[%c0_1, %c0_2] : memref<3072x1024xi8, #tpu.memory_space<vmem>>, vector<3072x1024xi8>
    %3 = arith.sitofp %2 : vector<3072x1024xi8> to vector<3072x1024xbf16>
    %cst = arith.constant dense<0.000000e+00> : vector<2x1024xf32>
    %4 = tpu.matmul %1, %3, %cst {dimension_numbers = #tpu.dot_dimension_numbers<[1], [0], [0], [1], [0, 0, 1, 1], [], []>} : vector<2x3072xbf16>, vector<3072x1024xbf16>, vector<2x1024xf32> -> vector<2x1024xf32>
    %c0_3 = arith.constant 0 : index
    %c0_4 = arith.constant 0 : index
    %5 = vector.load %arg2[%c0_3, %c0_4] : memref<1x1024xf32, #tpu.memory_space<vmem>>, vector<1x1024xf32>
    %6 = vector.broadcast %5 : vector<1x1024xf32> to vector<2x1024xf32>
    %7 = arith.mulf %4, %6 : vector<2x1024xf32>
    %c0_5 = arith.constant 0 : index
    %c0_6 = arith.constant 0 : index
    %8 = vector.load %arg3[%c0_5, %c0_6] : memref<1x1024xf32, #tpu.memory_space<vmem>>, vector<1x1024xf32>
    %9 = vector.broadcast %8 : vector<1x1024xf32> to vector<2x1024xf32>
    %10 = arith.addf %7, %9 : vector<2x1024xf32>
    %cst_7 = arith.constant 0.000000e+00 : f32
    %11 = vector.broadcast %cst_7 : f32 to vector<2x1024xf32>
    %12 = arith.maximumf %10, %11 : vector<2x1024xf32>
    %13 = arith.truncf %12 : vector<2x1024xf32> to vector<2x1024xbf16>
    %c0_8 = arith.constant 0 : index
    %c0_9 = arith.constant 0 : index
    %14 = vector.load %arg4[%c0_8, %c0_9] : memref<1024x512xi8, #tpu.memory_space<vmem>>, vector<1024x512xi8>
    %15 = arith.sitofp %14 : vector<1024x512xi8> to vector<1024x512xbf16>
    %cst_10 = arith.constant dense<0.000000e+00> : vector<2x512xf32>
    %16 = tpu.matmul %13, %15, %cst_10 {dimension_numbers = #tpu.dot_dimension_numbers<[1], [0], [0], [1], [0, 0, 1, 1], [], []>} : vector<2x1024xbf16>, vector<1024x512xbf16>, vector<2x512xf32> -> vector<2x512xf32>
    %c0_11 = arith.constant 0 : index
    %c0_12 = arith.constant 0 : index
    %17 = vector.load %arg5[%c0_11, %c0_12] : memref<1x512xf32, #tpu.memory_space<vmem>>, vector<1x512xf32>
    %18 = vector.broadcast %17 : vector<1x512xf32> to vector<2x512xf32>
    %19 = arith.mulf %16, %18 : vector<2x512xf32>
    %c0_13 = arith.constant 0 : index
    %c0_14 = arith.constant 0 : index
    %20 = vector.load %arg6[%c0_13, %c0_14] : memref<1x512xf32, #tpu.memory_space<vmem>>, vector<1x512xf32>
    %21 = vector.broadcast %20 : vector<1x512xf32> to vector<2x512xf32>
    %22 = arith.addf %19, %21 : vector<2x512xf32>
    %cst_15 = arith.constant 0.000000e+00 : f32
    %23 = vector.broadcast %cst_15 : f32 to vector<2x512xf32>
    %24 = arith.maximumf %22, %23 : vector<2x512xf32>
    %25 = arith.truncf %24 : vector<2x512xf32> to vector<2x512xbf16>
    %c0_16 = arith.constant 0 : index
    %c0_17 = arith.constant 0 : index
    %26 = vector.load %arg7[%c0_16, %c0_17] : memref<512x256xi8, #tpu.memory_space<vmem>>, vector<512x256xi8>
    %27 = arith.sitofp %26 : vector<512x256xi8> to vector<512x256xbf16>
    %cst_18 = arith.constant dense<0.000000e+00> : vector<2x256xf32>
    %28 = tpu.matmul %25, %27, %cst_18 {dimension_numbers = #tpu.dot_dimension_numbers<[1], [0], [0], [1], [0, 0, 1, 1], [], []>} : vector<2x512xbf16>, vector<512x256xbf16>, vector<2x256xf32> -> vector<2x256xf32>
    %c0_19 = arith.constant 0 : index
    %c0_20 = arith.constant 0 : index
    %29 = vector.load %arg8[%c0_19, %c0_20] : memref<1x256xf32, #tpu.memory_space<vmem>>, vector<1x256xf32>
    %30 = vector.broadcast %29 : vector<1x256xf32> to vector<2x256xf32>
    %31 = arith.mulf %28, %30 : vector<2x256xf32>
    %c0_21 = arith.constant 0 : index
    %c0_22 = arith.constant 0 : index
    %32 = vector.load %arg9[%c0_21, %c0_22] : memref<1x256xf32, #tpu.memory_space<vmem>>, vector<1x256xf32>
    %33 = vector.broadcast %32 : vector<1x256xf32> to vector<2x256xf32>
    %34 = arith.addf %31, %33 : vector<2x256xf32>
    %cst_23 = arith.constant 0.000000e+00 : f32
    %35 = vector.broadcast %cst_23 : f32 to vector<2x256xf32>
    %36 = arith.maximumf %34, %35 : vector<2x256xf32>
    %37 = arith.truncf %36 : vector<2x256xf32> to vector<2x256xbf16>
    %c0_24 = arith.constant 0 : index
    %c0_25 = arith.constant 0 : index
    %38 = vector.load %arg10[%c0_24, %c0_25] : memref<256x128xi8, #tpu.memory_space<vmem>>, vector<256x128xi8>
    %39 = arith.sitofp %38 : vector<256x128xi8> to vector<256x128xbf16>
    %cst_26 = arith.constant dense<0.000000e+00> : vector<2x128xf32>
    %40 = tpu.matmul %37, %39, %cst_26 {dimension_numbers = #tpu.dot_dimension_numbers<[1], [0], [0], [1], [0, 0, 1, 1], [], []>} : vector<2x256xbf16>, vector<256x128xbf16>, vector<2x128xf32> -> vector<2x128xf32>
    %c0_27 = arith.constant 0 : index
    %c0_28 = arith.constant 0 : index
    %41 = vector.load %arg11[%c0_27, %c0_28] : memref<1x128xf32, #tpu.memory_space<vmem>>, vector<1x128xf32>
    %42 = vector.broadcast %41 : vector<1x128xf32> to vector<2x128xf32>
    %43 = arith.mulf %40, %42 : vector<2x128xf32>
    %c0_29 = arith.constant 0 : index
    %c0_30 = arith.constant 0 : index
    %44 = vector.load %arg12[%c0_29, %c0_30] : memref<1x128xf32, #tpu.memory_space<vmem>>, vector<1x128xf32>
    %45 = vector.broadcast %44 : vector<1x128xf32> to vector<2x128xf32>
    %46 = arith.addf %43, %45 : vector<2x128xf32>
    %cst_31 = arith.constant 0.000000e+00 : f32
    %47 = vector.broadcast %cst_31 : f32 to vector<2x128xf32>
    %48 = arith.maximumf %46, %47 : vector<2x128xf32>
    %49 = arith.truncf %48 : vector<2x128xf32> to vector<2x128xbf16>
    %c0_32 = arith.constant 0 : index
    %c0_33 = arith.constant 0 : index
    %50 = vector.load %arg13[%c0_32, %c0_33] : memref<128x64xi8, #tpu.memory_space<vmem>>, vector<128x64xi8>
    %51 = arith.sitofp %50 : vector<128x64xi8> to vector<128x64xbf16>
    %cst_34 = arith.constant dense<0.000000e+00> : vector<2x64xf32>
    %52 = tpu.matmul %49, %51, %cst_34 {dimension_numbers = #tpu.dot_dimension_numbers<[1], [0], [0], [1], [0, 0, 1, 1], [], []>} : vector<2x128xbf16>, vector<128x64xbf16>, vector<2x64xf32> -> vector<2x64xf32>
    %c0_35 = arith.constant 0 : index
    %c0_36 = arith.constant 0 : index
    %53 = vector.load %arg14[%c0_35, %c0_36] : memref<1x64xf32, #tpu.memory_space<vmem>>, vector<1x64xf32>
    %54 = vector.broadcast %53 : vector<1x64xf32> to vector<2x64xf32>
    %55 = arith.mulf %52, %54 : vector<2x64xf32>
    %c0_37 = arith.constant 0 : index
    %c0_38 = arith.constant 0 : index
    %56 = vector.load %arg15[%c0_37, %c0_38] : memref<1x64xf32, #tpu.memory_space<vmem>>, vector<1x64xf32>
    %57 = vector.broadcast %56 : vector<1x64xf32> to vector<2x64xf32>
    %58 = arith.addf %55, %57 : vector<2x64xf32>
    %cst_39 = arith.constant 0.000000e+00 : f32
    %59 = vector.broadcast %cst_39 : f32 to vector<2x64xf32>
    %60 = arith.maximumf %58, %59 : vector<2x64xf32>
    %61 = arith.truncf %60 : vector<2x64xf32> to vector<2x64xbf16>
    %c0_40 = arith.constant 0 : index
    %c0_41 = arith.constant 0 : index
    %62 = vector.load %arg16[%c0_40, %c0_41] : memref<64x10xi8, #tpu.memory_space<vmem>>, vector<64x10xi8>
    %63 = arith.sitofp %62 : vector<64x10xi8> to vector<64x10xbf16>
    %cst_42 = arith.constant dense<0.000000e+00> : vector<2x10xf32>
    %64 = tpu.matmul %61, %63, %cst_42 {dimension_numbers = #tpu.dot_dimension_numbers<[1], [0], [0], [1], [0, 0, 1, 1], [], []>} : vector<2x64xbf16>, vector<64x10xbf16>, vector<2x10xf32> -> vector<2x10xf32>
    %c0_43 = arith.constant 0 : index
    %c0_44 = arith.constant 0 : index
    %65 = vector.load %arg17[%c0_43, %c0_44] : memref<1x10xf32, #tpu.memory_space<vmem>>, vector<1x10xf32>
    %66 = vector.broadcast %65 : vector<1x10xf32> to vector<2x10xf32>
    %67 = arith.mulf %64, %66 : vector<2x10xf32>
    %c0_45 = arith.constant 0 : index
    %c0_46 = arith.constant 0 : index
    %68 = vector.load %arg18[%c0_45, %c0_46] : memref<1x10xf32, #tpu.memory_space<vmem>>, vector<1x10xf32>
    %69 = vector.broadcast %68 : vector<1x10xf32> to vector<2x10xf32>
    %70 = arith.addf %67, %69 : vector<2x10xf32>
    %cst_47 = arith.constant dense<0xFF800000> : vector<2xf32>
    %71 = vector.multi_reduction <maximumf>, %70, %cst_47 [1] : vector<2x10xf32> to vector<2xf32>
    %72 = vector.shape_cast %71 : vector<2xf32> to vector<2x1xf32>
    %73 = vector.broadcast %72 : vector<2x1xf32> to vector<2x10xf32>
    %74 = arith.subf %70, %73 : vector<2x10xf32>
    %75 = math.exp %74 : vector<2x10xf32>
    %cst_48 = arith.constant dense<0.000000e+00> : vector<2xf32>
    %76 = vector.multi_reduction <add>, %75, %cst_48 [1] : vector<2x10xf32> to vector<2xf32>
    %77 = vector.shape_cast %76 : vector<2xf32> to vector<2x1xf32>
    %78 = math.log %77 : vector<2x1xf32>
    %79 = vector.broadcast %78 : vector<2x1xf32> to vector<2x10xf32>
    %80 = arith.subf %74, %79 : vector<2x10xf32>
    %c0_49 = arith.constant 0 : index
    %c0_50 = arith.constant 0 : index
    %81 = vector.load %arg19[%c0_49, %c0_50] : memref<2x10xf32, #tpu.memory_space<vmem>>, vector<2x10xf32>
    tpu.vector_store %arg19[%c0_49, %c0_50], %80 {strides = array<i32>} : memref<2x10xf32, #tpu.memory_space<vmem>>, vector<2x10xf32>,
    return
  }
}

</mosaic_0001>

<bundles_post_ra>
// kernel: classifier_forward.1
= control target key start
LH: loop header
LB: loop body
LE: loop exit
PB: predicated region body
PF: predicated region fallthrough
CT: control target
= control target key end

     0   :  { %s7299_s0 = inlined_call_operand.vmem [shape: f32[2,3072], index: 0, kind: input, shape index: {}]   ;;  %s7300_s1 = inlined_call_operand.hbm [shape: s8[3072,1024], index: 1, kind: input, shape index: {}]   ;;  %s7301_s2 = inlined_call_operand.hbm [shape: f32[1,1024], index: 2, kind: input, shape index: {}]   ;;  %s7302_s3 = inlined_call_operand.hbm [shape: f32[1,1024], index: 3, kind: input, shape index: {}]   ;;  %s7303_s4 = inlined_call_operand.hbm [shape: s8[1024,512], index: 4, kind: input, shape index: {}]   ;;  %s7304_s5 = inlined_call_operand.hbm [shape: f32[1,512], index: 5, kind: input, shape index: {}]   ;;  %s7305_s6 = inlined_call_operand.hbm [shape: f32[1,512], index: 6, kind: input, shape index: {}]   ;;  %s7306_s7 = inlined_call_operand.hbm [shape: s8[512,256], index: 7, kind: input, shape index: {}]   ;;  %s7307_s8 = inlined_call_operand.hbm [shape: f32[1,256], index: 8, kind: input, shape index: {}]   ;;  %s7308_s9 = inlined_call_operand.hbm [shape: f32[1,256], index: 9, kind: input, shape index: {}]   ;;  %s7309_s10 = inlined_call_operand.hbm [shape: s8[256,128], index: 10, kind: input, shape index: {}]   ;;  %s7310_s11 = inlined_call_operand.hbm [shape: f32[1,128], index: 11, kind: input, shape index: {}]   ;;  %s7311_s12 = inlined_call_operand.hbm [shape: f32[1,128], index: 12, kind: input, shape index: {}]   ;;  %s7312_s13 = inlined_call_operand.vmem [shape: s8[128,64], index: 13, kind: input, shape index: {}]   ;;  %s7313_s14 = inlined_call_operand.hbm [shape: f32[1,64], index: 14, kind: input, shape index: {}]   ;;  %s7314_s15 = inlined_call_operand.hbm [shape: f32[1,64], index: 15, kind: input, shape index: {}]   ;;  %s7315_s16 = inlined_call_operand.vmem [shape: s8[64,10], index: 16, kind: input, shape index: {}]   ;;  %s7316_s17 = inlined_call_operand.hbm [shape: f32[1,10], index: 17, kind: input, shape index: {}]   ;;  %s7317_s18 = inlined_call_operand.hbm [shape: f32[1,10], index: 18, kind: input, shape index: {}]   ;;  %s7318_s19 = inlined_call_operand.hbm [shape: f32[2,10], index: 19, kind: output, shape index: {}]  }
   0x1   :  { %7320 = sst [smem:[#allocation39_spill]] %s7299_s0 }
   0x2   :  { %7321 = sst [smem:[#allocation40_spill]] %s7300_s1 }
   0x3   :  { %7322 = sst [smem:[#allocation41_spill]] %s7301_s2 }
   0x4   :  { %7323 = sst [smem:[#allocation42_spill]] %s7302_s3 }
   0x5   :  { %24 = vsyncpa [#allocation3], 0 }
   0x6   :  { %25 = vsyncpa [#allocation6], 0 }
   0x7   :  { %26 = vsyncpa [#allocation9], 0 }
   0x8   :  { %27 = vsyncpa [#allocation12], 0 }
   0x9   :  { %28 = vsyncpa [#allocation15], 0 }
   0xa   :  { %29 = vsyncpa [#allocation18], 0 }
   0xb   :  { %30 = vsyncpa [#allocation21], 0 }
   0xc   :  { %31 = vsyncpa [#allocation24], 0 }
   0xd   :  { %32 = vsyncpa [#allocation27], 0 }
   0xe   :  { %33 = vsyncpa [#allocation4], 0  ;;  %s6557_s0 = smov [#allocation5]   ;;  %s6558_s20 = smov [#allocation8]  }
   0xf   :  { %s54_s30 = sshll.u32 %s6557_s0, 4  ;;  %s73_s21 = sshll.u32 %s6558_s20, 4  ;;  %s55_s30 = int_to_ptr.vmem [resolvable:$true] %s54_s30  ;;  %s74_s21 = int_to_ptr.vmem [resolvable:$true] %s73_s21 }
  0x10   :  { %s6205_s1 = scalar_lea.vmem %s55_s30, 128  ;;  %p6210_p1 = scmp.lt.s32.totalorder %s55_s30, %s55_s30 }
  0x11   :  { %p6206_p0 = scmp.ne.s32.totalorder %s55_s30, %s6205_s1  ;;  %p6211_p2 = scmp.lt.s32.totalorder %s6205_s1, %s6205_s1 }
  0x13   :  { %p6212_p3 = por %p6211_p2, %p6210_p1 }
  0x15   :  { %p6213_p4 = pnand %p6212_p3, %p6206_p0 }
  0x17   :  { %6216 = shalt.err (!%p6213_p4)
}
  0x18   :  { %s7324_s23 = sld [smem:[#allocation41_spill]]  ;;  %s6225_s24 = scalar_lea.vmem %s74_s21, 16384 }
  0x19   :  { %p6226_p5 = scmp.ne.s32.totalorder %s74_s21, %s6225_s24  ;;  %p6230_p6 = scmp.lt.s32.totalorder %s74_s21, %s74_s21 }
  0x1a   :  { %p6231_p7 = scmp.lt.s32.totalorder %s6225_s24, %s6225_s24 }
  0x1c   :  { %p6232_p8 = por %p6231_p7, %p6230_p6 }
  0x1e   :  { %57 = dma.hbm_to_vmem [thread:$0]  %s7324_s23, 128, %s55_s30, [#allocation6]  }
  0x1f   :  { %p6233_p9 = pnand %p6232_p8, %p6226_p5 }
  0x21   :  { %6236 = shalt.err (!%p6233_p9)
}
  0x22   :  { %s6559_s25 = smov 512   ;;  %s6560_s3 = smov 32  }
  0x23   :  { %79 = dma.hbm_to_vmem [thread:$0]  %s7303_s4, 16384, %s74_s21, [#allocation9], %s6559_s25, %s6559_s25, %s6560_s3  }
  0x24   :  { %s6561_s28 = smov [#allocation11]   ;;  %s6562_s0 = smov [#allocation14]  }
  0x25   :  { %s96_s29 = sshll.u32 %s6561_s28, 4  ;;  %s118_s20 = sshll.u32 %s6562_s0, 4  ;;  %s97_s29 = int_to_ptr.vmem [resolvable:$true] %s96_s29  ;;  %s119_s20 = int_to_ptr.vmem [resolvable:$true] %s118_s20 }
  0x26   :  { %s6245_s30 = scalar_lea.vmem %s97_s29, 64  ;;  %p6250_p11 = scmp.lt.s32.totalorder %s97_s29, %s97_s29 }
  0x27   :  { %p6246_p10 = scmp.ne.s32.totalorder %s97_s29, %s6245_s30  ;;  %p6251_p12 = scmp.lt.s32.totalorder %s6245_s30, %s6245_s30 }
  0x29   :  { %p6252_p13 = por %p6251_p12, %p6250_p11 }
  0x2b   :  { %p6253_p0 = pnand %p6252_p13, %p6246_p10 }
  0x2d   :  { %6256 = shalt.err (!%p6253_p0)
}
  0x2e   :  { %99 = dma.hbm_to_vmem [thread:$0]  %s7305_s6, 64, %s97_s29, [#allocation12]  }
  0x2f   :  { %s6265_s2 = scalar_lea.vmem %s119_s20, 32  ;;  %p6270_p2 = scmp.lt.s32.totalorder %s119_s20, %s119_s20 }
  0x30   :  { %p6266_p1 = scmp.ne.s32.totalorder %s119_s20, %s6265_s2  ;;  %p6271_p3 = scmp.lt.s32.totalorder %s6265_s2, %s6265_s2 }
  0x32   :  { %p6272_p4 = por %p6271_p3, %p6270_p2 }
  0x34   :  { %p6273_p5 = pnand %p6272_p4, %p6266_p1 }
  0x36   :  { %6276 = shalt.err (!%p6273_p5)
}
  0x37   :  { %121 = dma.hbm_to_vmem [thread:$0]  %s7307_s8, 32, %s119_s20, [#allocation15]  }
  0x38   :  { %s6563_s23 = smov [#allocation17]  }
  0x39   :  { %s137_s24 = sshll.u32 %s6563_s23, 4  ;;  %s138_s24 = int_to_ptr.vmem [resolvable:$true] %s137_s24 }
  0x3a   :  { %s6285_s25 = scalar_lea.vmem %s138_s24, 1024  ;;  %p6290_p7 = scmp.lt.s32.totalorder %s138_s24, %s138_s24 }
  0x3b   :  { %p6286_p6 = scmp.ne.s32.totalorder %s138_s24, %s6285_s25  ;;  %p6291_p8 = scmp.lt.s32.totalorder %s6285_s25, %s6285_s25 }
  0x3d   :  { %p6292_p9 = por %p6291_p8, %p6290_p7 }
  0x3f   :  { %p6293_p10 = pnand %p6292_p9, %p6286_p6 }
  0x41   :  { %6296 = shalt.err (!%p6293_p10)
}
  0x42   :  { %s6564_s6 = smov 128   ;;  %s6565_s3 = smov 8  }
  0x43   :  { %143 = dma.hbm_to_vmem [thread:$0]  %s7309_s10, 1024, %s138_s24, [#allocation18], %s6564_s6, %s6564_s6, %s6565_s3  }
  0x44   :  { %s6566_s28 = smov [#allocation20]   ;;  %s6567_s8 = smov [#allocation23]  }
  0x45   :  { %s160_s29 = sshll.u32 %s6566_s28, 4  ;;  %s182_s0 = sshll.u32 %s6567_s8, 4  ;;  %s161_s29 = int_to_ptr.vmem [resolvable:$true] %s160_s29  ;;  %s183_s0 = int_to_ptr.vmem [resolvable:$true] %s182_s0 }
  0x46   :  { %s6305_s20 = scalar_lea.vmem %s161_s29, 16  ;;  %s6309_s30 = scalar_lea.vmem %s161_s29, 32 }
  0x47   :  { %p6306_p11 = scmp.ne.s32.totalorder %s161_s29, %s6305_s20  ;;  %p6310_p12 = scmp.lt.s32.totalorder %s161_s29, %s161_s29 }
  0x48   :  { %p6311_p13 = scmp.lt.s32.totalorder %s6309_s30, %s6305_s20 }
  0x4a   :  { %p6312_p0 = por %p6311_p13, %p6310_p12 }
  0x4c   :  { %p6313_p1 = pnand %p6312_p0, %p6306_p11 }
  0x4e   :  { %6316 = shalt.err (!%p6313_p1)
}
  0x4f   :  { %163 = dma.hbm_to_vmem [thread:$0]  %s7311_s12, 16, %s161_s29, [#allocation21]  }
  0x50   :  { %s6325_s2 = scalar_lea.vmem %s183_s0, 16  ;;  %s6329_s10 = scalar_lea.vmem %s183_s0, 32 }
  0x51   :  { %p6326_p2 = scmp.ne.s32.totalorder %s183_s0, %s6325_s2  ;;  %p6330_p3 = scmp.lt.s32.totalorder %s183_s0, %s183_s0 }
  0x52   :  { %p6331_p4 = scmp.lt.s32.totalorder %s6329_s10, %s6325_s2 }
  0x54   :  { %p6332_p5 = por %p6331_p4, %p6330_p3 }
  0x56   :  { %p6333_p6 = pnand %p6332_p5, %p6326_p2 }
  0x58   :  { %6336 = shalt.err (!%p6333_p6)
}
  0x59   :  { %185 = dma.hbm_to_vmem [thread:$0]  %s7314_s15, 16, %s183_s0, [#allocation24]  }
  0x5a   :  { %s6568_s23 = smov [#allocation2]  }
  0x5b   :  { %s41_s24 = sshll.u32 %s6568_s23, 4  ;;  %s42_s24 = int_to_ptr.vmem [resolvable:$true] %s41_s24 }
  0x5c   :  { %s6345_s25 = scalar_lea.vmem %s42_s24, 98304  ;;  %p6350_p8 = scmp.lt.s32.totalorder %s42_s24, %s42_s24 }
  0x5d   :  { %p6346_p7 = scmp.ne.s32.totalorder %s42_s24, %s6345_s25  ;;  %p6351_p9 = scmp.lt.s32.totalorder %s6345_s25, %s6345_s25 }
  0x5f   :  { %p6352_p10 = por %p6351_p9, %p6350_p8 }
  0x61   :  { %p6353_p11 = pnand %p6352_p10, %p6346_p7 }
  0x63   :  { %6356 = shalt.err (!%p6353_p11)
}
  0x64   :  { %s6569_s12 = smov 1024   ;;  %s6570_s6 = smov 64  }
  0x65   :  { %s7325_s27 = sld [smem:[#allocation40_spill]]  ;;  %s6571_s28 = smov [#allocation7]  }
  0x66   :  { %s64_s29 = sshll.u32 %s6571_s28, 4  ;;  %s6572_s8 = smov [#allocation10]   ;;  %s65_s29 = int_to_ptr.vmem [resolvable:$true] %s64_s29 }
  0x67   :  { %s86_s15 = sshll.u32 %s6572_s8, 4  ;;  %s6365_s0 = scalar_lea.vmem %s65_s29, 128  ;;  %s87_s15 = int_to_ptr.vmem [resolvable:$true] %s86_s15 }
  0x68   :  { %p6366_p12 = scmp.ne.s32.totalorder %s65_s29, %s6365_s0  ;;  %p6370_p13 = scmp.lt.s32.totalorder %s65_s29, %s65_s29 }
  0x69   :  { %p6371_p0 = scmp.lt.s32.totalorder %s6365_s0, %s6365_s0 }
  0x6b   :  { %47 = dma.hbm_to_vmem [thread:$0]  %s7325_s27, 98304, %s42_s24, [#allocation3], %s6569_s12, %s6569_s12, %s6570_s6  }
  0x6c   :  { %p6372_p1 = por %p6371_p0, %p6370_p13 }
  0x6e   :  { %p6373_p2 = pnand %p6372_p1, %p6366_p12 }
  0x70   :  { %6376 = shalt.err (!%p6373_p2)
}
  0x71   :  { %s7326_s1 = sld [smem:[#allocation42_spill]]  ;;  %s6385_s22 = scalar_lea.vmem %s87_s15, 64 }
  0x72   :  { %p6386_p3 = scmp.ne.s32.totalorder %s87_s15, %s6385_s22  ;;  %p6390_p4 = scmp.lt.s32.totalorder %s87_s15, %s87_s15 }
  0x73   :  { %p6391_p5 = scmp.lt.s32.totalorder %s6385_s22, %s6385_s22 }
  0x75   :  { %p6392_p6 = por %p6391_p5, %p6390_p4 }
  0x77   :  { %67 = dma.hbm_to_vmem [thread:$0]  %s7326_s1, 128, %s65_s29, [#allocation6]  }
  0x78   :  { %p6393_p7 = pnand %p6392_p6, %p6386_p3 }
  0x7a   :  { %6396 = shalt.err (!%p6393_p7)
}
  0x7b   :  { %89 = dma.hbm_to_vmem [thread:$0]  %s7304_s5, 64, %s87_s15, [#allocation9]  }
  0x7c   :  { %s6573_s4 = smov [#allocation13]  }
  0x7d   :  { %s105_s21 = sshll.u32 %s6573_s4, 4  ;;  %s106_s21 = int_to_ptr.vmem [resolvable:$true] %s105_s21 }
  0x7e   :  { %s6405_s23 = scalar_lea.vmem %s106_s21, 4096  ;;  %p6410_p9 = scmp.lt.s32.totalorder %s106_s21, %s106_s21 }
  0x7f   :  { %p6406_p8 = scmp.ne.s32.totalorder %s106_s21, %s6405_s23  ;;  %p6411_p10 = scmp.lt.s32.totalorder %s6405_s23, %s6405_s23 }
  0x81   :  { %p6412_p11 = por %p6411_p10, %p6410_p9 }
  0x83   :  { %p6413_p12 = pnand %p6412_p11, %p6406_p8 }
  0x85   :  { %6416 = shalt.err (!%p6413_p12)
}
  0x86   :  { %s6574_s24 = smov 256   ;;  %s6575_s25 = smov 16  }
  0x87   :  { %111 = dma.hbm_to_vmem [thread:$0]  %s7306_s7, 4096, %s106_s21, [#allocation12], %s6574_s24, %s6574_s24, %s6575_s25  }
  0x88   :  { %s6576_s3 = smov [#allocation16]   ;;  %s6577_s5 = smov [#allocation19]  }
  0x89   :  { %s128_s26 = sshll.u32 %s6576_s3, 4  ;;  %s150_s27 = sshll.u32 %s6577_s5, 4  ;;  %s129_s26 = int_to_ptr.vmem [resolvable:$true] %s128_s26  ;;  %s151_s27 = int_to_ptr.vmem [resolvable:$true] %s150_s27 }
  0x8a   :  { %s6425_s28 = scalar_lea.vmem %s129_s26, 32  ;;  %p6430_p0 = scmp.lt.s32.totalorder %s129_s26, %s129_s26 }
  0x8b   :  { %p6426_p13 = scmp.ne.s32.totalorder %s129_s26, %s6425_s28  ;;  %p6431_p1 = scmp.lt.s32.totalorder %s6425_s28, %s6425_s28 }
  0x8d   :  { %p6432_p2 = por %p6431_p1, %p6430_p0 }
  0x8f   :  { %p6433_p3 = pnand %p6432_p2, %p6426_p13 }
  0x91   :  { %6436 = shalt.err (!%p6433_p3)
}
  0x92   :  { %131 = dma.hbm_to_vmem [thread:$0]  %s7308_s9, 32, %s129_s26, [#allocation15]  }
  0x93   :  { %s6445_s15 = scalar_lea.vmem %s151_s27, 16  ;;  %s6449_s7 = scalar_lea.vmem %s151_s27, 32 }
  0x94   :  { %p6446_p4 = scmp.ne.s32.totalorder %s151_s27, %s6445_s15  ;;  %p6450_p5 = scmp.lt.s32.totalorder %s151_s27, %s151_s27 }
  0x95   :  { %p6451_p6 = scmp.lt.s32.totalorder %s6449_s7, %s6445_s15 }
  0x97   :  { %p6452_p7 = por %p6451_p6, %p6450_p5 }
  0x99   :  { %p6453_p8 = pnand %p6452_p7, %p6446_p4 }
  0x9b   :  { %6456 = shalt.err (!%p6453_p8)
}
  0x9c   :  { %153 = dma.hbm_to_vmem [thread:$0]  %s7310_s11, 16, %s151_s27, [#allocation18]  }
  0x9d   :  { %s6578_s30 = smov [#allocation22]   ;;  %s6579_s22 = smov [#allocation25]  }
  0x9e   :  { %s172_s1 = sshll.u32 %s6578_s30, 4  ;;  %s194_s2 = sshll.u32 %s6579_s22, 4  ;;  %s173_s1 = int_to_ptr.vmem [resolvable:$true] %s172_s1  ;;  %s195_s2 = int_to_ptr.vmem [resolvable:$true] %s194_s2 }
  0x9f   :  { %s6465_s10 = scalar_lea.vmem %s173_s1, 16  ;;  %s6469_s9 = scalar_lea.vmem %s173_s1, 32 }
  0xa0   :  { %p6466_p9 = scmp.ne.s32.totalorder %s173_s1, %s6465_s10  ;;  %p6470_p10 = scmp.lt.s32.totalorder %s173_s1, %s173_s1 }
  0xa1   :  { %p6471_p11 = scmp.lt.s32.totalorder %s6469_s9, %s6465_s10 }
  0xa3   :  { %p6472_p12 = por %p6471_p11, %p6470_p10 }
  0xa5   :  { %p6473_p13 = pnand %p6472_p12, %p6466_p9 }
  0xa7   :  { %6476 = shalt.err (!%p6473_p13)
}
  0xa8   :  { %175 = dma.hbm_to_vmem [thread:$0]  %s7313_s14, 16, %s173_s1, [#allocation21]  }
  0xa9   :  { %s6485_s23 = scalar_lea.vmem %s195_s2, 16  ;;  %s6489_s11 = scalar_lea.vmem %s195_s2, 32 }
  0xaa   :  { %p6486_p0 = scmp.ne.s32.totalorder %s195_s2, %s6485_s23  ;;  %p6490_p1 = scmp.lt.s32.totalorder %s195_s2, %s195_s2 }
  0xab   :  { %p6491_p2 = scmp.lt.s32.totalorder %s6489_s11, %s6485_s23 }
  0xad   :  { %p6492_p3 = por %p6491_p2, %p6490_p1 }
  0xaf   :  { %p6493_p4 = pnand %p6492_p3, %p6486_p0 }
  0xb1   :  { %6496 = shalt.err (!%p6493_p4)
}
  0xb2   :  { %197 = dma.hbm_to_vmem [thread:$0]  %s7316_s17, 16, %s195_s2, [#allocation24]  }
  0xb3   :  { %s6580_s12 = smov [#allocation26]  }
  0xb4   :  { %s204_s6 = sshll.u32 %s6580_s12, 4  ;;  %s205_s6 = int_to_ptr.vmem [resolvable:$true] %s204_s6 }
  0xb5   :  { %s6505_s3 = scalar_lea.vmem %s205_s6, 16  ;;  %s6509_s26 = scalar_lea.vmem %s205_s6, 32 }
  0xb6   :  { %p6506_p5 = scmp.ne.s32.totalorder %s205_s6, %s6505_s3  ;;  %p6510_p6 = scmp.lt.s32.totalorder %s205_s6, %s205_s6 }
  0xb7   :  { %p6511_p7 = scmp.lt.s32.totalorder %s6509_s26, %s6505_s3 }
  0xb9   :  { %p6512_p8 = por %p6511_p7, %p6510_p6 }
  0xbb   :  { %p6513_p9 = pnand %p6512_p8, %p6506_p5 }
  0xbd   :  { %6516 = shalt.err (!%p6513_p9)
}
  0xbe   :  { %207 = dma.hbm_to_vmem [thread:$0]  %s7317_s18, 16, %s205_s6, [#allocation27]  }
  0xbf   :  { %6537 = dma.done.wait [#allocation3], 98304  }
  0xc0   :  { %6538 = vsyncadd [#allocation3], 4294868992 }
  0xc1   :  { %6539 = dma.done.wait [#allocation6], 256  }
  0xc2   :  { %6540 = vsyncadd [#allocation6], 4294967040 }
  0xc3   :  { %6541 = dma.done.wait [#allocation9], 16448  }
  0xc4   :  { %6542 = vsyncadd [#allocation9], 4294950848 }
  0xc5   :  { %6543 = dma.done.wait [#allocation12], 4160  }
  0xc6   :  { %6544 = vsyncadd [#allocation12], 4294963136 }
  0xc7   :  { %6545 = dma.done.wait [#allocation15], 64  }
  0xc8   :  { %6546 = vsyncadd [#allocation15], 4294967232 }
  0xc9   :  { %6547 = dma.done.wait [#allocation18], 1040  }
  0xca   :  { %6548 = vsyncadd [#allocation18], 4294966256 }
  0xcb   :  { %6549 = dma.done.wait [#allocation21], 32  }
  0xcc   :  { %6550 = vsyncadd [#allocation21], 4294967264 }
  0xcd   :  { %6551 = dma.done.wait [#allocation24], 32  }
  0xce   :  { %6552 = vsyncadd [#allocation24], 4294967264 }
  0xcf   :  { %6553 = dma.done.wait [#allocation27], 16  }
  0xd0   :  { %6554 = vsyncadd [#allocation27], 4294967280  ;;  %v444_v0 = vld [vmem:[#allocation2 + $0xc8] sm:$0xff]  ;;  %v443_v2 = vld [vmem:[#allocation2 + $0xc0] sm:$0xff]  ;;  %v6581_v18 = vmov 1983009808   ;;  %v273_v20 = vlaneseq }
  0xd1   :  { %v508_v1 = vld [vmem:[#allocation2 + $0x2c8] sm:$0xff]  ;;  %v1236_v3 = vunpack.c.l.s8.bf16 %v444_v0  ;;  %v1244_v4 = vunpack.c.h.s8.bf16 %v444_v0  ;;  %v507_v7 = vld [vmem:[#allocation2 + $0x2c0] sm:$0xff]  ;;  %v1243_v8 = vunpack.c.h.s8.bf16 %v443_v2  ;;  %v1235_v12 = vunpack.c.l.s8.bf16 %v443_v2  ;;  %s7327_s27 = sld [smem:[#allocation39_spill]] }
  0xd2   :  { %v1364_v5 = vunpack.c.l.s8.bf16 %v508_v1  ;;  %v1372_v6 = vunpack.c.h.s8.bf16 %v508_v1  ;;  %v1371_v9 = vunpack.c.h.s8.bf16 %v507_v7  ;;  %v436_v10 = vld [vmem:[#allocation2 + $0x88] sm:$0xff]  ;;  %v1363_v13 = vunpack.c.l.s8.bf16 %v507_v7  ;;  %v435_v16 = vld [vmem:[#allocation2 + $0x80] sm:$0xff] }
  0xd3   :  { %v500_v11 = vld [vmem:[#allocation2 + $0x288] sm:$0xff]  ;;  %2723 = vmatprep.subr.bf16.mxu0 %v1244_v4  ;;  %v1228_v14 = vunpack.c.h.s8.bf16 %v436_v10  ;;  %v499_v17 = vld [vmem:[#allocation2 + $0x280] sm:$0xff]  ;;  %v271_v19 = vunpack.c.l.s4 %v6581_v18  ;;  %v1227_v21 = vunpack.c.h.s8.bf16 %v435_v16  ;;  %v1220_v23 = vunpack.c.l.s8.bf16 %v436_v10 }
  0xd4   :  { %2764 = vmatprep.subr.bf16.mxu1 %v1372_v6  ;;  %2724 = vmatpush1.bf16.msra.mxu0 %v1243_v8  ;;  %v1356_v15 = vunpack.c.h.s8.bf16 %v500_v11  ;;  %v1355_v22 = vunpack.c.h.s8.bf16 %v499_v17  ;;  %v1348_v24 = vunpack.c.l.s8.bf16 %v500_v11  ;;  %v6733_v26 = vshrl.u32 %v273_v20, 7  ;;  %v428_v27 = vld [vmem:[#allocation2 + $0x48] sm:$0xff]  ;;  %v427_v33 = vld [vmem:[#allocation2 + $0x40] sm:$0xff] }
  0xd5   :  { %2765 = vmatpush1.bf16.msra.mxu1 %v1371_v9  ;;  %2725 = vmatprep.subr.bf16.mxu0 %v1236_v3  ;;  %v272_v25 = vunpack.c.0.s8 %v271_v19  ;;  %v492_v28 = vld [vmem:[#allocation2 + $0x248] sm:$0xff]  ;;  %v1219_v29 = vunpack.c.l.s8.bf16 %v435_v16  ;;  %v1347_v30 = vunpack.c.l.s8.bf16 %v499_v17  ;;  %v1212_v31 = vunpack.c.h.s8.bf16 %v428_v27  ;;  %v491_v34 = vld [vmem:[#allocation2 + $0x240] sm:$0xff] }
  0xd6   :  { %2766 = vmatprep.subr.bf16.mxu1 %v1364_v5  ;;  %v1340_v32 = vunpack.c.h.s8.bf16 %v492_v28  ;;  %v1211_v37 = vunpack.c.h.s8.bf16 %v427_v33  ;;  %v1339_v38 = vunpack.c.h.s8.bf16 %v491_v34  ;;  %v1204_v39 = vunpack.c.l.s8.bf16 %v428_v27  ;;  %v420_v43 = vld [vmem:[#allocation2 + $0x8] sm:$0xff]  ;;  %v419_v51 = vld [vmem:[#allocation2] sm:$0xff] }
  0xd7   :  { %v6736_v35 = vsub.s32 %v272_v25, %v6733_v26  ;;  %v257_v36 = vld [vmem:[%s7327_s27] sm:$0xff]  ;;  %v1332_v40 = vunpack.c.l.s8.bf16 %v492_v28  ;;  %v484_v44 = vld [vmem:[#allocation2 + $0x208] sm:$0xff]  ;;  %v1203_v47 = vunpack.c.l.s8.bf16 %v427_v33  ;;  %v1331_v48 = vunpack.c.l.s8.bf16 %v491_v34 }
  0xd8   :  { %2726 = vmatpush1.bf16.msra.mxu0 %v1235_v12  ;;  %v269_v42 = vcombine.high %v257_v36, %v257_v36  ;;  %v1196_v49 = vunpack.c.h.s8.bf16 %v420_v43  ;;  %v1324_v50 = vunpack.c.h.s8.bf16 %v484_v44  ;;  %v483_v52 = vld [vmem:[#allocation2 + $0x200] sm:$0xff]  ;;  %v1195_v56 = vunpack.c.h.s8.bf16 %v419_v51  ;;  %v476_v60 = vld [vmem:[#allocation2 + $0x1c8] sm:$0xff] }
  0xd9   :  { %2767 = vmatpush1.bf16.msra.mxu1 %v1363_v13  ;;  %2727 = vmatprep.subr.bf16.mxu0 %v1228_v14  ;;  %v6742_v41 = vrot.slane %v257_v36, %v6736_v35  ;;  %v1323_v57 = vunpack.c.h.s8.bf16 %v483_v52  ;;  %v1188_v58 = vunpack.c.l.s8.bf16 %v420_v43  ;;  %v1316_v59 = vunpack.c.l.s8.bf16 %v484_v44  ;;  %v540_v61 = vld [vmem:[#allocation2 + $0x3c8] sm:$0xff]  ;;  %v475_v2 = vld [vmem:[#allocation2 + $0x1c0] sm:$0xff] }
  0xda   :  { %2768 = vmatprep.subr.bf16.mxu1 %v1356_v15  ;;  %v6747_v46 = vrot.slane %v269_v42, %v6736_v35  ;;  %v1187_v62 = vunpack.c.l.s8.bf16 %v419_v51  ;;  %v1315_v63 = vunpack.c.l.s8.bf16 %v483_v52  ;;  %v1308_v0 = vunpack.c.h.s8.bf16 %v476_v60  ;;  %v539_v3 = vld [vmem:[#allocation2 + $0x3c0] sm:$0xff]  ;;  %v468_v8 = vld [vmem:[#allocation2 + $0x188] sm:$0xff] }
  0xdb   :  { %v284_v45 = vcombine.high %v6742_v41, %v6742_v41  ;;  %v1436_v1 = vunpack.c.h.s8.bf16 %v540_v61  ;;  %v1307_v4 = vunpack.c.h.s8.bf16 %v475_v2  ;;  %v1435_v5 = vunpack.c.h.s8.bf16 %v539_v3  ;;  %v532_v9 = vld [vmem:[#allocation2 + $0x388] sm:$0xff]  ;;  %v467_v14 = vld [vmem:[#allocation2 + $0x180] sm:$0xff] }
  0xdc   :  { %2728 = vmatpush1.bf16.msra.mxu0 %v1227_v21  ;;  %v285_v54 = vcombine.high %v6747_v46, %v6747_v46  ;;  %v1300_v6 = vunpack.c.l.s8.bf16 %v476_v60  ;;  %v1428_v7 = vunpack.c.l.s8.bf16 %v540_v61  ;;  %v1299_v10 = vunpack.c.l.s8.bf16 %v475_v2  ;;  %v531_v15 = vld [vmem:[#allocation2 + $0x380] sm:$0xff]  ;;  %v460_v20 = vld [vmem:[#allocation2 + $0x148] sm:$0xff] }
  0xdd   :  { %2769 = vmatpush1.bf16.msra.mxu1 %v1355_v22  ;;  %2729 = vmatprep.subr.bf16.mxu0 %v1220_v23  ;;  %v6749_v53 = vpack.c.bf16 %v284_v45, %v284_v45  ;;  %v1427_v11 = vunpack.c.l.s8.bf16 %v539_v3  ;;  %v1292_v12 = vunpack.c.h.s8.bf16 %v468_v8  ;;  %v1420_v13 = vunpack.c.h.s8.bf16 %v532_v9  ;;  %v524_v21 = vld [vmem:[#allocation2 + $0x348] sm:$0xff]  ;;  %v459_v27 = vld [vmem:[#allocation2 + $0x140] sm:$0xff] }
  0xde   :  { %2770 = vmatprep.subr.bf16.mxu1 %v1348_v24  ;;  %v6754_v55 = vpack.c.bf16 %v285_v54, %v285_v54  ;;  %v1291_v16 = vunpack.c.h.s8.bf16 %v467_v14  ;;  %v1419_v17 = vunpack.c.h.s8.bf16 %v531_v15  ;;  %v1284_v18 = vunpack.c.l.s8.bf16 %v468_v8  ;;  %v523_v28 = vld [vmem:[#allocation2 + $0x340] sm:$0xff]  ;;  %v452_v33 = vld [vmem:[#allocation2 + $0x108] sm:$0xff] }
  0xdf   :  { %2755 = vmatprep.mubr.bf16.mxu0 %v6749_v53  ;;  %v1412_v19 = vunpack.c.l.s8.bf16 %v532_v9  ;;  %v1283_v22 = vunpack.c.l.s8.bf16 %v467_v14  ;;  %v1411_v23 = vunpack.c.l.s8.bf16 %v531_v15  ;;  %v1276_v24 = vunpack.c.h.s8.bf16 %v460_v20  ;;  %v516_v34 = vld [vmem:[#allocation2 + $0x308] sm:$0xff]  ;;  %v451_v42 = vld [vmem:[#allocation2 + $0x100] sm:$0xff] }
  0xe0   :  { %2730 = vmatpush1.bf16.msra.mxu0 %v1219_v29  ;;  %2796 = vmatprep.mubr.bf16.mxu1 %v6754_v55  ;;  %v1404_v25 = vunpack.c.h.s8.bf16 %v524_v21  ;;  %v1275_v29 = vunpack.c.h.s8.bf16 %v459_v27  ;;  %v258_v36 = vld [vmem:[%s7327_s27 + $0x8] sm:$0xff]  ;;  %v515_v43 = vld [vmem:[#allocation2 + $0x300] sm:$0xff]  ;;  %v1259_v45 = vunpack.c.h.s8.bf16 %v451_v42  ;;  %vm6583_vm0 = vmmov 0  }
  0xe1   :  { %2771 = vmatpush1.bf16.msra.mxu1 %v1347_v30  ;;  %2731 = vmatprep.subr.bf16.mxu0 %v1212_v31  ;;  %v1403_v30 = vunpack.c.h.s8.bf16 %v523_v28  ;;  %v1268_v31 = vunpack.c.l.s8.bf16 %v460_v20  ;;  %v286_v44 = vcombine.high %v258_v36, %v258_v36  ;;  %v636_v51 = vld [vmem:[#allocation2 + $0x6c8] sm:$0xff]  ;;  %v6761_v52 = vrot.slane %v258_v36, %v6736_v35  ;;  %v571_v60 = vld [vmem:[#allocation2 + $0x4c0] sm:$0xff] }
  0xe2   :  { %2772 = vmatprep.subr.bf16.mxu1 %v1340_v32  ;;  %v1396_v32 = vunpack.c.l.s8.bf16 %v524_v21  ;;  %v635_v61 = vld [vmem:[#allocation2 + $0x6c0] sm:$0xff]  ;;  %v1499_v2 = vunpack.c.h.s8.bf16 %v571_v60  ;;  %vm5981_vm1 = vcmask 523264   ;;  %vm6041_vm2 = vcmask 74752  }
  0xe3   :  { %v6764_v54 = vrot.slane %v286_v44, %v6736_v35  ;;  %v1627_v3 = vunpack.c.h.s8.bf16 %v635_v61 }
  0xe4   :  { %2732 = vmatpush1.bf16.msra.mxu0 %v1211_v37  ;;  %v1267_v37 = vunpack.c.l.s8.bf16 %v459_v27 }
  0xe5   :  { %2773 = vmatpush1.bf16.msra.mxu1 %v1339_v38  ;;  %2733 = vmatprep.subr.bf16.mxu0 %v1204_v39  ;;  %v1395_v38 = vunpack.c.l.s8.bf16 %v523_v28  ;;  %v1260_v39 = vunpack.c.h.s8.bf16 %v452_v33 }
  0xe6   :  { %2774 = vmatprep.subr.bf16.mxu1 %v1332_v40  ;;  %v1388_v40 = vunpack.c.h.s8.bf16 %v516_v34 }
  0xe8   :  { %2734 = vmatpush1.bf16.msra.mxu0 %v1203_v47  ;;  %v1387_v47 = vunpack.c.h.s8.bf16 %v515_v43 }
  0xe9   :  { %2775 = vmatpush1.bf16.msra.mxu1 %v1331_v48  ;;  %2735 = vmatprep.subr.bf16.mxu0 %v1196_v49  ;;  %v1252_v48 = vunpack.c.l.s8.bf16 %v452_v33  ;;  %v1380_v49 = vunpack.c.l.s8.bf16 %v516_v34 }
  0xea   :  { %2776 = vmatprep.subr.bf16.mxu1 %v1324_v50  ;;  %v572_v50 = vld [vmem:[#allocation2 + $0x4c8] sm:$0xff] }
  0xec   :  { %2736 = vmatpush1.bf16.msra.mxu0 %v1195_v56  ;;  %v1251_v56 = vunpack.c.l.s8.bf16 %v451_v42 }
  0xed   :  { %2777 = vmatpush1.bf16.msra.mxu1 %v1323_v57  ;;  %2737 = vmatprep.subr.bf16.mxu0 %v1188_v58  ;;  %v1379_v57 = vunpack.c.l.s8.bf16 %v515_v43  ;;  %v1500_v58 = vunpack.c.h.s8.bf16 %v572_v50 }
  0xee   :  { %2778 = vmatprep.subr.bf16.mxu1 %v1316_v59  ;;  %v1628_v59 = vunpack.c.h.s8.bf16 %v636_v51 }
  0xf0   :  { %2738 = vmatpush1.bf16.msra.mxu0 %v1187_v62  ;;  %v301_v62 = vcombine.high %v6761_v52, %v6761_v52 }
  0xf1   :  { %2779 = vmatpush1.bf16.msra.mxu1 %v1315_v63  ;;  %2739 = vmatprep.subr.bf16.mxu0 %v1308_v0  ;;  %v302_v63 = vcombine.high %v6764_v54, %v6764_v54  ;;  %v6772_v0 = vpack.c.bf16 %v6742_v41, %v6742_v41  ;;  %v1491_v41 = vunpack.c.l.s8.bf16 %v571_v60 }
  0xf2   :  { %2780 = vmatprep.subr.bf16.mxu1 %v1436_v1  ;;  %v6776_v1 = vpack.c.bf16 %v6747_v46, %v6747_v46  ;;  %v6778_v8 = vpack.c.bf16 %v301_v62, %v301_v62  ;;  %v1619_v46 = vunpack.c.l.s8.bf16 %v635_v61  ;;  %v596_v62 = vld [vmem:[#allocation2 + $0x588] sm:$0xff] }
  0xf3   :  { %v6780_v9 = vpack.c.bf16 %v302_v63, %v302_v63  ;;  %v660_v63 = vld [vmem:[#allocation2 + $0x788] sm:$0xff] }
  0xf4   :  { %2740 = vmatpush2.bf16.msra.mxu0 %v1307_v4  ;;  %v1492_v4 = vunpack.c.l.s8.bf16 %v572_v50 }
  0xf5   :  { %2781 = vmatpush2.bf16.msra.mxu1 %v1435_v5  ;;  %2741 = vmatprep.subr.bf16.mxu0 %v1300_v6  ;;  %v1620_v5 = vunpack.c.l.s8.bf16 %v636_v51  ;;  %v564_v6 = vld [vmem:[#allocation2 + $0x488] sm:$0xff] }
  0xf6   :  { %2782 = vmatprep.subr.bf16.mxu1 %v1428_v7  ;;  %v628_v7 = vld [vmem:[#allocation2 + $0x688] sm:$0xff] }
  0xf8   :  { %2742 = vmatpush2.bf16.msra.mxu0 %v1299_v10  ;;  %v1484_v10 = vunpack.c.h.s8.bf16 %v564_v6 }
  0xf9   :  { %2783 = vmatpush2.bf16.msra.mxu1 %v1427_v11  ;;  %2743 = vmatprep.subr.bf16.mxu0 %v1292_v12  ;;  %v1612_v11 = vunpack.c.h.s8.bf16 %v628_v7  ;;  %v563_v12 = vld [vmem:[#allocation2 + $0x480] sm:$0xff] }
  0xfa   :  { %2784 = vmatprep.subr.bf16.mxu1 %v1420_v13  ;;  %v627_v13 = vld [vmem:[#allocation2 + $0x680] sm:$0xff]  ;;  %v1483_v14 = vunpack.c.h.s8.bf16 %v563_v12  ;;  %v1475_v20 = vunpack.c.l.s8.bf16 %v563_v12  ;;  %v588_v12 = vld [vmem:[#allocation2 + $0x548] sm:$0xff] }
  0xfb   :  { %v1611_v15 = vunpack.c.h.s8.bf16 %v627_v13  ;;  %v1603_v21 = vunpack.c.l.s8.bf16 %v627_v13  ;;  %v652_v13 = vld [vmem:[#allocation2 + $0x748] sm:$0xff] }
  0xfc   :  { %2744 = vmatpush2.bf16.msra.mxu0 %v1291_v16  ;;  %v1476_v16 = vunpack.c.l.s8.bf16 %v564_v6  ;;  %v595_v6 = vld [vmem:[#allocation2 + $0x580] sm:$0xff] }
  0xfd   :  { %2785 = vmatpush2.bf16.msra.mxu1 %v1419_v17  ;;  %2745 = vmatprep.subr.bf16.mxu0 %v1284_v18  ;;  %v1604_v17 = vunpack.c.l.s8.bf16 %v628_v7  ;;  %v556_v18 = vld [vmem:[#allocation2 + $0x448] sm:$0xff]  ;;  %v659_v7 = vld [vmem:[#allocation2 + $0x780] sm:$0xff] }
  0xfe   :  { %2786 = vmatprep.subr.bf16.mxu1 %v1412_v19  ;;  %v620_v19 = vld [vmem:[#allocation2 + $0x648] sm:$0xff] }
 0x100   :  { %2746 = vmatpush2.bf16.msra.mxu0 %v1283_v22  ;;  %v1468_v22 = vunpack.c.h.s8.bf16 %v556_v18 }
 0x101   :  { %2787 = vmatpush2.bf16.msra.mxu1 %v1411_v23  ;;  %2747 = vmatprep.subr.bf16.mxu0 %v1276_v24  ;;  %v1596_v23 = vunpack.c.h.s8.bf16 %v620_v19  ;;  %v555_v24 = vld [vmem:[#allocation2 + $0x440] sm:$0xff] }
 0x102   :  { %2788 = vmatprep.subr.bf16.mxu1 %v1404_v25  ;;  %v619_v25 = vld [vmem:[#allocation2 + $0x640] sm:$0xff]  ;;  %v1467_v27 = vunpack.c.h.s8.bf16 %v555_v24  ;;  %v1459_v33 = vunpack.c.l.s8.bf16 %v555_v24  ;;  %v580_v24 = vld [vmem:[#allocation2 + $0x508] sm:$0xff] }
 0x103   :  { %v1595_v28 = vunpack.c.h.s8.bf16 %v619_v25  ;;  %v1587_v34 = vunpack.c.l.s8.bf16 %v619_v25  ;;  %v644_v25 = vld [vmem:[#allocation2 + $0x708] sm:$0xff] }
 0x104   :  { %2748 = vmatpush2.bf16.msra.mxu0 %v1275_v29  ;;  %v1460_v29 = vunpack.c.l.s8.bf16 %v556_v18  ;;  %v587_v18 = vld [vmem:[#allocation2 + $0x540] sm:$0xff] }
 0x105   :  { %2789 = vmatpush2.bf16.msra.mxu1 %v1403_v30  ;;  %2749 = vmatprep.subr.bf16.mxu0 %v1268_v31  ;;  %v1588_v30 = vunpack.c.l.s8.bf16 %v620_v19  ;;  %v548_v31 = vld [vmem:[#allocation2 + $0x408] sm:$0xff]  ;;  %v651_v19 = vld [vmem:[#allocation2 + $0x740] sm:$0xff] }
 0x106   :  { %2790 = vmatprep.subr.bf16.mxu1 %v1396_v32  ;;  %v612_v32 = vld [vmem:[#allocation2 + $0x608] sm:$0xff]  ;;  %v1452_v36 = vunpack.c.h.s8.bf16 %v548_v31  ;;  %v1444_v43 = vunpack.c.l.s8.bf16 %v548_v31  ;;  %v1644_v31 = vunpack.c.h.s8.bf16 %v644_v25 }
 0x107   :  { %v1572_v44 = vunpack.c.l.s8.bf16 %v612_v32 }
 0x108   :  { %2750 = vmatpush2.bf16.msra.mxu0 %v1267_v37  ;;  %v1580_v37 = vunpack.c.h.s8.bf16 %v612_v32  ;;  %v579_v32 = vld [vmem:[#allocation2 + $0x500] sm:$0xff] }
 0x109   :  { %2791 = vmatpush2.bf16.msra.mxu1 %v1395_v38  ;;  %2751 = vmatprep.subr.bf16.mxu0 %v1260_v39  ;;  %v547_v38 = vld [vmem:[#allocation2 + $0x400] sm:$0xff] }
 0x10a   :  { %2792 = vmatprep.subr.bf16.mxu1 %v1388_v40  ;;  %v611_v39 = vld [vmem:[#allocation2 + $0x600] sm:$0xff]  ;;  %v1451_v40 = vunpack.c.h.s8.bf16 %v547_v38 }
 0x10b   :  { %v1579_v42 = vunpack.c.h.s8.bf16 %v611_v39 }
 0x10c   :  { %2752 = vmatpush2.bf16.msra.mxu0 %v1259_v45  ;;  %v604_v45 = vld [vmem:[#allocation2 + $0x5c8] sm:$0xff] }
 0x10d   :  { %2793 = vmatpush2.bf16.msra.mxu1 %v1387_v47  ;;  %2753 = vmatprep.subr.bf16.mxu0 %v1252_v48  ;;  %v668_v47 = vld [vmem:[#allocation2 + $0x7c8] sm:$0xff]  ;;  %v1443_v48 = vunpack.c.l.s8.bf16 %v547_v38  ;;  %v1564_v50 = vunpack.c.h.s8.bf16 %v604_v45  ;;  %v1556_v60 = vunpack.c.l.s8.bf16 %v604_v45  ;;  %v1508_v38 = vunpack.c.l.s8.bf16 %v580_v24 }
 0x10e   :  { %2794 = vmatprep.subr.bf16.mxu1 %v1380_v49  ;;  %v1571_v49 = vunpack.c.l.s8.bf16 %v611_v39  ;;  %v1692_v51 = vunpack.c.h.s8.bf16 %v668_v47  ;;  %v1684_v61 = vunpack.c.l.s8.bf16 %v668_v47  ;;  %v1636_v39 = vunpack.c.l.s8.bf16 %v644_v25 }
 0x10f   :  { %v1507_v45 = vunpack.c.l.s8.bf16 %v579_v32 }
 0x110   :  { %2754 = vmatpush2.bf16.msra.mxu0 %v1251_v56  ;;  %v603_v56 = vld [vmem:[#allocation2 + $0x5c0] sm:$0xff] }
 0x111   :  { %2795 = vmatpush2.bf16.msra.mxu1 %v1379_v57  ;;  %2805 = vmatprep.subr.bf16.mxu0 %v1500_v58  ;;  %v667_v57 = vld [vmem:[#allocation2 + $0x7c0] sm:$0xff]  ;;  %v1563_v58 = vunpack.c.h.s8.bf16 %v603_v56 }
 0x112   :  { %2846 = vmatprep.subr.bf16.mxu1 %v1628_v59  ;;  %v1691_v59 = vunpack.c.h.s8.bf16 %v667_v57 }
 0x113   :  { %2756 = vmatmul.mubr.bf16.vlgmr.msra.gmra.mxu0 %v6772_v0 }
 0x114   :  { %2797 = vmatmul.mubr.bf16.vlgmr.msra.gmra.mxu1 %v6776_v1  ;;  %2806 = vmatpush1.bf16.msra.mxu0 %v1499_v2  ;;  %v1555_v2 = vunpack.c.l.s8.bf16 %v603_v56 }
 0x115   :  { %2847 = vmatpush1.bf16.msra.mxu1 %v1627_v3  ;;  %2807 = vmatprep.subr.bf16.mxu0 %v1492_v4  ;;  %v1683_v3 = vunpack.c.l.s8.bf16 %v667_v57  ;;  %v1548_v4 = vunpack.c.h.s8.bf16 %v596_v62 }
 0x116   :  { %2848 = vmatprep.subr.bf16.mxu1 %v1620_v5  ;;  %2837 = vmatprep.mubr.bf16.mxu0 %v6778_v8  ;;  %v1676_v5 = vunpack.c.h.s8.bf16 %v660_v63 }
 0x117   :  { %2878 = vmatprep.mubr.bf16.mxu1 %v6780_v9 }
 0x118   :  { %2808 = vmatpush1.bf16.msra.mxu0 %v1491_v41  ;;  %v1547_v41 = vunpack.c.h.s8.bf16 %v595_v6 }
 0x119   :  { %2849 = vmatpush1.bf16.msra.mxu1 %v1619_v46  ;;  %2809 = vmatprep.subr.bf16.mxu0 %v1484_v10  ;;  %v1675_v46 = vunpack.c.h.s8.bf16 %v659_v7  ;;  %v1540_v10 = vunpack.c.l.s8.bf16 %v596_v62 }
 0x11a   :  { %2850 = vmatprep.subr.bf16.mxu1 %v1612_v11  ;;  %v1668_v11 = vunpack.c.l.s8.bf16 %v660_v63 }
 0x11c   :  { %2810 = vmatpush1.bf16.msra.mxu0 %v1483_v14  ;;  %v1539_v14 = vunpack.c.l.s8.bf16 %v595_v6 }
 0x11d   :  { %2851 = vmatpush1.bf16.msra.mxu1 %v1611_v15  ;;  %2811 = vmatprep.subr.bf16.mxu0 %v1476_v16  ;;  %v1667_v15 = vunpack.c.l.s8.bf16 %v659_v7  ;;  %v1532_v16 = vunpack.c.h.s8.bf16 %v588_v12 }
 0x11e   :  { %2852 = vmatprep.subr.bf16.mxu1 %v1604_v17  ;;  %v1660_v17 = vunpack.c.h.s8.bf16 %v652_v13 }
 0x120   :  { %2812 = vmatpush1.bf16.msra.mxu0 %v1475_v20  ;;  %v1531_v20 = vunpack.c.h.s8.bf16 %v587_v18 }
 0x121   :  { %2853 = vmatpush1.bf16.msra.mxu1 %v1603_v21  ;;  %2813 = vmatprep.subr.bf16.mxu0 %v1468_v22  ;;  %v1659_v21 = vunpack.c.h.s8.bf16 %v651_v19  ;;  %v1524_v22 = vunpack.c.l.s8.bf16 %v588_v12 }
 0x122   :  { %2854 = vmatprep.subr.bf16.mxu1 %v1596_v23  ;;  %v1652_v23 = vunpack.c.l.s8.bf16 %v652_v13 }
 0x124   :  { %2814 = vmatpush1.bf16.msra.mxu0 %v1467_v27  ;;  %v259_v27 = vld [vmem:[%s7327_s27 + $0x10] sm:$0xff] }
 0x125   :  { %2855 = vmatpush1.bf16.msra.mxu1 %v1595_v28  ;;  %2815 = vmatprep.subr.bf16.mxu0 %v1460_v29  ;;  %v1523_v28 = vunpack.c.l.s8.bf16 %v587_v18  ;;  %v1651_v29 = vunpack.c.l.s8.bf16 %v651_v19 }
 0x126   :  { %2856 = vmatprep.subr.bf16.mxu1 %v1588_v30  ;;  %v1516_v30 = vunpack.c.h.s8.bf16 %v580_v24 }
 0x128   :  { %2816 = vmatpush1.bf16.msra.mxu0 %v1459_v33  ;;  %v643_v33 = vld [vmem:[#allocation2 + $0x700] sm:$0xff] }
 0x129   :  { %2857 = vmatpush1.bf16.msra.mxu1 %v1587_v34  ;;  %2817 = vmatprep.subr.bf16.mxu0 %v1452_v36  ;;  %v303_v34 = vcombine.high %v259_v27, %v259_v27  ;;  %v1515_v36 = vunpack.c.h.s8.bf16 %v579_v32  ;;  %v1635_v47 = vunpack.c.l.s8.bf16 %v643_v33 }
 0x12a   :  { %2858 = vmatprep.subr.bf16.mxu1 %v1580_v37  ;;  %v1643_v37 = vunpack.c.h.s8.bf16 %v643_v33  ;;  %v675_v33 = vld [vmem:[#allocation2 + $0x800] sm:$0xff] }
 0x12c   :  { %2818 = vmatpush1.bf16.msra.mxu0 %v1451_v40  ;;  %v700_v40 = vld [vmem:[#allocation2 + $0x8c8] sm:$0xff] }
 0x12d   :  { %2859 = vmatpush1.bf16.msra.mxu1 %v1579_v42  ;;  %2819 = vmatprep.subr.bf16.mxu0 %v1444_v43  ;;  %v764_v42 = vld [vmem:[#allocation2 + $0xac8] sm:$0xff]  ;;  %v6790_v43 = vrot.slane %v259_v27, %v6736_v35  ;;  %v1748_v62 = vunpack.c.l.s8.bf16 %v700_v40 }
 0x12e   :  { %2860 = vmatprep.subr.bf16.mxu1 %v1572_v44  ;;  %v6793_v44 = vrot.slane %v303_v34, %v6736_v35  ;;  %v1876_v63 = vunpack.c.l.s8.bf16 %v764_v42  ;;  %v676_v27 = vld [vmem:[#allocation2 + $0x808] sm:$0xff]  ;;  %v739_v34 = vld [vmem:[#allocation2 + $0xa00] sm:$0xff] }
 0x12f   :  { %v318_v56 = vcombine.high %v6790_v43, %v6790_v43 }
 0x130   :  { %2820 = vmatpush1.bf16.msra.mxu0 %v1443_v48  ;;  %v1756_v48 = vunpack.c.h.s8.bf16 %v700_v40  ;;  %v319_v57 = vcombine.high %v6793_v44, %v6793_v44  ;;  %v732_v40 = vld [vmem:[#allocation2 + $0x9c8] sm:$0xff] }
 0x131   :  { %2861 = vmatpush1.bf16.msra.mxu1 %v1571_v49  ;;  %2821 = vmatprep.subr.bf16.mxu0 %v1564_v50  ;;  %v1884_v49 = vunpack.c.h.s8.bf16 %v764_v42  ;;  %v699_v50 = vld [vmem:[#allocation2 + $0x8c0] sm:$0xff]  ;;  %v796_v42 = vld [vmem:[#allocation2 + $0xbc8] sm:$0xff] }
 0x132   :  { %2862 = vmatprep.subr.bf16.mxu1 %v1692_v51  ;;  %v763_v51 = vld [vmem:[#allocation2 + $0xac0] sm:$0xff] }
 0x134   :  { %2822 = vmatpush2.bf16.msra.mxu0 %v1563_v58  ;;  %v6801_v58 = vpack.c.bf16 %v6761_v52, %v6761_v52  ;;  %v1747_v52 = vunpack.c.l.s8.bf16 %v699_v50 }
 0x135   :  { %2863 = vmatpush2.bf16.msra.mxu1 %v1691_v59  ;;  %2823 = vmatprep.subr.bf16.mxu0 %v1556_v60  ;;  %v6805_v59 = vpack.c.bf16 %v6764_v54, %v6764_v54  ;;  %v1755_v60 = vunpack.c.h.s8.bf16 %v699_v50  ;;  %v1875_v54 = vunpack.c.l.s8.bf16 %v763_v51  ;;  %v731_v50 = vld [vmem:[#allocation2 + $0x9c0] sm:$0xff] }
 0x136   :  { %2864 = vmatprep.subr.bf16.mxu1 %v1684_v61  ;;  %v1883_v61 = vunpack.c.h.s8.bf16 %v763_v51  ;;  %v795_v51 = vld [vmem:[#allocation2 + $0xbc0] sm:$0xff] }
 0x138   :  { %2824 = vmatpush2.bf16.msra.mxu0 %v1555_v2  ;;  %v692_v2 = vld [vmem:[#allocation2 + $0x888] sm:$0xff] }
 0x139   :  { %2865 = vmatpush2.bf16.msra.mxu1 %v1683_v3  ;;  %2825 = vmatprep.subr.bf16.mxu0 %v1548_v4  ;;  %v756_v3 = vld [vmem:[#allocation2 + $0xa88] sm:$0xff]  ;;  %v6807_v4 = vpack.c.bf16 %v318_v56, %v318_v56  ;;  %v1740_v6 = vunpack.c.h.s8.bf16 %v692_v2  ;;  %v1732_v12 = vunpack.c.l.s8.bf16 %v692_v2  ;;  %v1819_v56 = vunpack.c.h.s8.bf16 %v731_v50 }
 0x13a   :  { %2866 = vmatprep.subr.bf16.mxu1 %v1676_v5  ;;  %v6809_v5 = vpack.c.bf16 %v319_v57, %v319_v57  ;;  %v1868_v7 = vunpack.c.h.s8.bf16 %v756_v3  ;;  %v1860_v13 = vunpack.c.l.s8.bf16 %v756_v3  ;;  %v1947_v57 = vunpack.c.h.s8.bf16 %v795_v51 }
 0x13b   :  { %v1811_v2 = vunpack.c.l.s8.bf16 %v731_v50  ;;  %v1939_v3 = vunpack.c.l.s8.bf16 %v795_v51 }
 0x13c   :  { %2826 = vmatpush2.bf16.msra.mxu0 %v1547_v41  ;;  %v691_v41 = vld [vmem:[#allocation2 + $0x880] sm:$0xff] }
 0x13d   :  { %2867 = vmatpush2.bf16.msra.mxu1 %v1675_v46  ;;  %2827 = vmatprep.subr.bf16.mxu0 %v1540_v10  ;;  %v755_v46 = vld [vmem:[#allocation2 + $0xa80] sm:$0xff]  ;;  %v1739_v10 = vunpack.c.h.s8.bf16 %v691_v41 }
 0x13e   :  { %2868 = vmatprep.subr.bf16.mxu1 %v1668_v11  ;;  %v1867_v11 = vunpack.c.h.s8.bf16 %v755_v46 }
 0x140   :  { %2828 = vmatpush2.bf16.msra.mxu0 %v1539_v14  ;;  %v684_v14 = vld [vmem:[#allocation2 + $0x848] sm:$0xff] }
 0x141   :  { %2869 = vmatpush2.bf16.msra.mxu1 %v1667_v15  ;;  %2829 = vmatprep.subr.bf16.mxu0 %v1532_v16  ;;  %v748_v15 = vld [vmem:[#allocation2 + $0xa48] sm:$0xff]  ;;  %v1731_v16 = vunpack.c.l.s8.bf16 %v691_v41  ;;  %v1724_v18 = vunpack.c.h.s8.bf16 %v684_v14  ;;  %v1716_v24 = vunpack.c.l.s8.bf16 %v684_v14 }
 0x142   :  { %2870 = vmatprep.subr.bf16.mxu1 %v1660_v17  ;;  %v1859_v17 = vunpack.c.l.s8.bf16 %v755_v46  ;;  %v1852_v19 = vunpack.c.h.s8.bf16 %v748_v15  ;;  %v1844_v25 = vunpack.c.l.s8.bf16 %v748_v15 }
 0x144   :  { %2830 = vmatpush2.bf16.msra.mxu0 %v1531_v20  ;;  %v683_v20 = vld [vmem:[#allocation2 + $0x840] sm:$0xff] }
 0x145   :  { %2871 = vmatpush2.bf16.msra.mxu1 %v1659_v21  ;;  %2831 = vmatprep.subr.bf16.mxu0 %v1524_v22  ;;  %v747_v21 = vld [vmem:[#allocation2 + $0xa40] sm:$0xff]  ;;  %v1723_v22 = vunpack.c.h.s8.bf16 %v683_v20 }
 0x146   :  { %2872 = vmatprep.subr.bf16.mxu1 %v1652_v23  ;;  %v1851_v23 = vunpack.c.h.s8.bf16 %v747_v21 }
 0x148   :  { %2832 = vmatpush2.bf16.msra.mxu0 %v1523_v28  ;;  %v740_v28 = vld [vmem:[#allocation2 + $0xa08] sm:$0xff] }
 0x149   :  { %2873 = vmatpush2.bf16.msra.mxu1 %v1651_v29  ;;  %2833 = vmatprep.subr.bf16.mxu0 %v1516_v30  ;;  %v1715_v29 = vunpack.c.l.s8.bf16 %v683_v20  ;;  %v1843_v30 = vunpack.c.l.s8.bf16 %v747_v21  ;;  %v1836_v32 = vunpack.c.h.s8.bf16 %v740_v28 }
 0x14a   :  { %2874 = vmatprep.subr.bf16.mxu1 %v1644_v31  ;;  %v1708_v31 = vunpack.c.h.s8.bf16 %v676_v27 }
 0x14c   :  { %2834 = vmatpush2.bf16.msra.mxu0 %v1515_v36  ;;  %v1707_v36 = vunpack.c.h.s8.bf16 %v675_v33 }
 0x14d   :  { %2875 = vmatpush2.bf16.msra.mxu1 %v1643_v37  ;;  %2835 = vmatprep.subr.bf16.mxu0 %v1508_v38  ;;  %v1835_v37 = vunpack.c.h.s8.bf16 %v739_v34  ;;  %v1700_v38 = vunpack.c.l.s8.bf16 %v676_v27  ;;  %v260_v27 = vld [vmem:[%s7327_s27 + $0x18] sm:$0xff] }
 0x14e   :  { %2876 = vmatprep.subr.bf16.mxu1 %v1636_v39  ;;  %v1828_v39 = vunpack.c.l.s8.bf16 %v740_v28 }
 0x150   :  { %2836 = vmatpush2.bf16.msra.mxu0 %v1507_v45  ;;  %v1699_v45 = vunpack.c.l.s8.bf16 %v675_v33  ;;  %v771_v33 = vld [vmem:[#allocation2 + $0xb00] sm:$0xff] }
 0x151   :  { %2877 = vmatpush2.bf16.msra.mxu1 %v1635_v47  ;;  %2887 = vmatprep.subr.bf16.mxu0 %v1756_v48  ;;  %v1827_v47 = vunpack.c.l.s8.bf16 %v739_v34  ;;  %v1820_v48 = vunpack.c.h.s8.bf16 %v732_v40  ;;  %v320_v34 = vcombine.high %v260_v27, %v260_v27 }
 0x152   :  { %2928 = vmatprep.subr.bf16.mxu1 %v1884_v49  ;;  %v1948_v49 = vunpack.c.h.s8.bf16 %v796_v42 }
 0x153   :  { %2838 = vmatmul.mubr.bf16.vlgmr.msra.gmra.mxu0 %v6801_v58 }
 0x154   :  { %2879 = vmatmul.mubr.bf16.vlgmr.msra.gmra.mxu1 %v6805_v59  ;;  %2888 = vmatpush1.bf16.msra.mxu0 %v1755_v60  ;;  %v1812_v60 = vunpack.c.l.s8.bf16 %v732_v40  ;;  %v828_v40 = vld [vmem:[#allocation2 + $0xcc8] sm:$0xff] }
 0x155   :  { %2929 = vmatpush1.bf16.msra.mxu1 %v1883_v61  ;;  %2889 = vmatprep.subr.bf16.mxu0 %v1748_v62  ;;  %v1940_v61 = vunpack.c.l.s8.bf16 %v796_v42  ;;  %v724_v62 = vld [vmem:[#allocation2 + $0x988] sm:$0xff]  ;;  %v2012_v50 = vunpack.c.h.s8.bf16 %v828_v40 }
 0x156   :  { %2930 = vmatprep.subr.bf16.mxu1 %v1876_v63  ;;  %2919 = vmatprep.mubr.bf16.mxu0 %v6807_v4  ;;  %v788_v63 = vld [vmem:[#allocation2 + $0xb88] sm:$0xff] }
 0x157   :  { %2960 = vmatprep.mubr.bf16.mxu1 %v6809_v5  ;;  %v892_v42 = vld [vmem:[#allocation2 + $0xec8] sm:$0xff] }
 0x158   :  { %2890 = vmatpush1.bf16.msra.mxu0 %v1747_v52  ;;  %v1804_v52 = vunpack.c.h.s8.bf16 %v724_v62  ;;  %v2140_v51 = vunpack.c.h.s8.bf16 %v892_v42 }
 0x159   :  { %2931 = vmatpush1.bf16.msra.mxu1 %v1875_v54  ;;  %2891 = vmatprep.subr.bf16.mxu0 %v1740_v6  ;;  %v1932_v54 = vunpack.c.h.s8.bf16 %v788_v63  ;;  %v723_v6 = vld [vmem:[#allocation2 + $0x980] sm:$0xff] }
 0x15a   :  { %2932 = vmatprep.subr.bf16.mxu1 %v1868_v7  ;;  %v787_v7 = vld [vmem:[#allocation2 + $0xb80] sm:$0xff]  ;;  %v1803_v41 = vunpack.c.h.s8.bf16 %v723_v6  ;;  %v1795_v14 = vunpack.c.l.s8.bf16 %v723_v6  ;;  %v820_v6 = vld [vmem:[#allocation2 + $0xc88] sm:$0xff] }
 0x15b   :  { %v1931_v46 = vunpack.c.h.s8.bf16 %v787_v7  ;;  %v1923_v15 = vunpack.c.l.s8.bf16 %v787_v7  ;;  %v884_v7 = vld [vmem:[#allocation2 + $0xe88] sm:$0xff] }
 0x15c   :  { %2892 = vmatpush1.bf16.msra.mxu0 %v1739_v10  ;;  %v1796_v10 = vunpack.c.l.s8.bf16 %v724_v62  ;;  %v6830_v62 = vpack.c.bf16 %v6790_v43, %v6790_v43 }
 0x15d   :  { %2933 = vmatpush1.bf16.msra.mxu1 %v1867_v11  ;;  %2893 = vmatprep.subr.bf16.mxu0 %v1732_v12  ;;  %v1924_v11 = vunpack.c.l.s8.bf16 %v788_v63  ;;  %v716_v12 = vld [vmem:[#allocation2 + $0x948] sm:$0xff]  ;;  %v6834_v63 = vpack.c.bf16 %v6793_v44, %v6793_v44 }
 0x15e   :  { %2934 = vmatprep.subr.bf16.mxu1 %v1860_v13  ;;  %v780_v13 = vld [vmem:[#allocation2 + $0xb48] sm:$0xff] }
 0x160   :  { %2894 = vmatpush1.bf16.msra.mxu0 %v1731_v16  ;;  %v1788_v16 = vunpack.c.h.s8.bf16 %v716_v12 }
 0x161   :  { %2935 = vmatpush1.bf16.msra.mxu1 %v1859_v17  ;;  %2895 = vmatprep.subr.bf16.mxu0 %v1724_v18  ;;  %v1916_v17 = vunpack.c.h.s8.bf16 %v780_v13  ;;  %v715_v18 = vld [vmem:[#allocation2 + $0x940] sm:$0xff] }
 0x162   :  { %2936 = vmatprep.subr.bf16.mxu1 %v1852_v19  ;;  %v779_v19 = vld [vmem:[#allocation2 + $0xb40] sm:$0xff]  ;;  %v1787_v20 = vunpack.c.h.s8.bf16 %v715_v18  ;;  %v1779_v28 = vunpack.c.l.s8.bf16 %v715_v18  ;;  %v812_v18 = vld [vmem:[#allocation2 + $0xc48] sm:$0xff] }
 0x163   :  { %v1915_v21 = vunpack.c.h.s8.bf16 %v779_v19 }
 0x164   :  { %2896 = vmatpush1.bf16.msra.mxu0 %v1723_v22  ;;  %v1780_v22 = vunpack.c.l.s8.bf16 %v716_v12  ;;  %v819_v12 = vld [vmem:[#allocation2 + $0xc80] sm:$0xff] }
 0x165   :  { %2937 = vmatpush1.bf16.msra.mxu1 %v1851_v23  ;;  %2897 = vmatprep.subr.bf16.mxu0 %v1716_v24  ;;  %v1908_v23 = vunpack.c.l.s8.bf16 %v780_v13  ;;  %v708_v24 = vld [vmem:[#allocation2 + $0x908] sm:$0xff]  ;;  %v883_v13 = vld [vmem:[#allocation2 + $0xe80] sm:$0xff] }
 0x166   :  { %2938 = vmatprep.subr.bf16.mxu1 %v1844_v25  ;;  %v772_v25 = vld [vmem:[#allocation2 + $0xb08] sm:$0xff] }
 0x168   :  { %2898 = vmatpush1.bf16.msra.mxu0 %v1715_v29  ;;  %v1907_v29 = vunpack.c.l.s8.bf16 %v779_v19  ;;  %v876_v19 = vld [vmem:[#allocation2 + $0xe48] sm:$0xff] }
 0x169   :  { %2939 = vmatpush1.bf16.msra.mxu1 %v1843_v30  ;;  %2899 = vmatprep.subr.bf16.mxu0 %v1708_v31  ;;  %v1772_v30 = vunpack.c.h.s8.bf16 %v708_v24  ;;  %v1900_v31 = vunpack.c.h.s8.bf16 %v772_v25 }
 0x16a   :  { %2940 = vmatprep.subr.bf16.mxu1 %v1836_v32  ;;  %v707_v32 = vld [vmem:[#allocation2 + $0x900] sm:$0xff] }
 0x16c   :  { %2900 = vmatpush1.bf16.msra.mxu0 %v1707_v36  ;;  %v1771_v36 = vunpack.c.h.s8.bf16 %v707_v32 }
 0x16d   :  { %2941 = vmatpush1.bf16.msra.mxu1 %v1835_v37  ;;  %2901 = vmatprep.subr.bf16.mxu0 %v1700_v38  ;;  %v1899_v37 = vunpack.c.h.s8.bf16 %v771_v33  ;;  %v1764_v38 = vunpack.c.l.s8.bf16 %v708_v24  ;;  %v811_v24 = vld [vmem:[#allocation2 + $0xc40] sm:$0xff] }
 0x16e   :  { %2942 = vmatprep.subr.bf16.mxu1 %v1828_v39  ;;  %v1892_v39 = vunpack.c.l.s8.bf16 %v772_v25  ;;  %v875_v25 = vld [vmem:[#allocation2 + $0xe40] sm:$0xff] }
 0x170   :  { %2902 = vmatpush1.bf16.msra.mxu0 %v1699_v45  ;;  %v6819_v45 = vrot.slane %v260_v27, %v6736_v35  ;;  %v1979_v27 = vunpack.c.h.s8.bf16 %v811_v24 }
 0x171   :  { %2943 = vmatpush1.bf16.msra.mxu1 %v1827_v47  ;;  %2903 = vmatprep.subr.bf16.mxu0 %v1820_v48  ;;  %v6822_v47 = vrot.slane %v320_v34, %v6736_v35  ;;  %v1763_v48 = vunpack.c.l.s8.bf16 %v707_v32  ;;  %v868_v32 = vld [vmem:[#allocation2 + $0xe08] sm:$0xff]  ;;  %v2099_v34 = vunpack.c.l.s8.bf16 %v875_v25 }
 0x172   :  { %2944 = vmatprep.subr.bf16.mxu1 %v1948_v49  ;;  %v1891_v49 = vunpack.c.l.s8.bf16 %v771_v33  ;;  %v1971_v33 = vunpack.c.l.s8.bf16 %v811_v24 }
 0x174   :  { %2904 = vmatpush2.bf16.msra.mxu0 %v1819_v56  ;;  %v827_v56 = vld [vmem:[#allocation2 + $0xcc0] sm:$0xff] }
 0x175   :  { %2945 = vmatpush2.bf16.msra.mxu1 %v1947_v57  ;;  %2905 = vmatprep.subr.bf16.mxu0 %v1812_v60  ;;  %v891_v57 = vld [vmem:[#allocation2 + $0xec0] sm:$0xff]  ;;  %v335_v60 = vcombine.high %v6819_v45, %v6819_v45  ;;  %v2003_v43 = vunpack.c.l.s8.bf16 %v827_v56 }
 0x176   :  { %2946 = vmatprep.subr.bf16.mxu1 %v1940_v61  ;;  %v336_v61 = vcombine.high %v6822_v47, %v6822_v47  ;;  %v2131_v44 = vunpack.c.l.s8.bf16 %v891_v57 }
 0x178   :  { %2906 = vmatpush2.bf16.msra.mxu0 %v1811_v2  ;;  %v2011_v2 = vunpack.c.h.s8.bf16 %v827_v56 }
 0x179   :  { %2947 = vmatpush2.bf16.msra.mxu1 %v1939_v3  ;;  %2907 = vmatprep.subr.bf16.mxu0 %v1804_v52  ;;  %v2139_v3 = vunpack.c.h.s8.bf16 %v891_v57  ;;  %v2004_v52 = vunpack.c.l.s8.bf16 %v828_v40 }
 0x17a   :  { %2948 = vmatprep.subr.bf16.mxu1 %v1932_v54  ;;  %v2132_v54 = vunpack.c.l.s8.bf16 %v892_v42 }
 0x17c   :  { %2908 = vmatpush2.bf16.msra.mxu0 %v1803_v41  ;;  %v6836_v41 = vpack.c.bf16 %v335_v60, %v335_v60 }
 0x17d   :  { %2949 = vmatpush2.bf16.msra.mxu1 %v1931_v46  ;;  %2909 = vmatprep.subr.bf16.mxu0 %v1796_v10  ;;  %v6838_v46 = vpack.c.bf16 %v336_v61, %v336_v61  ;;  %v1996_v10 = vunpack.c.h.s8.bf16 %v820_v6 }
 0x17e   :  { %2950 = vmatprep.subr.bf16.mxu1 %v1924_v11  ;;  %v2124_v11 = vunpack.c.h.s8.bf16 %v884_v7 }
 0x180   :  { %2910 = vmatpush2.bf16.msra.mxu0 %v1795_v14  ;;  %v1995_v14 = vunpack.c.h.s8.bf16 %v819_v12 }
 0x181   :  { %2951 = vmatpush2.bf16.msra.mxu1 %v1923_v15  ;;  %2911 = vmatprep.subr.bf16.mxu0 %v1788_v16  ;;  %v2123_v15 = vunpack.c.h.s8.bf16 %v883_v13  ;;  %v1988_v16 = vunpack.c.l.s8.bf16 %v820_v6 }
 0x182   :  { %2952 = vmatprep.subr.bf16.mxu1 %v1916_v17  ;;  %v2116_v17 = vunpack.c.l.s8.bf16 %v884_v7 }
 0x184   :  { %2912 = vmatpush2.bf16.msra.mxu0 %v1787_v20  ;;  %v1987_v20 = vunpack.c.l.s8.bf16 %v819_v12 }
 0x185   :  { %2953 = vmatpush2.bf16.msra.mxu1 %v1915_v21  ;;  %2913 = vmatprep.subr.bf16.mxu0 %v1780_v22  ;;  %v2115_v21 = vunpack.c.l.s8.bf16 %v883_v13  ;;  %v1980_v22 = vunpack.c.h.s8.bf16 %v812_v18 }
 0x186   :  { %2954 = vmatprep.subr.bf16.mxu1 %v1908_v23  ;;  %v2108_v23 = vunpack.c.h.s8.bf16 %v876_v19 }
 0x188   :  { %2914 = vmatpush2.bf16.msra.mxu0 %v1779_v28  ;;  %v2107_v28 = vunpack.c.h.s8.bf16 %v875_v25 }
 0x189   :  { %2955 = vmatpush2.bf16.msra.mxu1 %v1907_v29  ;;  %2915 = vmatprep.subr.bf16.mxu0 %v1772_v30  ;;  %v1972_v29 = vunpack.c.l.s8.bf16 %v812_v18  ;;  %v2100_v30 = vunpack.c.l.s8.bf16 %v876_v19 }
 0x18a   :  { %2956 = vmatprep.subr.bf16.mxu1 %v1900_v31  ;;  %v804_v31 = vld [vmem:[#allocation2 + $0xc08] sm:$0xff] }
 0x18c   :  { %2916 = vmatpush2.bf16.msra.mxu0 %v1771_v36  ;;  %v1964_v36 = vunpack.c.h.s8.bf16 %v804_v31 }
 0x18d   :  { %2957 = vmatpush2.bf16.msra.mxu1 %v1899_v37  ;;  %2917 = vmatprep.subr.bf16.mxu0 %v1764_v38  ;;  %v2092_v37 = vunpack.c.h.s8.bf16 %v868_v32  ;;  %v803_v38 = vld [vmem:[#allocation2 + $0xc00] sm:$0xff] }
 0x18e   :  { %2958 = vmatprep.subr.bf16.mxu1 %v1892_v39  ;;  %v867_v39 = vld [vmem:[#allocation2 + $0xe00] sm:$0xff]  ;;  %v1963_v40 = vunpack.c.h.s8.bf16 %v803_v38  ;;  %v1955_v56 = vunpack.c.l.s8.bf16 %v803_v38 }
 0x18f   :  { %v2091_v42 = vunpack.c.h.s8.bf16 %v867_v39  ;;  %v2083_v57 = vunpack.c.l.s8.bf16 %v867_v39 }
 0x190   :  { %2918 = vmatpush2.bf16.msra.mxu0 %v1763_v48  ;;  %v1956_v48 = vunpack.c.l.s8.bf16 %v804_v31 }
 0x191   :  { %2959 = vmatpush2.bf16.msra.mxu1 %v1891_v49  ;;  %2969 = vmatprep.subr.bf16.mxu0 %v2012_v50  ;;  %v2084_v49 = vunpack.c.l.s8.bf16 %v868_v32  ;;  %v860_v50 = vld [vmem:[#allocation2 + $0xdc8] sm:$0xff] }
 0x192   :  { %3010 = vmatprep.subr.bf16.mxu1 %v2140_v51  ;;  %v924_v51 = vld [vmem:[#allocation2 + $0xfc8] sm:$0xff]  ;;  %v2076_v60 = vunpack.c.h.s8.bf16 %v860_v50  ;;  %v2068_v6 = vunpack.c.l.s8.bf16 %v860_v50 }
 0x193   :  { %2920 = vmatmul.mubr.bf16.vlgmr.msra.gmra.mxu0 %v6830_v62  ;;  %v2204_v61 = vunpack.c.h.s8.bf16 %v924_v51  ;;  %v2196_v7 = vunpack.c.l.s8.bf16 %v924_v51 }
 0x194   :  { %2961 = vmatmul.mubr.bf16.vlgmr.msra.gmra.mxu1 %v6834_v63  ;;  %2970 = vmatpush1.bf16.msra.mxu0 %v2011_v2  ;;  %v859_v2 = vld [vmem:[#allocation2 + $0xdc0] sm:$0xff] }
 0x195   :  { %3011 = vmatpush1.bf16.msra.mxu1 %v2139_v3  ;;  %2971 = vmatprep.subr.bf16.mxu0 %v2004_v52  ;;  %v923_v3 = vld [vmem:[#allocation2 + $0xfc0] sm:$0xff]  ;;  %v2075_v52 = vunpack.c.h.s8.bf16 %v859_v2 }
 0x196   :  { %3012 = vmatprep.subr.bf16.mxu1 %v2132_v54  ;;  %3001 = vmatprep.mubr.bf16.mxu0 %v6836_v41  ;;  %v2203_v54 = vunpack.c.h.s8.bf16 %v923_v3 }
 0x197   :  { %3042 = vmatprep.mubr.bf16.mxu1 %v6838_v46 }
 0x198   :  { %2972 = vmatpush1.bf16.msra.mxu0 %v2003_v43  ;;  %v852_v43 = vld [vmem:[#allocation2 + $0xd88] sm:$0xff] }
 0x199   :  { %3013 = vmatpush1.bf16.msra.mxu1 %v2131_v44  ;;  %2973 = vmatprep.subr.bf16.mxu0 %v1996_v10  ;;  %v916_v44 = vld [vmem:[#allocation2 + $0xf88] sm:$0xff]  ;;  %v2067_v10 = vunpack.c.l.s8.bf16 %v859_v2  ;;  %v2060_v12 = vunpack.c.h.s8.bf16 %v852_v43  ;;  %v2052_v18 = vunpack.c.l.s8.bf16 %v852_v43  ;;  %v955_v43 = vld [vmem:[#allocation2 + $0x10c0] sm:$0xff] }
 0x19a   :  { %3014 = vmatprep.subr.bf16.mxu1 %v2124_v11  ;;  %v2195_v11 = vunpack.c.l.s8.bf16 %v923_v3  ;;  %v2188_v13 = vunpack.c.h.s8.bf16 %v916_v44  ;;  %v2180_v19 = vunpack.c.l.s8.bf16 %v916_v44  ;;  %v1019_v44 = vld [vmem:[#allocation2 + $0x12c0] sm:$0xff] }
 0x19c   :  { %2974 = vmatpush1.bf16.msra.mxu0 %v1995_v14  ;;  %v851_v14 = vld [vmem:[#allocation2 + $0xd80] sm:$0xff] }
 0x19d   :  { %3015 = vmatpush1.bf16.msra.mxu1 %v2123_v15  ;;  %2975 = vmatprep.subr.bf16.mxu0 %v1988_v16  ;;  %v915_v15 = vld [vmem:[#allocation2 + $0xf80] sm:$0xff]  ;;  %v2059_v16 = vunpack.c.h.s8.bf16 %v851_v14 }
 0x19e   :  { %3016 = vmatprep.subr.bf16.mxu1 %v2116_v17  ;;  %v2187_v17 = vunpack.c.h.s8.bf16 %v915_v15 }
 0x1a0   :  { %2976 = vmatpush1.bf16.msra.mxu0 %v1987_v20  ;;  %v844_v20 = vld [vmem:[#allocation2 + $0xd48] sm:$0xff] }
 0x1a1   :  { %3017 = vmatpush1.bf16.msra.mxu1 %v2115_v21  ;;  %2977 = vmatprep.subr.bf16.mxu0 %v1980_v22  ;;  %v908_v21 = vld [vmem:[#allocation2 + $0xf48] sm:$0xff]  ;;  %v2051_v22 = vunpack.c.l.s8.bf16 %v851_v14  ;;  %v2044_v24 = vunpack.c.h.s8.bf16 %v844_v20  ;;  %v2036_v31 = vunpack.c.l.s8.bf16 %v844_v20  ;;  %v2267_v14 = vunpack.c.h.s8.bf16 %v955_v43 }
 0x1a2   :  { %3018 = vmatprep.subr.bf16.mxu1 %v2108_v23  ;;  %v2179_v23 = vunpack.c.l.s8.bf16 %v915_v15  ;;  %v2172_v25 = vunpack.c.h.s8.bf16 %v908_v21  ;;  %v2164_v32 = vunpack.c.l.s8.bf16 %v908_v21  ;;  %v2395_v15 = vunpack.c.h.s8.bf16 %v1019_v44 }
 0x1a4   :  { %2978 = vmatpush1.bf16.msra.mxu0 %v1979_v27  ;;  %v843_v27 = vld [vmem:[#allocation2 + $0xd40] sm:$0xff] }
 0x1a5   :  { %3019 = vmatpush1.bf16.msra.mxu1 %v2107_v28  ;;  %2979 = vmatprep.subr.bf16.mxu0 %v1972_v29  ;;  %v907_v28 = vld [vmem:[#allocation2 + $0xf40] sm:$0xff]  ;;  %v2043_v29 = vunpack.c.h.s8.bf16 %v843_v27 }
 0x1a6   :  { %3020 = vmatprep.subr.bf16.mxu1 %v2100_v30  ;;  %v2171_v30 = vunpack.c.h.s8.bf16 %v907_v28  ;;  %v2163_v38 = vunpack.c.l.s8.bf16 %v907_v28 }
 0x1a8   :  { %2980 = vmatpush1.bf16.msra.mxu0 %v1971_v33  ;;  %v836_v33 = vld [vmem:[#allocation2 + $0xd08] sm:$0xff] }
 0x1a9   :  { %3021 = vmatpush1.bf16.msra.mxu1 %v2099_v34  ;;  %2981 = vmatprep.subr.bf16.mxu0 %v1964_v36  ;;  %v900_v34 = vld [vmem:[#allocation2 + $0xf08] sm:$0xff]  ;;  %v261_v36 = vld [vmem:[%s7327_s27 + $0x20] sm:$0xff]  ;;  %v2028_v39 = vunpack.c.h.s8.bf16 %v836_v33 }
 0x1aa   :  { %3022 = vmatprep.subr.bf16.mxu1 %v2092_v37  ;;  %v2035_v37 = vunpack.c.l.s8.bf16 %v843_v27  ;;  %v6848_v2 = vrot.slane %v261_v36, %v6736_v35 }
 0x1ac   :  { %2982 = vmatpush1.bf16.msra.mxu0 %v1963_v40  ;;  %v2156_v40 = vunpack.c.h.s8.bf16 %v900_v34 }
 0x1ad   :  { %3023 = vmatpush1.bf16.msra.mxu1 %v2091_v42  ;;  %2983 = vmatprep.subr.bf16.mxu0 %v1956_v48  ;;  %v835_v42 = vld [vmem:[#allocation2 + $0xd00] sm:$0xff] }
 0x1ae   :  { %3024 = vmatprep.subr.bf16.mxu1 %v2084_v49  ;;  %v899_v48 = vld [vmem:[#allocation2 + $0xf00] sm:$0xff]  ;;  %v337_v49 = vcombine.high %v261_v36, %v261_v36  ;;  %v2027_v50 = vunpack.c.h.s8.bf16 %v835_v42 }
 0x1af   :  { %v2155_v51 = vunpack.c.h.s8.bf16 %v899_v48 }
 0x1b0   :  { %2984 = vmatpush1.bf16.msra.mxu0 %v1955_v56  ;;  %v2020_v56 = vunpack.c.l.s8.bf16 %v836_v33  ;;  %v6851_v3 = vrot.slane %v337_v49, %v6736_v35  ;;  %v1004_v49 = vld [vmem:[#allocation2 + $0x1248] sm:$0xff] }
 0x1b1   :  { %3025 = vmatpush1.bf16.msra.mxu1 %v2083_v57  ;;  %2985 = vmatprep.subr.bf16.mxu0 %v2076_v60  ;;  %v2148_v57 = vunpack.c.l.s8.bf16 %v900_v34  ;;  %v956_v60 = vld [vmem:[#allocation2 + $0x10c8] sm:$0xff] }
 0x1b2   :  { %3026 = vmatprep.subr.bf16.mxu1 %v2204_v61  ;;  %v1020_v61 = vld [vmem:[#allocation2 + $0x12c8] sm:$0xff] }
 0x1b4   :  { %2986 = vmatpush2.bf16.msra.mxu0 %v2075_v52  ;;  %v2019_v52 = vunpack.c.l.s8.bf16 %v835_v42 }
 0x1b5   :  { %3027 = vmatpush2.bf16.msra.mxu1 %v2203_v54  ;;  %2987 = vmatprep.subr.bf16.mxu0 %v2068_v6  ;;  %v2147_v54 = vunpack.c.l.s8.bf16 %v899_v48  ;;  %v2268_v6 = vunpack.c.h.s8.bf16 %v956_v60  ;;  %v940_v48 = vld [vmem:[#allocation2 + $0x1048] sm:$0xff] }
 0x1b6   :  { %3028 = vmatprep.subr.bf16.mxu1 %v2196_v7  ;;  %v2396_v7 = vunpack.c.h.s8.bf16 %v1020_v61 }
 0x1b8   :  { %2988 = vmatpush2.bf16.msra.mxu0 %v2067_v10  ;;  %v352_v10 = vcombine.high %v6848_v2, %v6848_v2 }
 0x1b9   :  { %3029 = vmatpush2.bf16.msra.mxu1 %v2195_v11  ;;  %2989 = vmatprep.subr.bf16.mxu0 %v2060_v12  ;;  %v353_v11 = vcombine.high %v6851_v3, %v6851_v3  ;;  %v6859_v12 = vpack.c.bf16 %v6819_v45, %v6819_v45 }
 0x1ba   :  { %3030 = vmatprep.subr.bf16.mxu1 %v2188_v13  ;;  %v6863_v13 = vpack.c.bf16 %v6822_v47, %v6822_v47  ;;  %v6865_v20 = vpack.c.bf16 %v352_v10, %v352_v10 }
 0x1bb   :  { %v6867_v21 = vpack.c.bf16 %v353_v11, %v353_v11 }
 0x1bc   :  { %2990 = vmatpush2.bf16.msra.mxu0 %v2059_v16  ;;  %v2260_v16 = vunpack.c.l.s8.bf16 %v956_v60  ;;  %v939_v60 = vld [vmem:[#allocation2 + $0x1040] sm:$0xff] }
 0x1bd   :  { %3031 = vmatpush2.bf16.msra.mxu1 %v2187_v17  ;;  %2991 = vmatprep.subr.bf16.mxu0 %v2052_v18  ;;  %v2388_v17 = vunpack.c.l.s8.bf16 %v1020_v61  ;;  %v948_v18 = vld [vmem:[#allocation2 + $0x1088] sm:$0xff]  ;;  %v1003_v61 = vld [vmem:[#allocation2 + $0x1240] sm:$0xff]  ;;  %v2227_v10 = vunpack.c.l.s8.bf16 %v939_v60 }
 0x1be   :  { %3032 = vmatprep.subr.bf16.mxu1 %v2180_v19  ;;  %v1012_v19 = vld [vmem:[#allocation2 + $0x1288] sm:$0xff]  ;;  %v2252_v28 = vunpack.c.h.s8.bf16 %v948_v18  ;;  %v2355_v11 = vunpack.c.l.s8.bf16 %v1003_v61 }
 0x1bf   :  { %v2372_v42 = vunpack.c.l.s8.bf16 %v1012_v19 }
 0x1c0   :  { %2992 = vmatpush2.bf16.msra.mxu0 %v2051_v22 }
 0x1c1   :  { %3033 = vmatpush2.bf16.msra.mxu1 %v2179_v23  ;;  %2993 = vmatprep.subr.bf16.mxu0 %v2044_v24  ;;  %v2259_v23 = vunpack.c.l.s8.bf16 %v955_v43  ;;  %v2387_v24 = vunpack.c.l.s8.bf16 %v1019_v44  ;;  %v932_v43 = vld [vmem:[#allocation2 + $0x1008] sm:$0xff] }
 0x1c2   :  { %3034 = vmatprep.subr.bf16.mxu1 %v2172_v25  ;;  %v996_v44 = vld [vmem:[#allocation2 + $0x1208] sm:$0xff] }
 0x1c4   :  { %2994 = vmatpush2.bf16.msra.mxu0 %v2043_v29  ;;  %v2380_v29 = vunpack.c.h.s8.bf16 %v1012_v19 }
 0x1c5   :  { %3035 = vmatpush2.bf16.msra.mxu1 %v2171_v30  ;;  %2995 = vmatprep.subr.bf16.mxu0 %v2036_v31  ;;  %v947_v30 = vld [vmem:[#allocation2 + $0x1080] sm:$0xff] }
 0x1c6   :  { %3036 = vmatprep.subr.bf16.mxu1 %v2164_v32  ;;  %v1011_v31 = vld [vmem:[#allocation2 + $0x1280] sm:$0xff]  ;;  %v2251_v36 = vunpack.c.h.s8.bf16 %v947_v30 }
 0x1c8   :  { %2996 = vmatpush2.bf16.msra.mxu0 %v2035_v37  ;;  %v2379_v37 = vunpack.c.h.s8.bf16 %v1011_v31 }
 0x1c9   :  { %3037 = vmatpush2.bf16.msra.mxu1 %v2163_v38  ;;  %2997 = vmatprep.subr.bf16.mxu0 %v2028_v39 }
 0x1ca   :  { %3038 = vmatprep.subr.bf16.mxu1 %v2156_v40  ;;  %v2244_v40 = vunpack.c.l.s8.bf16 %v948_v18 }
 0x1cc   :  { %2998 = vmatpush2.bf16.msra.mxu0 %v2027_v50  ;;  %v2243_v50 = vunpack.c.l.s8.bf16 %v947_v30  ;;  %v987_v30 = vld [vmem:[#allocation2 + $0x11c0] sm:$0xff] }
 0x1cd   :  { %3039 = vmatpush2.bf16.msra.mxu1 %v2155_v51  ;;  %2999 = vmatprep.subr.bf16.mxu0 %v2020_v56  ;;  %v2371_v51 = vunpack.c.l.s8.bf16 %v1011_v31  ;;  %v2236_v56 = vunpack.c.h.s8.bf16 %v940_v48  ;;  %v1051_v31 = vld [vmem:[#allocation2 + $0x13c0] sm:$0xff] }
 0x1ce   :  { %3040 = vmatprep.subr.bf16.mxu1 %v2148_v57  ;;  %v2364_v57 = vunpack.c.h.s8.bf16 %v1004_v49 }
 0x1d0   :  { %3000 = vmatpush2.bf16.msra.mxu0 %v2019_v52  ;;  %v2235_v52 = vunpack.c.h.s8.bf16 %v939_v60 }
 0x1d1   :  { %3041 = vmatpush2.bf16.msra.mxu1 %v2147_v54  ;;  %3051 = vmatprep.subr.bf16.mxu0 %v2268_v6  ;;  %v2363_v54 = vunpack.c.h.s8.bf16 %v1003_v61  ;;  %v2228_v6 = vunpack.c.l.s8.bf16 %v940_v48 }
 0x1d2   :  { %3092 = vmatprep.subr.bf16.mxu1 %v2396_v7  ;;  %v2356_v7 = vunpack.c.l.s8.bf16 %v1004_v49 }
 0x1d3   :  { %v2757_v45 = vpop.f32.mrf.mxu0  ;;  %3002 = vmatmul.mubr.bf16.vlgmr.msra.gmra.mxu0 %v6859_v12 }
 0x1d4   :  { %v2798_v22 = vpop.f32.mrf.mxu1  ;;  %3043 = vmatmul.mubr.bf16.vlgmr.msra.gmra.mxu1 %v6863_v13  ;;  %3052 = vmatpush1.bf16.msra.mxu0 %v2267_v14  ;;  %v2220_v14 = vunpack.c.h.s8.bf16 %v932_v43 }
 0x1d5   :  { %v6871_v47 = vadd.f32 %v2798_v22, %v2757_v45  ;;  %3093 = vmatpush1.bf16.msra.mxu1 %v2395_v15  ;;  %v2759_v25 = vpop.f32.mrf.mxu0  ;;  %3053 = vmatprep.subr.bf16.mxu0 %v2260_v16  ;;  %v2348_v15 = vunpack.c.h.s8.bf16 %v996_v44  ;;  %v931_v16 = vld [vmem:[#allocation2 + $0x1000] sm:$0xff]  ;;  %v2212_v45 = vunpack.c.l.s8.bf16 %v932_v43  ;;  %v2340_v22 = vunpack.c.l.s8.bf16 %v996_v44 }
 0x1d6   :  { %v2800_v27 = vpop.f32.mrf.mxu1  ;;  %3094 = vmatprep.subr.bf16.mxu1 %v2388_v17  ;;  %3083 = vmatprep.mubr.bf16.mxu0 %v6865_v20  ;;  %v995_v17 = vld [vmem:[#allocation2 + $0x1200] sm:$0xff]  ;;  %v2219_v18 = vunpack.c.h.s8.bf16 %v931_v16 }
 0x1d7   :  { %v6873_v32 = vadd.f32 %v2800_v27, %v2759_v25  ;;  %3124 = vmatprep.mubr.bf16.mxu1 %v6867_v21  ;;  %v2761_v33 = vpop.f32.mrf.mxu0  ;;  %v2347_v19 = vunpack.c.h.s8.bf16 %v995_v17  ;;  %v2211_v25 = vunpack.c.l.s8.bf16 %v931_v16  ;;  %v2339_v27 = vunpack.c.l.s8.bf16 %v995_v17 }
 0x1d8   :  { %v2802_v34 = vpop.f32.mrf.mxu1  ;;  %3054 = vmatpush1.bf16.msra.mxu0 %v2259_v23  ;;  %v988_v23 = vld [vmem:[#allocation2 + $0x11c8] sm:$0xff]  ;;  %v2331_v33 = vunpack.c.h.s8.bf16 %v987_v30 }
 0x1d9   :  { %3095 = vmatpush1.bf16.msra.mxu1 %v2387_v24  ;;  %v2762_v38 = vpop.f32.mrf.mxu0  ;;  %3055 = vmatprep.subr.bf16.mxu0 %v2252_v28  ;;  %v1052_v24 = vld [vmem:[#allocation2 + $0x13c8] sm:$0xff]  ;;  %v2332_v28 = vunpack.c.h.s8.bf16 %v988_v23  ;;  %v2459_v34 = vunpack.c.h.s8.bf16 %v1051_v31 }
 0x1da   :  { %v2803_v39 = vpop.f32.mrf.mxu1  ;;  %3096 = vmatprep.subr.bf16.mxu1 %v2380_v29  ;;  %v2460_v29 = vunpack.c.h.s8.bf16 %v1052_v24  ;;  %v980_v38 = vld [vmem:[#allocation2 + $0x1188] sm:$0xff] }
 0x1db   :  { %v1044_v39 = vld [vmem:[#allocation2 + $0x1388] sm:$0xff]  ;;  %v2316_v48 = vunpack.c.h.s8.bf16 %v980_v38  ;;  %v2308_v60 = vunpack.c.l.s8.bf16 %v980_v38 }
 0x1dc   :  { %3056 = vmatpush1.bf16.msra.mxu0 %v2251_v36  ;;  %v2324_v36 = vunpack.c.l.s8.bf16 %v988_v23  ;;  %v2444_v49 = vunpack.c.h.s8.bf16 %v1044_v39  ;;  %v2436_v61 = vunpack.c.l.s8.bf16 %v1044_v39 }
 0x1dd   :  { %3097 = vmatpush1.bf16.msra.mxu1 %v2379_v37  ;;  %3057 = vmatprep.subr.bf16.mxu0 %v2244_v40  ;;  %v2452_v37 = vunpack.c.l.s8.bf16 %v1052_v24  ;;  %v2323_v40 = vunpack.c.l.s8.bf16 %v987_v30 }
 0x1de   :  { %3098 = vmatprep.subr.bf16.mxu1 %v2372_v42  ;;  %v2451_v42 = vunpack.c.l.s8.bf16 %v1051_v31 }
 0x1e0   :  { %3058 = vmatpush1.bf16.msra.mxu0 %v2243_v50  ;;  %v979_v50 = vld [vmem:[#allocation2 + $0x1180] sm:$0xff] }
 0x1e1   :  { %3099 = vmatpush1.bf16.msra.mxu1 %v2371_v51  ;;  %3059 = vmatprep.subr.bf16.mxu0 %v2236_v56  ;;  %v1043_v51 = vld [vmem:[#allocation2 + $0x1380] sm:$0xff]  ;;  %v2315_v56 = vunpack.c.h.s8.bf16 %v979_v50 }
 0x1e2   :  { %3100 = vmatprep.subr.bf16.mxu1 %v2364_v57  ;;  %v2443_v57 = vunpack.c.h.s8.bf16 %v1043_v51 }
 0x1e4   :  { %3060 = vmatpush1.bf16.msra.mxu0 %v2235_v52  ;;  %v972_v52 = vld [vmem:[#allocation2 + $0x1148] sm:$0xff] }
 0x1e5   :  { %3101 = vmatpush1.bf16.msra.mxu1 %v2363_v54  ;;  %3061 = vmatprep.subr.bf16.mxu0 %v2228_v6  ;;  %v1036_v54 = vld [vmem:[#allocation2 + $0x1348] sm:$0xff]  ;;  %v2307_v6 = vunpack.c.l.s8.bf16 %v979_v50  ;;  %v2300_v43 = vunpack.c.h.s8.bf16 %v972_v52  ;;  %v2292_v16 = vunpack.c.l.s8.bf16 %v972_v52  ;;  %v1083_v50 = vld [vmem:[#allocation2 + $0x14c0] sm:$0xff] }
 0x1e6   :  { %3102 = vmatprep.subr.bf16.mxu1 %v2356_v7  ;;  %v2435_v7 = vunpack.c.l.s8.bf16 %v1043_v51  ;;  %v2428_v44 = vunpack.c.h.s8.bf16 %v1036_v54  ;;  %v2420_v17 = vunpack.c.l.s8.bf16 %v1036_v54  ;;  %v1147_v51 = vld [vmem:[#allocation2 + $0x16c0] sm:$0xff] }
 0x1e7   :  { %v2651_v52 = vunpack.c.h.s8.bf16 %v1147_v51 }
 0x1e8   :  { %3062 = vmatpush1.bf16.msra.mxu0 %v2227_v10  ;;  %v971_v10 = vld [vmem:[#allocation2 + $0x1140] sm:$0xff] }
 0x1e9   :  { %3103 = vmatpush1.bf16.msra.mxu1 %v2355_v11  ;;  %3063 = vmatprep.subr.bf16.mxu0 %v2220_v14  ;;  %v1035_v11 = vld [vmem:[#allocation2 + $0x1340] sm:$0xff]  ;;  %v2299_v14 = vunpack.c.h.s8.bf16 %v971_v10 }
 0x1ea   :  { %3104 = vmatprep.subr.bf16.mxu1 %v2348_v15  ;;  %v2427_v15 = vunpack.c.h.s8.bf16 %v1035_v11  ;;  %v2419_v23 = vunpack.c.l.s8.bf16 %v1035_v11 }
 0x1ec   :  { %3064 = vmatpush1.bf16.msra.mxu0 %v2219_v18  ;;  %v964_v18 = vld [vmem:[#allocation2 + $0x1108] sm:$0xff] }
 0x1ed   :  { %3105 = vmatpush1.bf16.msra.mxu1 %v2347_v19  ;;  %3065 = vmatprep.subr.bf16.mxu0 %v2212_v45  ;;  %v1028_v19 = vld [vmem:[#allocation2 + $0x1308] sm:$0xff]  ;;  %v2284_v24 = vunpack.c.h.s8.bf16 %v964_v18 }
 0x1ee   :  { %3106 = vmatprep.subr.bf16.mxu1 %v2340_v22  ;;  %v262_v45 = vld [vmem:[%s7327_s27 + $0x28] sm:$0xff]  ;;  %v2291_v22 = vunpack.c.l.s8.bf16 %v971_v10 }
 0x1ef   :  { %v6881_v38 = vrot.slane %v262_v45, %v6736_v35 }
 0x1f0   :  { %3066 = vmatpush1.bf16.msra.mxu0 %v2211_v25  ;;  %v2412_v25 = vunpack.c.h.s8.bf16 %v1028_v19 }
 0x1f1   :  { %3107 = vmatpush1.bf16.msra.mxu1 %v2339_v27  ;;  %3067 = vmatprep.subr.bf16.mxu0 %v2332_v28  ;;  %v963_v27 = vld [vmem:[#allocation2 + $0x1100] sm:$0xff] }
 0x1f2   :  { %3108 = vmatprep.subr.bf16.mxu1 %v2460_v29  ;;  %v1027_v28 = vld [vmem:[#allocation2 + $0x1300] sm:$0xff]  ;;  %v354_v29 = vcombine.high %v262_v45, %v262_v45  ;;  %v2283_v30 = vunpack.c.h.s8.bf16 %v963_v27 }
 0x1f3   :  { %v2411_v31 = vunpack.c.h.s8.bf16 %v1027_v28  ;;  %v1075_v45 = vld [vmem:[#allocation2 + $0x1480] sm:$0xff] }
 0x1f4   :  { %3068 = vmatpush2.bf16.msra.mxu0 %v2331_v33  ;;  %v2276_v33 = vunpack.c.l.s8.bf16 %v964_v18  ;;  %v6884_v39 = vrot.slane %v354_v29, %v6736_v35  ;;  %v6892_v35 = vpack.c.bf16 %v6848_v2, %v6848_v2 }
 0x1f5   :  { %3109 = vmatpush2.bf16.msra.mxu1 %v2459_v34  ;;  %3069 = vmatprep.subr.bf16.mxu0 %v2324_v36  ;;  %v2404_v34 = vunpack.c.l.s8.bf16 %v1028_v19  ;;  %v1084_v36 = vld [vmem:[#allocation2 + $0x14c8] sm:$0xff] }
 0x1f6   :  { %3110 = vmatprep.subr.bf16.mxu1 %v2452_v37  ;;  %v1148_v37 = vld [vmem:[#allocation2 + $0x16c8] sm:$0xff]  ;;  %v2516_v54 = vunpack.c.l.s8.bf16 %v1084_v36 }
 0x1f8   :  { %3070 = vmatpush2.bf16.msra.mxu0 %v2323_v40  ;;  %v2275_v40 = vunpack.c.l.s8.bf16 %v963_v27 }
 0x1f9   :  { %3111 = vmatpush2.bf16.msra.mxu1 %v2451_v42  ;;  %3071 = vmatprep.subr.bf16.mxu0 %v2316_v48  ;;  %v2403_v42 = vunpack.c.l.s8.bf16 %v1027_v28  ;;  %v2524_v48 = vunpack.c.h.s8.bf16 %v1084_v36  ;;  %v2507_v28 = vunpack.c.h.s8.bf16 %v1075_v45  ;;  %v1068_v36 = vld [vmem:[#allocation2 + $0x1448] sm:$0xff] }
 0x1fa   :  { %3112 = vmatprep.subr.bf16.mxu1 %v2444_v49  ;;  %v2652_v49 = vunpack.c.h.s8.bf16 %v1148_v37 }
 0x1fc   :  { %3072 = vmatpush2.bf16.msra.mxu0 %v2315_v56  ;;  %v369_v56 = vcombine.high %v6881_v38, %v6881_v38 }
 0x1fd   :  { %3113 = vmatpush2.bf16.msra.mxu1 %v2443_v57  ;;  %3073 = vmatprep.subr.bf16.mxu0 %v2308_v60  ;;  %v370_v57 = vcombine.high %v6884_v39, %v6884_v39  ;;  %v6896_v60 = vpack.c.bf16 %v6851_v3, %v6851_v3 }
 0x1fe   :  { %3114 = vmatprep.subr.bf16.mxu1 %v2436_v61  ;;  %v2523_v61 = vunpack.c.h.s8.bf16 %v1083_v50 }
 0x1ff   :  { %v6900_v10 = vpack.c.bf16 %v370_v57, %v370_v57  ;;  %v2484_v57 = vunpack.c.l.s8.bf16 %v1068_v36 }
 0x200   :  { %3074 = vmatpush2.bf16.msra.mxu0 %v2307_v6  ;;  %v2644_v6 = vunpack.c.l.s8.bf16 %v1148_v37  ;;  %v2499_v37 = vunpack.c.l.s8.bf16 %v1075_v45 }
 0x201   :  { %3115 = vmatpush2.bf16.msra.mxu1 %v2435_v7  ;;  %3075 = vmatprep.subr.bf16.mxu0 %v2300_v43  ;;  %v1076_v7 = vld [vmem:[#allocation2 + $0x1488] sm:$0xff] }
 0x202   :  { %3116 = vmatprep.subr.bf16.mxu1 %v2428_v44  ;;  %v1140_v43 = vld [vmem:[#allocation2 + $0x1688] sm:$0xff]  ;;  %v6898_v44 = vpack.c.bf16 %v369_v56, %v369_v56  ;;  %v2508_v18 = vunpack.c.h.s8.bf16 %v1076_v7 }
 0x203   :  { %v2636_v19 = vunpack.c.h.s8.bf16 %v1140_v43 }
 0x204   :  { %3076 = vmatpush2.bf16.msra.mxu0 %v2299_v14  ;;  %v2515_v14 = vunpack.c.l.s8.bf16 %v1083_v50  ;;  %v1131_v50 = vld [vmem:[#allocation2 + $0x1640] sm:$0xff] }
 0x205   :  { %3117 = vmatpush2.bf16.msra.mxu1 %v2427_v15  ;;  %3077 = vmatprep.subr.bf16.mxu0 %v2292_v16  ;;  %v2643_v15 = vunpack.c.l.s8.bf16 %v1147_v51  ;;  %v2619_v56 = vunpack.c.h.s8.bf16 %v1131_v50 }
 0x206   :  { %3118 = vmatprep.subr.bf16.mxu1 %v2420_v17 }
 0x208   :  { %3078 = vmatpush2.bf16.msra.mxu0 %v2291_v22  ;;  %v1139_v22 = vld [vmem:[#allocation2 + $0x1680] sm:$0xff] }
 0x209   :  { %3119 = vmatpush2.bf16.msra.mxu1 %v2419_v23  ;;  %3079 = vmatprep.subr.bf16.mxu0 %v2284_v24  ;;  %v2635_v29 = vunpack.c.h.s8.bf16 %v1139_v22 }
 0x20a   :  { %3120 = vmatprep.subr.bf16.mxu1 %v2412_v25 }
 0x20c   :  { %3080 = vmatpush2.bf16.msra.mxu0 %v2283_v30 }
 0x20d   :  { %3121 = vmatpush2.bf16.msra.mxu1 %v2411_v31  ;;  %3081 = vmatprep.subr.bf16.mxu0 %v2276_v33  ;;  %v2500_v33 = vunpack.c.l.s8.bf16 %v1076_v7  ;;  %v2611_v7 = vunpack.c.l.s8.bf16 %v1131_v50 }
 0x20e   :  { %3122 = vmatprep.subr.bf16.mxu1 %v2404_v34  ;;  %v2628_v34 = vunpack.c.l.s8.bf16 %v1140_v43 }
 0x210   :  { %3082 = vmatpush2.bf16.msra.mxu0 %v2275_v40  ;;  %v2627_v40 = vunpack.c.l.s8.bf16 %v1139_v22 }
 0x211   :  { %3123 = vmatpush2.bf16.msra.mxu1 %v2403_v42  ;;  %3133 = vmatprep.subr.bf16.mxu0 %v2524_v48  ;;  %v2492_v42 = vunpack.c.h.s8.bf16 %v1068_v36  ;;  %v1172_v36 = vld [vmem:[#allocation2 + $0x1788] sm:$0xff] }
 0x212   :  { %3174 = vmatprep.subr.bf16.mxu1 %v2652_v49  ;;  %v1067_v49 = vld [vmem:[#allocation2 + $0x1440] sm:$0xff] }
 0x213   :  { %v2839_v2 = vpop.f32.mrf.mxu0  ;;  %3084 = vmatmul.mubr.bf16.vlgmr.msra.gmra.mxu0 %v6892_v35  ;;  %v2491_v51 = vunpack.c.h.s8.bf16 %v1067_v49 }
 0x214   :  { %v2880_v11 = vpop.f32.mrf.mxu1  ;;  %3125 = vmatmul.mubr.bf16.vlgmr.msra.gmra.mxu1 %v6896_v60  ;;  %v2840_v3 = vadd.f32 %v2839_v2, %v6871_v47  ;;  %3134 = vmatpush1.bf16.msra.mxu0 %v2523_v61 }
 0x215   :  { %3175 = vmatpush1.bf16.msra.mxu1 %v2651_v52  ;;  %v2841_v16 = vpop.f32.mrf.mxu0  ;;  %3135 = vmatprep.subr.bf16.mxu0 %v2516_v54  ;;  %v1060_v52 = vld [vmem:[#allocation2 + $0x1408] sm:$0xff] }
 0x216   :  { %v2882_v17 = vpop.f32.mrf.mxu1  ;;  %3176 = vmatprep.subr.bf16.mxu1 %v2644_v6  ;;  %v6905_v23 = vadd.f32 %v2880_v11, %v2840_v3  ;;  %v2842_v24 = vadd.f32 %v2841_v16, %v6873_v32  ;;  %3165 = vmatprep.mubr.bf16.mxu0 %v6898_v44  ;;  %v1132_v32 = vld [vmem:[#allocation2 + $0x1648] sm:$0xff]  ;;  %v2483_v6 = vunpack.c.l.s8.bf16 %v1067_v49  ;;  %v2476_v43 = vunpack.c.h.s8.bf16 %v1060_v52  ;;  %v1059_v11 = vld [vmem:[#allocation2 + $0x1400] sm:$0xff] }
 0x217   :  { %3206 = vmatprep.mubr.bf16.mxu1 %v6900_v10  ;;  %v2843_v47 = vpop.f32.mrf.mxu0  ;;  %v2620_v48 = vunpack.c.h.s8.bf16 %v1132_v32  ;;  %v2612_v61 = vunpack.c.l.s8.bf16 %v1132_v32  ;;  %v1124_v54 = vld [vmem:[#allocation2 + $0x1608] sm:$0xff]  ;;  %v1123_v3 = vld [vmem:[#allocation2 + $0x1600] sm:$0xff]  ;;  %v2468_v16 = vunpack.c.l.s8.bf16 %v1060_v52  ;;  %v2467_v45 = vunpack.c.l.s8.bf16 %v1059_v11 }
 0x218   :  { %v2884_v25 = vpop.f32.mrf.mxu1  ;;  %v6910_v27 = vadd.f32 %v2882_v17, %v2842_v24  ;;  %3136 = vmatpush1.bf16.msra.mxu0 %v2515_v14  ;;  %v2604_v2 = vunpack.c.h.s8.bf16 %v1124_v54  ;;  %v2475_v14 = vunpack.c.h.s8.bf16 %v1059_v11  ;;  %v2596_v17 = vunpack.c.l.s8.bf16 %v1124_v54  ;;  %v1171_v49 = vld [vmem:[#allocation2 + $0x1780] sm:$0xff]  ;;  %v1164_v52 = vld [vmem:[#allocation2 + $0x1748] sm:$0xff] }
 0x219   :  { %3177 = vmatpush1.bf16.msra.mxu1 %v2643_v15  ;;  %v2844_v30 = vpop.f32.mrf.mxu0  ;;  %3137 = vmatprep.subr.bf16.mxu0 %v2508_v18  ;;  %v2603_v15 = vunpack.c.h.s8.bf16 %v1123_v3  ;;  %v1116_v18 = vld [vmem:[#allocation2 + $0x15c8] sm:$0xff]  ;;  %v2595_v22 = vunpack.c.l.s8.bf16 %v1123_v3  ;;  %v1115_v25 = vld [vmem:[#allocation2 + $0x15c0] sm:$0xff] }
 0x21a   :  { %v2885_v31 = vpop.f32.mrf.mxu1  ;;  %3178 = vmatprep.subr.bf16.mxu1 %v2636_v19  ;;  %v1180_v19 = vld [vmem:[#allocation2 + $0x17c8] sm:$0xff]  ;;  %v2588_v24 = vunpack.c.h.s8.bf16 %v1116_v18  ;;  %v2579_v32 = vunpack.c.l.s8.bf16 %v1115_v25  ;;  %v1163_v11 = vld [vmem:[#allocation2 + $0x1740] sm:$0xff] }
 0x21b   :  { %v2716_v47 = vunpack.c.h.s8.bf16 %v1180_v19  ;;  %v2580_v31 = vunpack.c.l.s8.bf16 %v1116_v18  ;;  %v1156_v18 = vld [vmem:[#allocation2 + $0x1708] sm:$0xff] }
 0x21c   :  { %3138 = vmatpush1.bf16.msra.mxu0 %v2507_v28  ;;  %v1179_v28 = vld [vmem:[#allocation2 + $0x17c0] sm:$0xff] }
 0x21d   :  { %3179 = vmatpush1.bf16.msra.mxu1 %v2635_v29  ;;  %3139 = vmatprep.subr.bf16.mxu0 %v2500_v33  ;;  %v2587_v29 = vunpack.c.h.s8.bf16 %v1115_v25  ;;  %v2715_v30 = vunpack.c.h.s8.bf16 %v1179_v28  ;;  %v2708_v33 = vunpack.c.l.s8.bf16 %v1180_v19  ;;  %v1155_v25 = vld [vmem:[#allocation2 + $0x1700] sm:$0xff] }
 0x21e   :  { %3180 = vmatprep.subr.bf16.mxu1 %v2628_v34  ;;  %v1108_v34 = vld [vmem:[#allocation2 + $0x1588] sm:$0xff] }
 0x220   :  { %3140 = vmatpush1.bf16.msra.mxu0 %v2499_v37  ;;  %v2707_v37 = vunpack.c.l.s8.bf16 %v1179_v28 }
 0x221   :  { %3181 = vmatpush1.bf16.msra.mxu1 %v2627_v40  ;;  %3141 = vmatprep.subr.bf16.mxu0 %v2492_v42  ;;  %v2572_v40 = vunpack.c.h.s8.bf16 %v1108_v34  ;;  %v2700_v42 = vunpack.c.h.s8.bf16 %v1172_v36 }
 0x222   :  { %3182 = vmatprep.subr.bf16.mxu1 %v2620_v48  ;;  %v1107_v48 = vld [vmem:[#allocation2 + $0x1580] sm:$0xff] }
 0x223   :  { %v2571_v50 = vunpack.c.h.s8.bf16 %v1107_v48  ;;  %v2563_v54 = vunpack.c.l.s8.bf16 %v1107_v48  ;;  %v509_v48 = vld [vmem:[#allocation2 + $0x2d0] sm:$0xff] }
 0x224   :  { %3142 = vmatpush1.bf16.msra.mxu0 %v2491_v51  ;;  %v2699_v51 = vunpack.c.h.s8.bf16 %v1171_v49 }
 0x225   :  { %3183 = vmatpush1.bf16.msra.mxu1 %v2619_v56  ;;  %3143 = vmatprep.subr.bf16.mxu0 %v2484_v57  ;;  %v2564_v56 = vunpack.c.l.s8.bf16 %v1108_v34  ;;  %v2692_v57 = vunpack.c.l.s8.bf16 %v1172_v36  ;;  %v510_v34 = vld [vmem:[#allocation2 + $0x2d8] sm:$0xff] }
 0x226   :  { %3184 = vmatprep.subr.bf16.mxu1 %v2612_v61  ;;  %v1100_v61 = vld [vmem:[#allocation2 + $0x1548] sm:$0xff] }
 0x228   :  { %3144 = vmatpush1.bf16.msra.mxu0 %v2483_v6  ;;  %v2691_v6 = vunpack.c.l.s8.bf16 %v1171_v49  ;;  %v6914_v49 = vpack.c.bf16 %v6881_v38, %v6881_v38 }
 0x229   :  { %3185 = vmatpush1.bf16.msra.mxu1 %v2611_v7  ;;  %3145 = vmatprep.subr.bf16.mxu0 %v2476_v43  ;;  %v2556_v7 = vunpack.c.h.s8.bf16 %v1100_v61  ;;  %v2684_v43 = vunpack.c.h.s8.bf16 %v1164_v52 }
 0x22a   :  { %3186 = vmatprep.subr.bf16.mxu1 %v2604_v2  ;;  %v1099_v2 = vld [vmem:[#allocation2 + $0x1540] sm:$0xff] }
 0x22b   :  { %v2555_v3 = vunpack.c.h.s8.bf16 %v1099_v2  ;;  %v2547_v19 = vunpack.c.l.s8.bf16 %v1099_v2 }
 0x22c   :  { %3146 = vmatpush1.bf16.msra.mxu0 %v2475_v14  ;;  %v2683_v14 = vunpack.c.h.s8.bf16 %v1163_v11 }
 0x22d   :  { %3187 = vmatpush1.bf16.msra.mxu1 %v2603_v15  ;;  %3147 = vmatprep.subr.bf16.mxu0 %v2468_v16  ;;  %v2548_v15 = vunpack.c.l.s8.bf16 %v1100_v61  ;;  %v2676_v16 = vunpack.c.l.s8.bf16 %v1164_v52  ;;  %v1366_v61 = vunpack.c.l.s8.bf16 %v510_v34  ;;  %v438_v52 = vld [vmem:[#allocation2 + $0x98] sm:$0xff] }
 0x22e   :  { %3188 = vmatprep.subr.bf16.mxu1 %v2596_v17  ;;  %v1092_v17 = vld [vmem:[#allocation2 + $0x1508] sm:$0xff] }
 0x230   :  { %3148 = vmatpush1.bf16.msra.mxu0 %v2467_v45  ;;  %v2675_v45 = vunpack.c.l.s8.bf16 %v1163_v11 }
 0x231   :  { %3189 = vmatpush1.bf16.msra.mxu1 %v2595_v22  ;;  %3149 = vmatprep.subr.bf16.mxu0 %v2588_v24  ;;  %v2540_v22 = vunpack.c.h.s8.bf16 %v1092_v17  ;;  %v2668_v24 = vunpack.c.h.s8.bf16 %v1156_v18 }
 0x232   :  { %3190 = vmatprep.subr.bf16.mxu1 %v2716_v47  ;;  %v1091_v47 = vld [vmem:[#allocation2 + $0x1500] sm:$0xff] }
 0x233   :  { %v2539_v28 = vunpack.c.h.s8.bf16 %v1091_v47  ;;  %v2531_v36 = vunpack.c.l.s8.bf16 %v1091_v47 }
 0x234   :  { %3150 = vmatpush2.bf16.msra.mxu0 %v2587_v29  ;;  %v2667_v29 = vunpack.c.h.s8.bf16 %v1155_v25 }
 0x235   :  { %3191 = vmatpush2.bf16.msra.mxu1 %v2715_v30  ;;  %3151 = vmatprep.subr.bf16.mxu0 %v2580_v31  ;;  %v2532_v30 = vunpack.c.l.s8.bf16 %v1092_v17  ;;  %v2660_v31 = vunpack.c.l.s8.bf16 %v1156_v18 }
 0x236   :  { %3192 = vmatprep.subr.bf16.mxu1 %v2708_v33  ;;  %v446_v33 = vld [vmem:[#allocation2 + $0xd8] sm:$0xff] }
 0x238   :  { %3152 = vmatpush2.bf16.msra.mxu0 %v2579_v32  ;;  %v2659_v32 = vunpack.c.l.s8.bf16 %v1155_v25 }
 0x239   :  { %3193 = vmatpush2.bf16.msra.mxu1 %v2707_v37  ;;  %3153 = vmatprep.subr.bf16.mxu0 %v2572_v40  ;;  %v1246_v37 = vunpack.c.h.s8.bf16 %v446_v33  ;;  %v1374_v40 = vunpack.c.h.s8.bf16 %v510_v34 }
 0x23a   :  { %3194 = vmatprep.subr.bf16.mxu1 %v2700_v42  ;;  %v445_v42 = vld [vmem:[#allocation2 + $0xd0] sm:$0xff] }
 0x23c   :  { %3154 = vmatpush2.bf16.msra.mxu0 %v2571_v50  ;;  %v6918_v50 = vpack.c.bf16 %v6884_v39, %v6884_v39  ;;  %v1237_v39 = vunpack.c.l.s8.bf16 %v445_v42 }
 0x23d   :  { %3195 = vmatpush2.bf16.msra.mxu1 %v2699_v51  ;;  %3155 = vmatprep.subr.bf16.mxu0 %v2564_v56  ;;  %v1245_v51 = vunpack.c.h.s8.bf16 %v445_v42  ;;  %v1373_v56 = vunpack.c.h.s8.bf16 %v509_v48 }
 0x23e   :  { %3196 = vmatprep.subr.bf16.mxu1 %v2692_v57  ;;  %v1238_v57 = vunpack.c.l.s8.bf16 %v446_v33 }
 0x240   :  { %3156 = vmatpush2.bf16.msra.mxu0 %v2563_v54  ;;  %v502_v54 = vld [vmem:[#allocation2 + $0x298] sm:$0xff] }
 0x241   :  { %3197 = vmatpush2.bf16.msra.mxu1 %v2691_v6  ;;  %3157 = vmatprep.subr.bf16.mxu0 %v2556_v7 }
 0x242   :  { %3198 = vmatprep.subr.bf16.mxu1 %v2684_v43  ;;  %v1365_v43 = vunpack.c.l.s8.bf16 %v509_v48 }
 0x244   :  { %3158 = vmatpush2.bf16.msra.mxu0 %v2555_v3  ;;  %v1230_v3 = vunpack.c.h.s8.bf16 %v438_v52 }
 0x245   :  { %3199 = vmatpush2.bf16.msra.mxu1 %v2683_v14  ;;  %3159 = vmatprep.subr.bf16.mxu0 %v2548_v15  ;;  %v1358_v14 = vunpack.c.h.s8.bf16 %v502_v54  ;;  %v437_v15 = vld [vmem:[#allocation2 + $0x90] sm:$0xff] }
 0x246   :  { %3200 = vmatprep.subr.bf16.mxu1 %v2676_v16  ;;  %v501_v16 = vld [vmem:[#allocation2 + $0x290] sm:$0xff] }
 0x247   :  { %v1349_v33 = vunpack.c.l.s8.bf16 %v501_v16 }
 0x248   :  { %3160 = vmatpush2.bf16.msra.mxu0 %v2547_v19 }
 0x249   :  { %3201 = vmatpush2.bf16.msra.mxu1 %v2675_v45  ;;  %3161 = vmatprep.subr.bf16.mxu0 %v2540_v22  ;;  %v1229_v22 = vunpack.c.h.s8.bf16 %v437_v15 }
 0x24a   :  { %3202 = vmatprep.subr.bf16.mxu1 %v2668_v24  ;;  %v1357_v24 = vunpack.c.h.s8.bf16 %v501_v16 }
 0x24c   :  { %3162 = vmatpush2.bf16.msra.mxu0 %v2539_v28  ;;  %v1222_v28 = vunpack.c.l.s8.bf16 %v438_v52 }
 0x24d   :  { %3203 = vmatpush2.bf16.msra.mxu1 %v2667_v29  ;;  %3163 = vmatprep.subr.bf16.mxu0 %v2532_v30  ;;  %v1350_v29 = vunpack.c.l.s8.bf16 %v502_v54  ;;  %v430_v30 = vld [vmem:[#allocation2 + $0x58] sm:$0xff] }
 0x24e   :  { %3204 = vmatprep.subr.bf16.mxu1 %v2660_v31  ;;  %v1221_v31 = vunpack.c.l.s8.bf16 %v437_v15  ;;  %v1214_v34 = vunpack.c.h.s8.bf16 %v430_v30  ;;  %v1206_v48 = vunpack.c.l.s8.bf16 %v430_v30  ;;  %v534_v30 = vld [vmem:[#allocation2 + $0x398] sm:$0xff] }
 0x250   :  { %3164 = vmatpush2.bf16.msra.mxu0 %v2531_v36 }
 0x251   :  { %3205 = vmatpush2.bf16.msra.mxu1 %v2659_v32  ;;  %3215 = vmatprep.subr.bf16.mxu0 %v1246_v37  ;;  %v429_v32 = vld [vmem:[#allocation2 + $0x50] sm:$0xff] }
 0x252   :  { %3256 = vmatprep.subr.bf16.mxu1 %v1374_v40  ;;  %v493_v37 = vld [vmem:[#allocation2 + $0x250] sm:$0xff]  ;;  %v1213_v40 = vunpack.c.h.s8.bf16 %v429_v32 }
 0x253   :  { %v2921_v6 = vpop.f32.mrf.mxu0  ;;  %3166 = vmatmul.mubr.bf16.vlgmr.msra.gmra.mxu0 %v6914_v49  ;;  %v1341_v42 = vunpack.c.h.s8.bf16 %v493_v37  ;;  %v1333_v52 = vunpack.c.l.s8.bf16 %v493_v37 }
 0x254   :  { %v2962_v7 = vpop.f32.mrf.mxu1  ;;  %3207 = vmatmul.mubr.bf16.vlgmr.msra.gmra.mxu1 %v6918_v50  ;;  %v2922_v38 = vadd.f32 %v2921_v6, %v6905_v23  ;;  %3216 = vmatpush1.bf16.msra.mxu0 %v1245_v51 }
 0x255   :  { %3257 = vmatpush1.bf16.msra.mxu1 %v1373_v56  ;;  %v2923_v2 = vpop.f32.mrf.mxu0  ;;  %3217 = vmatprep.subr.bf16.mxu0 %v1238_v57  ;;  %v422_v56 = vld [vmem:[#allocation2 + $0x18] sm:$0xff] }
 0x256   :  { %v2964_v11 = vpop.f32.mrf.mxu1  ;;  %3258 = vmatprep.subr.bf16.mxu1 %v1366_v61  ;;  %v6923_v17 = vadd.f32 %v2962_v7, %v2922_v38  ;;  %v2924_v18 = vadd.f32 %v2923_v2, %v6910_v27  ;;  %3247 = vmatprep.mubr.bf16.mxu0 %v6749_v53  ;;  %v494_v27 = vld [vmem:[#allocation2 + $0x258] sm:$0xff]  ;;  %v1205_v61 = vunpack.c.l.s8.bf16 %v429_v32  ;;  %v1198_v54 = vunpack.c.h.s8.bf16 %v422_v56  ;;  %v421_v7 = vld [vmem:[#allocation2 + $0x10] sm:$0xff] }
 0x257   :  { %3288 = vmatprep.mubr.bf16.mxu1 %v6754_v55  ;;  %v2925_v23 = vpop.f32.mrf.mxu0  ;;  %v1342_v36 = vunpack.c.h.s8.bf16 %v494_v27  ;;  %v1334_v51 = vunpack.c.l.s8.bf16 %v494_v27  ;;  %v486_v57 = vld [vmem:[#allocation2 + $0x218] sm:$0xff]  ;;  %v485_v38 = vld [vmem:[#allocation2 + $0x210] sm:$0xff]  ;;  %v1190_v2 = vunpack.c.l.s8.bf16 %v422_v56  ;;  %v1189_v15 = vunpack.c.l.s8.bf16 %v421_v7 }
 0x258   :  { %v2966_v19 = vpop.f32.mrf.mxu1  ;;  %v6928_v45 = vadd.f32 %v2964_v11, %v2924_v18  ;;  %3218 = vmatpush1.bf16.msra.mxu0 %v1237_v39  ;;  %v1326_v6 = vunpack.c.h.s8.bf16 %v486_v57  ;;  %v1197_v39 = vunpack.c.h.s8.bf16 %v421_v7  ;;  %v1318_v11 = vunpack.c.l.s8.bf16 %v486_v57  ;;  %v533_v32 = vld [vmem:[#allocation2 + $0x390] sm:$0xff]  ;;  %v526_v56 = vld [vmem:[#allocation2 + $0x358] sm:$0xff] }
 0x259   :  { %3259 = vmatpush1.bf16.msra.mxu1 %v1365_v43  ;;  %v2926_v47 = vpop.f32.mrf.mxu0  ;;  %3219 = vmatprep.subr.bf16.mxu0 %v1230_v3  ;;  %v1325_v43 = vunpack.c.h.s8.bf16 %v485_v38  ;;  %v478_v3 = vld [vmem:[#allocation2 + $0x1d8] sm:$0xff]  ;;  %v1317_v16 = vunpack.c.l.s8.bf16 %v485_v38  ;;  %v477_v19 = vld [vmem:[#allocation2 + $0x1d0] sm:$0xff] }
 0x25a   :  { %v2967_v25 = vpop.f32.mrf.mxu1  ;;  %3260 = vmatprep.subr.bf16.mxu1 %v1358_v14  ;;  %v542_v14 = vld [vmem:[#allocation2 + $0x3d8] sm:$0xff]  ;;  %v1310_v18 = vunpack.c.h.s8.bf16 %v478_v3  ;;  %v1301_v27 = vunpack.c.l.s8.bf16 %v477_v19  ;;  %v525_v7 = vld [vmem:[#allocation2 + $0x350] sm:$0xff] }
 0x25b   :  { %v1438_v23 = vunpack.c.h.s8.bf16 %v542_v14  ;;  %v1302_v25 = vunpack.c.l.s8.bf16 %v478_v3  ;;  %v518_v3 = vld [vmem:[#allocation2 + $0x318] sm:$0xff] }
 0x25c   :  { %3220 = vmatpush1.bf16.msra.mxu0 %v1229_v22  ;;  %v541_v22 = vld [vmem:[#allocation2 + $0x3d0] sm:$0xff] }
 0x25d   :  { %3261 = vmatpush1.bf16.msra.mxu1 %v1357_v24  ;;  %3221 = vmatprep.subr.bf16.mxu0 %v1222_v28  ;;  %v1309_v24 = vunpack.c.h.s8.bf16 %v477_v19  ;;  %v1437_v47 = vunpack.c.h.s8.bf16 %v541_v22  ;;  %v1430_v28 = vunpack.c.l.s8.bf16 %v542_v14  ;;  %v517_v19 = vld [vmem:[#allocation2 + $0x310] sm:$0xff] }
 0x25e   :  { %3262 = vmatprep.subr.bf16.mxu1 %v1350_v29  ;;  %v470_v29 = vld [vmem:[#allocation2 + $0x198] sm:$0xff] }
 0x260   :  { %3222 = vmatpush1.bf16.msra.mxu0 %v1221_v31  ;;  %v1429_v31 = vunpack.c.l.s8.bf16 %v541_v22 }
 0x261   :  { %3263 = vmatpush1.bf16.msra.mxu1 %v1349_v33  ;;  %3223 = vmatprep.subr.bf16.mxu0 %v1214_v34  ;;  %v1294_v33 = vunpack.c.h.s8.bf16 %v470_v29  ;;  %v1422_v34 = vunpack.c.h.s8.bf16 %v534_v30 }
 0x262   :  { %3264 = vmatprep.subr.bf16.mxu1 %v1342_v36  ;;  %v469_v36 = vld [vmem:[#allocation2 + $0x190] sm:$0xff] }
 0x263   :  { %v1293_v37 = vunpack.c.h.s8.bf16 %v469_v36  ;;  %v1285_v57 = vunpack.c.l.s8.bf16 %v469_v36  ;;  %v637_v36 = vld [vmem:[#allocation2 + $0x6d0] sm:$0xff] }
 0x264   :  { %3224 = vmatpush1.bf16.msra.mxu0 %v1213_v40  ;;  %v1421_v40 = vunpack.c.h.s8.bf16 %v533_v32 }
 0x265   :  { %3265 = vmatpush1.bf16.msra.mxu1 %v1341_v42  ;;  %3225 = vmatprep.subr.bf16.mxu0 %v1206_v48  ;;  %v1286_v42 = vunpack.c.l.s8.bf16 %v470_v29  ;;  %v1414_v48 = vunpack.c.l.s8.bf16 %v534_v30  ;;  %v638_v29 = vld [vmem:[#allocation2 + $0x6d8] sm:$0xff] }
 0x266   :  { %3266 = vmatprep.subr.bf16.mxu1 %v1334_v51  ;;  %v462_v51 = vld [vmem:[#allocation2 + $0x158] sm:$0xff] }
 0x268   :  { %3226 = vmatpush1.bf16.msra.mxu0 %v1205_v61  ;;  %v1413_v61 = vunpack.c.l.s8.bf16 %v533_v32 }
 0x269   :  { %3267 = vmatpush1.bf16.msra.mxu1 %v1333_v52  ;;  %3227 = vmatprep.subr.bf16.mxu0 %v1198_v54  ;;  %v1278_v52 = vunpack.c.h.s8.bf16 %v462_v51  ;;  %v1406_v54 = vunpack.c.h.s8.bf16 %v526_v56 }
 0x26a   :  { %3268 = vmatprep.subr.bf16.mxu1 %v1326_v6  ;;  %v461_v6 = vld [vmem:[#allocation2 + $0x150] sm:$0xff] }
 0x26b   :  { %v1277_v38 = vunpack.c.h.s8.bf16 %v461_v6  ;;  %v1269_v14 = vunpack.c.l.s8.bf16 %v461_v6 }
 0x26c   :  { %3228 = vmatpush1.bf16.msra.mxu0 %v1197_v39  ;;  %v1405_v39 = vunpack.c.h.s8.bf16 %v525_v7 }
 0x26d   :  { %3269 = vmatpush1.bf16.msra.mxu1 %v1325_v43  ;;  %3229 = vmatprep.subr.bf16.mxu0 %v1190_v2  ;;  %v1270_v43 = vunpack.c.l.s8.bf16 %v462_v51  ;;  %v1398_v2 = vunpack.c.l.s8.bf16 %v526_v56  ;;  %v630_v51 = vld [vmem:[#allocation2 + $0x698] sm:$0xff] }
 0x26e   :  { %3270 = vmatprep.subr.bf16.mxu1 %v1318_v11  ;;  %v454_v11 = vld [vmem:[#allocation2 + $0x118] sm:$0xff] }
 0x270   :  { %3230 = vmatpush1.bf16.msra.mxu0 %v1189_v15  ;;  %v1397_v15 = vunpack.c.l.s8.bf16 %v525_v7 }
 0x271   :  { %3271 = vmatpush1.bf16.msra.mxu1 %v1317_v16  ;;  %3231 = vmatprep.subr.bf16.mxu0 %v1310_v18  ;;  %v1262_v16 = vunpack.c.h.s8.bf16 %v454_v11  ;;  %v1390_v18 = vunpack.c.h.s8.bf16 %v518_v3 }
 0x272   :  { %3272 = vmatprep.subr.bf16.mxu1 %v1438_v23  ;;  %v453_v23 = vld [vmem:[#allocation2 + $0x110] sm:$0xff] }
 0x273   :  { %v1261_v22 = vunpack.c.h.s8.bf16 %v453_v23  ;;  %v1253_v30 = vunpack.c.l.s8.bf16 %v453_v23 }
 0x274   :  { %3232 = vmatpush2.bf16.msra.mxu0 %v1309_v24  ;;  %v1389_v24 = vunpack.c.h.s8.bf16 %v517_v19 }
 0x275   :  { %3273 = vmatpush2.bf16.msra.mxu1 %v1437_v47  ;;  %3233 = vmatprep.subr.bf16.mxu0 %v1302_v25  ;;  %v1254_v47 = vunpack.c.l.s8.bf16 %v454_v11  ;;  %v1382_v25 = vunpack.c.l.s8.bf16 %v518_v3 }
 0x276   :  { %3274 = vmatprep.subr.bf16.mxu1 %v1430_v28  ;;  %v574_v28 = vld [vmem:[#allocation2 + $0x4d8] sm:$0xff] }
 0x278   :  { %3234 = vmatpush2.bf16.msra.mxu0 %v1301_v27  ;;  %v1381_v27 = vunpack.c.l.s8.bf16 %v517_v19 }
 0x279   :  { %3275 = vmatpush2.bf16.msra.mxu1 %v1429_v31  ;;  %3235 = vmatprep.subr.bf16.mxu0 %v1294_v33  ;;  %v1502_v31 = vunpack.c.h.s8.bf16 %v574_v28  ;;  %v1630_v33 = vunpack.c.h.s8.bf16 %v638_v29 }
 0x27a   :  { %3276 = vmatprep.subr.bf16.mxu1 %v1422_v34  ;;  %v573_v34 = vld [vmem:[#allocation2 + $0x4d0] sm:$0xff] }
 0x27b   :  { %v1501_v32 = vunpack.c.h.s8.bf16 %v573_v34 }
 0x27c   :  { %3236 = vmatpush2.bf16.msra.mxu0 %v1293_v37  ;;  %v1629_v37 = vunpack.c.h.s8.bf16 %v637_v36 }
 0x27d   :  { %3277 = vmatpush2.bf16.msra.mxu1 %v1421_v40  ;;  %3237 = vmatprep.subr.bf16.mxu0 %v1286_v42  ;;  %v1494_v40 = vunpack.c.l.s8.bf16 %v574_v28  ;;  %v1622_v42 = vunpack.c.l.s8.bf16 %v638_v29 }
 0x27e   :  { %3278 = vmatprep.subr.bf16.mxu1 %v1414_v48  ;;  %v566_v48 = vld [vmem:[#allocation2 + $0x498] sm:$0xff] }
 0x280   :  { %3238 = vmatpush2.bf16.msra.mxu0 %v1285_v57 }
 0x281   :  { %3279 = vmatpush2.bf16.msra.mxu1 %v1413_v61  ;;  %3239 = vmatprep.subr.bf16.mxu0 %v1278_v52  ;;  %v1493_v52 = vunpack.c.l.s8.bf16 %v573_v34 }
 0x282   :  { %3280 = vmatprep.subr.bf16.mxu1 %v1406_v54  ;;  %v1621_v54 = vunpack.c.l.s8.bf16 %v637_v36 }
 0x284   :  { %3240 = vmatpush2.bf16.msra.mxu0 %v1277_v38  ;;  %v1486_v38 = vunpack.c.h.s8.bf16 %v566_v48 }
 0x285   :  { %3281 = vmatpush2.bf16.msra.mxu1 %v1405_v39  ;;  %3241 = vmatprep.subr.bf16.mxu0 %v1270_v43  ;;  %v1614_v39 = vunpack.c.h.s8.bf16 %v630_v51  ;;  %v565_v43 = vld [vmem:[#allocation2 + $0x490] sm:$0xff] }
 0x286   :  { %3282 = vmatprep.subr.bf16.mxu1 %v1398_v2  ;;  %v629_v2 = vld [vmem:[#allocation2 + $0x690] sm:$0xff] }
 0x287   :  { %v1605_v28 = vunpack.c.l.s8.bf16 %v629_v2 }
 0x288   :  { %3242 = vmatpush2.bf16.msra.mxu0 %v1269_v14 }
 0x289   :  { %3283 = vmatpush2.bf16.msra.mxu1 %v1397_v15  ;;  %3243 = vmatprep.subr.bf16.mxu0 %v1262_v16  ;;  %v1485_v16 = vunpack.c.h.s8.bf16 %v565_v43 }
 0x28a   :  { %3284 = vmatprep.subr.bf16.mxu1 %v1390_v18  ;;  %v1613_v18 = vunpack.c.h.s8.bf16 %v629_v2 }
 0x28c   :  { %3244 = vmatpush2.bf16.msra.mxu0 %v1261_v22  ;;  %v1478_v22 = vunpack.c.l.s8.bf16 %v566_v48 }
 0x28d   :  { %3285 = vmatpush2.bf16.msra.mxu1 %v1389_v24  ;;  %3245 = vmatprep.subr.bf16.mxu0 %v1254_v47  ;;  %v1606_v24 = vunpack.c.l.s8.bf16 %v630_v51  ;;  %v558_v47 = vld [vmem:[#allocation2 + $0x458] sm:$0xff] }
 0x28e   :  { %3286 = vmatprep.subr.bf16.mxu1 %v1382_v25  ;;  %v1477_v25 = vunpack.c.l.s8.bf16 %v565_v43  ;;  %v1470_v29 = vunpack.c.h.s8.bf16 %v558_v47  ;;  %v1462_v36 = vunpack.c.l.s8.bf16 %v558_v47  ;;  %v662_v47 = vld [vmem:[#allocation2 + $0x798] sm:$0xff] }
 0x290   :  { %3246 = vmatpush2.bf16.msra.mxu0 %v1253_v30 }
 0x291   :  { %3287 = vmatpush2.bf16.msra.mxu1 %v1381_v27  ;;  %3297 = vmatprep.subr.bf16.mxu0 %v1502_v31  ;;  %v557_v27 = vld [vmem:[#allocation2 + $0x450] sm:$0xff] }
 0x292   :  { %3338 = vmatprep.subr.bf16.mxu1 %v1630_v33  ;;  %v621_v31 = vld [vmem:[#allocation2 + $0x650] sm:$0xff]  ;;  %v1469_v33 = vunpack.c.h.s8.bf16 %v557_v27 }
 0x293   :  { %v3003_v56 = vpop.f32.mrf.mxu0  ;;  %3248 = vmatmul.mubr.bf16.vlgmr.msra.gmra.mxu0 %v6772_v0  ;;  %v1597_v34 = vunpack.c.h.s8.bf16 %v621_v31  ;;  %v1589_v48 = vunpack.c.l.s8.bf16 %v621_v31 }
 0x294   :  { %v3044_v57 = vpop.f32.mrf.mxu1  ;;  %3289 = vmatmul.mubr.bf16.vlgmr.msra.gmra.mxu1 %v6776_v1  ;;  %v3004_v61 = vadd.f32 %v3003_v56, %v6923_v17  ;;  %3298 = vmatpush1.bf16.msra.mxu0 %v1501_v32 }
 0x295   :  { %3339 = vmatpush1.bf16.msra.mxu1 %v1629_v37  ;;  %v3005_v6 = vpop.f32.mrf.mxu0  ;;  %3299 = vmatprep.subr.bf16.mxu0 %v1494_v40  ;;  %v550_v37 = vld [vmem:[#allocation2 + $0x418] sm:$0xff] }
 0x296   :  { %v3046_v7 = vpop.f32.mrf.mxu1  ;;  %3340 = vmatprep.subr.bf16.mxu1 %v1622_v42  ;;  %v6933_v11 = vadd.f32 %v3044_v57, %v3004_v61  ;;  %v3006_v3 = vadd.f32 %v3005_v6, %v6928_v45  ;;  %3329 = vmatprep.mubr.bf16.mxu0 %v6778_v8  ;;  %v622_v45 = vld [vmem:[#allocation2 + $0x658] sm:$0xff]  ;;  %v1461_v42 = vunpack.c.l.s8.bf16 %v557_v27  ;;  %v1454_v51 = vunpack.c.h.s8.bf16 %v550_v37  ;;  %v549_v57 = vld [vmem:[#allocation2 + $0x410] sm:$0xff] }
 0x297   :  { %3370 = vmatprep.mubr.bf16.mxu1 %v6780_v9  ;;  %v3007_v17 = vpop.f32.mrf.mxu0  ;;  %v1598_v30 = vunpack.c.h.s8.bf16 %v622_v45  ;;  %v1590_v32 = vunpack.c.l.s8.bf16 %v622_v45  ;;  %v614_v40 = vld [vmem:[#allocation2 + $0x618] sm:$0xff]  ;;  %v613_v61 = vld [vmem:[#allocation2 + $0x610] sm:$0xff]  ;;  %v1446_v6 = vunpack.c.l.s8.bf16 %v550_v37  ;;  %v1445_v43 = vunpack.c.l.s8.bf16 %v549_v57 }
 0x298   :  { %v3048_v14 = vpop.f32.mrf.mxu1  ;;  %v6938_v15 = vadd.f32 %v3046_v7, %v3006_v3  ;;  %3300 = vmatpush1.bf16.msra.mxu0 %v1493_v52  ;;  %v1582_v56 = vunpack.c.h.s8.bf16 %v614_v40  ;;  %v1453_v52 = vunpack.c.h.s8.bf16 %v549_v57  ;;  %v1574_v7 = vunpack.c.l.s8.bf16 %v614_v40  ;;  %v661_v27 = vld [vmem:[#allocation2 + $0x790] sm:$0xff]  ;;  %v654_v37 = vld [vmem:[#allocation2 + $0x758] sm:$0xff] }
 0x299   :  { %3341 = vmatpush1.bf16.msra.mxu1 %v1621_v54  ;;  %v3008_v23 = vpop.f32.mrf.mxu0  ;;  %3301 = vmatprep.subr.bf16.mxu0 %v1486_v38  ;;  %v1581_v54 = vunpack.c.h.s8.bf16 %v613_v61  ;;  %v606_v38 = vld [vmem:[#allocation2 + $0x5d8] sm:$0xff]  ;;  %v1573_v2 = vunpack.c.l.s8.bf16 %v613_v61  ;;  %v605_v14 = vld [vmem:[#allocation2 + $0x5d0] sm:$0xff] }
 0x29a   :  { %v3049_v19 = vpop.f32.mrf.mxu1  ;;  %3342 = vmatprep.subr.bf16.mxu1 %v1614_v39  ;;  %v670_v39 = vld [vmem:[#allocation2 + $0x7d8] sm:$0xff]  ;;  %v1566_v3 = vunpack.c.h.s8.bf16 %v606_v38  ;;  %v1557_v45 = vunpack.c.l.s8.bf16 %v605_v14  ;;  %v653_v57 = vld [vmem:[#allocation2 + $0x750] sm:$0xff] }
 0x29b   :  { %v1694_v17 = vunpack.c.h.s8.bf16 %v670_v39  ;;  %v1558_v19 = vunpack.c.l.s8.bf16 %v606_v38  ;;  %v646_v38 = vld [vmem:[#allocation2 + $0x718] sm:$0xff] }
 0x29c   :  { %3302 = vmatpush1.bf16.msra.mxu0 %v1485_v16  ;;  %v669_v16 = vld [vmem:[#allocation2 + $0x7d0] sm:$0xff] }
 0x29d   :  { %3343 = vmatpush1.bf16.msra.mxu1 %v1613_v18  ;;  %3303 = vmatprep.subr.bf16.mxu0 %v1478_v22  ;;  %v1565_v18 = vunpack.c.h.s8.bf16 %v605_v14  ;;  %v1693_v23 = vunpack.c.h.s8.bf16 %v669_v16  ;;  %v1686_v22 = vunpack.c.l.s8.bf16 %v670_v39  ;;  %v645_v14 = vld [vmem:[#allocation2 + $0x710] sm:$0xff] }
 0x29e   :  { %3344 = vmatprep.subr.bf16.mxu1 %v1606_v24  ;;  %v598_v24 = vld [vmem:[#allocation2 + $0x598] sm:$0xff] }
 0x2a0   :  { %3304 = vmatpush1.bf16.msra.mxu0 %v1477_v25  ;;  %v1685_v25 = vunpack.c.l.s8.bf16 %v669_v16 }
 0x2a1   :  { %3345 = vmatpush1.bf16.msra.mxu1 %v1605_v28  ;;  %3305 = vmatprep.subr.bf16.mxu0 %v1470_v29  ;;  %v1550_v28 = vunpack.c.h.s8.bf16 %v598_v24  ;;  %v1678_v29 = vunpack.c.h.s8.bf16 %v662_v47 }
 0x2a2   :  { %3346 = vmatprep.subr.bf16.mxu1 %v1598_v30  ;;  %v597_v30 = vld [vmem:[#allocation2 + $0x590] sm:$0xff] }
 0x2a3   :  { %v1549_v31 = vunpack.c.h.s8.bf16 %v597_v30  ;;  %v1541_v40 = vunpack.c.l.s8.bf16 %v597_v30  ;;  %v765_v30 = vld [vmem:[#allocation2 + $0xad0] sm:$0xff] }
 0x2a4   :  { %3306 = vmatpush1.bf16.msra.mxu0 %v1469_v33  ;;  %v1677_v33 = vunpack.c.h.s8.bf16 %v661_v27 }
 0x2a5   :  { %3347 = vmatpush1.bf16.msra.mxu1 %v1597_v34  ;;  %3307 = vmatprep.subr.bf16.mxu0 %v1462_v36  ;;  %v1542_v34 = vunpack.c.l.s8.bf16 %v598_v24  ;;  %v1670_v36 = vunpack.c.l.s8.bf16 %v662_v47  ;;  %v766_v24 = vld [vmem:[#allocation2 + $0xad8] sm:$0xff] }
 0x2a6   :  { %3348 = vmatprep.subr.bf16.mxu1 %v1590_v32  ;;  %v590_v32 = vld [vmem:[#allocation2 + $0x558] sm:$0xff] }
 0x2a8   :  { %3308 = vmatpush1.bf16.msra.mxu0 %v1461_v42  ;;  %v1669_v42 = vunpack.c.l.s8.bf16 %v661_v27 }
 0x2a9   :  { %3349 = vmatpush1.bf16.msra.mxu1 %v1589_v48  ;;  %3309 = vmatprep.subr.bf16.mxu0 %v1454_v51  ;;  %v1534_v48 = vunpack.c.h.s8.bf16 %v590_v32  ;;  %v1662_v51 = vunpack.c.h.s8.bf16 %v654_v37 }
 0x2aa   :  { %3350 = vmatprep.subr.bf16.mxu1 %v1582_v56  ;;  %v589_v56 = vld [vmem:[#allocation2 + $0x550] sm:$0xff] }
 0x2ab   :  { %v1533_v61 = vunpack.c.h.s8.bf16 %v589_v56  ;;  %v1525_v39 = vunpack.c.l.s8.bf16 %v589_v56 }
 0x2ac   :  { %3310 = vmatpush1.bf16.msra.mxu0 %v1453_v52  ;;  %v1661_v52 = vunpack.c.h.s8.bf16 %v653_v57 }
 0x2ad   :  { %3351 = vmatpush1.bf16.msra.mxu1 %v1581_v54  ;;  %3311 = vmatprep.subr.bf16.mxu0 %v1446_v6  ;;  %v1526_v54 = vunpack.c.l.s8.bf16 %v590_v32  ;;  %v1654_v6 = vunpack.c.l.s8.bf16 %v654_v37  ;;  %v758_v32 = vld [vmem:[#allocation2 + $0xa98] sm:$0xff] }
 0x2ae   :  { %3352 = vmatprep.subr.bf16.mxu1 %v1574_v7  ;;  %v582_v7 = vld [vmem:[#allocation2 + $0x518] sm:$0xff] }
 0x2b0   :  { %3312 = vmatpush1.bf16.msra.mxu0 %v1445_v43  ;;  %v1653_v43 = vunpack.c.l.s8.bf16 %v653_v57 }
 0x2b1   :  { %3353 = vmatpush1.bf16.msra.mxu1 %v1573_v2  ;;  %3313 = vmatprep.subr.bf16.mxu0 %v1566_v3  ;;  %v1518_v2 = vunpack.c.h.s8.bf16 %v582_v7  ;;  %v1646_v3 = vunpack.c.h.s8.bf16 %v646_v38 }
 0x2b2   :  { %3354 = vmatprep.subr.bf16.mxu1 %v1694_v17  ;;  %v581_v17 = vld [vmem:[#allocation2 + $0x510] sm:$0xff] }
 0x2b3   :  { %v1517_v16 = vunpack.c.h.s8.bf16 %v581_v17  ;;  %v1509_v47 = vunpack.c.l.s8.bf16 %v581_v17 }
 0x2b4   :  { %3314 = vmatpush2.bf16.msra.mxu0 %v1565_v18  ;;  %v1645_v18 = vunpack.c.h.s8.bf16 %v645_v14 }
 0x2b5   :  { %3355 = vmatpush2.bf16.msra.mxu1 %v1693_v23  ;;  %3315 = vmatprep.subr.bf16.mxu0 %v1558_v19  ;;  %v1510_v23 = vunpack.c.l.s8.bf16 %v582_v7  ;;  %v1638_v19 = vunpack.c.l.s8.bf16 %v646_v38 }
 0x2b6   :  { %3356 = vmatprep.subr.bf16.mxu1 %v1686_v22  ;;  %v702_v22 = vld [vmem:[#allocation2 + $0x8d8] sm:$0xff] }
 0x2b8   :  { %3316 = vmatpush2.bf16.msra.mxu0 %v1557_v45  ;;  %v1637_v45 = vunpack.c.l.s8.bf16 %v645_v14 }
 0x2b9   :  { %3357 = vmatpush2.bf16.msra.mxu1 %v1685_v25  ;;  %3317 = vmatprep.subr.bf16.mxu0 %v1550_v28  ;;  %v1758_v25 = vunpack.c.h.s8.bf16 %v702_v22  ;;  %v1886_v28 = vunpack.c.h.s8.bf16 %v766_v24 }
 0x2ba   :  { %3358 = vmatprep.subr.bf16.mxu1 %v1678_v29  ;;  %v701_v29 = vld [vmem:[#allocation2 + $0x8d0] sm:$0xff] }
 0x2bb   :  { %v1757_v27 = vunpack.c.h.s8.bf16 %v701_v29 }
 0x2bc   :  { %3318 = vmatpush2.bf16.msra.mxu0 %v1549_v31  ;;  %v1885_v31 = vunpack.c.h.s8.bf16 %v765_v30 }
 0x2bd   :  { %3359 = vmatpush2.bf16.msra.mxu1 %v1677_v33  ;;  %3319 = vmatprep.subr.bf16.mxu0 %v1542_v34  ;;  %v1750_v33 = vunpack.c.l.s8.bf16 %v702_v22  ;;  %v1878_v34 = vunpack.c.l.s8.bf16 %v766_v24 }
 0x2be   :  { %3360 = vmatprep.subr.bf16.mxu1 %v1670_v36  ;;  %v694_v36 = vld [vmem:[#allocation2 + $0x898] sm:$0xff] }
 0x2c0   :  { %3320 = vmatpush2.bf16.msra.mxu0 %v1541_v40 }
 0x2c1   :  { %3361 = vmatpush2.bf16.msra.mxu1 %v1669_v42  ;;  %3321 = vmatprep.subr.bf16.mxu0 %v1534_v48  ;;  %v1749_v48 = vunpack.c.l.s8.bf16 %v701_v29 }
 0x2c2   :  { %3362 = vmatprep.subr.bf16.mxu1 %v1662_v51  ;;  %v1877_v51 = vunpack.c.l.s8.bf16 %v765_v30 }
 0x2c4   :  { %3322 = vmatpush2.bf16.msra.mxu0 %v1533_v61  ;;  %v1742_v61 = vunpack.c.h.s8.bf16 %v694_v36 }
 0x2c5   :  { %3363 = vmatpush2.bf16.msra.mxu1 %v1661_v52  ;;  %3323 = vmatprep.subr.bf16.mxu0 %v1526_v54  ;;  %v1870_v52 = vunpack.c.h.s8.bf16 %v758_v32  ;;  %v693_v54 = vld [vmem:[#allocation2 + $0x890] sm:$0xff] }
 0x2c6   :  { %3364 = vmatprep.subr.bf16.mxu1 %v1654_v6  ;;  %v757_v6 = vld [vmem:[#allocation2 + $0xa90] sm:$0xff] }
 0x2c7   :  { %v1861_v22 = vunpack.c.l.s8.bf16 %v757_v6 }
 0x2c8   :  { %3324 = vmatpush2.bf16.msra.mxu0 %v1525_v39 }
 0x2c9   :  { %3365 = vmatpush2.bf16.msra.mxu1 %v1653_v43  ;;  %3325 = vmatprep.subr.bf16.mxu0 %v1518_v2  ;;  %v1741_v2 = vunpack.c.h.s8.bf16 %v693_v54 }
 0x2ca   :  { %3366 = vmatprep.subr.bf16.mxu1 %v1646_v3  ;;  %v1869_v3 = vunpack.c.h.s8.bf16 %v757_v6 }
 0x2cc   :  { %3326 = vmatpush2.bf16.msra.mxu0 %v1517_v16  ;;  %v1734_v16 = vunpack.c.l.s8.bf16 %v694_v36 }
 0x2cd   :  { %3367 = vmatpush2.bf16.msra.mxu1 %v1645_v18  ;;  %3327 = vmatprep.subr.bf16.mxu0 %v1510_v23  ;;  %v1862_v18 = vunpack.c.l.s8.bf16 %v758_v32  ;;  %v686_v23 = vld [vmem:[#allocation2 + $0x858] sm:$0xff] }
 0x2ce   :  { %3368 = vmatprep.subr.bf16.mxu1 %v1638_v19  ;;  %v1733_v19 = vunpack.c.l.s8.bf16 %v693_v54  ;;  %v1726_v24 = vunpack.c.h.s8.bf16 %v686_v23  ;;  %v1718_v30 = vunpack.c.l.s8.bf16 %v686_v23  ;;  %v790_v23 = vld [vmem:[#allocation2 + $0xb98] sm:$0xff] }
 0x2d0   :  { %3328 = vmatpush2.bf16.msra.mxu0 %v1509_v47 }
 0x2d1   :  { %3369 = vmatpush2.bf16.msra.mxu1 %v1637_v45  ;;  %3379 = vmatprep.subr.bf16.mxu0 %v1758_v25  ;;  %v685_v45 = vld [vmem:[#allocation2 + $0x850] sm:$0xff] }
 0x2d2   :  { %3420 = vmatprep.subr.bf16.mxu1 %v1886_v28  ;;  %v749_v25 = vld [vmem:[#allocation2 + $0xa50] sm:$0xff]  ;;  %v1725_v28 = vunpack.c.h.s8.bf16 %v685_v45 }
 0x2d3   :  { %v3085_v37 = vpop.f32.mrf.mxu0  ;;  %3330 = vmatmul.mubr.bf16.vlgmr.msra.gmra.mxu0 %v6801_v58  ;;  %v1853_v29 = vunpack.c.h.s8.bf16 %v749_v25  ;;  %v1845_v36 = vunpack.c.l.s8.bf16 %v749_v25 }
 0x2d4   :  { %v3126_v40 = vpop.f32.mrf.mxu1  ;;  %3371 = vmatmul.mubr.bf16.vlgmr.msra.gmra.mxu1 %v6805_v59  ;;  %v3086_v42 = vadd.f32 %v3085_v37, %v6933_v11  ;;  %3380 = vmatpush1.bf16.msra.mxu0 %v1757_v27 }
 0x2d5   :  { %3421 = vmatpush1.bf16.msra.mxu1 %v1885_v31  ;;  %v3087_v56 = vpop.f32.mrf.mxu0  ;;  %3381 = vmatprep.subr.bf16.mxu0 %v1750_v33  ;;  %v678_v31 = vld [vmem:[#allocation2 + $0x818] sm:$0xff] }
 0x2d6   :  { %v3128_v57 = vpop.f32.mrf.mxu1  ;;  %3422 = vmatprep.subr.bf16.mxu1 %v1878_v34  ;;  %v6943_v7 = vadd.f32 %v3126_v40, %v3086_v42  ;;  %v3088_v38 = vadd.f32 %v3087_v56, %v6938_v15  ;;  %3411 = vmatprep.mubr.bf16.mxu0 %v6807_v4  ;;  %v750_v15 = vld [vmem:[#allocation2 + $0xa58] sm:$0xff]  ;;  %v1717_v34 = vunpack.c.l.s8.bf16 %v685_v45  ;;  %v1710_v32 = vunpack.c.h.s8.bf16 %v678_v31  ;;  %v677_v40 = vld [vmem:[#allocation2 + $0x810] sm:$0xff] }
 0x2d7   :  { %3452 = vmatprep.mubr.bf16.mxu1 %v6809_v5  ;;  %v3089_v11 = vpop.f32.mrf.mxu0  ;;  %v1854_v47 = vunpack.c.h.s8.bf16 %v750_v15  ;;  %v1846_v27 = vunpack.c.l.s8.bf16 %v750_v15  ;;  %v742_v33 = vld [vmem:[#allocation2 + $0xa18] sm:$0xff]  ;;  %v741_v42 = vld [vmem:[#allocation2 + $0xa10] sm:$0xff]  ;;  %v1702_v56 = vunpack.c.l.s8.bf16 %v678_v31  ;;  %v1701_v54 = vunpack.c.l.s8.bf16 %v677_v40 }
 0x2d8   :  { %v3130_v39 = vpop.f32.mrf.mxu1  ;;  %v6948_v43 = vadd.f32 %v3128_v57, %v3088_v38  ;;  %3382 = vmatpush1.bf16.msra.mxu0 %v1749_v48  ;;  %v1838_v37 = vunpack.c.h.s8.bf16 %v742_v33  ;;  %v1709_v48 = vunpack.c.h.s8.bf16 %v677_v40  ;;  %v1830_v57 = vunpack.c.l.s8.bf16 %v742_v33  ;;  %v789_v45 = vld [vmem:[#allocation2 + $0xb90] sm:$0xff]  ;;  %v782_v31 = vld [vmem:[#allocation2 + $0xb58] sm:$0xff] }
 0x2d9   :  { %3423 = vmatpush1.bf16.msra.mxu1 %v1877_v51  ;;  %v3090_v17 = vpop.f32.mrf.mxu0  ;;  %3383 = vmatprep.subr.bf16.mxu0 %v1742_v61  ;;  %v1837_v51 = vunpack.c.h.s8.bf16 %v741_v42  ;;  %v734_v61 = vld [vmem:[#allocation2 + $0x9d8] sm:$0xff]  ;;  %v1829_v6 = vunpack.c.l.s8.bf16 %v741_v42  ;;  %v733_v39 = vld [vmem:[#allocation2 + $0x9d0] sm:$0xff] }
 0x2da   :  { %v3131_v14 = vpop.f32.mrf.mxu1  ;;  %3424 = vmatprep.subr.bf16.mxu1 %v1870_v52  ;;  %v798_v52 = vld [vmem:[#allocation2 + $0xbd8] sm:$0xff]  ;;  %v1822_v38 = vunpack.c.h.s8.bf16 %v734_v61  ;;  %v1813_v15 = vunpack.c.l.s8.bf16 %v733_v39  ;;  %v781_v40 = vld [vmem:[#allocation2 + $0xb50] sm:$0xff] }
 0x2db   :  { %v1950_v11 = vunpack.c.h.s8.bf16 %v798_v52  ;;  %v1814_v14 = vunpack.c.l.s8.bf16 %v734_v61  ;;  %v774_v61 = vld [vmem:[#allocation2 + $0xb18] sm:$0xff] }
 0x2dc   :  { %3384 = vmatpush1.bf16.msra.mxu0 %v1741_v2  ;;  %v797_v2 = vld [vmem:[#allocation2 + $0xbd0] sm:$0xff] }
 0x2dd   :  { %3425 = vmatpush1.bf16.msra.mxu1 %v1869_v3  ;;  %3385 = vmatprep.subr.bf16.mxu0 %v1734_v16  ;;  %v1821_v3 = vunpack.c.h.s8.bf16 %v733_v39  ;;  %v1949_v17 = vunpack.c.h.s8.bf16 %v797_v2  ;;  %v1942_v16 = vunpack.c.l.s8.bf16 %v798_v52  ;;  %v773_v39 = vld [vmem:[#allocation2 + $0xb10] sm:$0xff] }
 0x2de   :  { %3426 = vmatprep.subr.bf16.mxu1 %v1862_v18  ;;  %v726_v18 = vld [vmem:[#allocation2 + $0x998] sm:$0xff] }
 0x2e0   :  { %3386 = vmatpush1.bf16.msra.mxu0 %v1733_v19  ;;  %v1941_v19 = vunpack.c.l.s8.bf16 %v797_v2 }
 0x2e1   :  { %3427 = vmatpush1.bf16.msra.mxu1 %v1861_v22  ;;  %3387 = vmatprep.subr.bf16.mxu0 %v1726_v24  ;;  %v1806_v22 = vunpack.c.h.s8.bf16 %v726_v18  ;;  %v1934_v24 = vunpack.c.h.s8.bf16 %v790_v23 }
 0x2e2   :  { %3428 = vmatprep.subr.bf16.mxu1 %v1854_v47  ;;  %v725_v47 = vld [vmem:[#allocation2 + $0x990] sm:$0xff] }
 0x2e3   :  { %v1805_v25 = vunpack.c.h.s8.bf16 %v725_v47  ;;  %v1797_v33 = vunpack.c.l.s8.bf16 %v725_v47  ;;  %v893_v47 = vld [vmem:[#allocation2 + $0xed0] sm:$0xff] }
 0x2e4   :  { %3388 = vmatpush1.bf16.msra.mxu0 %v1725_v28  ;;  %v1933_v28 = vunpack.c.h.s8.bf16 %v789_v45 }
 0x2e5   :  { %3429 = vmatpush1.bf16.msra.mxu1 %v1853_v29  ;;  %3389 = vmatprep.subr.bf16.mxu0 %v1718_v30  ;;  %v1798_v29 = vunpack.c.l.s8.bf16 %v726_v18  ;;  %v1926_v30 = vunpack.c.l.s8.bf16 %v790_v23  ;;  %v894_v18 = vld [vmem:[#allocation2 + $0xed8] sm:$0xff] }
 0x2e6   :  { %3430 = vmatprep.subr.bf16.mxu1 %v1846_v27  ;;  %v718_v27 = vld [vmem:[#allocation2 + $0x958] sm:$0xff] }
 0x2e8   :  { %3390 = vmatpush1.bf16.msra.mxu0 %v1717_v34  ;;  %v1925_v34 = vunpack.c.l.s8.bf16 %v789_v45 }
 0x2e9   :  { %3431 = vmatpush1.bf16.msra.mxu1 %v1845_v36  ;;  %3391 = vmatprep.subr.bf16.mxu0 %v1710_v32  ;;  %v1790_v36 = vunpack.c.h.s8.bf16 %v718_v27  ;;  %v1918_v32 = vunpack.c.h.s8.bf16 %v782_v31 }
 0x2ea   :  { %3432 = vmatprep.subr.bf16.mxu1 %v1838_v37  ;;  %v717_v37 = vld [vmem:[#allocation2 + $0x950] sm:$0xff] }
 0x2eb   :  { %v1789_v42 = vunpack.c.h.s8.bf16 %v717_v37  ;;  %v1781_v52 = vunpack.c.l.s8.bf16 %v717_v37 }
 0x2ec   :  { %3392 = vmatpush1.bf16.msra.mxu0 %v1709_v48  ;;  %v1917_v48 = vunpack.c.h.s8.bf16 %v781_v40 }
 0x2ed   :  { %3433 = vmatpush1.bf16.msra.mxu1 %v1837_v51  ;;  %3393 = vmatprep.subr.bf16.mxu0 %v1702_v56  ;;  %v1782_v51 = vunpack.c.l.s8.bf16 %v718_v27  ;;  %v1910_v56 = vunpack.c.l.s8.bf16 %v782_v31  ;;  %v886_v27 = vld [vmem:[#allocation2 + $0xe98] sm:$0xff] }
 0x2ee   :  { %3434 = vmatprep.subr.bf16.mxu1 %v1830_v57  ;;  %v710_v57 = vld [vmem:[#allocation2 + $0x918] sm:$0xff] }
 0x2f0   :  { %3394 = vmatpush1.bf16.msra.mxu0 %v1701_v54  ;;  %v1909_v54 = vunpack.c.l.s8.bf16 %v781_v40 }
 0x2f1   :  { %3435 = vmatpush1.bf16.msra.mxu1 %v1829_v6  ;;  %3395 = vmatprep.subr.bf16.mxu0 %v1822_v38  ;;  %v1774_v6 = vunpack.c.h.s8.bf16 %v710_v57  ;;  %v1902_v38 = vunpack.c.h.s8.bf16 %v774_v61 }
 0x2f2   :  { %3436 = vmatprep.subr.bf16.mxu1 %v1950_v11  ;;  %v709_v11 = vld [vmem:[#allocation2 + $0x910] sm:$0xff] }
 0x2f3   :  { %v1773_v2 = vunpack.c.h.s8.bf16 %v709_v11  ;;  %v1765_v23 = vunpack.c.l.s8.bf16 %v709_v11 }
 0x2f4   :  { %3396 = vmatpush2.bf16.msra.mxu0 %v1821_v3  ;;  %v1901_v3 = vunpack.c.h.s8.bf16 %v773_v39 }
 0x2f5   :  { %3437 = vmatpush2.bf16.msra.mxu1 %v1949_v17  ;;  %3397 = vmatprep.subr.bf16.mxu0 %v1814_v14  ;;  %v1766_v17 = vunpack.c.l.s8.bf16 %v710_v57  ;;  %v1894_v14 = vunpack.c.l.s8.bf16 %v774_v61 }
 0x2f6   :  { %3438 = vmatprep.subr.bf16.mxu1 %v1942_v16  ;;  %v830_v16 = vld [vmem:[#allocation2 + $0xcd8] sm:$0xff] }
 0x2f8   :  { %3398 = vmatpush2.bf16.msra.mxu0 %v1813_v15  ;;  %v1893_v15 = vunpack.c.l.s8.bf16 %v773_v39 }
 0x2f9   :  { %3439 = vmatpush2.bf16.msra.mxu1 %v1941_v19  ;;  %3399 = vmatprep.subr.bf16.mxu0 %v1806_v22  ;;  %v2014_v19 = vunpack.c.h.s8.bf16 %v830_v16  ;;  %v2142_v22 = vunpack.c.h.s8.bf16 %v894_v18 }
 0x2fa   :  { %3440 = vmatprep.subr.bf16.mxu1 %v1934_v24  ;;  %v829_v24 = vld [vmem:[#allocation2 + $0xcd0] sm:$0xff] }
 0x2fb   :  { %v2013_v45 = vunpack.c.h.s8.bf16 %v829_v24 }
 0x2fc   :  { %3400 = vmatpush2.bf16.msra.mxu0 %v1805_v25  ;;  %v2141_v25 = vunpack.c.h.s8.bf16 %v893_v47 }
 0x2fd   :  { %3441 = vmatpush2.bf16.msra.mxu1 %v1933_v28  ;;  %3401 = vmatprep.subr.bf16.mxu0 %v1798_v29  ;;  %v2006_v28 = vunpack.c.l.s8.bf16 %v830_v16  ;;  %v2134_v29 = vunpack.c.l.s8.bf16 %v894_v18 }
 0x2fe   :  { %3442 = vmatprep.subr.bf16.mxu1 %v1926_v30  ;;  %v822_v30 = vld [vmem:[#allocation2 + $0xc98] sm:$0xff] }
 0x300   :  { %3402 = vmatpush2.bf16.msra.mxu0 %v1797_v33 }
 0x301   :  { %3443 = vmatpush2.bf16.msra.mxu1 %v1925_v34  ;;  %3403 = vmatprep.subr.bf16.mxu0 %v1790_v36  ;;  %v2005_v36 = vunpack.c.l.s8.bf16 %v829_v24 }
 0x302   :  { %3444 = vmatprep.subr.bf16.mxu1 %v1918_v32  ;;  %v2133_v32 = vunpack.c.l.s8.bf16 %v893_v47 }
 0x304   :  { %3404 = vmatpush2.bf16.msra.mxu0 %v1789_v42  ;;  %v1998_v42 = vunpack.c.h.s8.bf16 %v822_v30 }
 0x305   :  { %3445 = vmatpush2.bf16.msra.mxu1 %v1917_v48  ;;  %3405 = vmatprep.subr.bf16.mxu0 %v1782_v51  ;;  %v2126_v48 = vunpack.c.h.s8.bf16 %v886_v27  ;;  %v821_v51 = vld [vmem:[#allocation2 + $0xc90] sm:$0xff] }
 0x306   :  { %3446 = vmatprep.subr.bf16.mxu1 %v1910_v56  ;;  %v885_v56 = vld [vmem:[#allocation2 + $0xe90] sm:$0xff] }
 0x307   :  { %v2117_v16 = vunpack.c.l.s8.bf16 %v885_v56 }
 0x308   :  { %3406 = vmatpush2.bf16.msra.mxu0 %v1781_v52 }
 0x309   :  { %3447 = vmatpush2.bf16.msra.mxu1 %v1909_v54  ;;  %3407 = vmatprep.subr.bf16.mxu0 %v1774_v6  ;;  %v1997_v6 = vunpack.c.h.s8.bf16 %v821_v51 }
 0x30a   :  { %3448 = vmatprep.subr.bf16.mxu1 %v1902_v38  ;;  %v2125_v38 = vunpack.c.h.s8.bf16 %v885_v56 }
 0x30c   :  { %3408 = vmatpush2.bf16.msra.mxu0 %v1773_v2  ;;  %v1990_v2 = vunpack.c.l.s8.bf16 %v822_v30 }
 0x30d   :  { %3449 = vmatpush2.bf16.msra.mxu1 %v1901_v3  ;;  %3409 = vmatprep.subr.bf16.mxu0 %v1766_v17  ;;  %v2118_v3 = vunpack.c.l.s8.bf16 %v886_v27  ;;  %v814_v17 = vld [vmem:[#allocation2 + $0xc58] sm:$0xff] }
 0x30e   :  { %3450 = vmatprep.subr.bf16.mxu1 %v1894_v14  ;;  %v1989_v14 = vunpack.c.l.s8.bf16 %v821_v51  ;;  %v1982_v18 = vunpack.c.h.s8.bf16 %v814_v17  ;;  %v1974_v47 = vunpack.c.l.s8.bf16 %v814_v17  ;;  %v918_v17 = vld [vmem:[#allocation2 + $0xf98] sm:$0xff] }
 0x310   :  { %3410 = vmatpush2.bf16.msra.mxu0 %v1765_v23 }
 0x311   :  { %3451 = vmatpush2.bf16.msra.mxu1 %v1893_v15  ;;  %3461 = vmatprep.subr.bf16.mxu0 %v2014_v19  ;;  %v813_v15 = vld [vmem:[#allocation2 + $0xc50] sm:$0xff] }
 0x312   :  { %3502 = vmatprep.subr.bf16.mxu1 %v2142_v22  ;;  %v877_v19 = vld [vmem:[#allocation2 + $0xe50] sm:$0xff]  ;;  %v1981_v22 = vunpack.c.h.s8.bf16 %v813_v15 }
 0x313   :  { %v3167_v31 = vpop.f32.mrf.mxu0  ;;  %3412 = vmatmul.mubr.bf16.vlgmr.msra.gmra.mxu0 %v6830_v62  ;;  %v2109_v24 = vunpack.c.h.s8.bf16 %v877_v19  ;;  %v2101_v30 = vunpack.c.l.s8.bf16 %v877_v19 }
 0x314   :  { %v3208_v33 = vpop.f32.mrf.mxu1  ;;  %3453 = vmatmul.mubr.bf16.vlgmr.msra.gmra.mxu1 %v6834_v63  ;;  %v3168_v34 = vadd.f32 %v3167_v31, %v6943_v7  ;;  %3462 = vmatpush1.bf16.msra.mxu0 %v2013_v45 }
 0x315   :  { %3503 = vmatpush1.bf16.msra.mxu1 %v2141_v25  ;;  %v3169_v37 = vpop.f32.mrf.mxu0  ;;  %3463 = vmatprep.subr.bf16.mxu0 %v2006_v28  ;;  %v806_v25 = vld [vmem:[#allocation2 + $0xc18] sm:$0xff] }
 0x316   :  { %v3210_v40 = vpop.f32.mrf.mxu1  ;;  %3504 = vmatprep.subr.bf16.mxu1 %v2134_v29  ;;  %v6953_v57 = vadd.f32 %v3208_v33, %v3168_v34  ;;  %v3170_v61 = vadd.f32 %v3169_v37, %v6948_v43  ;;  %3493 = vmatprep.mubr.bf16.mxu0 %v6836_v41  ;;  %v878_v43 = vld [vmem:[#allocation2 + $0xe58] sm:$0xff]  ;;  %v1973_v29 = vunpack.c.l.s8.bf16 %v813_v15  ;;  %v1966_v27 = vunpack.c.h.s8.bf16 %v806_v25  ;;  %v805_v33 = vld [vmem:[#allocation2 + $0xc10] sm:$0xff] }
 0x317   :  { %3534 = vmatprep.mubr.bf16.mxu1 %v6838_v46  ;;  %v3171_v7 = vpop.f32.mrf.mxu0  ;;  %v2110_v23 = vunpack.c.h.s8.bf16 %v878_v43  ;;  %v2102_v45 = vunpack.c.l.s8.bf16 %v878_v43  ;;  %v870_v28 = vld [vmem:[#allocation2 + $0xe18] sm:$0xff]  ;;  %v869_v34 = vld [vmem:[#allocation2 + $0xe10] sm:$0xff]  ;;  %v1958_v37 = vunpack.c.l.s8.bf16 %v806_v25  ;;  %v1957_v51 = vunpack.c.l.s8.bf16 %v805_v33 }
 0x318   :  { %v3212_v52 = vpop.f32.mrf.mxu1  ;;  %v6958_v54 = vadd.f32 %v3210_v40, %v3170_v61  ;;  %3464 = vmatpush1.bf16.msra.mxu0 %v2005_v36  ;;  %v2094_v31 = vunpack.c.h.s8.bf16 %v870_v28  ;;  %v1965_v36 = vunpack.c.h.s8.bf16 %v805_v33  ;;  %v2086_v40 = vunpack.c.l.s8.bf16 %v870_v28  ;;  %v917_v15 = vld [vmem:[#allocation2 + $0xf90] sm:$0xff]  ;;  %v910_v25 = vld [vmem:[#allocation2 + $0xf58] sm:$0xff] }
 0x319   :  { %3505 = vmatpush1.bf16.msra.mxu1 %v2133_v32  ;;  %v3172_v11 = vpop.f32.mrf.mxu0  ;;  %3465 = vmatprep.subr.bf16.mxu0 %v1998_v42  ;;  %v2093_v32 = vunpack.c.h.s8.bf16 %v869_v34  ;;  %v862_v42 = vld [vmem:[#allocation2 + $0xdd8] sm:$0xff]  ;;  %v2085_v56 = vunpack.c.l.s8.bf16 %v869_v34  ;;  %v861_v52 = vld [vmem:[#allocation2 + $0xdd0] sm:$0xff] }
 0x31a   :  { %v3213_v39 = vpop.f32.mrf.mxu1  ;;  %3506 = vmatprep.subr.bf16.mxu1 %v2126_v48  ;;  %v926_v48 = vld [vmem:[#allocation2 + $0xfd8] sm:$0xff]  ;;  %v2078_v61 = vunpack.c.h.s8.bf16 %v862_v42  ;;  %v2069_v43 = vunpack.c.l.s8.bf16 %v861_v52  ;;  %v909_v33 = vld [vmem:[#allocation2 + $0xf50] sm:$0xff] }
 0x31b   :  { %v2206_v7 = vunpack.c.h.s8.bf16 %v926_v48  ;;  %v2070_v39 = vunpack.c.l.s8.bf16 %v862_v42  ;;  %v902_v42 = vld [vmem:[#allocation2 + $0xf18] sm:$0xff] }
 0x31c   :  { %3466 = vmatpush1.bf16.msra.mxu0 %v1997_v6  ;;  %v925_v6 = vld [vmem:[#allocation2 + $0xfd0] sm:$0xff] }
 0x31d   :  { %3507 = vmatpush1.bf16.msra.mxu1 %v2125_v38  ;;  %3467 = vmatprep.subr.bf16.mxu0 %v1990_v2  ;;  %v2077_v38 = vunpack.c.h.s8.bf16 %v861_v52  ;;  %v2205_v11 = vunpack.c.h.s8.bf16 %v925_v6  ;;  %v2198_v2 = vunpack.c.l.s8.bf16 %v926_v48  ;;  %v901_v52 = vld [vmem:[#allocation2 + $0xf10] sm:$0xff] }
 0x31e   :  { %3508 = vmatprep.subr.bf16.mxu1 %v2118_v3  ;;  %v854_v3 = vld [vmem:[#allocation2 + $0xd98] sm:$0xff] }
 0x320   :  { %3468 = vmatpush1.bf16.msra.mxu0 %v1989_v14  ;;  %v2197_v14 = vunpack.c.l.s8.bf16 %v925_v6 }
 0x321   :  { %3509 = vmatpush1.bf16.msra.mxu1 %v2117_v16  ;;  %3469 = vmatprep.subr.bf16.mxu0 %v1982_v18  ;;  %v2062_v16 = vunpack.c.h.s8.bf16 %v854_v3  ;;  %v2190_v18 = vunpack.c.h.s8.bf16 %v918_v17 }
 0x322   :  { %3510 = vmatprep.subr.bf16.mxu1 %v2110_v23  ;;  %v853_v23 = vld [vmem:[#allocation2 + $0xd90] sm:$0xff] }
 0x323   :  { %v2061_v19 = vunpack.c.h.s8.bf16 %v853_v23  ;;  %v2053_v28 = vunpack.c.l.s8.bf16 %v853_v23  ;;  %v1021_v23 = vld [vmem:[#allocation2 + $0x12d0] sm:$0xff] }
 0x324   :  { %3470 = vmatpush1.bf16.msra.mxu0 %v1981_v22  ;;  %v2189_v22 = vunpack.c.h.s8.bf16 %v917_v15 }
 0x325   :  { %3511 = vmatpush1.bf16.msra.mxu1 %v2109_v24  ;;  %3471 = vmatprep.subr.bf16.mxu0 %v1974_v47  ;;  %v2054_v24 = vunpack.c.l.s8.bf16 %v854_v3  ;;  %v2182_v47 = vunpack.c.l.s8.bf16 %v918_v17  ;;  %v1022_v3 = vld [vmem:[#allocation2 + $0x12d8] sm:$0xff] }
 0x326   :  { %3512 = vmatprep.subr.bf16.mxu1 %v2102_v45  ;;  %v846_v45 = vld [vmem:[#allocation2 + $0xd58] sm:$0xff] }
 0x328   :  { %3472 = vmatpush1.bf16.msra.mxu0 %v1973_v29  ;;  %v2181_v29 = vunpack.c.l.s8.bf16 %v917_v15 }
 0x329   :  { %3513 = vmatpush1.bf16.msra.mxu1 %v2101_v30  ;;  %3473 = vmatprep.subr.bf16.mxu0 %v1966_v27  ;;  %v2046_v30 = vunpack.c.h.s8.bf16 %v846_v45  ;;  %v2174_v27 = vunpack.c.h.s8.bf16 %v910_v25 }
 0x32a   :  { %3514 = vmatprep.subr.bf16.mxu1 %v2094_v31  ;;  %v845_v31 = vld [vmem:[#allocation2 + $0xd50] sm:$0xff] }
 0x32b   :  { %v2045_v34 = vunpack.c.h.s8.bf16 %v845_v31  ;;  %v2037_v48 = vunpack.c.l.s8.bf16 %v845_v31 }
 0x32c   :  { %3474 = vmatpush1.bf16.msra.mxu0 %v1965_v36  ;;  %v2173_v36 = vunpack.c.h.s8.bf16 %v909_v33 }
 0x32d   :  { %3515 = vmatpush1.bf16.msra.mxu1 %v2093_v32  ;;  %3475 = vmatprep.subr.bf16.mxu0 %v1958_v37  ;;  %v2038_v32 = vunpack.c.l.s8.bf16 %v846_v45  ;;  %v2166_v37 = vunpack.c.l.s8.bf16 %v910_v25  ;;  %v1014_v45 = vld [vmem:[#allocation2 + $0x1298] sm:$0xff] }
 0x32e   :  { %3516 = vmatprep.subr.bf16.mxu1 %v2086_v40  ;;  %v838_v40 = vld [vmem:[#allocation2 + $0xd18] sm:$0xff] }
 0x330   :  { %3476 = vmatpush1.bf16.msra.mxu0 %v1957_v51  ;;  %v2165_v51 = vunpack.c.l.s8.bf16 %v909_v33 }
 0x331   :  { %3517 = vmatpush1.bf16.msra.mxu1 %v2085_v56  ;;  %3477 = vmatprep.subr.bf16.mxu0 %v2078_v61  ;;  %v2030_v56 = vunpack.c.h.s8.bf16 %v838_v40  ;;  %v2158_v61 = vunpack.c.h.s8.bf16 %v902_v42 }
 0x332   :  { %3518 = vmatprep.subr.bf16.mxu1 %v2206_v7  ;;  %v837_v7 = vld [vmem:[#allocation2 + $0xd10] sm:$0xff] }
 0x333   :  { %v2029_v6 = vunpack.c.h.s8.bf16 %v837_v7  ;;  %v2021_v17 = vunpack.c.l.s8.bf16 %v837_v7 }
 0x334   :  { %3478 = vmatpush2.bf16.msra.mxu0 %v2077_v38  ;;  %v2157_v38 = vunpack.c.h.s8.bf16 %v901_v52 }
 0x335   :  { %3519 = vmatpush2.bf16.msra.mxu1 %v2205_v11  ;;  %3479 = vmatprep.subr.bf16.mxu0 %v2070_v39  ;;  %v2022_v11 = vunpack.c.l.s8.bf16 %v838_v40  ;;  %v2150_v39 = vunpack.c.l.s8.bf16 %v902_v42 }
 0x336   :  { %3520 = vmatprep.subr.bf16.mxu1 %v2198_v2  ;;  %v958_v2 = vld [vmem:[#allocation2 + $0x10d8] sm:$0xff] }
 0x338   :  { %3480 = vmatpush2.bf16.msra.mxu0 %v2069_v43  ;;  %v2149_v43 = vunpack.c.l.s8.bf16 %v901_v52 }
 0x339   :  { %3521 = vmatpush2.bf16.msra.mxu1 %v2197_v14  ;;  %3481 = vmatprep.subr.bf16.mxu0 %v2062_v16  ;;  %v2270_v14 = vunpack.c.h.s8.bf16 %v958_v2  ;;  %v2398_v16 = vunpack.c.h.s8.bf16 %v1022_v3 }
 0x33a   :  { %3522 = vmatprep.subr.bf16.mxu1 %v2190_v18  ;;  %v957_v18 = vld [vmem:[#allocation2 + $0x10d0] sm:$0xff] }
 0x33b   :  { %v2269_v15 = vunpack.c.h.s8.bf16 %v957_v18 }
 0x33c   :  { %3482 = vmatpush2.bf16.msra.mxu0 %v2061_v19  ;;  %v2397_v19 = vunpack.c.h.s8.bf16 %v1021_v23 }
 0x33d   :  { %3523 = vmatpush2.bf16.msra.mxu1 %v2189_v22  ;;  %3483 = vmatprep.subr.bf16.mxu0 %v2054_v24  ;;  %v2262_v22 = vunpack.c.l.s8.bf16 %v958_v2  ;;  %v2390_v24 = vunpack.c.l.s8.bf16 %v1022_v3 }
 0x33e   :  { %3524 = vmatprep.subr.bf16.mxu1 %v2182_v47  ;;  %v950_v47 = vld [vmem:[#allocation2 + $0x1098] sm:$0xff] }
 0x33f   :  { %v2246_v52 = vunpack.c.l.s8.bf16 %v950_v47 }
 0x340   :  { %3484 = vmatpush2.bf16.msra.mxu0 %v2053_v28 }
 0x341   :  { %3525 = vmatpush2.bf16.msra.mxu1 %v2181_v29  ;;  %3485 = vmatprep.subr.bf16.mxu0 %v2046_v30  ;;  %v2261_v30 = vunpack.c.l.s8.bf16 %v957_v18 }
 0x342   :  { %3526 = vmatprep.subr.bf16.mxu1 %v2174_v27  ;;  %v2389_v27 = vunpack.c.l.s8.bf16 %v1021_v23 }
 0x344   :  { %3486 = vmatpush2.bf16.msra.mxu0 %v2045_v34  ;;  %v2254_v34 = vunpack.c.h.s8.bf16 %v950_v47 }
 0x345   :  { %3527 = vmatpush2.bf16.msra.mxu1 %v2173_v36  ;;  %3487 = vmatprep.subr.bf16.mxu0 %v2038_v32  ;;  %v2382_v36 = vunpack.c.h.s8.bf16 %v1014_v45  ;;  %v949_v32 = vld [vmem:[#allocation2 + $0x1090] sm:$0xff] }
 0x346   :  { %3528 = vmatprep.subr.bf16.mxu1 %v2166_v37  ;;  %v1013_v37 = vld [vmem:[#allocation2 + $0x1290] sm:$0xff] }
 0x347   :  { %v2373_v2 = vunpack.c.l.s8.bf16 %v1013_v37 }
 0x348   :  { %3488 = vmatpush2.bf16.msra.mxu0 %v2037_v48 }
 0x349   :  { %3529 = vmatpush2.bf16.msra.mxu1 %v2165_v51  ;;  %3489 = vmatprep.subr.bf16.mxu0 %v2030_v56  ;;  %v2253_v51 = vunpack.c.h.s8.bf16 %v949_v32  ;;  %v2381_v56 = vunpack.c.h.s8.bf16 %v1013_v37 }
 0x34a   :  { %3530 = vmatprep.subr.bf16.mxu1 %v2158_v61 }
 0x34c   :  { %3490 = vmatpush2.bf16.msra.mxu0 %v2029_v6  ;;  %v2374_v6 = vunpack.c.l.s8.bf16 %v1014_v45 }
 0x34d   :  { %3531 = vmatpush2.bf16.msra.mxu1 %v2157_v38  ;;  %3491 = vmatprep.subr.bf16.mxu0 %v2022_v11  ;;  %v942_v38 = vld [vmem:[#allocation2 + $0x1058] sm:$0xff] }
 0x34e   :  { %3532 = vmatprep.subr.bf16.mxu1 %v2150_v39  ;;  %v1006_v11 = vld [vmem:[#allocation2 + $0x1258] sm:$0xff]  ;;  %v2245_v39 = vunpack.c.l.s8.bf16 %v949_v32  ;;  %v2238_v3 = vunpack.c.h.s8.bf16 %v942_v38  ;;  %v2230_v23 = vunpack.c.l.s8.bf16 %v942_v38 }
 0x34f   :  { %v1054_v32 = vld [vmem:[#allocation2 + $0x13d8] sm:$0xff] }
 0x350   :  { %3492 = vmatpush2.bf16.msra.mxu0 %v2021_v17  ;;  %v2366_v17 = vunpack.c.h.s8.bf16 %v1006_v11  ;;  %v2454_v38 = vunpack.c.l.s8.bf16 %v1054_v32 }
 0x351   :  { %3533 = vmatpush2.bf16.msra.mxu1 %v2149_v43  ;;  %3543 = vmatprep.subr.bf16.mxu0 %v2270_v14  ;;  %v941_v43 = vld [vmem:[#allocation2 + $0x1050] sm:$0xff] }
 0x352   :  { %3584 = vmatprep.subr.bf16.mxu1 %v2398_v16  ;;  %v1005_v14 = vld [vmem:[#allocation2 + $0x1250] sm:$0xff]  ;;  %v2237_v16 = vunpack.c.h.s8.bf16 %v941_v43 }
 0x353   :  { %v3249_v25 = vpop.f32.mrf.mxu0  ;;  %3494 = vmatmul.mubr.bf16.vlgmr.msra.gmra.mxu0 %v6859_v12  ;;  %v2365_v18 = vunpack.c.h.s8.bf16 %v1005_v14  ;;  %v2357_v47 = vunpack.c.l.s8.bf16 %v1005_v14  ;;  %v981_v14 = vld [vmem:[#allocation2 + $0x1190] sm:$0xff] }
 0x354   :  { %v3290_v28 = vpop.f32.mrf.mxu1  ;;  %3535 = vmatmul.mubr.bf16.vlgmr.msra.gmra.mxu1 %v6863_v13  ;;  %3544 = vmatpush1.bf16.msra.mxu0 %v2269_v15  ;;  %v2358_v15 = vunpack.c.l.s8.bf16 %v1006_v11  ;;  %v982_v11 = vld [vmem:[#allocation2 + $0x1198] sm:$0xff] }
 0x355   :  { %v6962_v29 = vadd.f32 %v3290_v28, %v3249_v25  ;;  %3585 = vmatpush1.bf16.msra.mxu1 %v2397_v19  ;;  %v3251_v31 = vpop.f32.mrf.mxu0  ;;  %3545 = vmatprep.subr.bf16.mxu0 %v2262_v22  ;;  %v934_v19 = vld [vmem:[#allocation2 + $0x1018] sm:$0xff]  ;;  %v933_v28 = vld [vmem:[#allocation2 + $0x1010] sm:$0xff] }
 0x356   :  { %v3292_v33 = vpop.f32.mrf.mxu1  ;;  %3586 = vmatprep.subr.bf16.mxu1 %v2390_v24  ;;  %3575 = vmatprep.mubr.bf16.mxu0 %v6865_v20  ;;  %v998_v22 = vld [vmem:[#allocation2 + $0x1218] sm:$0xff]  ;;  %v2229_v24 = vunpack.c.l.s8.bf16 %v941_v43  ;;  %v2222_v45 = vunpack.c.h.s8.bf16 %v934_v19  ;;  %v2213_v37 = vunpack.c.l.s8.bf16 %v933_v28 }
 0x357   :  { %v6964_v40 = vadd.f32 %v3292_v33, %v3251_v31  ;;  %3616 = vmatprep.mubr.bf16.mxu1 %v6867_v21  ;;  %v3253_v42 = vpop.f32.mrf.mxu0  ;;  %v2350_v25 = vunpack.c.h.s8.bf16 %v998_v22  ;;  %v2214_v33 = vunpack.c.l.s8.bf16 %v934_v19 }
 0x358   :  { %v3294_v48 = vpop.f32.mrf.mxu1  ;;  %3546 = vmatpush1.bf16.msra.mxu0 %v2261_v30  ;;  %v997_v30 = vld [vmem:[#allocation2 + $0x1210] sm:$0xff] }
 0x359   :  { %3587 = vmatpush1.bf16.msra.mxu1 %v2389_v27  ;;  %v3254_v61 = vpop.f32.mrf.mxu0  ;;  %3547 = vmatprep.subr.bf16.mxu0 %v2254_v34  ;;  %v2221_v27 = vunpack.c.h.s8.bf16 %v933_v28  ;;  %v2349_v31 = vunpack.c.h.s8.bf16 %v997_v30  ;;  %v2342_v34 = vunpack.c.l.s8.bf16 %v998_v22  ;;  %v2341_v42 = vunpack.c.l.s8.bf16 %v997_v30  ;;  %v974_v22 = vld [vmem:[#allocation2 + $0x1158] sm:$0xff]  ;;  %v973_v30 = vld [vmem:[#allocation2 + $0x1150] sm:$0xff] }
 0x35a   :  { %v3295_v7 = vpop.f32.mrf.mxu1  ;;  %3588 = vmatprep.subr.bf16.mxu1 %v2382_v36  ;;  %v990_v36 = vld [vmem:[#allocation2 + $0x11d8] sm:$0xff]  ;;  %v1053_v61 = vld [vmem:[#allocation2 + $0x13d0] sm:$0xff] }
 0x35b   :  { %v2334_v48 = vunpack.c.h.s8.bf16 %v990_v36 }
 0x35c   :  { %3548 = vmatpush1.bf16.msra.mxu0 %v2253_v51  ;;  %v2462_v51 = vunpack.c.h.s8.bf16 %v1054_v32  ;;  %v966_v32 = vld [vmem:[#allocation2 + $0x1118] sm:$0xff] }
 0x35d   :  { %3589 = vmatpush1.bf16.msra.mxu1 %v2381_v56  ;;  %3549 = vmatprep.subr.bf16.mxu0 %v2246_v52  ;;  %v989_v56 = vld [vmem:[#allocation2 + $0x11d0] sm:$0xff]  ;;  %v2461_v52 = vunpack.c.h.s8.bf16 %v1053_v61 }
 0x35e   :  { %3590 = vmatprep.subr.bf16.mxu1 %v2374_v6  ;;  %v2333_v7 = vunpack.c.h.s8.bf16 %v989_v56  ;;  %v2326_v6 = vunpack.c.l.s8.bf16 %v990_v36 }
 0x360   :  { %3550 = vmatpush1.bf16.msra.mxu0 %v2245_v39  ;;  %v1046_v39 = vld [vmem:[#allocation2 + $0x1398] sm:$0xff] }
 0x361   :  { %3591 = vmatpush1.bf16.msra.mxu1 %v2373_v2  ;;  %3551 = vmatprep.subr.bf16.mxu0 %v2238_v3  ;;  %v2325_v2 = vunpack.c.l.s8.bf16 %v989_v56  ;;  %v2453_v3 = vunpack.c.l.s8.bf16 %v1053_v61  ;;  %v2446_v43 = vunpack.c.h.s8.bf16 %v1046_v39  ;;  %v2438_v19 = vunpack.c.l.s8.bf16 %v1046_v39  ;;  %v965_v61 = vld [vmem:[#allocation2 + $0x1110] sm:$0xff]  ;;  %v1086_v39 = vld [vmem:[#allocation2 + $0x14d8] sm:$0xff] }
 0x362   :  { %3592 = vmatprep.subr.bf16.mxu1 %v2366_v17  ;;  %v2318_v17 = vunpack.c.h.s8.bf16 %v982_v11 }
 0x364   :  { %3552 = vmatpush1.bf16.msra.mxu0 %v2237_v16  ;;  %v1045_v16 = vld [vmem:[#allocation2 + $0x1390] sm:$0xff] }
 0x365   :  { %3593 = vmatpush1.bf16.msra.mxu1 %v2365_v18  ;;  %3553 = vmatprep.subr.bf16.mxu0 %v2230_v23  ;;  %v2317_v18 = vunpack.c.h.s8.bf16 %v981_v14  ;;  %v2445_v23 = vunpack.c.h.s8.bf16 %v1045_v16 }
 0x366   :  { %3594 = vmatprep.subr.bf16.mxu1 %v2358_v15  ;;  %v2310_v15 = vunpack.c.l.s8.bf16 %v982_v11 }
 0x368   :  { %3554 = vmatpush1.bf16.msra.mxu0 %v2229_v24  ;;  %v1038_v24 = vld [vmem:[#allocation2 + $0x1358] sm:$0xff] }
 0x369   :  { %3595 = vmatpush1.bf16.msra.mxu1 %v2357_v47  ;;  %3555 = vmatprep.subr.bf16.mxu0 %v2222_v45  ;;  %v2309_v47 = vunpack.c.l.s8.bf16 %v981_v14  ;;  %v2437_v45 = vunpack.c.l.s8.bf16 %v1045_v16  ;;  %v2430_v28 = vunpack.c.h.s8.bf16 %v1038_v24  ;;  %v2422_v36 = vunpack.c.l.s8.bf16 %v1038_v24  ;;  %v1085_v16 = vld [vmem:[#allocation2 + $0x14d0] sm:$0xff]  ;;  %v1078_v24 = vld [vmem:[#allocation2 + $0x1498] sm:$0xff] }
 0x36a   :  { %3596 = vmatprep.subr.bf16.mxu1 %v2350_v25  ;;  %v2302_v25 = vunpack.c.h.s8.bf16 %v974_v22 }
 0x36c   :  { %3556 = vmatpush1.bf16.msra.mxu0 %v2221_v27  ;;  %v1037_v27 = vld [vmem:[#allocation2 + $0x1350] sm:$0xff] }
 0x36d   :  { %3597 = vmatpush1.bf16.msra.mxu1 %v2349_v31  ;;  %3557 = vmatprep.subr.bf16.mxu0 %v2214_v33  ;;  %v2301_v31 = vunpack.c.h.s8.bf16 %v973_v30  ;;  %v2429_v33 = vunpack.c.h.s8.bf16 %v1037_v27 }
 0x36e   :  { %3598 = vmatprep.subr.bf16.mxu1 %v2342_v34  ;;  %v2294_v34 = vunpack.c.l.s8.bf16 %v974_v22 }
 0x370   :  { %3558 = vmatpush1.bf16.msra.mxu0 %v2213_v37  ;;  %v1030_v37 = vld [vmem:[#allocation2 + $0x1318] sm:$0xff] }
 0x371   :  { %3599 = vmatpush1.bf16.msra.mxu1 %v2341_v42  ;;  %3559 = vmatprep.subr.bf16.mxu0 %v2334_v48  ;;  %v2293_v42 = vunpack.c.l.s8.bf16 %v973_v30  ;;  %v2421_v48 = vunpack.c.l.s8.bf16 %v1037_v27  ;;  %v2414_v56 = vunpack.c.h.s8.bf16 %v1030_v37  ;;  %v2406_v11 = vunpack.c.l.s8.bf16 %v1030_v37  ;;  %v1141_v37 = vld [vmem:[#allocation2 + $0x1690] sm:$0xff] }
 0x372   :  { %3600 = vmatprep.subr.bf16.mxu1 %v2462_v51  ;;  %v2286_v51 = vunpack.c.h.s8.bf16 %v966_v32  ;;  %v2517_v30 = vunpack.c.l.s8.bf16 %v1085_v16 }
 0x374   :  { %3560 = vmatpush2.bf16.msra.mxu0 %v2333_v7  ;;  %v1029_v7 = vld [vmem:[#allocation2 + $0x1310] sm:$0xff] }
 0x375   :  { %3601 = vmatpush2.bf16.msra.mxu1 %v2461_v52  ;;  %3561 = vmatprep.subr.bf16.mxu0 %v2326_v6  ;;  %v2285_v52 = vunpack.c.h.s8.bf16 %v965_v61  ;;  %v2413_v6 = vunpack.c.h.s8.bf16 %v1029_v7 }
 0x376   :  { %3602 = vmatprep.subr.bf16.mxu1 %v2454_v38  ;;  %v2278_v38 = vunpack.c.l.s8.bf16 %v966_v32  ;;  %v1077_v32 = vld [vmem:[#allocation2 + $0x1490] sm:$0xff] }
 0x378   :  { %3562 = vmatpush2.bf16.msra.mxu0 %v2325_v2  ;;  %v1150_v2 = vld [vmem:[#allocation2 + $0x16d8] sm:$0xff] }
 0x379   :  { %3603 = vmatpush2.bf16.msra.mxu1 %v2453_v3  ;;  %3563 = vmatprep.subr.bf16.mxu0 %v2318_v17  ;;  %v2277_v3 = vunpack.c.l.s8.bf16 %v965_v61  ;;  %v2405_v17 = vunpack.c.l.s8.bf16 %v1029_v7  ;;  %v2654_v14 = vunpack.c.h.s8.bf16 %v1150_v2  ;;  %v2646_v22 = vunpack.c.l.s8.bf16 %v1150_v2 }
 0x37a   :  { %3604 = vmatprep.subr.bf16.mxu1 %v2446_v43  ;;  %v2526_v43 = vunpack.c.h.s8.bf16 %v1086_v39  ;;  %v2509_v61 = vunpack.c.h.s8.bf16 %v1077_v32  ;;  %v2637_v7 = vunpack.c.h.s8.bf16 %v1141_v37  ;;  %v2501_v2 = vunpack.c.l.s8.bf16 %v1077_v32  ;;  %v1118_v32 = vld [vmem:[#allocation2 + $0x15d8] sm:$0xff] }
 0x37c   :  { %3564 = vmatpush2.bf16.msra.mxu0 %v2317_v18  ;;  %v1149_v18 = vld [vmem:[#allocation2 + $0x16d0] sm:$0xff] }
 0x37d   :  { %3605 = vmatpush2.bf16.msra.mxu1 %v2445_v23  ;;  %3565 = vmatprep.subr.bf16.mxu0 %v2310_v15  ;;  %v2525_v23 = vunpack.c.h.s8.bf16 %v1085_v16  ;;  %v2653_v15 = vunpack.c.h.s8.bf16 %v1149_v18  ;;  %v2645_v27 = vunpack.c.l.s8.bf16 %v1149_v18  ;;  %v1133_v16 = vld [vmem:[#allocation2 + $0x1650] sm:$0xff] }
 0x37e   :  { %3606 = vmatprep.subr.bf16.mxu1 %v2438_v19  ;;  %v2518_v19 = vunpack.c.l.s8.bf16 %v1086_v39  ;;  %v1070_v39 = vld [vmem:[#allocation2 + $0x1458] sm:$0xff] }
 0x380   :  { %3566 = vmatpush2.bf16.msra.mxu0 %v2309_v47  ;;  %v1142_v47 = vld [vmem:[#allocation2 + $0x1698] sm:$0xff] }
 0x381   :  { %3607 = vmatpush2.bf16.msra.mxu1 %v2437_v45  ;;  %3567 = vmatprep.subr.bf16.mxu0 %v2302_v25 }
 0x382   :  { %3608 = vmatprep.subr.bf16.mxu1 %v2430_v28 }
 0x384   :  { %3568 = vmatpush2.bf16.msra.mxu0 %v2301_v31 }
 0x385   :  { %3609 = vmatpush2.bf16.msra.mxu1 %v2429_v33  ;;  %3569 = vmatprep.subr.bf16.mxu0 %v2294_v34  ;;  %v2510_v34 = vunpack.c.h.s8.bf16 %v1078_v24 }
 0x386   :  { %3610 = vmatprep.subr.bf16.mxu1 %v2422_v36  ;;  %v2638_v36 = vunpack.c.h.s8.bf16 %v1142_v47 }
 0x388   :  { %3570 = vmatpush2.bf16.msra.mxu0 %v2293_v42 }
 0x389   :  { %3611 = vmatpush2.bf16.msra.mxu1 %v2421_v48  ;;  %3571 = vmatprep.subr.bf16.mxu0 %v2286_v51 }
 0x38a   :  { %3612 = vmatprep.subr.bf16.mxu1 %v2414_v56 }
 0x38c   :  { %3572 = vmatpush2.bf16.msra.mxu0 %v2285_v52 }
 0x38d   :  { %3613 = vmatpush2.bf16.msra.mxu1 %v2413_v6  ;;  %3573 = vmatprep.subr.bf16.mxu0 %v2278_v38  ;;  %v2502_v38 = vunpack.c.l.s8.bf16 %v1078_v24  ;;  %v1126_v24 = vld [vmem:[#allocation2 + $0x1618] sm:$0xff] }
 0x38e   :  { %3614 = vmatprep.subr.bf16.mxu1 %v2406_v11  ;;  %v2630_v11 = vunpack.c.l.s8.bf16 %v1142_v47 }
 0x390   :  { %3574 = vmatpush2.bf16.msra.mxu0 %v2277_v3  ;;  %v2629_v3 = vunpack.c.l.s8.bf16 %v1141_v37  ;;  %v1182_v37 = vld [vmem:[#allocation2 + $0x17d8] sm:$0xff] }
 0x391   :  { %3615 = vmatpush2.bf16.msra.mxu1 %v2405_v17  ;;  %3625 = vmatprep.subr.bf16.mxu0 %v2526_v43  ;;  %v2494_v17 = vunpack.c.h.s8.bf16 %v1070_v39 }
 0x392   :  { %3666 = vmatprep.subr.bf16.mxu1 %v2654_v14  ;;  %v1069_v14 = vld [vmem:[#allocation2 + $0x1450] sm:$0xff] }
 0x393   :  { %v3331_v45 = vpop.f32.mrf.mxu0  ;;  %3576 = vmatmul.mubr.bf16.vlgmr.msra.gmra.mxu0 %v6892_v35  ;;  %v2493_v18 = vunpack.c.h.s8.bf16 %v1069_v14  ;;  %v2485_v47 = vunpack.c.l.s8.bf16 %v1069_v14 }
 0x394   :  { %v3372_v25 = vpop.f32.mrf.mxu1  ;;  %3617 = vmatmul.mubr.bf16.vlgmr.msra.gmra.mxu1 %v6896_v60  ;;  %v3332_v28 = vadd.f32 %v3331_v45, %v6962_v29  ;;  %3626 = vmatpush1.bf16.msra.mxu0 %v2525_v23  ;;  %v2621_v23 = vunpack.c.h.s8.bf16 %v1133_v16  ;;  %v2613_v45 = vunpack.c.l.s8.bf16 %v1133_v16  ;;  %v1109_v16 = vld [vmem:[#allocation2 + $0x1590] sm:$0xff] }
 0x395   :  { %3667 = vmatpush1.bf16.msra.mxu1 %v2653_v15  ;;  %v3333_v31 = vpop.f32.mrf.mxu0  ;;  %3627 = vmatprep.subr.bf16.mxu0 %v2518_v19  ;;  %v2486_v15 = vunpack.c.l.s8.bf16 %v1070_v39  ;;  %v2710_v39 = vunpack.c.l.s8.bf16 %v1182_v37 }
 0x396   :  { %v3374_v33 = vpop.f32.mrf.mxu1  ;;  %3668 = vmatprep.subr.bf16.mxu1 %v2646_v22  ;;  %v6971_v42 = vadd.f32 %v3372_v25, %v3332_v28  ;;  %v3334_v48 = vadd.f32 %v3333_v31, %v6964_v40  ;;  %3657 = vmatprep.mubr.bf16.mxu0 %v6898_v44  ;;  %v1134_v40 = vld [vmem:[#allocation2 + $0x1658] sm:$0xff]  ;;  %v2606_v28 = vunpack.c.h.s8.bf16 %v1126_v24 }
 0x397   :  { %3698 = vmatprep.mubr.bf16.mxu1 %v6900_v10  ;;  %v3335_v29 = vpop.f32.mrf.mxu0  ;;  %v2622_v43 = vunpack.c.h.s8.bf16 %v1134_v40  ;;  %v2614_v19 = vunpack.c.l.s8.bf16 %v1134_v40  ;;  %v1062_v22 = vld [vmem:[#allocation2 + $0x1418] sm:$0xff] }
 0x398   :  { %v3376_v51 = vpop.f32.mrf.mxu1  ;;  %v6976_v56 = vadd.f32 %v3374_v33, %v3334_v48  ;;  %3628 = vmatpush1.bf16.msra.mxu0 %v2517_v30  ;;  %v2478_v25 = vunpack.c.h.s8.bf16 %v1062_v22  ;;  %v1061_v30 = vld [vmem:[#allocation2 + $0x1410] sm:$0xff]  ;;  %v1110_v40 = vld [vmem:[#allocation2 + $0x1598] sm:$0xff] }
 0x399   :  { %3669 = vmatpush1.bf16.msra.mxu1 %v2645_v27  ;;  %v3336_v52 = vpop.f32.mrf.mxu0  ;;  %3629 = vmatprep.subr.bf16.mxu0 %v2510_v34  ;;  %v1125_v27 = vld [vmem:[#allocation2 + $0x1610] sm:$0xff]  ;;  %v2477_v31 = vunpack.c.h.s8.bf16 %v1061_v30  ;;  %v2470_v34 = vunpack.c.l.s8.bf16 %v1062_v22  ;;  %v2469_v48 = vunpack.c.l.s8.bf16 %v1061_v30  ;;  %v2590_v51 = vunpack.c.h.s8.bf16 %v1118_v32 }
 0x39a   :  { %v3377_v6 = vpop.f32.mrf.mxu1  ;;  %3670 = vmatprep.subr.bf16.mxu1 %v2638_v36  ;;  %v2605_v33 = vunpack.c.h.s8.bf16 %v1125_v27  ;;  %v2598_v36 = vunpack.c.l.s8.bf16 %v1126_v24  ;;  %v2597_v29 = vunpack.c.l.s8.bf16 %v1125_v27  ;;  %v1181_v52 = vld [vmem:[#allocation2 + $0x17d0] sm:$0xff]  ;;  %v1102_v24 = vld [vmem:[#allocation2 + $0x1558] sm:$0xff] }
 0x39b   :  { %v1101_v27 = vld [vmem:[#allocation2 + $0x1550] sm:$0xff] }
 0x39c   :  { %3630 = vmatpush1.bf16.msra.mxu0 %v2509_v61  ;;  %v2718_v61 = vunpack.c.h.s8.bf16 %v1182_v37  ;;  %v1094_v37 = vld [vmem:[#allocation2 + $0x1518] sm:$0xff] }
 0x39d   :  { %3671 = vmatpush1.bf16.msra.mxu1 %v2637_v7  ;;  %3631 = vmatprep.subr.bf16.mxu0 %v2502_v38  ;;  %v1117_v7 = vld [vmem:[#allocation2 + $0x15d0] sm:$0xff]  ;;  %v2717_v38 = vunpack.c.h.s8.bf16 %v1181_v52 }
 0x39e   :  { %3672 = vmatprep.subr.bf16.mxu1 %v2630_v11  ;;  %v2589_v6 = vunpack.c.h.s8.bf16 %v1117_v7  ;;  %v2582_v11 = vunpack.c.l.s8.bf16 %v1118_v32 }
 0x3a0   :  { %3632 = vmatpush1.bf16.msra.mxu0 %v2501_v2  ;;  %v1174_v2 = vld [vmem:[#allocation2 + $0x1798] sm:$0xff] }
 0x3a1   :  { %3673 = vmatpush1.bf16.msra.mxu1 %v2629_v3  ;;  %3633 = vmatprep.subr.bf16.mxu0 %v2494_v17  ;;  %v2581_v3 = vunpack.c.l.s8.bf16 %v1117_v7  ;;  %v2709_v17 = vunpack.c.l.s8.bf16 %v1181_v52  ;;  %v2702_v14 = vunpack.c.h.s8.bf16 %v1174_v2  ;;  %v2694_v22 = vunpack.c.l.s8.bf16 %v1174_v2  ;;  %v1093_v52 = vld [vmem:[#allocation2 + $0x1510] sm:$0xff]  ;;  %v448_v2 = vld [vmem:[#allocation2 + $0xe8] sm:$0xff] }
 0x3a2   :  { %3674 = vmatprep.subr.bf16.mxu1 %v2622_v43  ;;  %v2574_v43 = vunpack.c.h.s8.bf16 %v1110_v40 }
 0x3a4   :  { %3634 = vmatpush1.bf16.msra.mxu0 %v2493_v18  ;;  %v1173_v18 = vld [vmem:[#allocation2 + $0x1790] sm:$0xff] }
 0x3a5   :  { %3675 = vmatpush1.bf16.msra.mxu1 %v2621_v23  ;;  %3635 = vmatprep.subr.bf16.mxu0 %v2486_v15  ;;  %v2573_v23 = vunpack.c.h.s8.bf16 %v1109_v16  ;;  %v2701_v15 = vunpack.c.h.s8.bf16 %v1173_v18 }
 0x3a6   :  { %3676 = vmatprep.subr.bf16.mxu1 %v2614_v19  ;;  %v2566_v19 = vunpack.c.l.s8.bf16 %v1110_v40 }
 0x3a8   :  { %3636 = vmatpush1.bf16.msra.mxu0 %v2485_v47  ;;  %v1166_v47 = vld [vmem:[#allocation2 + $0x1758] sm:$0xff] }
 0x3a9   :  { %3677 = vmatpush1.bf16.msra.mxu1 %v2613_v45  ;;  %3637 = vmatprep.subr.bf16.mxu0 %v2478_v25  ;;  %v2565_v45 = vunpack.c.l.s8.bf16 %v1109_v16  ;;  %v2693_v25 = vunpack.c.l.s8.bf16 %v1173_v18  ;;  %v2686_v30 = vunpack.c.h.s8.bf16 %v1166_v47  ;;  %v2678_v32 = vunpack.c.l.s8.bf16 %v1166_v47  ;;  %v447_v18 = vld [vmem:[#allocation2 + $0xe0] sm:$0xff]  ;;  %v440_v47 = vld [vmem:[#allocation2 + $0xa8] sm:$0xff] }
 0x3aa   :  { %3678 = vmatprep.subr.bf16.mxu1 %v2606_v28  ;;  %v2558_v28 = vunpack.c.h.s8.bf16 %v1102_v24 }
 0x3ac   :  { %3638 = vmatpush1.bf16.msra.mxu0 %v2477_v31  ;;  %v1165_v31 = vld [vmem:[#allocation2 + $0x1750] sm:$0xff] }
 0x3ad   :  { %3679 = vmatpush1.bf16.msra.mxu1 %v2605_v33  ;;  %3639 = vmatprep.subr.bf16.mxu0 %v2470_v34  ;;  %v2557_v33 = vunpack.c.h.s8.bf16 %v1101_v27  ;;  %v2685_v34 = vunpack.c.h.s8.bf16 %v1165_v31 }
 0x3ae   :  { %3680 = vmatprep.subr.bf16.mxu1 %v2598_v36  ;;  %v2550_v36 = vunpack.c.l.s8.bf16 %v1102_v24 }
 0x3b0   :  { %3640 = vmatpush1.bf16.msra.mxu0 %v2469_v48  ;;  %v1158_v48 = vld [vmem:[#allocation2 + $0x1718] sm:$0xff] }
 0x3b1   :  { %3681 = vmatpush1.bf16.msra.mxu1 %v2597_v29  ;;  %3641 = vmatprep.subr.bf16.mxu0 %v2590_v51  ;;  %v2549_v29 = vunpack.c.l.s8.bf16 %v1101_v27  ;;  %v2677_v51 = vunpack.c.l.s8.bf16 %v1165_v31  ;;  %v2670_v7 = vunpack.c.h.s8.bf16 %v1158_v48  ;;  %v2662_v40 = vunpack.c.l.s8.bf16 %v1158_v48  ;;  %v503_v48 = vld [vmem:[#allocation2 + $0x2a0] sm:$0xff] }
 0x3b2   :  { %3682 = vmatprep.subr.bf16.mxu1 %v2718_v61  ;;  %v2542_v61 = vunpack.c.h.s8.bf16 %v1094_v37  ;;  %v1239_v27 = vunpack.c.l.s8.bf16 %v447_v18 }
 0x3b4   :  { %3642 = vmatpush2.bf16.msra.mxu0 %v2589_v6  ;;  %v1157_v6 = vld [vmem:[#allocation2 + $0x1710] sm:$0xff] }
 0x3b5   :  { %3683 = vmatpush2.bf16.msra.mxu1 %v2717_v38  ;;  %3643 = vmatprep.subr.bf16.mxu0 %v2582_v11  ;;  %v2541_v38 = vunpack.c.h.s8.bf16 %v1093_v52  ;;  %v2669_v11 = vunpack.c.h.s8.bf16 %v1157_v6 }
 0x3b6   :  { %3684 = vmatprep.subr.bf16.mxu1 %v2710_v39  ;;  %v2534_v39 = vunpack.c.l.s8.bf16 %v1094_v37  ;;  %v439_v37 = vld [vmem:[#allocation2 + $0xa0] sm:$0xff] }
 0x3b8   :  { %3644 = vmatpush2.bf16.msra.mxu0 %v2581_v3  ;;  %v512_v3 = vld [vmem:[#allocation2 + $0x2e8] sm:$0xff] }
 0x3b9   :  { %3685 = vmatpush2.bf16.msra.mxu1 %v2709_v17  ;;  %3645 = vmatprep.subr.bf16.mxu0 %v2574_v43  ;;  %v2533_v17 = vunpack.c.l.s8.bf16 %v1093_v52  ;;  %v2661_v43 = vunpack.c.l.s8.bf16 %v1157_v6  ;;  %v1376_v16 = vunpack.c.h.s8.bf16 %v512_v3  ;;  %v1368_v24 = vunpack.c.l.s8.bf16 %v512_v3 }
 0x3ba   :  { %3686 = vmatprep.subr.bf16.mxu1 %v2702_v14  ;;  %v1248_v14 = vunpack.c.h.s8.bf16 %v448_v2  ;;  %v1231_v52 = vunpack.c.h.s8.bf16 %v439_v37  ;;  %v1359_v6 = vunpack.c.h.s8.bf16 %v503_v48  ;;  %v1223_v3 = vunpack.c.l.s8.bf16 %v439_v37  ;;  %v480_v37 = vld [vmem:[#allocation2 + $0x1e8] sm:$0xff] }
 0x3bc   :  { %3646 = vmatpush2.bf16.msra.mxu0 %v2573_v23  ;;  %v511_v23 = vld [vmem:[#allocation2 + $0x2e0] sm:$0xff] }
 0x3bd   :  { %3687 = vmatpush2.bf16.msra.mxu1 %v2701_v15  ;;  %3647 = vmatprep.subr.bf16.mxu0 %v2566_v19  ;;  %v1247_v15 = vunpack.c.h.s8.bf16 %v447_v18  ;;  %v1375_v19 = vunpack.c.h.s8.bf16 %v511_v23  ;;  %v1367_v31 = vunpack.c.l.s8.bf16 %v511_v23  ;;  %v495_v18 = vld [vmem:[#allocation2 + $0x260] sm:$0xff] }
 0x3be   :  { %3688 = vmatprep.subr.bf16.mxu1 %v2694_v22  ;;  %v1240_v22 = vunpack.c.l.s8.bf16 %v448_v2  ;;  %v432_v2 = vld [vmem:[#allocation2 + $0x68] sm:$0xff] }
 0x3c0   :  { %3648 = vmatpush2.bf16.msra.mxu0 %v2565_v45  ;;  %v504_v45 = vld [vmem:[#allocation2 + $0x2a8] sm:$0xff] }
 0x3c1   :  { %3689 = vmatpush2.bf16.msra.mxu1 %v2693_v25  ;;  %3649 = vmatprep.subr.bf16.mxu0 %v2558_v28 }
 0x3c2   :  { %3690 = vmatprep.subr.bf16.mxu1 %v2686_v30 }
 0x3c4   :  { %3650 = vmatpush2.bf16.msra.mxu0 %v2557_v33 }
 0x3c5   :  { %3691 = vmatpush2.bf16.msra.mxu1 %v2685_v34  ;;  %3651 = vmatprep.subr.bf16.mxu0 %v2550_v36  ;;  %v1232_v36 = vunpack.c.h.s8.bf16 %v440_v47 }
 0x3c6   :  { %3692 = vmatprep.subr.bf16.mxu1 %v2678_v32  ;;  %v1360_v32 = vunpack.c.h.s8.bf16 %v504_v45 }
 0x3c8   :  { %3652 = vmatpush2.bf16.msra.mxu0 %v2549_v29 }
 0x3c9   :  { %3693 = vmatpush2.bf16.msra.mxu1 %v2677_v51  ;;  %3653 = vmatprep.subr.bf16.mxu0 %v2542_v61 }
 0x3ca   :  { %3694 = vmatprep.subr.bf16.mxu1 %v2670_v7 }
 0x3cc   :  { %3654 = vmatpush2.bf16.msra.mxu0 %v2541_v38 }
 0x3cd   :  { %3695 = vmatpush2.bf16.msra.mxu1 %v2669_v11  ;;  %3655 = vmatprep.subr.bf16.mxu0 %v2534_v39  ;;  %v1224_v39 = vunpack.c.l.s8.bf16 %v440_v47  ;;  %v488_v47 = vld [vmem:[#allocation2 + $0x228] sm:$0xff] }
 0x3ce   :  { %3696 = vmatprep.subr.bf16.mxu1 %v2662_v40  ;;  %v1352_v40 = vunpack.c.l.s8.bf16 %v504_v45 }
 0x3d0   :  { %3656 = vmatpush2.bf16.msra.mxu0 %v2533_v17  ;;  %v1351_v17 = vunpack.c.l.s8.bf16 %v503_v48  ;;  %v544_v48 = vld [vmem:[#allocation2 + $0x3e8] sm:$0xff] }
 0x3d1   :  { %3697 = vmatpush2.bf16.msra.mxu1 %v2661_v43  ;;  %3707 = vmatprep.subr.bf16.mxu0 %v1248_v14  ;;  %v1216_v43 = vunpack.c.h.s8.bf16 %v432_v2 }
 0x3d2   :  { %3748 = vmatprep.subr.bf16.mxu1 %v1376_v16  ;;  %v431_v16 = vld [vmem:[#allocation2 + $0x60] sm:$0xff] }
 0x3d3   :  { %v3413_v25 = vpop.f32.mrf.mxu0  ;;  %3658 = vmatmul.mubr.bf16.vlgmr.msra.gmra.mxu0 %v6914_v49  ;;  %v1215_v23 = vunpack.c.h.s8.bf16 %v431_v16  ;;  %v1207_v45 = vunpack.c.l.s8.bf16 %v431_v16 }
 0x3d4   :  { %v3454_v28 = vpop.f32.mrf.mxu1  ;;  %3699 = vmatmul.mubr.bf16.vlgmr.msra.gmra.mxu1 %v6918_v50  ;;  %v3414_v30 = vadd.f32 %v3413_v25, %v6971_v42  ;;  %3708 = vmatpush1.bf16.msra.mxu0 %v1247_v15  ;;  %v1343_v15 = vunpack.c.h.s8.bf16 %v495_v18  ;;  %v1335_v25 = vunpack.c.l.s8.bf16 %v495_v18  ;;  %v471_v18 = vld [vmem:[#allocation2 + $0x1a0] sm:$0xff] }
 0x3d5   :  { %3749 = vmatpush1.bf16.msra.mxu1 %v1375_v19  ;;  %v3415_v33 = vpop.f32.mrf.mxu0  ;;  %3709 = vmatprep.subr.bf16.mxu0 %v1240_v22  ;;  %v1208_v19 = vunpack.c.l.s8.bf16 %v432_v2  ;;  %v1432_v2 = vunpack.c.l.s8.bf16 %v544_v48 }
 0x3d6   :  { %v3456_v34 = vpop.f32.mrf.mxu1  ;;  %3750 = vmatprep.subr.bf16.mxu1 %v1368_v24  ;;  %v6981_v29 = vadd.f32 %v3454_v28, %v3414_v30  ;;  %v3416_v51 = vadd.f32 %v3415_v33, %v6976_v56  ;;  %3739 = vmatprep.mubr.bf16.mxu0 %v6749_v53  ;;  %v496_v56 = vld [vmem:[#allocation2 + $0x268] sm:$0xff]  ;;  %v1328_v30 = vunpack.c.h.s8.bf16 %v488_v47 }
 0x3d7   :  { %3780 = vmatprep.mubr.bf16.mxu1 %v6754_v55  ;;  %v3417_v42 = vpop.f32.mrf.mxu0  ;;  %v1344_v14 = vunpack.c.h.s8.bf16 %v496_v56  ;;  %v1336_v22 = vunpack.c.l.s8.bf16 %v496_v56  ;;  %v424_v24 = vld [vmem:[#allocation2 + $0x28] sm:$0xff] }
 0x3d8   :  { %v3458_v61 = vpop.f32.mrf.mxu1  ;;  %v6986_v7 = vadd.f32 %v3456_v34, %v3416_v51  ;;  %3710 = vmatpush1.bf16.msra.mxu0 %v1239_v27  ;;  %v1200_v28 = vunpack.c.h.s8.bf16 %v424_v24  ;;  %v423_v27 = vld [vmem:[#allocation2 + $0x20] sm:$0xff]  ;;  %v472_v56 = vld [vmem:[#allocation2 + $0x1a8] sm:$0xff] }
 0x3d9   :  { %3751 = vmatpush1.bf16.msra.mxu1 %v1367_v31  ;;  %v3418_v38 = vpop.f32.mrf.mxu0  ;;  %3711 = vmatprep.subr.bf16.mxu0 %v1232_v36  ;;  %v487_v31 = vld [vmem:[#allocation2 + $0x220] sm:$0xff]  ;;  %v1199_v33 = vunpack.c.h.s8.bf16 %v423_v27  ;;  %v1192_v36 = vunpack.c.l.s8.bf16 %v424_v24  ;;  %v1191_v51 = vunpack.c.l.s8.bf16 %v423_v27  ;;  %v1312_v61 = vunpack.c.h.s8.bf16 %v480_v37 }
 0x3da   :  { %v3459_v11 = vpop.f32.mrf.mxu1  ;;  %3752 = vmatprep.subr.bf16.mxu1 %v1360_v32  ;;  %v1327_v34 = vunpack.c.h.s8.bf16 %v487_v31  ;;  %v1320_v32 = vunpack.c.l.s8.bf16 %v488_v47  ;;  %v1319_v42 = vunpack.c.l.s8.bf16 %v487_v31  ;;  %v543_v38 = vld [vmem:[#allocation2 + $0x3e0] sm:$0xff]  ;;  %v464_v47 = vld [vmem:[#allocation2 + $0x168] sm:$0xff] }
 0x3db   :  { %v463_v31 = vld [vmem:[#allocation2 + $0x160] sm:$0xff] }
 0x3dc   :  { %3712 = vmatpush1.bf16.msra.mxu0 %v1231_v52  ;;  %v1440_v52 = vunpack.c.h.s8.bf16 %v544_v48  ;;  %v456_v48 = vld [vmem:[#allocation2 + $0x128] sm:$0xff] }
 0x3dd   :  { %3753 = vmatpush1.bf16.msra.mxu1 %v1359_v6  ;;  %3713 = vmatprep.subr.bf16.mxu0 %v1224_v39  ;;  %v479_v6 = vld [vmem:[#allocation2 + $0x1e0] sm:$0xff]  ;;  %v1439_v39 = vunpack.c.h.s8.bf16 %v543_v38 }
 0x3de   :  { %3754 = vmatprep.subr.bf16.mxu1 %v1352_v40  ;;  %v1311_v11 = vunpack.c.h.s8.bf16 %v479_v6  ;;  %v1304_v40 = vunpack.c.l.s8.bf16 %v480_v37 }
 0x3e0   :  { %3714 = vmatpush1.bf16.msra.mxu0 %v1223_v3  ;;  %v536_v3 = vld [vmem:[#allocation2 + $0x3a8] sm:$0xff] }
 0x3e1   :  { %3755 = vmatpush1.bf16.msra.mxu1 %v1351_v17  ;;  %3715 = vmatprep.subr.bf16.mxu0 %v1216_v43  ;;  %v1303_v17 = vunpack.c.l.s8.bf16 %v479_v6  ;;  %v1431_v43 = vunpack.c.l.s8.bf16 %v543_v38  ;;  %v1424_v16 = vunpack.c.h.s8.bf16 %v536_v3  ;;  %v1416_v24 = vunpack.c.l.s8.bf16 %v536_v3  ;;  %v455_v38 = vld [vmem:[#allocation2 + $0x120] sm:$0xff]  ;;  %v576_v3 = vld [vmem:[#allocation2 + $0x4e8] sm:$0xff] }
 0x3e2   :  { %3756 = vmatprep.subr.bf16.mxu1 %v1344_v14  ;;  %v1296_v14 = vunpack.c.h.s8.bf16 %v472_v56 }
 0x3e4   :  { %3716 = vmatpush1.bf16.msra.mxu0 %v1215_v23  ;;  %v535_v23 = vld [vmem:[#allocation2 + $0x3a0] sm:$0xff] }
 0x3e5   :  { %3757 = vmatpush1.bf16.msra.mxu1 %v1343_v15  ;;  %3717 = vmatprep.subr.bf16.mxu0 %v1208_v19  ;;  %v1295_v15 = vunpack.c.h.s8.bf16 %v471_v18  ;;  %v1423_v19 = vunpack.c.h.s8.bf16 %v535_v23 }
 0x3e6   :  { %3758 = vmatprep.subr.bf16.mxu1 %v1336_v22  ;;  %v1288_v22 = vunpack.c.l.s8.bf16 %v472_v56 }
 0x3e8   :  { %3718 = vmatpush1.bf16.msra.mxu0 %v1207_v45  ;;  %v528_v45 = vld [vmem:[#allocation2 + $0x368] sm:$0xff] }
 0x3e9   :  { %3759 = vmatpush1.bf16.msra.mxu1 %v1335_v25  ;;  %3719 = vmatprep.subr.bf16.mxu0 %v1200_v28  ;;  %v1287_v25 = vunpack.c.l.s8.bf16 %v471_v18  ;;  %v1415_v28 = vunpack.c.l.s8.bf16 %v535_v23  ;;  %v1408_v27 = vunpack.c.h.s8.bf16 %v528_v45  ;;  %v1400_v37 = vunpack.c.l.s8.bf16 %v528_v45  ;;  %v575_v23 = vld [vmem:[#allocation2 + $0x4e0] sm:$0xff]  ;;  %v568_v45 = vld [vmem:[#allocation2 + $0x4a8] sm:$0xff] }
 0x3ea   :  { %3760 = vmatprep.subr.bf16.mxu1 %v1328_v30  ;;  %v1280_v30 = vunpack.c.h.s8.bf16 %v464_v47 }
 0x3ec   :  { %3720 = vmatpush1.bf16.msra.mxu0 %v1199_v33  ;;  %v527_v33 = vld [vmem:[#allocation2 + $0x360] sm:$0xff] }
 0x3ed   :  { %3761 = vmatpush1.bf16.msra.mxu1 %v1327_v34  ;;  %3721 = vmatprep.subr.bf16.mxu0 %v1192_v36  ;;  %v1279_v34 = vunpack.c.h.s8.bf16 %v463_v31  ;;  %v1407_v36 = vunpack.c.h.s8.bf16 %v527_v33 }
 0x3ee   :  { %3762 = vmatprep.subr.bf16.mxu1 %v1320_v32  ;;  %v1272_v32 = vunpack.c.l.s8.bf16 %v464_v47 }
 0x3f0   :  { %3722 = vmatpush1.bf16.msra.mxu0 %v1191_v51  ;;  %v520_v51 = vld [vmem:[#allocation2 + $0x328] sm:$0xff] }
 0x3f1   :  { %3763 = vmatpush1.bf16.msra.mxu1 %v1319_v42  ;;  %3723 = vmatprep.subr.bf16.mxu0 %v1312_v61  ;;  %v1271_v42 = vunpack.c.l.s8.bf16 %v463_v31  ;;  %v1399_v61 = vunpack.c.l.s8.bf16 %v527_v33  ;;  %v1392_v6 = vunpack.c.h.s8.bf16 %v520_v51  ;;  %v1384_v56 = vunpack.c.l.s8.bf16 %v520_v51  ;;  %v631_v51 = vld [vmem:[#allocation2 + $0x6a0] sm:$0xff] }
 0x3f2   :  { %3764 = vmatprep.subr.bf16.mxu1 %v1440_v52  ;;  %v1264_v52 = vunpack.c.h.s8.bf16 %v456_v48  ;;  %v1495_v31 = vunpack.c.l.s8.bf16 %v575_v23 }
 0x3f4   :  { %3724 = vmatpush2.bf16.msra.mxu0 %v1311_v11  ;;  %v519_v11 = vld [vmem:[#allocation2 + $0x320] sm:$0xff] }
 0x3f5   :  { %3765 = vmatpush2.bf16.msra.mxu1 %v1439_v39  ;;  %3725 = vmatprep.subr.bf16.mxu0 %v1304_v40  ;;  %v1263_v39 = vunpack.c.h.s8.bf16 %v455_v38  ;;  %v1391_v40 = vunpack.c.h.s8.bf16 %v519_v11 }
 0x3f6   :  { %3766 = vmatprep.subr.bf16.mxu1 %v1432_v2  ;;  %v1256_v2 = vunpack.c.l.s8.bf16 %v456_v48  ;;  %v567_v48 = vld [vmem:[#allocation2 + $0x4a0] sm:$0xff] }
 0x3f8   :  { %3726 = vmatpush2.bf16.msra.mxu0 %v1303_v17  ;;  %v640_v17 = vld [vmem:[#allocation2 + $0x6e8] sm:$0xff] }
 0x3f9   :  { %3767 = vmatpush2.bf16.msra.mxu1 %v1431_v43  ;;  %3727 = vmatprep.subr.bf16.mxu0 %v1296_v14  ;;  %v1255_v43 = vunpack.c.l.s8.bf16 %v455_v38  ;;  %v1383_v14 = vunpack.c.l.s8.bf16 %v519_v11  ;;  %v1632_v18 = vunpack.c.h.s8.bf16 %v640_v17  ;;  %v1624_v47 = vunpack.c.l.s8.bf16 %v640_v17 }
 0x3fa   :  { %3768 = vmatprep.subr.bf16.mxu1 %v1424_v16  ;;  %v1504_v16 = vunpack.c.h.s8.bf16 %v576_v3  ;;  %v1487_v38 = vunpack.c.h.s8.bf16 %v567_v48  ;;  %v1615_v11 = vunpack.c.h.s8.bf16 %v631_v51  ;;  %v1479_v17 = vunpack.c.l.s8.bf16 %v567_v48  ;;  %v608_v48 = vld [vmem:[#allocation2 + $0x5e8] sm:$0xff] }
 0x3fc   :  { %3728 = vmatpush2.bf16.msra.mxu0 %v1295_v15  ;;  %v639_v15 = vld [vmem:[#allocation2 + $0x6e0] sm:$0xff] }
 0x3fd   :  { %3769 = vmatpush2.bf16.msra.mxu1 %v1423_v19  ;;  %3729 = vmatprep.subr.bf16.mxu0 %v1288_v22  ;;  %v1503_v19 = vunpack.c.h.s8.bf16 %v575_v23  ;;  %v1631_v22 = vunpack.c.h.s8.bf16 %v639_v15  ;;  %v1623_v33 = vunpack.c.l.s8.bf16 %v639_v15  ;;  %v623_v23 = vld [vmem:[#allocation2 + $0x660] sm:$0xff] }
 0x3fe   :  { %3770 = vmatprep.subr.bf16.mxu1 %v1416_v24  ;;  %v1496_v24 = vunpack.c.l.s8.bf16 %v576_v3  ;;  %v560_v3 = vld [vmem:[#allocation2 + $0x468] sm:$0xff] }
 0x400   :  { %3730 = vmatpush2.bf16.msra.mxu0 %v1287_v25  ;;  %v632_v25 = vld [vmem:[#allocation2 + $0x6a8] sm:$0xff] }
 0x401   :  { %3771 = vmatpush2.bf16.msra.mxu1 %v1415_v28  ;;  %3731 = vmatprep.subr.bf16.mxu0 %v1280_v30 }
 0x402   :  { %3772 = vmatprep.subr.bf16.mxu1 %v1408_v27 }
 0x404   :  { %3732 = vmatpush2.bf16.msra.mxu0 %v1279_v34 }
 0x405   :  { %3773 = vmatpush2.bf16.msra.mxu1 %v1407_v36  ;;  %3733 = vmatprep.subr.bf16.mxu0 %v1272_v32  ;;  %v1488_v32 = vunpack.c.h.s8.bf16 %v568_v45 }
 0x406   :  { %3774 = vmatprep.subr.bf16.mxu1 %v1400_v37  ;;  %v1616_v37 = vunpack.c.h.s8.bf16 %v632_v25 }
 0x408   :  { %3734 = vmatpush2.bf16.msra.mxu0 %v1271_v42 }
 0x409   :  { %3775 = vmatpush2.bf16.msra.mxu1 %v1399_v61  ;;  %3735 = vmatprep.subr.bf16.mxu0 %v1264_v52 }
 0x40a   :  { %3776 = vmatprep.subr.bf16.mxu1 %v1392_v6 }
 0x40c   :  { %3736 = vmatpush2.bf16.msra.mxu0 %v1263_v39 }
 0x40d   :  { %3777 = vmatpush2.bf16.msra.mxu1 %v1391_v40  ;;  %3737 = vmatprep.subr.bf16.mxu0 %v1256_v2  ;;  %v1480_v2 = vunpack.c.l.s8.bf16 %v568_v45  ;;  %v616_v45 = vld [vmem:[#allocation2 + $0x628] sm:$0xff] }
 0x40e   :  { %3778 = vmatprep.subr.bf16.mxu1 %v1384_v56  ;;  %v1608_v56 = vunpack.c.l.s8.bf16 %v632_v25 }
 0x410   :  { %3738 = vmatpush2.bf16.msra.mxu0 %v1255_v43  ;;  %v1607_v43 = vunpack.c.l.s8.bf16 %v631_v51  ;;  %v672_v51 = vld [vmem:[#allocation2 + $0x7e8] sm:$0xff] }
 0x411   :  { %3779 = vmatpush2.bf16.msra.mxu1 %v1383_v14  ;;  %3789 = vmatprep.subr.bf16.mxu0 %v1504_v16  ;;  %v1472_v14 = vunpack.c.h.s8.bf16 %v560_v3 }
 0x412   :  { %3830 = vmatprep.subr.bf16.mxu1 %v1632_v18  ;;  %v559_v18 = vld [vmem:[#allocation2 + $0x460] sm:$0xff] }
 0x413   :  { %v3495_v28 = vpop.f32.mrf.mxu0  ;;  %3740 = vmatmul.mubr.bf16.vlgmr.msra.gmra.mxu0 %v6772_v0  ;;  %v1471_v15 = vunpack.c.h.s8.bf16 %v559_v18  ;;  %v1463_v25 = vunpack.c.l.s8.bf16 %v559_v18 }
 0x414   :  { %v3536_v30 = vpop.f32.mrf.mxu1  ;;  %3781 = vmatmul.mubr.bf16.vlgmr.msra.gmra.mxu1 %v6776_v1  ;;  %v3496_v27 = vadd.f32 %v3495_v28, %v6981_v29  ;;  %3790 = vmatpush1.bf16.msra.mxu0 %v1503_v19  ;;  %v1599_v19 = vunpack.c.h.s8.bf16 %v623_v23  ;;  %v1591_v28 = vunpack.c.l.s8.bf16 %v623_v23  ;;  %v599_v23 = vld [vmem:[#allocation2 + $0x5a0] sm:$0xff] }
 0x415   :  { %3831 = vmatpush1.bf16.msra.mxu1 %v1631_v22  ;;  %v3497_v34 = vpop.f32.mrf.mxu0  ;;  %3791 = vmatprep.subr.bf16.mxu0 %v1496_v24  ;;  %v1464_v22 = vunpack.c.l.s8.bf16 %v560_v3  ;;  %v1688_v3 = vunpack.c.l.s8.bf16 %v672_v51 }
 0x416   :  { %v3538_v36 = vpop.f32.mrf.mxu1  ;;  %3832 = vmatprep.subr.bf16.mxu1 %v1624_v47  ;;  %v6991_v42 = vadd.f32 %v3536_v30, %v3496_v27  ;;  %v3498_v61 = vadd.f32 %v3497_v34, %v6986_v7  ;;  %3821 = vmatprep.mubr.bf16.mxu0 %v6778_v8  ;;  %v624_v7 = vld [vmem:[#allocation2 + $0x668] sm:$0xff]  ;;  %v1584_v27 = vunpack.c.h.s8.bf16 %v616_v45 }
 0x417   :  { %3862 = vmatprep.mubr.bf16.mxu1 %v6780_v9  ;;  %v3499_v29 = vpop.f32.mrf.mxu0  ;;  %v1600_v16 = vunpack.c.h.s8.bf16 %v624_v7  ;;  %v1592_v24 = vunpack.c.l.s8.bf16 %v624_v7  ;;  %v552_v47 = vld [vmem:[#allocation2 + $0x428] sm:$0xff] }
 0x418   :  { %v3540_v52 = vpop.f32.mrf.mxu1  ;;  %v6996_v6 = vadd.f32 %v3538_v36, %v3498_v61  ;;  %3792 = vmatpush1.bf16.msra.mxu0 %v1495_v31  ;;  %v1456_v30 = vunpack.c.h.s8.bf16 %v552_v47  ;;  %v551_v31 = vld [vmem:[#allocation2 + $0x420] sm:$0xff]  ;;  %v600_v7 = vld [vmem:[#allocation2 + $0x5a8] sm:$0xff] }
 0x419   :  { %3833 = vmatpush1.bf16.msra.mxu1 %v1623_v33  ;;  %v3500_v39 = vpop.f32.mrf.mxu0  ;;  %3793 = vmatprep.subr.bf16.mxu0 %v1488_v32  ;;  %v615_v33 = vld [vmem:[#allocation2 + $0x620] sm:$0xff]  ;;  %v1455_v34 = vunpack.c.h.s8.bf16 %v551_v31  ;;  %v1448_v32 = vunpack.c.l.s8.bf16 %v552_v47  ;;  %v1447_v61 = vunpack.c.l.s8.bf16 %v551_v31  ;;  %v1568_v52 = vunpack.c.h.s8.bf16 %v608_v48 }
 0x41a   :  { %v3541_v40 = vpop.f32.mrf.mxu1  ;;  %3834 = vmatprep.subr.bf16.mxu1 %v1616_v37  ;;  %v1583_v36 = vunpack.c.h.s8.bf16 %v615_v33  ;;  %v1576_v37 = vunpack.c.l.s8.bf16 %v616_v45  ;;  %v1575_v29 = vunpack.c.l.s8.bf16 %v615_v33  ;;  %v671_v39 = vld [vmem:[#allocation2 + $0x7e0] sm:$0xff]  ;;  %v592_v45 = vld [vmem:[#allocation2 + $0x568] sm:$0xff] }
 0x41b   :  { %v591_v33 = vld [vmem:[#allocation2 + $0x560] sm:$0xff] }
 0x41c   :  { %3794 = vmatpush1.bf16.msra.mxu0 %v1487_v38  ;;  %v1696_v38 = vunpack.c.h.s8.bf16 %v672_v51  ;;  %v584_v51 = vld [vmem:[#allocation2 + $0x528] sm:$0xff] }
 0x41d   :  { %3835 = vmatpush1.bf16.msra.mxu1 %v1615_v11  ;;  %3795 = vmatprep.subr.bf16.mxu0 %v1480_v2  ;;  %v607_v11 = vld [vmem:[#allocation2 + $0x5e0] sm:$0xff]  ;;  %v1695_v2 = vunpack.c.h.s8.bf16 %v671_v39 }
 0x41e   :  { %3836 = vmatprep.subr.bf16.mxu1 %v1608_v56  ;;  %v1567_v40 = vunpack.c.h.s8.bf16 %v607_v11  ;;  %v1560_v56 = vunpack.c.l.s8.bf16 %v608_v48 }
 0x420   :  { %3796 = vmatpush1.bf16.msra.mxu0 %v1479_v17  ;;  %v664_v17 = vld [vmem:[#allocation2 + $0x7a8] sm:$0xff] }
 0x421   :  { %3837 = vmatpush1.bf16.msra.mxu1 %v1607_v43  ;;  %3797 = vmatprep.subr.bf16.mxu0 %v1472_v14  ;;  %v1559_v43 = vunpack.c.l.s8.bf16 %v607_v11  ;;  %v1687_v14 = vunpack.c.l.s8.bf16 %v671_v39  ;;  %v1680_v18 = vunpack.c.h.s8.bf16 %v664_v17  ;;  %v1672_v47 = vunpack.c.l.s8.bf16 %v664_v17  ;;  %v583_v39 = vld [vmem:[#allocation2 + $0x520] sm:$0xff]  ;;  %v704_v17 = vld [vmem:[#allocation2 + $0x8e8] sm:$0xff] }
 0x422   :  { %3838 = vmatprep.subr.bf16.mxu1 %v1600_v16  ;;  %v1552_v16 = vunpack.c.h.s8.bf16 %v600_v7 }
 0x424   :  { %3798 = vmatpush1.bf16.msra.mxu0 %v1471_v15  ;;  %v663_v15 = vld [vmem:[#allocation2 + $0x7a0] sm:$0xff] }
 0x425   :  { %3839 = vmatpush1.bf16.msra.mxu1 %v1599_v19  ;;  %3799 = vmatprep.subr.bf16.mxu0 %v1464_v22  ;;  %v1551_v19 = vunpack.c.h.s8.bf16 %v599_v23  ;;  %v1679_v22 = vunpack.c.h.s8.bf16 %v663_v15 }
 0x426   :  { %3840 = vmatprep.subr.bf16.mxu1 %v1592_v24  ;;  %v1544_v24 = vunpack.c.l.s8.bf16 %v600_v7 }
 0x428   :  { %3800 = vmatpush1.bf16.msra.mxu0 %v1463_v25  ;;  %v656_v25 = vld [vmem:[#allocation2 + $0x768] sm:$0xff] }
 0x429   :  { %3841 = vmatpush1.bf16.msra.mxu1 %v1591_v28  ;;  %3801 = vmatprep.subr.bf16.mxu0 %v1456_v30  ;;  %v1543_v28 = vunpack.c.l.s8.bf16 %v599_v23  ;;  %v1671_v30 = vunpack.c.l.s8.bf16 %v663_v15  ;;  %v1664_v31 = vunpack.c.h.s8.bf16 %v656_v25  ;;  %v1656_v48 = vunpack.c.l.s8.bf16 %v656_v25  ;;  %v703_v15 = vld [vmem:[#allocation2 + $0x8e0] sm:$0xff]  ;;  %v696_v25 = vld [vmem:[#allocation2 + $0x8a8] sm:$0xff] }
 0x42a   :  { %3842 = vmatprep.subr.bf16.mxu1 %v1584_v27  ;;  %v1536_v27 = vunpack.c.h.s8.bf16 %v592_v45 }
 0x42c   :  { %3802 = vmatpush1.bf16.msra.mxu0 %v1455_v34  ;;  %v655_v34 = vld [vmem:[#allocation2 + $0x760] sm:$0xff] }
 0x42d   :  { %3843 = vmatpush1.bf16.msra.mxu1 %v1583_v36  ;;  %3803 = vmatprep.subr.bf16.mxu0 %v1448_v32  ;;  %v1535_v36 = vunpack.c.h.s8.bf16 %v591_v33  ;;  %v1663_v32 = vunpack.c.h.s8.bf16 %v655_v34 }
 0x42e   :  { %3844 = vmatprep.subr.bf16.mxu1 %v1576_v37  ;;  %v1528_v37 = vunpack.c.l.s8.bf16 %v592_v45 }
 0x430   :  { %3804 = vmatpush1.bf16.msra.mxu0 %v1447_v61  ;;  %v648_v61 = vld [vmem:[#allocation2 + $0x728] sm:$0xff] }
 0x431   :  { %3845 = vmatpush1.bf16.msra.mxu1 %v1575_v29  ;;  %3805 = vmatprep.subr.bf16.mxu0 %v1568_v52  ;;  %v1527_v29 = vunpack.c.l.s8.bf16 %v591_v33  ;;  %v1655_v52 = vunpack.c.l.s8.bf16 %v655_v34  ;;  %v1648_v11 = vunpack.c.h.s8.bf16 %v648_v61  ;;  %v1640_v7 = vunpack.c.l.s8.bf16 %v648_v61  ;;  %v759_v61 = vld [vmem:[#allocation2 + $0xaa0] sm:$0xff] }
 0x432   :  { %3846 = vmatprep.subr.bf16.mxu1 %v1696_v38  ;;  %v1520_v38 = vunpack.c.h.s8.bf16 %v584_v51  ;;  %v1751_v33 = vunpack.c.l.s8.bf16 %v703_v15 }
 0x434   :  { %3806 = vmatpush2.bf16.msra.mxu0 %v1567_v40  ;;  %v647_v40 = vld [vmem:[#allocation2 + $0x720] sm:$0xff] }
 0x435   :  { %3847 = vmatpush2.bf16.msra.mxu1 %v1695_v2  ;;  %3807 = vmatprep.subr.bf16.mxu0 %v1560_v56  ;;  %v1519_v2 = vunpack.c.h.s8.bf16 %v583_v39  ;;  %v1647_v56 = vunpack.c.h.s8.bf16 %v647_v40 }
 0x436   :  { %3848 = vmatprep.subr.bf16.mxu1 %v1688_v3  ;;  %v1512_v3 = vunpack.c.l.s8.bf16 %v584_v51  ;;  %v695_v51 = vld [vmem:[#allocation2 + $0x8a0] sm:$0xff] }
 0x438   :  { %3808 = vmatpush2.bf16.msra.mxu0 %v1559_v43  ;;  %v768_v43 = vld [vmem:[#allocation2 + $0xae8] sm:$0xff] }
 0x439   :  { %3849 = vmatpush2.bf16.msra.mxu1 %v1687_v14  ;;  %3809 = vmatprep.subr.bf16.mxu0 %v1552_v16  ;;  %v1511_v14 = vunpack.c.l.s8.bf16 %v583_v39  ;;  %v1639_v16 = vunpack.c.l.s8.bf16 %v647_v40  ;;  %v1888_v23 = vunpack.c.h.s8.bf16 %v768_v43  ;;  %v1880_v45 = vunpack.c.l.s8.bf16 %v768_v43 }
 0x43a   :  { %3850 = vmatprep.subr.bf16.mxu1 %v1680_v18  ;;  %v1760_v18 = vunpack.c.h.s8.bf16 %v704_v17  ;;  %v1743_v39 = vunpack.c.h.s8.bf16 %v695_v51  ;;  %v1871_v40 = vunpack.c.h.s8.bf16 %v759_v61  ;;  %v1735_v43 = vunpack.c.l.s8.bf16 %v695_v51  ;;  %v736_v51 = vld [vmem:[#allocation2 + $0x9e8] sm:$0xff] }
 0x43c   :  { %3810 = vmatpush2.bf16.msra.mxu0 %v1551_v19  ;;  %v767_v19 = vld [vmem:[#allocation2 + $0xae0] sm:$0xff] }
 0x43d   :  { %3851 = vmatpush2.bf16.msra.mxu1 %v1679_v22  ;;  %3811 = vmatprep.subr.bf16.mxu0 %v1544_v24  ;;  %v1759_v22 = vunpack.c.h.s8.bf16 %v703_v15  ;;  %v1887_v24 = vunpack.c.h.s8.bf16 %v767_v19  ;;  %v1879_v34 = vunpack.c.l.s8.bf16 %v767_v19  ;;  %v751_v15 = vld [vmem:[#allocation2 + $0xa60] sm:$0xff] }
 0x43e   :  { %3852 = vmatprep.subr.bf16.mxu1 %v1672_v47  ;;  %v1752_v47 = vunpack.c.l.s8.bf16 %v704_v17  ;;  %v688_v17 = vld [vmem:[#allocation2 + $0x868] sm:$0xff] }
 0x440   :  { %3812 = vmatpush2.bf16.msra.mxu0 %v1543_v28  ;;  %v760_v28 = vld [vmem:[#allocation2 + $0xaa8] sm:$0xff] }
 0x441   :  { %3853 = vmatpush2.bf16.msra.mxu1 %v1671_v30  ;;  %3813 = vmatprep.subr.bf16.mxu0 %v1536_v27 }
 0x442   :  { %3854 = vmatprep.subr.bf16.mxu1 %v1664_v31 }
 0x444   :  { %3814 = vmatpush2.bf16.msra.mxu0 %v1535_v36 }
 0x445   :  { %3855 = vmatpush2.bf16.msra.mxu1 %v1663_v32  ;;  %3815 = vmatprep.subr.bf16.mxu0 %v1528_v37  ;;  %v1744_v37 = vunpack.c.h.s8.bf16 %v696_v25 }
 0x446   :  { %3856 = vmatprep.subr.bf16.mxu1 %v1656_v48  ;;  %v1872_v48 = vunpack.c.h.s8.bf16 %v760_v28 }
 0x448   :  { %3816 = vmatpush2.bf16.msra.mxu0 %v1527_v29 }
 0x449   :  { %3857 = vmatpush2.bf16.msra.mxu1 %v1655_v52  ;;  %3817 = vmatprep.subr.bf16.mxu0 %v1520_v38 }
 0x44a   :  { %3858 = vmatprep.subr.bf16.mxu1 %v1648_v11 }
 0x44c   :  { %3818 = vmatpush2.bf16.msra.mxu0 %v1519_v2 }
 0x44d   :  { %3859 = vmatpush2.bf16.msra.mxu1 %v1647_v56  ;;  %3819 = vmatprep.subr.bf16.mxu0 %v1512_v3  ;;  %v1736_v3 = vunpack.c.l.s8.bf16 %v696_v25  ;;  %v744_v25 = vld [vmem:[#allocation2 + $0xa28] sm:$0xff] }
 0x44e   :  { %3860 = vmatprep.subr.bf16.mxu1 %v1640_v7  ;;  %v1864_v7 = vunpack.c.l.s8.bf16 %v760_v28 }
 0x450   :  { %3820 = vmatpush2.bf16.msra.mxu0 %v1511_v14  ;;  %v1863_v14 = vunpack.c.l.s8.bf16 %v759_v61  ;;  %v800_v61 = vld [vmem:[#allocation2 + $0xbe8] sm:$0xff] }
 0x451   :  { %3861 = vmatpush2.bf16.msra.mxu1 %v1639_v16  ;;  %3871 = vmatprep.subr.bf16.mxu0 %v1760_v18  ;;  %v1728_v16 = vunpack.c.h.s8.bf16 %v688_v17 }
 0x452   :  { %3912 = vmatprep.subr.bf16.mxu1 %v1888_v23  ;;  %v687_v23 = vld [vmem:[#allocation2 + $0x860] sm:$0xff] }
 0x453   :  { %v3577_v30 = vpop.f32.mrf.mxu0  ;;  %3822 = vmatmul.mubr.bf16.vlgmr.msra.gmra.mxu0 %v6801_v58  ;;  %v1727_v19 = vunpack.c.h.s8.bf16 %v687_v23  ;;  %v1719_v28 = vunpack.c.l.s8.bf16 %v687_v23 }
 0x454   :  { %v3618_v27 = vpop.f32.mrf.mxu1  ;;  %3863 = vmatmul.mubr.bf16.vlgmr.msra.gmra.mxu1 %v6805_v59  ;;  %v3578_v31 = vadd.f32 %v3577_v30, %v6991_v42  ;;  %3872 = vmatpush1.bf16.msra.mxu0 %v1759_v22  ;;  %v1855_v22 = vunpack.c.h.s8.bf16 %v751_v15  ;;  %v1847_v30 = vunpack.c.l.s8.bf16 %v751_v15  ;;  %v727_v15 = vld [vmem:[#allocation2 + $0x9a0] sm:$0xff] }
 0x455   :  { %3913 = vmatpush1.bf16.msra.mxu1 %v1887_v24  ;;  %v3579_v36 = vpop.f32.mrf.mxu0  ;;  %3873 = vmatprep.subr.bf16.mxu0 %v1752_v47  ;;  %v1720_v24 = vunpack.c.l.s8.bf16 %v688_v17  ;;  %v1944_v17 = vunpack.c.l.s8.bf16 %v800_v61 }
 0x456   :  { %v3620_v32 = vpop.f32.mrf.mxu1  ;;  %3914 = vmatprep.subr.bf16.mxu1 %v1880_v45  ;;  %v7001_v29 = vadd.f32 %v3618_v27, %v3578_v31  ;;  %v3580_v52 = vadd.f32 %v3579_v36, %v6996_v6  ;;  %3903 = vmatprep.mubr.bf16.mxu0 %v6807_v4  ;;  %v752_v6 = vld [vmem:[#allocation2 + $0xa68] sm:$0xff]  ;;  %v1840_v31 = vunpack.c.h.s8.bf16 %v744_v25 }
 0x457   :  { %3944 = vmatprep.mubr.bf16.mxu1 %v6809_v5  ;;  %v3581_v42 = vpop.f32.mrf.mxu0  ;;  %v1856_v18 = vunpack.c.h.s8.bf16 %v752_v6  ;;  %v1848_v47 = vunpack.c.l.s8.bf16 %v752_v6  ;;  %v680_v45 = vld [vmem:[#allocation2 + $0x828] sm:$0xff] }
 0x458   :  { %v3622_v38 = vpop.f32.mrf.mxu1  ;;  %v7006_v11 = vadd.f32 %v3620_v32, %v3580_v52  ;;  %3874 = vmatpush1.bf16.msra.mxu0 %v1751_v33  ;;  %v1712_v27 = vunpack.c.h.s8.bf16 %v680_v45  ;;  %v679_v33 = vld [vmem:[#allocation2 + $0x820] sm:$0xff]  ;;  %v728_v6 = vld [vmem:[#allocation2 + $0x9a8] sm:$0xff] }
 0x459   :  { %3915 = vmatpush1.bf16.msra.mxu1 %v1879_v34  ;;  %v3582_v2 = vpop.f32.mrf.mxu0  ;;  %3875 = vmatprep.subr.bf16.mxu0 %v1744_v37  ;;  %v743_v34 = vld [vmem:[#allocation2 + $0xa20] sm:$0xff]  ;;  %v1711_v36 = vunpack.c.h.s8.bf16 %v679_v33  ;;  %v1704_v37 = vunpack.c.l.s8.bf16 %v680_v45  ;;  %v1703_v52 = vunpack.c.l.s8.bf16 %v679_v33  ;;  %v1824_v38 = vunpack.c.h.s8.bf16 %v736_v51 }
 0x45a   :  { %v3623_v56 = vpop.f32.mrf.mxu1  ;;  %3916 = vmatprep.subr.bf16.mxu1 %v1872_v48  ;;  %v1839_v32 = vunpack.c.h.s8.bf16 %v743_v34  ;;  %v1832_v48 = vunpack.c.l.s8.bf16 %v744_v25  ;;  %v1831_v42 = vunpack.c.l.s8.bf16 %v743_v34  ;;  %v799_v2 = vld [vmem:[#allocation2 + $0xbe0] sm:$0xff]  ;;  %v720_v25 = vld [vmem:[#allocation2 + $0x968] sm:$0xff] }
 0x45b   :  { %v719_v34 = vld [vmem:[#allocation2 + $0x960] sm:$0xff] }
 0x45c   :  { %3876 = vmatpush1.bf16.msra.mxu0 %v1743_v39  ;;  %v1952_v39 = vunpack.c.h.s8.bf16 %v800_v61  ;;  %v712_v61 = vld [vmem:[#allocation2 + $0x928] sm:$0xff] }
 0x45d   :  { %3917 = vmatpush1.bf16.msra.mxu1 %v1871_v40  ;;  %3877 = vmatprep.subr.bf16.mxu0 %v1736_v3  ;;  %v735_v40 = vld [vmem:[#allocation2 + $0x9e0] sm:$0xff]  ;;  %v1951_v3 = vunpack.c.h.s8.bf16 %v799_v2 }
 0x45e   :  { %3918 = vmatprep.subr.bf16.mxu1 %v1864_v7  ;;  %v1823_v56 = vunpack.c.h.s8.bf16 %v735_v40  ;;  %v1816_v7 = vunpack.c.l.s8.bf16 %v736_v51 }
 0x460   :  { %3878 = vmatpush1.bf16.msra.mxu0 %v1735_v43  ;;  %v792_v43 = vld [vmem:[#allocation2 + $0xba8] sm:$0xff] }
 0x461   :  { %3919 = vmatpush1.bf16.msra.mxu1 %v1863_v14  ;;  %3879 = vmatprep.subr.bf16.mxu0 %v1728_v16  ;;  %v1815_v14 = vunpack.c.l.s8.bf16 %v735_v40  ;;  %v1943_v16 = vunpack.c.l.s8.bf16 %v799_v2  ;;  %v1936_v23 = vunpack.c.h.s8.bf16 %v792_v43  ;;  %v1928_v45 = vunpack.c.l.s8.bf16 %v792_v43  ;;  %v711_v2 = vld [vmem:[#allocation2 + $0x920] sm:$0xff]  ;;  %v832_v43 = vld [vmem:[#allocation2 + $0xce8] sm:$0xff] }
 0x462   :  { %3920 = vmatprep.subr.bf16.mxu1 %v1856_v18  ;;  %v1808_v18 = vunpack.c.h.s8.bf16 %v728_v6 }
 0x464   :  { %3880 = vmatpush1.bf16.msra.mxu0 %v1727_v19  ;;  %v791_v19 = vld [vmem:[#allocation2 + $0xba0] sm:$0xff] }
 0x465   :  { %3921 = vmatpush1.bf16.msra.mxu1 %v1855_v22  ;;  %3881 = vmatprep.subr.bf16.mxu0 %v1720_v24  ;;  %v1807_v22 = vunpack.c.h.s8.bf16 %v727_v15  ;;  %v1935_v24 = vunpack.c.h.s8.bf16 %v791_v19 }
 0x466   :  { %3922 = vmatprep.subr.bf16.mxu1 %v1848_v47  ;;  %v1800_v47 = vunpack.c.l.s8.bf16 %v728_v6 }
 0x468   :  { %3882 = vmatpush1.bf16.msra.mxu0 %v1719_v28  ;;  %v784_v28 = vld [vmem:[#allocation2 + $0xb68] sm:$0xff] }
 0x469   :  { %3923 = vmatpush1.bf16.msra.mxu1 %v1847_v30  ;;  %3883 = vmatprep.subr.bf16.mxu0 %v1712_v27  ;;  %v1799_v30 = vunpack.c.l.s8.bf16 %v727_v15  ;;  %v1927_v27 = vunpack.c.l.s8.bf16 %v791_v19  ;;  %v1920_v33 = vunpack.c.h.s8.bf16 %v784_v28  ;;  %v1912_v51 = vunpack.c.l.s8.bf16 %v784_v28  ;;  %v831_v19 = vld [vmem:[#allocation2 + $0xce0] sm:$0xff]  ;;  %v824_v28 = vld [vmem:[#allocation2 + $0xca8] sm:$0xff] }
 0x46a   :  { %3924 = vmatprep.subr.bf16.mxu1 %v1840_v31  ;;  %v1792_v31 = vunpack.c.h.s8.bf16 %v720_v25 }
 0x46c   :  { %3884 = vmatpush1.bf16.msra.mxu0 %v1711_v36  ;;  %v783_v36 = vld [vmem:[#allocation2 + $0xb60] sm:$0xff] }
 0x46d   :  { %3925 = vmatpush1.bf16.msra.mxu1 %v1839_v32  ;;  %3885 = vmatprep.subr.bf16.mxu0 %v1704_v37  ;;  %v1791_v32 = vunpack.c.h.s8.bf16 %v719_v34  ;;  %v1919_v37 = vunpack.c.h.s8.bf16 %v783_v36 }
 0x46e   :  { %3926 = vmatprep.subr.bf16.mxu1 %v1832_v48  ;;  %v1784_v48 = vunpack.c.l.s8.bf16 %v720_v25 }
 0x470   :  { %3886 = vmatpush1.bf16.msra.mxu0 %v1703_v52  ;;  %v776_v52 = vld [vmem:[#allocation2 + $0xb28] sm:$0xff] }
 0x471   :  { %3927 = vmatpush1.bf16.msra.mxu1 %v1831_v42  ;;  %3887 = vmatprep.subr.bf16.mxu0 %v1824_v38  ;;  %v1783_v42 = vunpack.c.l.s8.bf16 %v719_v34  ;;  %v1911_v38 = vunpack.c.l.s8.bf16 %v783_v36  ;;  %v1904_v40 = vunpack.c.h.s8.bf16 %v776_v52  ;;  %v1896_v6 = vunpack.c.l.s8.bf16 %v776_v52  ;;  %v887_v52 = vld [vmem:[#allocation2 + $0xea0] sm:$0xff] }
 0x472   :  { %3928 = vmatprep.subr.bf16.mxu1 %v1952_v39  ;;  %v1776_v39 = vunpack.c.h.s8.bf16 %v712_v61  ;;  %v2007_v34 = vunpack.c.l.s8.bf16 %v831_v19 }
 0x474   :  { %3888 = vmatpush2.bf16.msra.mxu0 %v1823_v56  ;;  %v775_v56 = vld [vmem:[#allocation2 + $0xb20] sm:$0xff] }
 0x475   :  { %3929 = vmatpush2.bf16.msra.mxu1 %v1951_v3  ;;  %3889 = vmatprep.subr.bf16.mxu0 %v1816_v7  ;;  %v1775_v3 = vunpack.c.h.s8.bf16 %v711_v2  ;;  %v1903_v7 = vunpack.c.h.s8.bf16 %v775_v56 }
 0x476   :  { %3930 = vmatprep.subr.bf16.mxu1 %v1944_v17  ;;  %v1768_v17 = vunpack.c.l.s8.bf16 %v712_v61  ;;  %v823_v61 = vld [vmem:[#allocation2 + $0xca0] sm:$0xff] }
 0x478   :  { %3890 = vmatpush2.bf16.msra.mxu0 %v1815_v14  ;;  %v896_v14 = vld [vmem:[#allocation2 + $0xee8] sm:$0xff] }
 0x479   :  { %3931 = vmatpush2.bf16.msra.mxu1 %v1943_v16  ;;  %3891 = vmatprep.subr.bf16.mxu0 %v1808_v18  ;;  %v1767_v16 = vunpack.c.l.s8.bf16 %v711_v2  ;;  %v1895_v18 = vunpack.c.l.s8.bf16 %v775_v56  ;;  %v2144_v15 = vunpack.c.h.s8.bf16 %v896_v14  ;;  %v2136_v25 = vunpack.c.l.s8.bf16 %v896_v14 }
 0x47a   :  { %3932 = vmatprep.subr.bf16.mxu1 %v1936_v23  ;;  %v2016_v23 = vunpack.c.h.s8.bf16 %v832_v43  ;;  %v1999_v2 = vunpack.c.h.s8.bf16 %v823_v61  ;;  %v2127_v56 = vunpack.c.h.s8.bf16 %v887_v52  ;;  %v1991_v14 = vunpack.c.l.s8.bf16 %v823_v61  ;;  %v864_v61 = vld [vmem:[#allocation2 + $0xde8] sm:$0xff] }
 0x47c   :  { %3892 = vmatpush2.bf16.msra.mxu0 %v1807_v22  ;;  %v895_v22 = vld [vmem:[#allocation2 + $0xee0] sm:$0xff] }
 0x47d   :  { %3933 = vmatpush2.bf16.msra.mxu1 %v1935_v24  ;;  %3893 = vmatprep.subr.bf16.mxu0 %v1800_v47  ;;  %v2015_v24 = vunpack.c.h.s8.bf16 %v831_v19  ;;  %v2143_v47 = vunpack.c.h.s8.bf16 %v895_v22  ;;  %v2135_v36 = vunpack.c.l.s8.bf16 %v895_v22  ;;  %v879_v19 = vld [vmem:[#allocation2 + $0xe60] sm:$0xff] }
 0x47e   :  { %3934 = vmatprep.subr.bf16.mxu1 %v1928_v45  ;;  %v2008_v45 = vunpack.c.l.s8.bf16 %v832_v43  ;;  %v816_v43 = vld [vmem:[#allocation2 + $0xc68] sm:$0xff] }
 0x480   :  { %3894 = vmatpush2.bf16.msra.mxu0 %v1799_v30  ;;  %v888_v30 = vld [vmem:[#allocation2 + $0xea8] sm:$0xff] }
 0x481   :  { %3935 = vmatpush2.bf16.msra.mxu1 %v1927_v27  ;;  %3895 = vmatprep.subr.bf16.mxu0 %v1792_v31 }
 0x482   :  { %3936 = vmatprep.subr.bf16.mxu1 %v1920_v33 }
 0x484   :  { %3896 = vmatpush2.bf16.msra.mxu0 %v1791_v32 }
 0x485   :  { %3937 = vmatpush2.bf16.msra.mxu1 %v1919_v37  ;;  %3897 = vmatprep.subr.bf16.mxu0 %v1784_v48  ;;  %v2000_v48 = vunpack.c.h.s8.bf16 %v824_v28 }
 0x486   :  { %3938 = vmatprep.subr.bf16.mxu1 %v1912_v51  ;;  %v2128_v51 = vunpack.c.h.s8.bf16 %v888_v30 }
 0x488   :  { %3898 = vmatpush2.bf16.msra.mxu0 %v1783_v42 }
 0x489   :  { %3939 = vmatpush2.bf16.msra.mxu1 %v1911_v38  ;;  %3899 = vmatprep.subr.bf16.mxu0 %v1776_v39 }
 0x48a   :  { %3940 = vmatprep.subr.bf16.mxu1 %v1904_v40 }
 0x48c   :  { %3900 = vmatpush2.bf16.msra.mxu0 %v1775_v3 }
 0x48d   :  { %3941 = vmatpush2.bf16.msra.mxu1 %v1903_v7  ;;  %3901 = vmatprep.subr.bf16.mxu0 %v1768_v17  ;;  %v1992_v17 = vunpack.c.l.s8.bf16 %v824_v28  ;;  %v872_v28 = vld [vmem:[#allocation2 + $0xe28] sm:$0xff] }
 0x48e   :  { %3942 = vmatprep.subr.bf16.mxu1 %v1896_v6  ;;  %v2120_v6 = vunpack.c.l.s8.bf16 %v888_v30 }
 0x490   :  { %3902 = vmatpush2.bf16.msra.mxu0 %v1767_v16  ;;  %v2119_v16 = vunpack.c.l.s8.bf16 %v887_v52  ;;  %v928_v52 = vld [vmem:[#allocation2 + $0xfe8] sm:$0xff] }
 0x491   :  { %3943 = vmatpush2.bf16.msra.mxu1 %v1895_v18  ;;  %3953 = vmatprep.subr.bf16.mxu0 %v2016_v23  ;;  %v1984_v18 = vunpack.c.h.s8.bf16 %v816_v43 }
 0x492   :  { %3994 = vmatprep.subr.bf16.mxu1 %v2144_v15  ;;  %v815_v15 = vld [vmem:[#allocation2 + $0xc60] sm:$0xff] }
 0x493   :  { %v3659_v27 = vpop.f32.mrf.mxu0  ;;  %3904 = vmatmul.mubr.bf16.vlgmr.msra.gmra.mxu0 %v6830_v62  ;;  %v1983_v22 = vunpack.c.h.s8.bf16 %v815_v15  ;;  %v1975_v30 = vunpack.c.l.s8.bf16 %v815_v15 }
 0x494   :  { %v3700_v31 = vpop.f32.mrf.mxu1  ;;  %3945 = vmatmul.mubr.bf16.vlgmr.msra.gmra.mxu1 %v6834_v63  ;;  %v3660_v33 = vadd.f32 %v3659_v27, %v7001_v29  ;;  %3954 = vmatpush1.bf16.msra.mxu0 %v2015_v24  ;;  %v2111_v24 = vunpack.c.h.s8.bf16 %v879_v19  ;;  %v2103_v27 = vunpack.c.l.s8.bf16 %v879_v19  ;;  %v855_v19 = vld [vmem:[#allocation2 + $0xda0] sm:$0xff] }
 0x495   :  { %3995 = vmatpush1.bf16.msra.mxu1 %v2143_v47  ;;  %v3661_v32 = vpop.f32.mrf.mxu0  ;;  %3955 = vmatprep.subr.bf16.mxu0 %v2008_v45  ;;  %v1976_v47 = vunpack.c.l.s8.bf16 %v816_v43  ;;  %v2200_v43 = vunpack.c.l.s8.bf16 %v928_v52 }
 0x496   :  { %v3702_v37 = vpop.f32.mrf.mxu1  ;;  %3996 = vmatprep.subr.bf16.mxu1 %v2136_v25  ;;  %v7011_v42 = vadd.f32 %v3700_v31, %v3660_v33  ;;  %v3662_v38 = vadd.f32 %v3661_v32, %v7006_v11  ;;  %3985 = vmatprep.mubr.bf16.mxu0 %v6836_v41  ;;  %v880_v11 = vld [vmem:[#allocation2 + $0xe68] sm:$0xff]  ;;  %v2096_v33 = vunpack.c.h.s8.bf16 %v872_v28 }
 0x497   :  { %4026 = vmatprep.mubr.bf16.mxu1 %v6838_v46  ;;  %v3663_v29 = vpop.f32.mrf.mxu0  ;;  %v2112_v23 = vunpack.c.h.s8.bf16 %v880_v11  ;;  %v2104_v45 = vunpack.c.l.s8.bf16 %v880_v11  ;;  %v808_v25 = vld [vmem:[#allocation2 + $0xc28] sm:$0xff] }
 0x498   :  { %v3704_v39 = vpop.f32.mrf.mxu1  ;;  %v7016_v40 = vadd.f32 %v3702_v37, %v3662_v38  ;;  %3956 = vmatpush1.bf16.msra.mxu0 %v2007_v34  ;;  %v1968_v31 = vunpack.c.h.s8.bf16 %v808_v25  ;;  %v807_v34 = vld [vmem:[#allocation2 + $0xc20] sm:$0xff]  ;;  %v856_v11 = vld [vmem:[#allocation2 + $0xda8] sm:$0xff] }
 0x499   :  { %3997 = vmatpush1.bf16.msra.mxu1 %v2135_v36  ;;  %v3664_v3 = vpop.f32.mrf.mxu0  ;;  %3957 = vmatprep.subr.bf16.mxu0 %v2000_v48  ;;  %v871_v36 = vld [vmem:[#allocation2 + $0xe20] sm:$0xff]  ;;  %v1967_v32 = vunpack.c.h.s8.bf16 %v807_v34  ;;  %v1960_v48 = vunpack.c.l.s8.bf16 %v808_v25  ;;  %v1959_v38 = vunpack.c.l.s8.bf16 %v807_v34  ;;  %v2080_v39 = vunpack.c.h.s8.bf16 %v864_v61 }
 0x49a   :  { %v3705_v7 = vpop.f32.mrf.mxu1  ;;  %3998 = vmatprep.subr.bf16.mxu1 %v2128_v51  ;;  %v2095_v37 = vunpack.c.h.s8.bf16 %v871_v36  ;;  %v2088_v51 = vunpack.c.l.s8.bf16 %v872_v28  ;;  %v2087_v29 = vunpack.c.l.s8.bf16 %v871_v36  ;;  %v927_v3 = vld [vmem:[#allocation2 + $0xfe0] sm:$0xff]  ;;  %v848_v28 = vld [vmem:[#allocation2 + $0xd68] sm:$0xff] }
 0x49b   :  { %v847_v36 = vld [vmem:[#allocation2 + $0xd60] sm:$0xff] }
 0x49c   :  { %3958 = vmatpush1.bf16.msra.mxu0 %v1999_v2  ;;  %v2208_v2 = vunpack.c.h.s8.bf16 %v928_v52  ;;  %v840_v52 = vld [vmem:[#allocation2 + $0xd28] sm:$0xff] }
 0x49d   :  { %3999 = vmatpush1.bf16.msra.mxu1 %v2127_v56  ;;  %3959 = vmatprep.subr.bf16.mxu0 %v1992_v17  ;;  %v863_v56 = vld [vmem:[#allocation2 + $0xde0] sm:$0xff]  ;;  %v2207_v17 = vunpack.c.h.s8.bf16 %v927_v3 }
 0x49e   :  { %4000 = vmatprep.subr.bf16.mxu1 %v2120_v6  ;;  %v2079_v7 = vunpack.c.h.s8.bf16 %v863_v56  ;;  %v2072_v6 = vunpack.c.l.s8.bf16 %v864_v61 }
 0x4a0   :  { %3960 = vmatpush1.bf16.msra.mxu0 %v1991_v14  ;;  %v920_v14 = vld [vmem:[#allocation2 + $0xfa8] sm:$0xff] }
 0x4a1   :  { %4001 = vmatpush1.bf16.msra.mxu1 %v2119_v16  ;;  %3961 = vmatprep.subr.bf16.mxu0 %v1984_v18  ;;  %v2071_v16 = vunpack.c.l.s8.bf16 %v863_v56  ;;  %v2199_v18 = vunpack.c.l.s8.bf16 %v927_v3  ;;  %v2192_v15 = vunpack.c.h.s8.bf16 %v920_v14  ;;  %v2184_v25 = vunpack.c.l.s8.bf16 %v920_v14  ;;  %v839_v3 = vld [vmem:[#allocation2 + $0xd20] sm:$0xff]  ;;  %v960_v14 = vld [vmem:[#allocation2 + $0x10e8] sm:$0xff] }
 0x4a2   :  { %4002 = vmatprep.subr.bf16.mxu1 %v2112_v23  ;;  %v2064_v23 = vunpack.c.h.s8.bf16 %v856_v11 }
 0x4a4   :  { %3962 = vmatpush1.bf16.msra.mxu0 %v1983_v22  ;;  %v919_v22 = vld [vmem:[#allocation2 + $0xfa0] sm:$0xff] }
 0x4a5   :  { %4003 = vmatpush1.bf16.msra.mxu1 %v2111_v24  ;;  %3963 = vmatprep.subr.bf16.mxu0 %v1976_v47  ;;  %v2063_v24 = vunpack.c.h.s8.bf16 %v855_v19  ;;  %v2191_v47 = vunpack.c.h.s8.bf16 %v919_v22 }
 0x4a6   :  { %4004 = vmatprep.subr.bf16.mxu1 %v2104_v45  ;;  %v2056_v45 = vunpack.c.l.s8.bf16 %v856_v11 }
 0x4a8   :  { %3964 = vmatpush1.bf16.msra.mxu0 %v1975_v30  ;;  %v912_v30 = vld [vmem:[#allocation2 + $0xf68] sm:$0xff] }
 0x4a9   :  { %4005 = vmatpush1.bf16.msra.mxu1 %v2103_v27  ;;  %3965 = vmatprep.subr.bf16.mxu0 %v1968_v31  ;;  %v2055_v27 = vunpack.c.l.s8.bf16 %v855_v19  ;;  %v2183_v31 = vunpack.c.l.s8.bf16 %v919_v22  ;;  %v2176_v34 = vunpack.c.h.s8.bf16 %v912_v30  ;;  %v2168_v61 = vunpack.c.l.s8.bf16 %v912_v30  ;;  %v959_v22 = vld [vmem:[#allocation2 + $0x10e0] sm:$0xff]  ;;  %v952_v30 = vld [vmem:[#allocation2 + $0x10a8] sm:$0xff] }
 0x4aa   :  { %4006 = vmatprep.subr.bf16.mxu1 %v2096_v33  ;;  %v2048_v33 = vunpack.c.h.s8.bf16 %v848_v28 }
 0x4ac   :  { %3966 = vmatpush1.bf16.msra.mxu0 %v1967_v32  ;;  %v911_v32 = vld [vmem:[#allocation2 + $0xf60] sm:$0xff] }
 0x4ad   :  { %4007 = vmatpush1.bf16.msra.mxu1 %v2095_v37  ;;  %3967 = vmatprep.subr.bf16.mxu0 %v1960_v48  ;;  %v2047_v37 = vunpack.c.h.s8.bf16 %v847_v36  ;;  %v2175_v48 = vunpack.c.h.s8.bf16 %v911_v32 }
 0x4ae   :  { %4008 = vmatprep.subr.bf16.mxu1 %v2088_v51  ;;  %v2040_v51 = vunpack.c.l.s8.bf16 %v848_v28 }
 0x4b0   :  { %3968 = vmatpush1.bf16.msra.mxu0 %v1959_v38  ;;  %v904_v38 = vld [vmem:[#allocation2 + $0xf28] sm:$0xff] }
 0x4b1   :  { %4009 = vmatpush1.bf16.msra.mxu1 %v2087_v29  ;;  %3969 = vmatprep.subr.bf16.mxu0 %v2080_v39  ;;  %v2039_v29 = vunpack.c.l.s8.bf16 %v847_v36  ;;  %v2167_v39 = vunpack.c.l.s8.bf16 %v911_v32  ;;  %v2160_v56 = vunpack.c.h.s8.bf16 %v904_v38  ;;  %v2152_v11 = vunpack.c.l.s8.bf16 %v904_v38  ;;  %v1015_v38 = vld [vmem:[#allocation2 + $0x12a0] sm:$0xff] }
 0x4b2   :  { %4010 = vmatprep.subr.bf16.mxu1 %v2208_v2  ;;  %v2032_v2 = vunpack.c.h.s8.bf16 %v840_v52  ;;  %v2263_v36 = vunpack.c.l.s8.bf16 %v959_v22 }
 0x4b4   :  { %3970 = vmatpush2.bf16.msra.mxu0 %v2079_v7  ;;  %v903_v7 = vld [vmem:[#allocation2 + $0xf20] sm:$0xff] }
 0x4b5   :  { %4011 = vmatpush2.bf16.msra.mxu1 %v2207_v17  ;;  %3971 = vmatprep.subr.bf16.mxu0 %v2072_v6  ;;  %v2031_v17 = vunpack.c.h.s8.bf16 %v839_v3  ;;  %v2159_v6 = vunpack.c.h.s8.bf16 %v903_v7 }
 0x4b6   :  { %4012 = vmatprep.subr.bf16.mxu1 %v2200_v43  ;;  %v2024_v43 = vunpack.c.l.s8.bf16 %v840_v52  ;;  %v951_v52 = vld [vmem:[#allocation2 + $0x10a0] sm:$0xff] }
 0x4b8   :  { %3972 = vmatpush2.bf16.msra.mxu0 %v2071_v16  ;;  %v1024_v16 = vld [vmem:[#allocation2 + $0x12e8] sm:$0xff] }
 0x4b9   :  { %4013 = vmatpush2.bf16.msra.mxu1 %v2199_v18  ;;  %3973 = vmatprep.subr.bf16.mxu0 %v2064_v23  ;;  %v2023_v18 = vunpack.c.l.s8.bf16 %v839_v3  ;;  %v2151_v23 = vunpack.c.l.s8.bf16 %v903_v7  ;;  %v2400_v19 = vunpack.c.h.s8.bf16 %v1024_v16  ;;  %v2392_v28 = vunpack.c.l.s8.bf16 %v1024_v16 }
 0x4ba   :  { %4014 = vmatprep.subr.bf16.mxu1 %v2192_v15  ;;  %v2272_v15 = vunpack.c.h.s8.bf16 %v960_v14  ;;  %v2383_v3 = vunpack.c.h.s8.bf16 %v1015_v38  ;;  %v2247_v16 = vunpack.c.l.s8.bf16 %v951_v52 }
 0x4bc   :  { %3974 = vmatpush2.bf16.msra.mxu0 %v2063_v24  ;;  %v1023_v24 = vld [vmem:[#allocation2 + $0x12e0] sm:$0xff] }
 0x4bd   :  { %4015 = vmatpush2.bf16.msra.mxu1 %v2191_v47  ;;  %3975 = vmatprep.subr.bf16.mxu0 %v2056_v45  ;;  %v2271_v47 = vunpack.c.h.s8.bf16 %v959_v22  ;;  %v2399_v45 = vunpack.c.h.s8.bf16 %v1023_v24  ;;  %v2391_v32 = vunpack.c.l.s8.bf16 %v1023_v24  ;;  %v1007_v22 = vld [vmem:[#allocation2 + $0x1260] sm:$0xff] }
 0x4be   :  { %4016 = vmatprep.subr.bf16.mxu1 %v2184_v25  ;;  %v2264_v25 = vunpack.c.l.s8.bf16 %v960_v14  ;;  %v1008_v14 = vld [vmem:[#allocation2 + $0x1268] sm:$0xff] }
 0x4c0   :  { %3976 = vmatpush2.bf16.msra.mxu0 %v2055_v27  ;;  %v1016_v27 = vld [vmem:[#allocation2 + $0x12a8] sm:$0xff] }
 0x4c1   :  { %4017 = vmatpush2.bf16.msra.mxu1 %v2183_v31  ;;  %3977 = vmatprep.subr.bf16.mxu0 %v2048_v33 }
 0x4c2   :  { %4018 = vmatprep.subr.bf16.mxu1 %v2176_v34 }
 0x4c4   :  { %3978 = vmatpush2.bf16.msra.mxu0 %v2047_v37 }
 0x4c5   :  { %4019 = vmatpush2.bf16.msra.mxu1 %v2175_v48  ;;  %3979 = vmatprep.subr.bf16.mxu0 %v2040_v51  ;;  %v2256_v51 = vunpack.c.h.s8.bf16 %v952_v30 }
 0x4c6   :  { %4020 = vmatprep.subr.bf16.mxu1 %v2168_v61  ;;  %v2384_v61 = vunpack.c.h.s8.bf16 %v1016_v27 }
 0x4c8   :  { %3980 = vmatpush2.bf16.msra.mxu0 %v2039_v29 }
 0x4c9   :  { %4021 = vmatpush2.bf16.msra.mxu1 %v2167_v39  ;;  %3981 = vmatprep.subr.bf16.mxu0 %v2032_v2 }
 0x4ca   :  { %4022 = vmatprep.subr.bf16.mxu1 %v2160_v56  ;;  %v2255_v56 = vunpack.c.h.s8.bf16 %v951_v52 }
 0x4cc   :  { %3982 = vmatpush2.bf16.msra.mxu0 %v2031_v17 }
 0x4cd   :  { %4023 = vmatpush2.bf16.msra.mxu1 %v2159_v6  ;;  %3983 = vmatprep.subr.bf16.mxu0 %v2024_v43  ;;  %v2248_v6 = vunpack.c.l.s8.bf16 %v952_v30  ;;  %v2376_v43 = vunpack.c.l.s8.bf16 %v1016_v27  ;;  %v1000_v30 = vld [vmem:[#allocation2 + $0x1228] sm:$0xff] }
 0x4ce   :  { %4024 = vmatprep.subr.bf16.mxu1 %v2152_v11  ;;  %v944_v11 = vld [vmem:[#allocation2 + $0x1068] sm:$0xff]  ;;  %v2344_v52 = vunpack.c.l.s8.bf16 %v1000_v30 }
 0x4d0   :  { %3984 = vmatpush2.bf16.msra.mxu0 %v2023_v18  ;;  %v2375_v18 = vunpack.c.l.s8.bf16 %v1015_v38  ;;  %v992_v38 = vld [vmem:[#allocation2 + $0x11e8] sm:$0xff] }
 0x4d1   :  { %4025 = vmatpush2.bf16.msra.mxu1 %v2151_v23  ;;  %4035 = vmatprep.subr.bf16.mxu0 %v2272_v15  ;;  %v2240_v23 = vunpack.c.h.s8.bf16 %v944_v11  ;;  %v2368_v15 = vunpack.c.h.s8.bf16 %v1008_v14 }
 0x4d2   :  { %4076 = vmatprep.subr.bf16.mxu1 %v2400_v19  ;;  %v943_v19 = vld [vmem:[#allocation2 + $0x1060] sm:$0xff] }
 0x4d3   :  { %v3741_v31 = vpop.f32.mrf.mxu0  ;;  %3986 = vmatmul.mubr.bf16.vlgmr.msra.gmra.mxu0 %v6859_v12  ;;  %v2239_v24 = vunpack.c.h.s8.bf16 %v943_v19  ;;  %v2231_v27 = vunpack.c.l.s8.bf16 %v943_v19 }
 0x4d4   :  { %v3782_v33 = vpop.f32.mrf.mxu1  ;;  %4027 = vmatmul.mubr.bf16.vlgmr.msra.gmra.mxu1 %v6863_v13  ;;  %4036 = vmatpush1.bf16.msra.mxu0 %v2271_v47  ;;  %v2367_v47 = vunpack.c.h.s8.bf16 %v1007_v22 }
 0x4d5   :  { %v7020_v34 = vadd.f32 %v3782_v33, %v3741_v31  ;;  %4077 = vmatpush1.bf16.msra.mxu1 %v2399_v45  ;;  %v3743_v37 = vpop.f32.mrf.mxu0  ;;  %4037 = vmatprep.subr.bf16.mxu0 %v2264_v25  ;;  %v2232_v45 = vunpack.c.l.s8.bf16 %v944_v11  ;;  %v2360_v25 = vunpack.c.l.s8.bf16 %v1008_v14  ;;  %v2359_v31 = vunpack.c.l.s8.bf16 %v1007_v22 }
 0x4d6   :  { %v3784_v48 = vpop.f32.mrf.mxu1  ;;  %4078 = vmatprep.subr.bf16.mxu1 %v2392_v28  ;;  %4067 = vmatprep.mubr.bf16.mxu0 %v6865_v20  ;;  %v936_v28 = vld [vmem:[#allocation2 + $0x1028] sm:$0xff]  ;;  %v2328_v14 = vunpack.c.l.s8.bf16 %v992_v38 }
 0x4d7   :  { %v7022_v29 = vadd.f32 %v3784_v48, %v3743_v37  ;;  %4108 = vmatprep.mubr.bf16.mxu1 %v6867_v21  ;;  %v3745_v39 = vpop.f32.mrf.mxu0  ;;  %v2224_v33 = vunpack.c.h.s8.bf16 %v936_v28  ;;  %v999_v37 = vld [vmem:[#allocation2 + $0x1220] sm:$0xff] }
 0x4d8   :  { %v3786_v2 = vpop.f32.mrf.mxu1  ;;  %4038 = vmatpush1.bf16.msra.mxu0 %v2263_v36  ;;  %v2352_v36 = vunpack.c.h.s8.bf16 %v1000_v30  ;;  %v1056_v39 = vld [vmem:[#allocation2 + $0x13e8] sm:$0xff] }
 0x4d9   :  { %4079 = vmatpush1.bf16.msra.mxu1 %v2391_v32  ;;  %v3746_v7 = vpop.f32.mrf.mxu0  ;;  %4039 = vmatprep.subr.bf16.mxu0 %v2256_v51  ;;  %v935_v32 = vld [vmem:[#allocation2 + $0x1020] sm:$0xff]  ;;  %v2351_v51 = vunpack.c.h.s8.bf16 %v999_v37 }
 0x4da   :  { %v3787_v17 = vpop.f32.mrf.mxu1  ;;  %4080 = vmatprep.subr.bf16.mxu1 %v2384_v61  ;;  %v2223_v48 = vunpack.c.h.s8.bf16 %v935_v32  ;;  %v2216_v61 = vunpack.c.l.s8.bf16 %v936_v28  ;;  %v2215_v2 = vunpack.c.l.s8.bf16 %v935_v32  ;;  %v2464_v7 = vunpack.c.h.s8.bf16 %v1056_v39 }
 0x4db   :  { %v991_v17 = vld [vmem:[#allocation2 + $0x11e0] sm:$0xff] }
 0x4dc   :  { %4040 = vmatpush1.bf16.msra.mxu0 %v2255_v56  ;;  %v2343_v56 = vunpack.c.l.s8.bf16 %v999_v37 }
 0x4dd   :  { %4081 = vmatpush1.bf16.msra.mxu1 %v2383_v3  ;;  %4041 = vmatprep.subr.bf16.mxu0 %v2248_v6  ;;  %v2336_v3 = vunpack.c.h.s8.bf16 %v992_v38  ;;  %v1055_v6 = vld [vmem:[#allocation2 + $0x13e0] sm:$0xff] }
 0x4de   :  { %4082 = vmatprep.subr.bf16.mxu1 %v2376_v43  ;;  %v2335_v43 = vunpack.c.h.s8.bf16 %v991_v17  ;;  %v2463_v11 = vunpack.c.h.s8.bf16 %v1055_v6  ;;  %v2455_v19 = vunpack.c.l.s8.bf16 %v1055_v6 }
 0x4e0   :  { %4042 = vmatpush1.bf16.msra.mxu0 %v2247_v16  ;;  %v2456_v16 = vunpack.c.l.s8.bf16 %v1056_v39 }
 0x4e1   :  { %4083 = vmatpush1.bf16.msra.mxu1 %v2375_v18  ;;  %4043 = vmatprep.subr.bf16.mxu0 %v2240_v23  ;;  %v984_v18 = vld [vmem:[#allocation2 + $0x11a8] sm:$0xff] }
 0x4e2   :  { %4084 = vmatprep.subr.bf16.mxu1 %v2368_v15  ;;  %v1048_v23 = vld [vmem:[#allocation2 + $0x13a8] sm:$0xff]  ;;  %v2327_v15 = vunpack.c.l.s8.bf16 %v991_v17  ;;  %v2320_v22 = vunpack.c.h.s8.bf16 %v984_v18  ;;  %v2312_v30 = vunpack.c.l.s8.bf16 %v984_v18 }
 0x4e4   :  { %4044 = vmatpush1.bf16.msra.mxu0 %v2239_v24  ;;  %v2448_v24 = vunpack.c.h.s8.bf16 %v1048_v23 }
 0x4e5   :  { %4085 = vmatpush1.bf16.msra.mxu1 %v2367_v47  ;;  %4045 = vmatprep.subr.bf16.mxu0 %v2232_v45  ;;  %v983_v47 = vld [vmem:[#allocation2 + $0x11a0] sm:$0xff] }
 0x4e6   :  { %4086 = vmatprep.subr.bf16.mxu1 %v2360_v25  ;;  %v1047_v45 = vld [vmem:[#allocation2 + $0x13a0] sm:$0xff]  ;;  %v2319_v25 = vunpack.c.h.s8.bf16 %v983_v47 }
 0x4e7   :  { %v2447_v28 = vunpack.c.h.s8.bf16 %v1047_v45  ;;  %v2439_v32 = vunpack.c.l.s8.bf16 %v1047_v45 }
 0x4e8   :  { %4046 = vmatpush1.bf16.msra.mxu0 %v2231_v27  ;;  %v2440_v27 = vunpack.c.l.s8.bf16 %v1048_v23 }
 0x4e9   :  { %4087 = vmatpush1.bf16.msra.mxu1 %v2359_v31  ;;  %4047 = vmatprep.subr.bf16.mxu0 %v2224_v33  ;;  %v976_v31 = vld [vmem:[#allocation2 + $0x1168] sm:$0xff] }
 0x4ea   :  { %4088 = vmatprep.subr.bf16.mxu1 %v2352_v36  ;;  %v1040_v33 = vld [vmem:[#allocation2 + $0x1368] sm:$0xff]  ;;  %v2311_v36 = vunpack.c.l.s8.bf16 %v983_v47  ;;  %v2304_v37 = vunpack.c.h.s8.bf16 %v976_v31  ;;  %v2296_v39 = vunpack.c.l.s8.bf16 %v976_v31 }
 0x4ec   :  { %4048 = vmatpush1.bf16.msra.mxu0 %v2223_v48  ;;  %v2432_v48 = vunpack.c.h.s8.bf16 %v1040_v33 }
 0x4ed   :  { %4089 = vmatpush1.bf16.msra.mxu1 %v2351_v51  ;;  %4049 = vmatprep.subr.bf16.mxu0 %v2216_v61  ;;  %v975_v51 = vld [vmem:[#allocation2 + $0x1160] sm:$0xff] }
 0x4ee   :  { %4090 = vmatprep.subr.bf16.mxu1 %v2344_v52  ;;  %v1039_v61 = vld [vmem:[#allocation2 + $0x1360] sm:$0xff]  ;;  %v2303_v52 = vunpack.c.h.s8.bf16 %v975_v51 }
 0x4ef   :  { %v2431_v38 = vunpack.c.h.s8.bf16 %v1039_v61  ;;  %v2423_v17 = vunpack.c.l.s8.bf16 %v1039_v61 }
 0x4f0   :  { %4050 = vmatpush1.bf16.msra.mxu0 %v2215_v2  ;;  %v2424_v2 = vunpack.c.l.s8.bf16 %v1040_v33 }
 0x4f1   :  { %4091 = vmatpush1.bf16.msra.mxu1 %v2343_v56  ;;  %4051 = vmatprep.subr.bf16.mxu0 %v2336_v3  ;;  %v968_v56 = vld [vmem:[#allocation2 + $0x1128] sm:$0xff] }
 0x4f2   :  { %4092 = vmatprep.subr.bf16.mxu1 %v2464_v7  ;;  %v1032_v3 = vld [vmem:[#allocation2 + $0x1328] sm:$0xff]  ;;  %v2295_v7 = vunpack.c.l.s8.bf16 %v975_v51  ;;  %v2288_v6 = vunpack.c.h.s8.bf16 %v968_v56  ;;  %v2280_v23 = vunpack.c.l.s8.bf16 %v968_v56 }
 0x4f4   :  { %4052 = vmatpush2.bf16.msra.mxu0 %v2335_v43  ;;  %v2416_v43 = vunpack.c.h.s8.bf16 %v1032_v3 }
 0x4f5   :  { %4093 = vmatpush2.bf16.msra.mxu1 %v2463_v11  ;;  %4053 = vmatprep.subr.bf16.mxu0 %v2328_v14  ;;  %v967_v11 = vld [vmem:[#allocation2 + $0x1120] sm:$0xff] }
 0x4f6   :  { %4094 = vmatprep.subr.bf16.mxu1 %v2456_v16  ;;  %v1031_v14 = vld [vmem:[#allocation2 + $0x1320] sm:$0xff]  ;;  %v2287_v16 = vunpack.c.h.s8.bf16 %v967_v11 }
 0x4f7   :  { %v2415_v18 = vunpack.c.h.s8.bf16 %v1031_v14  ;;  %v2407_v47 = vunpack.c.l.s8.bf16 %v1031_v14 }
 0x4f8   :  { %4054 = vmatpush2.bf16.msra.mxu0 %v2327_v15  ;;  %v2408_v15 = vunpack.c.l.s8.bf16 %v1032_v3 }
 0x4f9   :  { %4095 = vmatpush2.bf16.msra.mxu1 %v2455_v19  ;;  %4055 = vmatprep.subr.bf16.mxu0 %v2320_v22  ;;  %v1088_v19 = vld [vmem:[#allocation2 + $0x14e8] sm:$0xff] }
 0x4fa   :  { %4096 = vmatprep.subr.bf16.mxu1 %v2448_v24  ;;  %v1152_v22 = vld [vmem:[#allocation2 + $0x16e8] sm:$0xff]  ;;  %v2279_v24 = vunpack.c.l.s8.bf16 %v967_v11  ;;  %v2528_v45 = vunpack.c.h.s8.bf16 %v1088_v19  ;;  %v2520_v33 = vunpack.c.l.s8.bf16 %v1088_v19 }
 0x4fc   :  { %4056 = vmatpush2.bf16.msra.mxu0 %v2319_v25  ;;  %v2656_v25 = vunpack.c.h.s8.bf16 %v1152_v22 }
 0x4fd   :  { %4097 = vmatpush2.bf16.msra.mxu1 %v2447_v28  ;;  %4057 = vmatprep.subr.bf16.mxu0 %v2312_v30  ;;  %v1087_v28 = vld [vmem:[#allocation2 + $0x14e0] sm:$0xff] }
 0x4fe   :  { %4098 = vmatprep.subr.bf16.mxu1 %v2440_v27  ;;  %v1151_v30 = vld [vmem:[#allocation2 + $0x16e0] sm:$0xff]  ;;  %v2527_v27 = vunpack.c.h.s8.bf16 %v1087_v28 }
 0x4ff   :  { %v2655_v31 = vunpack.c.h.s8.bf16 %v1151_v30 }
 0x500   :  { %4058 = vmatpush2.bf16.msra.mxu0 %v2311_v36  ;;  %v2648_v36 = vunpack.c.l.s8.bf16 %v1152_v22 }
 0x501   :  { %4099 = vmatpush2.bf16.msra.mxu1 %v2439_v32  ;;  %4059 = vmatprep.subr.bf16.mxu0 %v2304_v37  ;;  %v1080_v32 = vld [vmem:[#allocation2 + $0x14a8] sm:$0xff] }
 0x502   :  { %4100 = vmatprep.subr.bf16.mxu1 %v2432_v48  ;;  %v1144_v37 = vld [vmem:[#allocation2 + $0x16a8] sm:$0xff]  ;;  %v2512_v56 = vunpack.c.h.s8.bf16 %v1080_v32  ;;  %v2504_v19 = vunpack.c.l.s8.bf16 %v1080_v32 }
 0x503   :  { %v2640_v3 = vunpack.c.h.s8.bf16 %v1144_v37  ;;  %v2632_v22 = vunpack.c.l.s8.bf16 %v1144_v37  ;;  %v1064_v37 = vld [vmem:[#allocation2 + $0x1428] sm:$0xff] }
 0x504   :  { %4060 = vmatpush2.bf16.msra.mxu0 %v2303_v52  ;;  %v2519_v52 = vunpack.c.l.s8.bf16 %v1087_v28 }
 0x505   :  { %4101 = vmatpush2.bf16.msra.mxu1 %v2431_v38  ;;  %4061 = vmatprep.subr.bf16.mxu0 %v2296_v39  ;;  %v2647_v38 = vunpack.c.l.s8.bf16 %v1151_v30  ;;  %v1071_v30 = vld [vmem:[#allocation2 + $0x1460] sm:$0xff] }
 0x506   :  { %4102 = vmatprep.subr.bf16.mxu1 %v2424_v2 }
 0x508   :  { %4062 = vmatpush2.bf16.msra.mxu0 %v2295_v7  ;;  %v1079_v7 = vld [vmem:[#allocation2 + $0x14a0] sm:$0xff] }
 0x509   :  { %4103 = vmatpush2.bf16.msra.mxu1 %v2423_v17  ;;  %4063 = vmatprep.subr.bf16.mxu0 %v2288_v6  ;;  %v1143_v17 = vld [vmem:[#allocation2 + $0x16a0] sm:$0xff] }
 0x50a   :  { %4104 = vmatprep.subr.bf16.mxu1 %v2416_v43 }
 0x50c   :  { %4064 = vmatpush2.bf16.msra.mxu0 %v2287_v16  ;;  %v2511_v16 = vunpack.c.h.s8.bf16 %v1079_v7 }
 0x50d   :  { %4105 = vmatpush2.bf16.msra.mxu1 %v2415_v18  ;;  %4065 = vmatprep.subr.bf16.mxu0 %v2280_v23  ;;  %v2639_v18 = vunpack.c.h.s8.bf16 %v1143_v17 }
 0x50e   :  { %4106 = vmatprep.subr.bf16.mxu1 %v2408_v15 }
 0x510   :  { %4066 = vmatpush2.bf16.msra.mxu0 %v2279_v24  ;;  %v1072_v24 = vld [vmem:[#allocation2 + $0x1468] sm:$0xff] }
 0x511   :  { %4107 = vmatpush2.bf16.msra.mxu1 %v2407_v47  ;;  %4117 = vmatprep.subr.bf16.mxu0 %v2528_v45  ;;  %v2503_v47 = vunpack.c.l.s8.bf16 %v1079_v7  ;;  %v2631_v45 = vunpack.c.l.s8.bf16 %v1143_v17  ;;  %v2472_v7 = vunpack.c.l.s8.bf16 %v1064_v37 }
 0x512   :  { %4158 = vmatprep.subr.bf16.mxu1 %v2656_v25  ;;  %v2496_v25 = vunpack.c.h.s8.bf16 %v1072_v24 }
 0x513   :  { %v3823_v48 = vpop.f32.mrf.mxu0  ;;  %4068 = vmatmul.mubr.bf16.vlgmr.msra.gmra.mxu0 %v6892_v35 }
 0x514   :  { %v3864_v51 = vpop.f32.mrf.mxu1  ;;  %4109 = vmatmul.mubr.bf16.vlgmr.msra.gmra.mxu1 %v6896_v60  ;;  %v3824_v61 = vadd.f32 %v3823_v48, %v7020_v34  ;;  %4118 = vmatpush1.bf16.msra.mxu0 %v2527_v27  ;;  %v1135_v27 = vld [vmem:[#allocation2 + $0x1660] sm:$0xff]  ;;  %v1128_v48 = vld [vmem:[#allocation2 + $0x1628] sm:$0xff] }
 0x515   :  { %4159 = vmatpush1.bf16.msra.mxu1 %v2655_v31  ;;  %v3825_v39 = vpop.f32.mrf.mxu0  ;;  %4119 = vmatprep.subr.bf16.mxu0 %v2520_v33  ;;  %v2495_v31 = vunpack.c.h.s8.bf16 %v1071_v30  ;;  %v2623_v33 = vunpack.c.h.s8.bf16 %v1135_v27  ;;  %v2600_v17 = vunpack.c.l.s8.bf16 %v1128_v48 }
 0x516   :  { %v3866_v2 = vpop.f32.mrf.mxu1  ;;  %4160 = vmatprep.subr.bf16.mxu1 %v2648_v36  ;;  %v7029_v6 = vadd.f32 %v3864_v51, %v3824_v61  ;;  %v3826_v43 = vadd.f32 %v3825_v39, %v7022_v29  ;;  %4149 = vmatprep.mubr.bf16.mxu0 %v6898_v44  ;;  %v1136_v29 = vld [vmem:[#allocation2 + $0x1668] sm:$0xff]  ;;  %v2488_v36 = vunpack.c.l.s8.bf16 %v1072_v24  ;;  %v2487_v51 = vunpack.c.l.s8.bf16 %v1071_v30  ;;  %v1063_v39 = vld [vmem:[#allocation2 + $0x1420] sm:$0xff] }
 0x517   :  { %4190 = vmatprep.mubr.bf16.mxu1 %v6900_v10  ;;  %v3827_v34 = vpop.f32.mrf.mxu0  ;;  %v2624_v28 = vunpack.c.h.s8.bf16 %v1136_v29  ;;  %v2616_v32 = vunpack.c.l.s8.bf16 %v1136_v29  ;;  %v2615_v61 = vunpack.c.l.s8.bf16 %v1135_v27 }
 0x518   :  { %v3868_v11 = vpop.f32.mrf.mxu1  ;;  %v7034_v14 = vadd.f32 %v3866_v2, %v3826_v43  ;;  %4120 = vmatpush1.bf16.msra.mxu0 %v2519_v52  ;;  %v2480_v52 = vunpack.c.h.s8.bf16 %v1064_v37  ;;  %v1127_v2 = vld [vmem:[#allocation2 + $0x1620] sm:$0xff]  ;;  %v1120_v43 = vld [vmem:[#allocation2 + $0x15e8] sm:$0xff] }
 0x519   :  { %4161 = vmatpush1.bf16.msra.mxu1 %v2647_v38  ;;  %v3828_v23 = vpop.f32.mrf.mxu0  ;;  %4121 = vmatprep.subr.bf16.mxu0 %v2512_v56  ;;  %v2608_v38 = vunpack.c.h.s8.bf16 %v1128_v48  ;;  %v2479_v56 = vunpack.c.h.s8.bf16 %v1063_v39  ;;  %v1184_v34 = vld [vmem:[#allocation2 + $0x17e8] sm:$0xff]  ;;  %v2471_v11 = vunpack.c.l.s8.bf16 %v1063_v39  ;;  %v2584_v29 = vunpack.c.l.s8.bf16 %v1120_v43 }
 0x51a   :  { %v3869_v15 = vpop.f32.mrf.mxu1  ;;  %4162 = vmatprep.subr.bf16.mxu1 %v2640_v3  ;;  %v2607_v3 = vunpack.c.h.s8.bf16 %v1127_v2  ;;  %v2720_v23 = vunpack.c.h.s8.bf16 %v1184_v34 }
 0x51b   :  { %v1119_v15 = vld [vmem:[#allocation2 + $0x15e0] sm:$0xff] }
 0x51c   :  { %4122 = vmatpush1.bf16.msra.mxu0 %v2511_v16  ;;  %v2599_v16 = vunpack.c.l.s8.bf16 %v1127_v2 }
 0x51d   :  { %4163 = vmatpush1.bf16.msra.mxu1 %v2639_v18  ;;  %4123 = vmatprep.subr.bf16.mxu0 %v2504_v19  ;;  %v2592_v18 = vunpack.c.h.s8.bf16 %v1120_v43  ;;  %v1183_v19 = vld [vmem:[#allocation2 + $0x17e0] sm:$0xff] }
 0x51e   :  { %4164 = vmatprep.subr.bf16.mxu1 %v2632_v22  ;;  %v2591_v22 = vunpack.c.h.s8.bf16 %v1119_v15  ;;  %v2719_v24 = vunpack.c.h.s8.bf16 %v1183_v19  ;;  %v2711_v30 = vunpack.c.l.s8.bf16 %v1183_v19 }
 0x520   :  { %4124 = vmatpush1.bf16.msra.mxu0 %v2503_v47  ;;  %v2712_v47 = vunpack.c.l.s8.bf16 %v1184_v34 }
 0x521   :  { %4165 = vmatpush1.bf16.msra.mxu1 %v2631_v45  ;;  %4125 = vmatprep.subr.bf16.mxu0 %v2496_v25  ;;  %v1112_v45 = vld [vmem:[#allocation2 + $0x15a8] sm:$0xff] }
 0x522   :  { %4166 = vmatprep.subr.bf16.mxu1 %v2624_v28  ;;  %v1176_v25 = vld [vmem:[#allocation2 + $0x17a8] sm:$0xff]  ;;  %v2583_v28 = vunpack.c.l.s8.bf16 %v1119_v15  ;;  %v2576_v27 = vunpack.c.h.s8.bf16 %v1112_v45  ;;  %v2568_v48 = vunpack.c.l.s8.bf16 %v1112_v45 }
 0x524   :  { %4126 = vmatpush1.bf16.msra.mxu0 %v2495_v31  ;;  %v2704_v31 = vunpack.c.h.s8.bf16 %v1176_v25 }
 0x525   :  { %4167 = vmatpush1.bf16.msra.mxu1 %v2623_v33  ;;  %4127 = vmatprep.subr.bf16.mxu0 %v2488_v36  ;;  %v1111_v33 = vld [vmem:[#allocation2 + $0x15a0] sm:$0xff] }
 0x526   :  { %4168 = vmatprep.subr.bf16.mxu1 %v2616_v32  ;;  %v1175_v36 = vld [vmem:[#allocation2 + $0x17a0] sm:$0xff]  ;;  %v2575_v32 = vunpack.c.h.s8.bf16 %v1111_v33 }
 0x527   :  { %v2703_v37 = vunpack.c.h.s8.bf16 %v1175_v36  ;;  %v2695_v39 = vunpack.c.l.s8.bf16 %v1175_v36 }
 0x528   :  { %4128 = vmatpush1.bf16.msra.mxu0 %v2487_v51  ;;  %v2696_v51 = vunpack.c.l.s8.bf16 %v1176_v25 }
 0x529   :  { %4169 = vmatpush1.bf16.msra.mxu1 %v2615_v61  ;;  %4129 = vmatprep.subr.bf16.mxu0 %v2480_v52  ;;  %v1104_v61 = vld [vmem:[#allocation2 + $0x1568] sm:$0xff] }
 0x52a   :  { %4170 = vmatprep.subr.bf16.mxu1 %v2608_v38  ;;  %v1168_v52 = vld [vmem:[#allocation2 + $0x1768] sm:$0xff]  ;;  %v2567_v38 = vunpack.c.l.s8.bf16 %v1111_v33  ;;  %v2560_v2 = vunpack.c.h.s8.bf16 %v1104_v61  ;;  %v2552_v34 = vunpack.c.l.s8.bf16 %v1104_v61 }
 0x52c   :  { %4130 = vmatpush1.bf16.msra.mxu0 %v2479_v56  ;;  %v2688_v56 = vunpack.c.h.s8.bf16 %v1168_v52 }
 0x52d   :  { %4171 = vmatpush1.bf16.msra.mxu1 %v2607_v3  ;;  %4131 = vmatprep.subr.bf16.mxu0 %v2472_v7  ;;  %v1103_v3 = vld [vmem:[#allocation2 + $0x1560] sm:$0xff] }
 0x52e   :  { %4172 = vmatprep.subr.bf16.mxu1 %v2600_v17  ;;  %v1167_v7 = vld [vmem:[#allocation2 + $0x1760] sm:$0xff]  ;;  %v2559_v17 = vunpack.c.h.s8.bf16 %v1103_v3 }
 0x52f   :  { %v2687_v43 = vunpack.c.h.s8.bf16 %v1167_v7  ;;  %v2679_v15 = vunpack.c.l.s8.bf16 %v1167_v7 }
 0x530   :  { %4132 = vmatpush1.bf16.msra.mxu0 %v2471_v11  ;;  %v2680_v11 = vunpack.c.l.s8.bf16 %v1168_v52 }
 0x531   :  { %4173 = vmatpush1.bf16.msra.mxu1 %v2599_v16  ;;  %4133 = vmatprep.subr.bf16.mxu0 %v2592_v18  ;;  %v1096_v16 = vld [vmem:[#allocation2 + $0x1528] sm:$0xff] }
 0x532   :  { %4174 = vmatprep.subr.bf16.mxu1 %v2720_v23  ;;  %v1160_v18 = vld [vmem:[#allocation2 + $0x1728] sm:$0xff]  ;;  %v2551_v23 = vunpack.c.l.s8.bf16 %v1103_v3  ;;  %v2544_v19 = vunpack.c.h.s8.bf16 %v1096_v16  ;;  %v2536_v25 = vunpack.c.l.s8.bf16 %v1096_v16 }
 0x534   :  { %4134 = vmatpush2.bf16.msra.mxu0 %v2591_v22  ;;  %v2672_v22 = vunpack.c.h.s8.bf16 %v1160_v18 }
 0x535   :  { %4175 = vmatpush2.bf16.msra.mxu1 %v2719_v24  ;;  %4135 = vmatprep.subr.bf16.mxu0 %v2584_v29  ;;  %v1095_v24 = vld [vmem:[#allocation2 + $0x1520] sm:$0xff] }
 0x536   :  { %4176 = vmatprep.subr.bf16.mxu1 %v2712_v47  ;;  %v1159_v29 = vld [vmem:[#allocation2 + $0x1720] sm:$0xff]  ;;  %v2543_v47 = vunpack.c.h.s8.bf16 %v1095_v24 }
 0x537   :  { %v2671_v45 = vunpack.c.h.s8.bf16 %v1159_v29  ;;  %v2663_v33 = vunpack.c.l.s8.bf16 %v1159_v29 }
 0x538   :  { %4136 = vmatpush2.bf16.msra.mxu0 %v2583_v28  ;;  %v2664_v28 = vunpack.c.l.s8.bf16 %v1160_v18 }
 0x539   :  { %4177 = vmatpush2.bf16.msra.mxu1 %v2711_v30  ;;  %4137 = vmatprep.subr.bf16.mxu0 %v2576_v27  ;;  %v450_v30 = vld [vmem:[#allocation2 + $0xf8] sm:$0xff] }
 0x53a   :  { %4178 = vmatprep.subr.bf16.mxu1 %v2704_v31  ;;  %v514_v27 = vld [vmem:[#allocation2 + $0x2f8] sm:$0xff]  ;;  %v2535_v31 = vunpack.c.l.s8.bf16 %v1095_v24  ;;  %v1250_v36 = vunpack.c.h.s8.bf16 %v450_v30  ;;  %v1242_v52 = vunpack.c.l.s8.bf16 %v450_v30 }
 0x53c   :  { %4138 = vmatpush2.bf16.msra.mxu0 %v2575_v32  ;;  %v1378_v32 = vunpack.c.h.s8.bf16 %v514_v27 }
 0x53d   :  { %4179 = vmatpush2.bf16.msra.mxu1 %v2703_v37  ;;  %4139 = vmatprep.subr.bf16.mxu0 %v2568_v48  ;;  %v449_v37 = vld [vmem:[#allocation2 + $0xf0] sm:$0xff] }
 0x53e   :  { %4180 = vmatprep.subr.bf16.mxu1 %v2696_v51  ;;  %v513_v48 = vld [vmem:[#allocation2 + $0x2f0] sm:$0xff]  ;;  %v1249_v51 = vunpack.c.h.s8.bf16 %v449_v37 }
 0x53f   :  { %v1377_v61 = vunpack.c.h.s8.bf16 %v513_v48 }
 0x540   :  { %4140 = vmatpush2.bf16.msra.mxu0 %v2567_v38  ;;  %v1370_v38 = vunpack.c.l.s8.bf16 %v514_v27 }
 0x541   :  { %4181 = vmatpush2.bf16.msra.mxu1 %v2695_v39  ;;  %4141 = vmatprep.subr.bf16.mxu0 %v2560_v2  ;;  %v442_v39 = vld [vmem:[#allocation2 + $0xb8] sm:$0xff] }
 0x542   :  { %4182 = vmatprep.subr.bf16.mxu1 %v2688_v56  ;;  %v506_v2 = vld [vmem:[#allocation2 + $0x2b8] sm:$0xff]  ;;  %v1234_v16 = vunpack.c.h.s8.bf16 %v442_v39  ;;  %v1226_v30 = vunpack.c.l.s8.bf16 %v442_v39 }
 0x543   :  { %v1362_v18 = vunpack.c.h.s8.bf16 %v506_v2  ;;  %v1354_v27 = vunpack.c.l.s8.bf16 %v506_v2  ;;  %v490_v39 = vld [vmem:[#allocation2 + $0x238] sm:$0xff] }
 0x544   :  { %4142 = vmatpush2.bf16.msra.mxu0 %v2559_v17  ;;  %v1241_v17 = vunpack.c.l.s8.bf16 %v449_v37  ;;  %v497_v37 = vld [vmem:[#allocation2 + $0x270] sm:$0xff] }
 0x545   :  { %4183 = vmatpush2.bf16.msra.mxu1 %v2687_v43  ;;  %4143 = vmatprep.subr.bf16.mxu0 %v2552_v34  ;;  %v1369_v43 = vunpack.c.l.s8.bf16 %v513_v48 }
 0x546   :  { %4184 = vmatprep.subr.bf16.mxu1 %v2680_v11 }
 0x548   :  { %4144 = vmatpush2.bf16.msra.mxu0 %v2551_v23  ;;  %v441_v23 = vld [vmem:[#allocation2 + $0xb0] sm:$0xff] }
 0x549   :  { %4185 = vmatpush2.bf16.msra.mxu1 %v2679_v15  ;;  %4145 = vmatprep.subr.bf16.mxu0 %v2544_v19  ;;  %v505_v15 = vld [vmem:[#allocation2 + $0x2b0] sm:$0xff] }
 0x54a   :  { %4186 = vmatprep.subr.bf16.mxu1 %v2672_v22 }
 0x54c   :  { %4146 = vmatpush2.bf16.msra.mxu0 %v2543_v47  ;;  %v1233_v47 = vunpack.c.h.s8.bf16 %v441_v23 }
 0x54d   :  { %4187 = vmatpush2.bf16.msra.mxu1 %v2671_v45  ;;  %4147 = vmatprep.subr.bf16.mxu0 %v2536_v25  ;;  %v1361_v45 = vunpack.c.h.s8.bf16 %v505_v15 }
 0x54e   :  { %4188 = vmatprep.subr.bf16.mxu1 %v2664_v28 }
 0x550   :  { %4148 = vmatpush2.bf16.msra.mxu0 %v2535_v31  ;;  %v434_v31 = vld [vmem:[#allocation2 + $0x78] sm:$0xff] }
 0x551   :  { %4189 = vmatpush2.bf16.msra.mxu1 %v2663_v33  ;;  %4199 = vmatprep.subr.bf16.mxu0 %v1250_v36  ;;  %v1218_v33 = vunpack.c.h.s8.bf16 %v434_v31 }
 0x552   :  { %4240 = vmatprep.subr.bf16.mxu1 %v1378_v32  ;;  %v433_v32 = vld [vmem:[#allocation2 + $0x70] sm:$0xff] }
 0x553   :  { %v3905_v56 = vpop.f32.mrf.mxu0  ;;  %4150 = vmatmul.mubr.bf16.vlgmr.msra.gmra.mxu0 %v6914_v49  ;;  %v1217_v48 = vunpack.c.h.s8.bf16 %v433_v32  ;;  %v1209_v2 = vunpack.c.l.s8.bf16 %v433_v32 }
 0x554   :  { %v3946_v3 = vpop.f32.mrf.mxu1  ;;  %4191 = vmatmul.mubr.bf16.vlgmr.msra.gmra.mxu1 %v6918_v50  ;;  %v3906_v7 = vadd.f32 %v3905_v56, %v7029_v6  ;;  %4200 = vmatpush1.bf16.msra.mxu0 %v1249_v51  ;;  %v1345_v51 = vunpack.c.h.s8.bf16 %v497_v37  ;;  %v1337_v56 = vunpack.c.l.s8.bf16 %v497_v37  ;;  %v473_v37 = vld [vmem:[#allocation2 + $0x1b0] sm:$0xff] }
 0x555   :  { %4241 = vmatpush1.bf16.msra.mxu1 %v1377_v61  ;;  %v3907_v34 = vpop.f32.mrf.mxu0  ;;  %4201 = vmatprep.subr.bf16.mxu0 %v1242_v52  ;;  %v1210_v61 = vunpack.c.l.s8.bf16 %v434_v31 }
 0x556   :  { %v3948_v11 = vpop.f32.mrf.mxu1  ;;  %4242 = vmatprep.subr.bf16.mxu1 %v1370_v38  ;;  %v7039_v19 = vadd.f32 %v3946_v3, %v3906_v7  ;;  %v3908_v22 = vadd.f32 %v3907_v34, %v7034_v14  ;;  %4231 = vmatprep.mubr.bf16.mxu0 %v6749_v53  ;;  %v498_v14 = vld [vmem:[#allocation2 + $0x278] sm:$0xff]  ;;  %v1225_v53 = vunpack.c.l.s8.bf16 %v441_v23  ;;  %v1330_v7 = vunpack.c.h.s8.bf16 %v490_v39 }
 0x557   :  { %4272 = vmatprep.mubr.bf16.mxu1 %v6754_v55  ;;  %v3909_v6 = vpop.f32.mrf.mxu0  ;;  %v1353_v55 = vunpack.c.l.s8.bf16 %v505_v15  ;;  %v1346_v36 = vunpack.c.h.s8.bf16 %v498_v14  ;;  %v1338_v52 = vunpack.c.l.s8.bf16 %v498_v14  ;;  %v426_v38 = vld [vmem:[#allocation2 + $0x38] sm:$0xff] }
 0x558   :  { %v3950_v24 = vpop.f32.mrf.mxu1  ;;  %v7044_v29 = vadd.f32 %v3948_v11, %v3908_v22  ;;  %4202 = vmatpush1.bf16.msra.mxu0 %v1241_v17  ;;  %v1202_v3 = vunpack.c.h.s8.bf16 %v426_v38  ;;  %v425_v17 = vld [vmem:[#allocation2 + $0x30] sm:$0xff]  ;;  %v482_v23 = vld [vmem:[#allocation2 + $0x1f8] sm:$0xff] }
 0x559   :  { %4243 = vmatpush1.bf16.msra.mxu1 %v1369_v43  ;;  %v3910_v25 = vpop.f32.mrf.mxu0  ;;  %4203 = vmatprep.subr.bf16.mxu0 %v1234_v16  ;;  %v489_v43 = vld [vmem:[#allocation2 + $0x230] sm:$0xff]  ;;  %v1201_v34 = vunpack.c.h.s8.bf16 %v425_v17  ;;  %v1194_v16 = vunpack.c.l.s8.bf16 %v426_v38  ;;  %v546_v15 = vld [vmem:[#allocation2 + $0x3f8] sm:$0xff]  ;;  %v1193_v22 = vunpack.c.l.s8.bf16 %v425_v17  ;;  %v1314_v24 = vunpack.c.h.s8.bf16 %v482_v23 }
 0x55a   :  { %v3951_v28 = vpop.f32.mrf.mxu1  ;;  %4244 = vmatprep.subr.bf16.mxu1 %v1362_v18  ;;  %v1329_v11 = vunpack.c.h.s8.bf16 %v489_v43  ;;  %v1322_v18 = vunpack.c.l.s8.bf16 %v490_v39  ;;  %v1321_v6 = vunpack.c.l.s8.bf16 %v489_v43  ;;  %v545_v25 = vld [vmem:[#allocation2 + $0x3f0] sm:$0xff]  ;;  %v1434_v31 = vunpack.c.l.s8.bf16 %v546_v15  ;;  %v474_v14 = vld [vmem:[#allocation2 + $0x1b8] sm:$0xff] }
 0x55b   :  { %v466_v39 = vld [vmem:[#allocation2 + $0x178] sm:$0xff]  ;;  %v465_v43 = vld [vmem:[#allocation2 + $0x170] sm:$0xff] }
 0x55c   :  { %4204 = vmatpush1.bf16.msra.mxu0 %v1233_v47  ;;  %v1442_v47 = vunpack.c.h.s8.bf16 %v546_v15  ;;  %v458_v15 = vld [vmem:[#allocation2 + $0x138] sm:$0xff] }
 0x55d   :  { %4245 = vmatpush1.bf16.msra.mxu1 %v1361_v45  ;;  %4205 = vmatprep.subr.bf16.mxu0 %v1226_v30  ;;  %v481_v45 = vld [vmem:[#allocation2 + $0x1f0] sm:$0xff]  ;;  %v1441_v30 = vunpack.c.h.s8.bf16 %v545_v25 }
 0x55e   :  { %4246 = vmatprep.subr.bf16.mxu1 %v1354_v27  ;;  %v1313_v28 = vunpack.c.h.s8.bf16 %v481_v45  ;;  %v1306_v27 = vunpack.c.l.s8.bf16 %v482_v23 }
 0x560   :  { %4206 = vmatpush1.bf16.msra.mxu0 %v1225_v53  ;;  %v538_v53 = vld [vmem:[#allocation2 + $0x3b8] sm:$0xff] }
 0x561   :  { %4247 = vmatpush1.bf16.msra.mxu1 %v1353_v55  ;;  %4207 = vmatprep.subr.bf16.mxu0 %v1218_v33  ;;  %v1305_v55 = vunpack.c.l.s8.bf16 %v481_v45  ;;  %v1433_v33 = vunpack.c.l.s8.bf16 %v545_v25  ;;  %v1426_v32 = vunpack.c.h.s8.bf16 %v538_v53  ;;  %v1418_v38 = vunpack.c.l.s8.bf16 %v538_v53  ;;  %v457_v25 = vld [vmem:[#allocation2 + $0x130] sm:$0xff]  ;;  %v578_v53 = vld [vmem:[#allocation2 + $0x4f8] sm:$0xff] }
 0x562   :  { %4248 = vmatprep.subr.bf16.mxu1 %v1346_v36  ;;  %v1298_v36 = vunpack.c.h.s8.bf16 %v474_v14 }
 0x564   :  { %4208 = vmatpush1.bf16.msra.mxu0 %v1217_v48  ;;  %v537_v48 = vld [vmem:[#allocation2 + $0x3b0] sm:$0xff] }
 0x565   :  { %4249 = vmatpush1.bf16.msra.mxu1 %v1345_v51  ;;  %4209 = vmatprep.subr.bf16.mxu0 %v1210_v61  ;;  %v1297_v51 = vunpack.c.h.s8.bf16 %v473_v37  ;;  %v1425_v61 = vunpack.c.h.s8.bf16 %v537_v48 }
 0x566   :  { %4250 = vmatprep.subr.bf16.mxu1 %v1338_v52  ;;  %v1290_v52 = vunpack.c.l.s8.bf16 %v474_v14 }
 0x568   :  { %4210 = vmatpush1.bf16.msra.mxu0 %v1209_v2  ;;  %v530_v2 = vld [vmem:[#allocation2 + $0x378] sm:$0xff] }
 0x569   :  { %4251 = vmatpush1.bf16.msra.mxu1 %v1337_v56  ;;  %4211 = vmatprep.subr.bf16.mxu0 %v1202_v3  ;;  %v1289_v56 = vunpack.c.l.s8.bf16 %v473_v37  ;;  %v1417_v3 = vunpack.c.l.s8.bf16 %v537_v48  ;;  %v1410_v17 = vunpack.c.h.s8.bf16 %v530_v2  ;;  %v1402_v23 = vunpack.c.l.s8.bf16 %v530_v2  ;;  %v577_v48 = vld [vmem:[#allocation2 + $0x4f0] sm:$0xff]  ;;  %v570_v2 = vld [vmem:[#allocation2 + $0x4b8] sm:$0xff] }
 0x56a   :  { %4252 = vmatprep.subr.bf16.mxu1 %v1330_v7  ;;  %v1282_v7 = vunpack.c.h.s8.bf16 %v466_v39 }
 0x56c   :  { %4212 = vmatpush1.bf16.msra.mxu0 %v1201_v34  ;;  %v529_v34 = vld [vmem:[#allocation2 + $0x370] sm:$0xff] }
 0x56d   :  { %4253 = vmatpush1.bf16.msra.mxu1 %v1329_v11  ;;  %4213 = vmatprep.subr.bf16.mxu0 %v1194_v16  ;;  %v1281_v11 = vunpack.c.h.s8.bf16 %v465_v43  ;;  %v1409_v16 = vunpack.c.h.s8.bf16 %v529_v34 }
 0x56e   :  { %4254 = vmatprep.subr.bf16.mxu1 %v1322_v18  ;;  %v1274_v18 = vunpack.c.l.s8.bf16 %v466_v39 }
 0x570   :  { %4214 = vmatpush1.bf16.msra.mxu0 %v1193_v22  ;;  %v522_v22 = vld [vmem:[#allocation2 + $0x338] sm:$0xff] }
 0x571   :  { %4255 = vmatpush1.bf16.msra.mxu1 %v1321_v6  ;;  %4215 = vmatprep.subr.bf16.mxu0 %v1314_v24  ;;  %v1273_v6 = vunpack.c.l.s8.bf16 %v465_v43  ;;  %v1401_v24 = vunpack.c.l.s8.bf16 %v529_v34  ;;  %v1394_v45 = vunpack.c.h.s8.bf16 %v522_v22  ;;  %v1386_v14 = vunpack.c.l.s8.bf16 %v522_v22  ;;  %v633_v22 = vld [vmem:[#allocation2 + $0x6b0] sm:$0xff] }
 0x572   :  { %4256 = vmatprep.subr.bf16.mxu1 %v1442_v47  ;;  %v1266_v47 = vunpack.c.h.s8.bf16 %v458_v15  ;;  %v1497_v43 = vunpack.c.l.s8.bf16 %v577_v48 }
 0x574   :  { %4216 = vmatpush2.bf16.msra.mxu0 %v1313_v28  ;;  %v521_v28 = vld [vmem:[#allocation2 + $0x330] sm:$0xff] }
 0x575   :  { %4257 = vmatpush2.bf16.msra.mxu1 %v1441_v30  ;;  %4217 = vmatprep.subr.bf16.mxu0 %v1306_v27  ;;  %v1265_v30 = vunpack.c.h.s8.bf16 %v457_v25  ;;  %v1393_v27 = vunpack.c.h.s8.bf16 %v521_v28 }
 0x576   :  { %4258 = vmatprep.subr.bf16.mxu1 %v1434_v31  ;;  %v1258_v31 = vunpack.c.l.s8.bf16 %v458_v15  ;;  %v569_v15 = vld [vmem:[#allocation2 + $0x4b0] sm:$0xff] }
 0x578   :  { %4218 = vmatpush2.bf16.msra.mxu0 %v1305_v55  ;;  %v642_v55 = vld [vmem:[#allocation2 + $0x6f8] sm:$0xff] }
 0x579   :  { %4259 = vmatpush2.bf16.msra.mxu1 %v1433_v33  ;;  %4219 = vmatprep.subr.bf16.mxu0 %v1298_v36  ;;  %v1257_v33 = vunpack.c.l.s8.bf16 %v457_v25  ;;  %v1385_v36 = vunpack.c.l.s8.bf16 %v521_v28  ;;  %v1634_v37 = vunpack.c.h.s8.bf16 %v642_v55  ;;  %v1626_v39 = vunpack.c.l.s8.bf16 %v642_v55  ;;  %v561_v55 = vld [vmem:[#allocation2 + $0x470] sm:$0xff] }
 0x57a   :  { %4260 = vmatprep.subr.bf16.mxu1 %v1426_v32  ;;  %v1506_v32 = vunpack.c.h.s8.bf16 %v578_v53 }
 0x57c   :  { %4220 = vmatpush2.bf16.msra.mxu0 %v1297_v51  ;;  %v641_v51 = vld [vmem:[#allocation2 + $0x6f0] sm:$0xff] }
 0x57d   :  { %4261 = vmatpush2.bf16.msra.mxu1 %v1425_v61  ;;  %4221 = vmatprep.subr.bf16.mxu0 %v1290_v52  ;;  %v1505_v61 = vunpack.c.h.s8.bf16 %v577_v48  ;;  %v1633_v52 = vunpack.c.h.s8.bf16 %v641_v51  ;;  %v1625_v34 = vunpack.c.l.s8.bf16 %v641_v51  ;;  %v554_v51 = vld [vmem:[#allocation2 + $0x438] sm:$0xff] }
 0x57e   :  { %4262 = vmatprep.subr.bf16.mxu1 %v1418_v38  ;;  %v1498_v38 = vunpack.c.l.s8.bf16 %v578_v53 }
 0x580   :  { %4222 = vmatpush2.bf16.msra.mxu0 %v1289_v56  ;;  %v634_v56 = vld [vmem:[#allocation2 + $0x6b8] sm:$0xff] }
 0x581   :  { %4263 = vmatpush2.bf16.msra.mxu1 %v1417_v3  ;;  %4223 = vmatprep.subr.bf16.mxu0 %v1282_v7 }
 0x582   :  { %4264 = vmatprep.subr.bf16.mxu1 %v1410_v17 }
 0x584   :  { %4224 = vmatpush2.bf16.msra.mxu0 %v1281_v11 }
 0x585   :  { %4265 = vmatpush2.bf16.msra.mxu1 %v1409_v16  ;;  %4225 = vmatprep.subr.bf16.mxu0 %v1274_v18  ;;  %v1490_v18 = vunpack.c.h.s8.bf16 %v570_v2 }
 0x586   :  { %4266 = vmatprep.subr.bf16.mxu1 %v1402_v23  ;;  %v1618_v23 = vunpack.c.h.s8.bf16 %v634_v56 }
 0x588   :  { %4226 = vmatpush2.bf16.msra.mxu0 %v1273_v6 }
 0x589   :  { %4267 = vmatpush2.bf16.msra.mxu1 %v1401_v24  ;;  %4227 = vmatprep.subr.bf16.mxu0 %v1266_v47  ;;  %v1489_v47 = vunpack.c.h.s8.bf16 %v569_v15 }
 0x58a   :  { %4268 = vmatprep.subr.bf16.mxu1 %v1394_v45  ;;  %v1617_v45 = vunpack.c.h.s8.bf16 %v633_v22 }
 0x58c   :  { %4228 = vmatpush2.bf16.msra.mxu0 %v1265_v30  ;;  %v1482_v30 = vunpack.c.l.s8.bf16 %v570_v2 }
 0x58d   :  { %4269 = vmatpush2.bf16.msra.mxu1 %v1393_v27  ;;  %4229 = vmatprep.subr.bf16.mxu0 %v1258_v31  ;;  %v1610_v27 = vunpack.c.l.s8.bf16 %v634_v56  ;;  %v562_v31 = vld [vmem:[#allocation2 + $0x478] sm:$0xff]  ;;  %v553_v56 = vld [vmem:[#allocation2 + $0x430] sm:$0xff] }
 0x58e   :  { %4270 = vmatprep.subr.bf16.mxu1 %v1386_v14  ;;  %v1474_v14 = vunpack.c.h.s8.bf16 %v562_v31 }
 0x590   :  { %4230 = vmatpush2.bf16.msra.mxu0 %v1257_v33  ;;  %v625_v33 = vld [vmem:[#allocation2 + $0x670] sm:$0xff] }
 0x591   :  { %4271 = vmatpush2.bf16.msra.mxu1 %v1385_v36  ;;  %4281 = vmatprep.subr.bf16.mxu0 %v1506_v32  ;;  %v1473_v36 = vunpack.c.h.s8.bf16 %v561_v55  ;;  %v1601_v32 = vunpack.c.h.s8.bf16 %v625_v33 }
 0x592   :  { %4322 = vmatprep.subr.bf16.mxu1 %v1634_v37  ;;  %v1466_v37 = vunpack.c.l.s8.bf16 %v562_v31 }
 0x593   :  { %v3987_v3 = vpop.f32.mrf.mxu0  ;;  %4232 = vmatmul.mubr.bf16.vlgmr.msra.gmra.mxu0 %v6772_v0 }
 0x594   :  { %v4028_v7 = vpop.f32.mrf.mxu1  ;;  %4273 = vmatmul.mubr.bf16.vlgmr.msra.gmra.mxu1 %v6776_v1  ;;  %v3988_v17 = vadd.f32 %v3987_v3, %v7039_v19  ;;  %4282 = vmatpush1.bf16.msra.mxu0 %v1505_v61  ;;  %v618_v61 = vld [vmem:[#allocation2 + $0x638] sm:$0xff]  ;;  %v617_v3 = vld [vmem:[#allocation2 + $0x630] sm:$0xff] }
 0x595   :  { %4323 = vmatpush1.bf16.msra.mxu1 %v1633_v52  ;;  %v3989_v11 = vpop.f32.mrf.mxu0  ;;  %4283 = vmatprep.subr.bf16.mxu0 %v1498_v38  ;;  %v1465_v52 = vunpack.c.l.s8.bf16 %v561_v55  ;;  %v1593_v38 = vunpack.c.l.s8.bf16 %v625_v33  ;;  %v1586_v2 = vunpack.c.h.s8.bf16 %v618_v61 }
 0x596   :  { %v4030_v16 = vpop.f32.mrf.mxu1  ;;  %4324 = vmatprep.subr.bf16.mxu1 %v1626_v39  ;;  %v7049_v6 = vadd.f32 %v4028_v7, %v3988_v17  ;;  %v3990_v0 = vadd.f32 %v3989_v11, %v7044_v29  ;;  %4313 = vmatprep.mubr.bf16.mxu0 %v6778_v8  ;;  %v626_v29 = vld [vmem:[#allocation2 + $0x678] sm:$0xff]  ;;  %v1481_v8 = vunpack.c.l.s8.bf16 %v569_v15  ;;  %v1458_v39 = vunpack.c.h.s8.bf16 %v554_v51 }
 0x597   :  { %4354 = vmatprep.mubr.bf16.mxu1 %v6780_v9  ;;  %v3991_v1 = vpop.f32.mrf.mxu0  ;;  %v1609_v9 = vunpack.c.l.s8.bf16 %v633_v22  ;;  %v1602_v53 = vunpack.c.h.s8.bf16 %v626_v29  ;;  %v1594_v48 = vunpack.c.l.s8.bf16 %v626_v29  ;;  %v1457_v7 = vunpack.c.h.s8.bf16 %v553_v56  ;;  %v610_v11 = vld [vmem:[#allocation2 + $0x5f8] sm:$0xff] }
 0x598   :  { %v4032_v19 = vpop.f32.mrf.mxu1  ;;  %v7054_v24 = vadd.f32 %v4030_v16, %v3990_v0  ;;  %4284 = vmatpush1.bf16.msra.mxu0 %v1497_v43  ;;  %v1585_v17 = vunpack.c.h.s8.bf16 %v617_v3  ;;  %v1450_v43 = vunpack.c.l.s8.bf16 %v554_v51  ;;  %v674_v16 = vld [vmem:[#allocation2 + $0x7f8] sm:$0xff]  ;;  %v1570_v15 = vunpack.c.h.s8.bf16 %v610_v11  ;;  %v609_v0 = vld [vmem:[#allocation2 + $0x5f0] sm:$0xff] }
 0x599   :  { %4325 = vmatpush1.bf16.msra.mxu1 %v1625_v34  ;;  %v3992_v25 = vpop.f32.mrf.mxu0  ;;  %4285 = vmatprep.subr.bf16.mxu0 %v1490_v18  ;;  %v1578_v34 = vunpack.c.l.s8.bf16 %v618_v61  ;;  %v1449_v18 = vunpack.c.l.s8.bf16 %v553_v56  ;;  %v1698_v22 = vunpack.c.h.s8.bf16 %v674_v16  ;;  %v673_v1 = vld [vmem:[#allocation2 + $0x7f0] sm:$0xff]  ;;  %v1569_v19 = vunpack.c.h.s8.bf16 %v609_v0 }
 0x59a   :  { %v4033_v28 = vpop.f32.mrf.mxu1  ;;  %4326 = vmatprep.subr.bf16.mxu1 %v1618_v23  ;;  %v1577_v23 = vunpack.c.l.s8.bf16 %v617_v3  ;;  %v1690_v25 = vunpack.c.l.s8.bf16 %v674_v16  ;;  %v1689_v31 = vunpack.c.l.s8.bf16 %v673_v1 }
 0x59b   :  { %v602_v28 = vld [vmem:[#allocation2 + $0x5b8] sm:$0xff] }
 0x59c   :  { %4286 = vmatpush1.bf16.msra.mxu0 %v1489_v47  ;;  %v1697_v47 = vunpack.c.h.s8.bf16 %v673_v1  ;;  %v1554_v29 = vunpack.c.h.s8.bf16 %v602_v28  ;;  %v1546_v33 = vunpack.c.l.s8.bf16 %v602_v28 }
 0x59d   :  { %4327 = vmatpush1.bf16.msra.mxu1 %v1617_v45  ;;  %4287 = vmatprep.subr.bf16.mxu0 %v1482_v30  ;;  %v1562_v45 = vunpack.c.l.s8.bf16 %v610_v11  ;;  %v666_v30 = vld [vmem:[#allocation2 + $0x7b8] sm:$0xff] }
 0x59e   :  { %4328 = vmatprep.subr.bf16.mxu1 %v1610_v27  ;;  %v1561_v27 = vunpack.c.l.s8.bf16 %v609_v0 }
 0x5a0   :  { %4288 = vmatpush1.bf16.msra.mxu0 %v1481_v8  ;;  %v1682_v8 = vunpack.c.h.s8.bf16 %v666_v30 }
 0x5a1   :  { %4329 = vmatpush1.bf16.msra.mxu1 %v1609_v9  ;;  %4289 = vmatprep.subr.bf16.mxu0 %v1474_v14  ;;  %v601_v9 = vld [vmem:[#allocation2 + $0x5b0] sm:$0xff] }
 0x5a2   :  { %4330 = vmatprep.subr.bf16.mxu1 %v1602_v53  ;;  %v665_v14 = vld [vmem:[#allocation2 + $0x7b0] sm:$0xff]  ;;  %v1553_v53 = vunpack.c.h.s8.bf16 %v601_v9 }
 0x5a3   :  { %v1681_v55 = vunpack.c.h.s8.bf16 %v665_v14  ;;  %v1673_v51 = vunpack.c.l.s8.bf16 %v665_v14 }
 0x5a4   :  { %4290 = vmatpush1.bf16.msra.mxu0 %v1473_v36  ;;  %v1674_v36 = vunpack.c.l.s8.bf16 %v666_v30 }
 0x5a5   :  { %4331 = vmatpush1.bf16.msra.mxu1 %v1601_v32  ;;  %4291 = vmatprep.subr.bf16.mxu0 %v1466_v37  ;;  %v594_v32 = vld [vmem:[#allocation2 + $0x578] sm:$0xff] }
 0x5a6   :  { %4332 = vmatprep.subr.bf16.mxu1 %v1594_v48  ;;  %v658_v37 = vld [vmem:[#allocation2 + $0x778] sm:$0xff]  ;;  %v1545_v48 = vunpack.c.l.s8.bf16 %v601_v9  ;;  %v1538_v61 = vunpack.c.h.s8.bf16 %v594_v32  ;;  %v1530_v3 = vunpack.c.l.s8.bf16 %v594_v32 }
 0x5a8   :  { %4292 = vmatpush1.bf16.msra.mxu0 %v1465_v52  ;;  %v1666_v52 = vunpack.c.h.s8.bf16 %v658_v37 }
 0x5a9   :  { %4333 = vmatpush1.bf16.msra.mxu1 %v1593_v38  ;;  %4293 = vmatprep.subr.bf16.mxu0 %v1458_v39  ;;  %v593_v38 = vld [vmem:[#allocation2 + $0x570] sm:$0xff] }
 0x5aa   :  { %4334 = vmatprep.subr.bf16.mxu1 %v1586_v2  ;;  %v657_v39 = vld [vmem:[#allocation2 + $0x770] sm:$0xff]  ;;  %v1537_v2 = vunpack.c.h.s8.bf16 %v593_v38 }
 0x5ab   :  { %v1665_v56 = vunpack.c.h.s8.bf16 %v657_v39  ;;  %v1657_v11 = vunpack.c.l.s8.bf16 %v657_v39 }
 0x5ac   :  { %4294 = vmatpush1.bf16.msra.mxu0 %v1457_v7  ;;  %v1658_v7 = vunpack.c.l.s8.bf16 %v658_v37 }
 0x5ad   :  { %4335 = vmatpush1.bf16.msra.mxu1 %v1585_v17  ;;  %4295 = vmatprep.subr.bf16.mxu0 %v1450_v43  ;;  %v586_v17 = vld [vmem:[#allocation2 + $0x538] sm:$0xff] }
 0x5ae   :  { %4336 = vmatprep.subr.bf16.mxu1 %v1578_v34  ;;  %v650_v43 = vld [vmem:[#allocation2 + $0x738] sm:$0xff]  ;;  %v1529_v34 = vunpack.c.l.s8.bf16 %v593_v38  ;;  %v1522_v16 = vunpack.c.h.s8.bf16 %v586_v17  ;;  %v1514_v1 = vunpack.c.l.s8.bf16 %v586_v17 }
 0x5b0   :  { %4296 = vmatpush1.bf16.msra.mxu0 %v1449_v18  ;;  %v1650_v18 = vunpack.c.h.s8.bf16 %v650_v43 }
 0x5b1   :  { %4337 = vmatpush1.bf16.msra.mxu1 %v1577_v23  ;;  %4297 = vmatprep.subr.bf16.mxu0 %v1570_v15  ;;  %v585_v23 = vld [vmem:[#allocation2 + $0x530] sm:$0xff] }
 0x5b2   :  { %4338 = vmatprep.subr.bf16.mxu1 %v1698_v22  ;;  %v649_v15 = vld [vmem:[#allocation2 + $0x730] sm:$0xff]  ;;  %v1521_v22 = vunpack.c.h.s8.bf16 %v585_v23 }
 0x5b3   :  { %v1649_v0 = vunpack.c.h.s8.bf16 %v649_v15  ;;  %v1641_v28 = vunpack.c.l.s8.bf16 %v649_v15 }
 0x5b4   :  { %4298 = vmatpush2.bf16.msra.mxu0 %v1569_v19  ;;  %v1642_v19 = vunpack.c.l.s8.bf16 %v650_v43 }
 0x5b5   :  { %4339 = vmatpush2.bf16.msra.mxu1 %v1697_v47  ;;  %4299 = vmatprep.subr.bf16.mxu0 %v1562_v45  ;;  %v706_v47 = vld [vmem:[#allocation2 + $0x8f8] sm:$0xff] }
 0x5b6   :  { %4340 = vmatprep.subr.bf16.mxu1 %v1690_v25  ;;  %v770_v45 = vld [vmem:[#allocation2 + $0xaf8] sm:$0xff]  ;;  %v1513_v25 = vunpack.c.l.s8.bf16 %v585_v23  ;;  %v1762_v30 = vunpack.c.h.s8.bf16 %v706_v47  ;;  %v1754_v14 = vunpack.c.l.s8.bf16 %v706_v47 }
 0x5b7   :  { %v690_v23 = vld [vmem:[#allocation2 + $0x878] sm:$0xff] }
 0x5b8   :  { %4300 = vmatpush2.bf16.msra.mxu0 %v1561_v27  ;;  %v1890_v27 = vunpack.c.h.s8.bf16 %v770_v45  ;;  %v1730_v15 = vunpack.c.h.s8.bf16 %v690_v23 }
 0x5b9   :  { %4341 = vmatpush2.bf16.msra.mxu1 %v1689_v31  ;;  %4301 = vmatprep.subr.bf16.mxu0 %v1554_v29  ;;  %v705_v31 = vld [vmem:[#allocation2 + $0x8f0] sm:$0xff] }
 0x5ba   :  { %4342 = vmatprep.subr.bf16.mxu1 %v1682_v8  ;;  %v769_v29 = vld [vmem:[#allocation2 + $0xaf0] sm:$0xff]  ;;  %v1761_v8 = vunpack.c.h.s8.bf16 %v705_v31 }
 0x5bb   :  { %v1889_v9 = vunpack.c.h.s8.bf16 %v769_v29 }
 0x5bc   :  { %4302 = vmatpush2.bf16.msra.mxu0 %v1553_v53  ;;  %v1882_v53 = vunpack.c.l.s8.bf16 %v770_v45  ;;  %v1722_v45 = vunpack.c.l.s8.bf16 %v690_v23  ;;  %v793_v23 = vld [vmem:[#allocation2 + $0xbb0] sm:$0xff] }
 0x5bd   :  { %4343 = vmatpush2.bf16.msra.mxu1 %v1681_v55  ;;  %4303 = vmatprep.subr.bf16.mxu0 %v1546_v33  ;;  %v698_v55 = vld [vmem:[#allocation2 + $0x8b8] sm:$0xff] }
 0x5be   :  { %4344 = vmatprep.subr.bf16.mxu1 %v1674_v36  ;;  %v762_v33 = vld [vmem:[#allocation2 + $0xab8] sm:$0xff]  ;;  %v1746_v38 = vunpack.c.h.s8.bf16 %v698_v55 }
 0x5bf   :  { %v1874_v39 = vunpack.c.h.s8.bf16 %v762_v33 }
 0x5c0   :  { %4304 = vmatpush2.bf16.msra.mxu0 %v1545_v48  ;;  %v1753_v48 = vunpack.c.l.s8.bf16 %v705_v31 }
 0x5c1   :  { %4345 = vmatpush2.bf16.msra.mxu1 %v1673_v51  ;;  %4305 = vmatprep.subr.bf16.mxu0 %v1538_v61  ;;  %v1881_v51 = vunpack.c.l.s8.bf16 %v769_v29 }
 0x5c2   :  { %4346 = vmatprep.subr.bf16.mxu1 %v1666_v52 }
 0x5c4   :  { %4306 = vmatpush2.bf16.msra.mxu0 %v1537_v2  ;;  %v697_v2 = vld [vmem:[#allocation2 + $0x8b0] sm:$0xff] }
 0x5c5   :  { %4347 = vmatpush2.bf16.msra.mxu1 %v1665_v56  ;;  %4307 = vmatprep.subr.bf16.mxu0 %v1530_v3  ;;  %v761_v56 = vld [vmem:[#allocation2 + $0xab0] sm:$0xff]  ;;  %v1745_v17 = vunpack.c.h.s8.bf16 %v697_v2 }
 0x5c6   :  { %4348 = vmatprep.subr.bf16.mxu1 %v1658_v7  ;;  %v1873_v43 = vunpack.c.h.s8.bf16 %v761_v56 }
 0x5c8   :  { %4308 = vmatpush2.bf16.msra.mxu0 %v1529_v34 }
 0x5c9   :  { %4349 = vmatpush2.bf16.msra.mxu1 %v1657_v11  ;;  %4309 = vmatprep.subr.bf16.mxu0 %v1522_v16  ;;  %v1738_v16 = vunpack.c.l.s8.bf16 %v698_v55 }
 0x5ca   :  { %4350 = vmatprep.subr.bf16.mxu1 %v1650_v18  ;;  %v1866_v18 = vunpack.c.l.s8.bf16 %v762_v33 }
 0x5cc   :  { %4310 = vmatpush2.bf16.msra.mxu0 %v1521_v22 }
 0x5cd   :  { %4351 = vmatpush2.bf16.msra.mxu1 %v1649_v0  ;;  %4311 = vmatprep.subr.bf16.mxu0 %v1514_v1  ;;  %v689_v0 = vld [vmem:[#allocation2 + $0x870] sm:$0xff] }
 0x5ce   :  { %4352 = vmatprep.subr.bf16.mxu1 %v1642_v19  ;;  %v753_v1 = vld [vmem:[#allocation2 + $0xa70] sm:$0xff]  ;;  %v1729_v19 = vunpack.c.h.s8.bf16 %v689_v0 }
 0x5cf   :  { %v1857_v47 = vunpack.c.h.s8.bf16 %v753_v1  ;;  %v1849_v31 = vunpack.c.l.s8.bf16 %v753_v1 }
 0x5d0   :  { %4312 = vmatpush2.bf16.msra.mxu0 %v1513_v25 }
 0x5d1   :  { %4353 = vmatpush2.bf16.msra.mxu1 %v1641_v28  ;;  %4363 = vmatprep.subr.bf16.mxu0 %v1762_v30  ;;  %v682_v28 = vld [vmem:[#allocation2 + $0x838] sm:$0xff] }
 0x5d2   :  { %4404 = vmatprep.subr.bf16.mxu1 %v1890_v27  ;;  %v746_v30 = vld [vmem:[#allocation2 + $0xa38] sm:$0xff]  ;;  %v1721_v27 = vunpack.c.l.s8.bf16 %v689_v0  ;;  %v1714_v29 = vunpack.c.h.s8.bf16 %v682_v28  ;;  %v1706_v33 = vunpack.c.l.s8.bf16 %v682_v28  ;;  %v785_v28 = vld [vmem:[#allocation2 + $0xb70] sm:$0xff] }
 0x5d3   :  { %v4069_v36 = vpop.f32.mrf.mxu0  ;;  %4314 = vmatmul.mubr.bf16.vlgmr.msra.gmra.mxu0 %v6801_v58  ;;  %v786_v0 = vld [vmem:[#allocation2 + $0xb78] sm:$0xff] }
 0x5d4   :  { %v4110_v32 = vpop.f32.mrf.mxu1  ;;  %4355 = vmatmul.mubr.bf16.vlgmr.msra.gmra.mxu1 %v6805_v59  ;;  %v4070_v37 = vadd.f32 %v4069_v36, %v7049_v6  ;;  %4364 = vmatpush1.bf16.msra.mxu0 %v1761_v8  ;;  %v1842_v8 = vunpack.c.h.s8.bf16 %v746_v30  ;;  %v1834_v36 = vunpack.c.l.s8.bf16 %v746_v30 }
 0x5d5   :  { %4405 = vmatpush1.bf16.msra.mxu1 %v1889_v9  ;;  %v4071_v61 = vpop.f32.mrf.mxu0  ;;  %4365 = vmatprep.subr.bf16.mxu0 %v1754_v14  ;;  %v681_v9 = vld [vmem:[#allocation2 + $0x830] sm:$0xff] }
 0x5d6   :  { %v4112_v52 = vpop.f32.mrf.mxu1  ;;  %4406 = vmatprep.subr.bf16.mxu1 %v1882_v53  ;;  %v7059_v3 = vadd.f32 %v4110_v32, %v4070_v37  ;;  %v4072_v58 = vadd.f32 %v4071_v61, %v7054_v24  ;;  %4395 = vmatprep.mubr.bf16.mxu0 %v6807_v4  ;;  %v754_v24 = vld [vmem:[#allocation2 + $0xa78] sm:$0xff]  ;;  %v1737_v4 = vunpack.c.l.s8.bf16 %v697_v2  ;;  %v745_v14 = vld [vmem:[#allocation2 + $0xa30] sm:$0xff]  ;;  %v1713_v53 = vunpack.c.h.s8.bf16 %v681_v9 }
 0x5d7   :  { %4436 = vmatprep.mubr.bf16.mxu1 %v6809_v5  ;;  %v4073_v59 = vpop.f32.mrf.mxu0  ;;  %v1865_v5 = vunpack.c.l.s8.bf16 %v761_v56  ;;  %v1858_v22 = vunpack.c.h.s8.bf16 %v754_v24  ;;  %v1850_v25 = vunpack.c.l.s8.bf16 %v754_v24  ;;  %v1841_v55 = vunpack.c.h.s8.bf16 %v745_v14  ;;  %v738_v32 = vld [vmem:[#allocation2 + $0x9f8] sm:$0xff] }
 0x5d8   :  { %v4114_v6 = vpop.f32.mrf.mxu1  ;;  %v7064_v7 = vadd.f32 %v4112_v52, %v4072_v58  ;;  %4366 = vmatpush1.bf16.msra.mxu0 %v1753_v48  ;;  %v802_v37 = vld [vmem:[#allocation2 + $0xbf8] sm:$0xff]  ;;  %v1705_v48 = vunpack.c.l.s8.bf16 %v681_v9  ;;  %v1826_v61 = vunpack.c.h.s8.bf16 %v738_v32  ;;  %v1818_v58 = vunpack.c.l.s8.bf16 %v738_v32  ;;  %v777_v32 = vld [vmem:[#allocation2 + $0xb30] sm:$0xff] }
 0x5d9   :  { %4407 = vmatpush1.bf16.msra.mxu1 %v1881_v51  ;;  %v4074_v34 = vpop.f32.mrf.mxu0  ;;  %4367 = vmatprep.subr.bf16.mxu0 %v1746_v38  ;;  %v1833_v51 = vunpack.c.l.s8.bf16 %v745_v14  ;;  %v1954_v52 = vunpack.c.h.s8.bf16 %v802_v37  ;;  %v737_v38 = vld [vmem:[#allocation2 + $0x9f0] sm:$0xff]  ;;  %v1946_v59 = vunpack.c.l.s8.bf16 %v802_v37  ;;  %v730_v6 = vld [vmem:[#allocation2 + $0x9b8] sm:$0xff] }
 0x5da   :  { %v4115_v11 = vpop.f32.mrf.mxu1  ;;  %4408 = vmatprep.subr.bf16.mxu1 %v1874_v39  ;;  %v801_v39 = vld [vmem:[#allocation2 + $0xbf0] sm:$0xff]  ;;  %v1825_v2 = vunpack.c.h.s8.bf16 %v737_v38  ;;  %v778_v9 = vld [vmem:[#allocation2 + $0xb38] sm:$0xff] }
 0x5db   :  { %v1953_v56 = vunpack.c.h.s8.bf16 %v801_v39  ;;  %v1945_v34 = vunpack.c.l.s8.bf16 %v801_v39  ;;  %v1810_v11 = vunpack.c.h.s8.bf16 %v730_v6 }
 0x5dc   :  { %4368 = vmatpush1.bf16.msra.mxu0 %v1745_v17  ;;  %v794_v17 = vld [vmem:[#allocation2 + $0xbb8] sm:$0xff] }
 0x5dd   :  { %4409 = vmatpush1.bf16.msra.mxu1 %v1873_v43  ;;  %4369 = vmatprep.subr.bf16.mxu0 %v1738_v16  ;;  %v1817_v43 = vunpack.c.l.s8.bf16 %v737_v38  ;;  %v1938_v16 = vunpack.c.h.s8.bf16 %v794_v17  ;;  %v898_v38 = vld [vmem:[#allocation2 + $0xef8] sm:$0xff] }
 0x5de   :  { %4410 = vmatprep.subr.bf16.mxu1 %v1866_v18  ;;  %v729_v18 = vld [vmem:[#allocation2 + $0x9b0] sm:$0xff] }
 0x5df   :  { %v1809_v24 = vunpack.c.h.s8.bf16 %v729_v18  ;;  %v1801_v1 = vunpack.c.l.s8.bf16 %v729_v18  ;;  %v890_v18 = vld [vmem:[#allocation2 + $0xeb8] sm:$0xff] }
 0x5e0   :  { %4370 = vmatpush1.bf16.msra.mxu0 %v1737_v4  ;;  %v1937_v4 = vunpack.c.h.s8.bf16 %v793_v23 }
 0x5e1   :  { %4411 = vmatpush1.bf16.msra.mxu1 %v1865_v5  ;;  %4371 = vmatprep.subr.bf16.mxu0 %v1730_v15  ;;  %v1802_v5 = vunpack.c.l.s8.bf16 %v730_v6  ;;  %v1930_v15 = vunpack.c.l.s8.bf16 %v794_v17  ;;  %v897_v6 = vld [vmem:[#allocation2 + $0xef0] sm:$0xff] }
 0x5e2   :  { %4412 = vmatprep.subr.bf16.mxu1 %v1858_v22  ;;  %v722_v22 = vld [vmem:[#allocation2 + $0x978] sm:$0xff] }
 0x5e4   :  { %4372 = vmatpush1.bf16.msra.mxu0 %v1729_v19  ;;  %v1929_v19 = vunpack.c.l.s8.bf16 %v793_v23 }
 0x5e5   :  { %4413 = vmatpush1.bf16.msra.mxu1 %v1857_v47  ;;  %4373 = vmatprep.subr.bf16.mxu0 %v1722_v45  ;;  %v1794_v47 = vunpack.c.h.s8.bf16 %v722_v22  ;;  %v1922_v45 = vunpack.c.h.s8.bf16 %v786_v0 }
 0x5e6   :  { %4414 = vmatprep.subr.bf16.mxu1 %v1850_v25  ;;  %v721_v25 = vld [vmem:[#allocation2 + $0x970] sm:$0xff] }
 0x5e7   :  { %v1793_v30 = vunpack.c.h.s8.bf16 %v721_v25  ;;  %v1785_v14 = vunpack.c.l.s8.bf16 %v721_v25 }
 0x5e8   :  { %4374 = vmatpush1.bf16.msra.mxu0 %v1721_v27  ;;  %v1921_v27 = vunpack.c.h.s8.bf16 %v785_v28 }
 0x5e9   :  { %4415 = vmatpush1.bf16.msra.mxu1 %v1849_v31  ;;  %4375 = vmatprep.subr.bf16.mxu0 %v1714_v29  ;;  %v1786_v31 = vunpack.c.l.s8.bf16 %v722_v22  ;;  %v1914_v29 = vunpack.c.l.s8.bf16 %v786_v0 }
 0x5ea   :  { %4416 = vmatprep.subr.bf16.mxu1 %v1842_v8  ;;  %v714_v8 = vld [vmem:[#allocation2 + $0x938] sm:$0xff] }
 0x5ec   :  { %4376 = vmatpush1.bf16.msra.mxu0 %v1713_v53  ;;  %v1913_v53 = vunpack.c.l.s8.bf16 %v785_v28 }
 0x5ed   :  { %4417 = vmatpush1.bf16.msra.mxu1 %v1841_v55  ;;  %4377 = vmatprep.subr.bf16.mxu0 %v1706_v33  ;;  %v1778_v55 = vunpack.c.h.s8.bf16 %v714_v8  ;;  %v1906_v33 = vunpack.c.h.s8.bf16 %v778_v9 }
 0x5ee   :  { %4418 = vmatprep.subr.bf16.mxu1 %v1834_v36  ;;  %v713_v36 = vld [vmem:[#allocation2 + $0x930] sm:$0xff] }
 0x5ef   :  { %v1777_v37 = vunpack.c.h.s8.bf16 %v713_v36  ;;  %v1769_v39 = vunpack.c.l.s8.bf16 %v713_v36  ;;  %v881_v36 = vld [vmem:[#allocation2 + $0xe70] sm:$0xff] }
 0x5f0   :  { %4378 = vmatpush1.bf16.msra.mxu0 %v1705_v48  ;;  %v1905_v48 = vunpack.c.h.s8.bf16 %v777_v32 }
 0x5f1   :  { %4419 = vmatpush1.bf16.msra.mxu1 %v1833_v51  ;;  %4379 = vmatprep.subr.bf16.mxu0 %v1826_v61  ;;  %v1770_v51 = vunpack.c.l.s8.bf16 %v714_v8  ;;  %v1898_v61 = vunpack.c.l.s8.bf16 %v778_v9  ;;  %v2122_v9 = vunpack.c.l.s8.bf16 %v890_v18 }
 0x5f2   :  { %4420 = vmatprep.subr.bf16.mxu1 %v1954_v52  ;;  %v834_v52 = vld [vmem:[#allocation2 + $0xcf8] sm:$0xff] }
 0x5f4   :  { %4380 = vmatpush2.bf16.msra.mxu0 %v1825_v2  ;;  %v1897_v2 = vunpack.c.l.s8.bf16 %v777_v32 }
 0x5f5   :  { %4421 = vmatpush2.bf16.msra.mxu1 %v1953_v56  ;;  %4381 = vmatprep.subr.bf16.mxu0 %v1818_v58  ;;  %v2018_v56 = vunpack.c.h.s8.bf16 %v834_v52  ;;  %v2146_v58 = vunpack.c.h.s8.bf16 %v898_v38 }
 0x5f6   :  { %4422 = vmatprep.subr.bf16.mxu1 %v1946_v59  ;;  %v833_v59 = vld [vmem:[#allocation2 + $0xcf0] sm:$0xff] }
 0x5f7   :  { %v2017_v17 = vunpack.c.h.s8.bf16 %v833_v59 }
 0x5f8   :  { %4382 = vmatpush2.bf16.msra.mxu0 %v1817_v43  ;;  %v2145_v43 = vunpack.c.h.s8.bf16 %v897_v6 }
 0x5f9   :  { %4423 = vmatpush2.bf16.msra.mxu1 %v1945_v34  ;;  %4383 = vmatprep.subr.bf16.mxu0 %v1810_v11  ;;  %v2010_v34 = vunpack.c.l.s8.bf16 %v834_v52  ;;  %v2138_v11 = vunpack.c.l.s8.bf16 %v898_v38  ;;  %v874_v52 = vld [vmem:[#allocation2 + $0xe38] sm:$0xff] }
 0x5fa   :  { %4424 = vmatprep.subr.bf16.mxu1 %v1938_v16  ;;  %v826_v16 = vld [vmem:[#allocation2 + $0xcb8] sm:$0xff] }
 0x5fb   :  { %v1994_v8 = vunpack.c.l.s8.bf16 %v826_v16 }
 0x5fc   :  { %4384 = vmatpush2.bf16.msra.mxu0 %v1809_v24 }
 0x5fd   :  { %4425 = vmatpush2.bf16.msra.mxu1 %v1937_v4  ;;  %4385 = vmatprep.subr.bf16.mxu0 %v1802_v5  ;;  %v2009_v5 = vunpack.c.l.s8.bf16 %v833_v59  ;;  %v873_v59 = vld [vmem:[#allocation2 + $0xe30] sm:$0xff] }
 0x5fe   :  { %4426 = vmatprep.subr.bf16.mxu1 %v1930_v15  ;;  %v2137_v15 = vunpack.c.l.s8.bf16 %v897_v6 }
 0x600   :  { %4386 = vmatpush2.bf16.msra.mxu0 %v1801_v1  ;;  %v2002_v1 = vunpack.c.h.s8.bf16 %v826_v16  ;;  %v930_v16 = vld [vmem:[#allocation2 + $0xff8] sm:$0xff] }
 0x601   :  { %4427 = vmatpush2.bf16.msra.mxu1 %v1929_v19  ;;  %4387 = vmatprep.subr.bf16.mxu0 %v1794_v47  ;;  %v2130_v19 = vunpack.c.h.s8.bf16 %v890_v18  ;;  %v825_v47 = vld [vmem:[#allocation2 + $0xcb0] sm:$0xff] }
 0x602   :  { %4428 = vmatprep.subr.bf16.mxu1 %v1922_v45  ;;  %v889_v45 = vld [vmem:[#allocation2 + $0xeb0] sm:$0xff] }
 0x604   :  { %4388 = vmatpush2.bf16.msra.mxu0 %v1793_v30  ;;  %v2001_v30 = vunpack.c.h.s8.bf16 %v825_v47 }
 0x605   :  { %4429 = vmatpush2.bf16.msra.mxu1 %v1921_v27  ;;  %4389 = vmatprep.subr.bf16.mxu0 %v1786_v31  ;;  %v2129_v27 = vunpack.c.h.s8.bf16 %v889_v45 }
 0x606   :  { %4430 = vmatprep.subr.bf16.mxu1 %v1914_v29 }
 0x608   :  { %4390 = vmatpush2.bf16.msra.mxu0 %v1785_v14  ;;  %v818_v14 = vld [vmem:[#allocation2 + $0xc78] sm:$0xff] }
 0x609   :  { %4431 = vmatpush2.bf16.msra.mxu1 %v1913_v53  ;;  %4391 = vmatprep.subr.bf16.mxu0 %v1778_v55  ;;  %v1986_v53 = vunpack.c.h.s8.bf16 %v818_v14 }
 0x60a   :  { %4432 = vmatprep.subr.bf16.mxu1 %v1906_v33  ;;  %v817_v33 = vld [vmem:[#allocation2 + $0xc70] sm:$0xff] }
 0x60b   :  { %v1985_v32 = vunpack.c.h.s8.bf16 %v817_v33  ;;  %v1977_v38 = vunpack.c.l.s8.bf16 %v817_v33 }
 0x60c   :  { %4392 = vmatpush2.bf16.msra.mxu0 %v1777_v37  ;;  %v2113_v37 = vunpack.c.h.s8.bf16 %v881_v36 }
 0x60d   :  { %4433 = vmatpush2.bf16.msra.mxu1 %v1905_v48  ;;  %4393 = vmatprep.subr.bf16.mxu0 %v1770_v51  ;;  %v1978_v48 = vunpack.c.l.s8.bf16 %v818_v14 }
 0x60e   :  { %4434 = vmatprep.subr.bf16.mxu1 %v1898_v61  ;;  %v810_v61 = vld [vmem:[#allocation2 + $0xc38] sm:$0xff] }
 0x610   :  { %4394 = vmatpush2.bf16.msra.mxu0 %v1769_v39  ;;  %v2105_v39 = vunpack.c.l.s8.bf16 %v881_v36  ;;  %v849_v36 = vld [vmem:[#allocation2 + $0xd70] sm:$0xff] }
 0x611   :  { %4435 = vmatpush2.bf16.msra.mxu1 %v1897_v2  ;;  %4445 = vmatprep.subr.bf16.mxu0 %v2018_v56  ;;  %v1970_v2 = vunpack.c.h.s8.bf16 %v810_v61  ;;  %v2098_v56 = vunpack.c.h.s8.bf16 %v874_v52 }
 0x612   :  { %4486 = vmatprep.subr.bf16.mxu1 %v2146_v58  ;;  %v809_v58 = vld [vmem:[#allocation2 + $0xc30] sm:$0xff] }
 0x613   :  { %v4151_v23 = vpop.f32.mrf.mxu0  ;;  %4396 = vmatmul.mubr.bf16.vlgmr.msra.gmra.mxu0 %v6830_v62  ;;  %v1969_v6 = vunpack.c.h.s8.bf16 %v809_v58  ;;  %v1961_v18 = vunpack.c.l.s8.bf16 %v809_v58 }
 0x614   :  { %v4192_v24 = vpop.f32.mrf.mxu1  ;;  %4437 = vmatmul.mubr.bf16.vlgmr.msra.gmra.mxu1 %v6834_v63  ;;  %v4152_v4 = vadd.f32 %v4151_v23, %v7059_v3  ;;  %4446 = vmatpush1.bf16.msra.mxu0 %v2017_v17  ;;  %v2097_v17 = vunpack.c.h.s8.bf16 %v873_v59  ;;  %v2089_v23 = vunpack.c.l.s8.bf16 %v873_v59  ;;  %v841_v59 = vld [vmem:[#allocation2 + $0xd30] sm:$0xff] }
 0x615   :  { %4487 = vmatpush1.bf16.msra.mxu1 %v2145_v43  ;;  %v4153_v22 = vpop.f32.mrf.mxu0  ;;  %4447 = vmatprep.subr.bf16.mxu0 %v2010_v34  ;;  %v1962_v43 = vunpack.c.l.s8.bf16 %v810_v61  ;;  %v2090_v34 = vunpack.c.l.s8.bf16 %v874_v52  ;;  %v842_v52 = vld [vmem:[#allocation2 + $0xd38] sm:$0xff] }
 0x616   :  { %v4194_v0 = vpop.f32.mrf.mxu1  ;;  %4488 = vmatprep.subr.bf16.mxu1 %v2138_v11  ;;  %v7069_v25 = vadd.f32 %v4192_v24, %v4152_v4  ;;  %v4154_v62 = vadd.f32 %v4153_v22, %v7064_v7  ;;  %4477 = vmatprep.mubr.bf16.mxu0 %v6836_v41  ;;  %v882_v7 = vld [vmem:[#allocation2 + $0xe78] sm:$0xff]  ;;  %v1993_v41 = vunpack.c.l.s8.bf16 %v825_v47  ;;  %v2210_v4 = vunpack.c.h.s8.bf16 %v930_v16 }
 0x617   :  { %4518 = vmatprep.mubr.bf16.mxu1 %v6838_v46  ;;  %v4155_v63 = vpop.f32.mrf.mxu0  ;;  %v2121_v46 = vunpack.c.l.s8.bf16 %v889_v45  ;;  %v2114_v55 = vunpack.c.h.s8.bf16 %v882_v7  ;;  %v2106_v51 = vunpack.c.l.s8.bf16 %v882_v7  ;;  %v866_v11 = vld [vmem:[#allocation2 + $0xdf8] sm:$0xff] }
 0x618   :  { %v4196_v3 = vpop.f32.mrf.mxu1  ;;  %v7074_v28 = vadd.f32 %v4194_v0, %v4154_v62  ;;  %4448 = vmatpush1.bf16.msra.mxu0 %v2009_v5  ;;  %v2082_v24 = vunpack.c.h.s8.bf16 %v866_v11  ;;  %v865_v5 = vld [vmem:[#allocation2 + $0xdf0] sm:$0xff]  ;;  %v858_v47 = vld [vmem:[#allocation2 + $0xdb8] sm:$0xff] }
 0x619   :  { %4489 = vmatpush1.bf16.msra.mxu1 %v2137_v15  ;;  %v4156_v31 = vpop.f32.mrf.mxu0  ;;  %4449 = vmatprep.subr.bf16.mxu0 %v2002_v1  ;;  %v929_v15 = vld [vmem:[#allocation2 + $0xff0] sm:$0xff]  ;;  %v2081_v22 = vunpack.c.h.s8.bf16 %v865_v5  ;;  %v2074_v1 = vunpack.c.l.s8.bf16 %v866_v11  ;;  %v922_v45 = vld [vmem:[#allocation2 + $0xfb8] sm:$0xff]  ;;  %v2073_v62 = vunpack.c.l.s8.bf16 %v865_v5  ;;  %v2066_v3 = vunpack.c.h.s8.bf16 %v858_v47 }
 0x61a   :  { %v4197_v29 = vpop.f32.mrf.mxu1  ;;  %4490 = vmatprep.subr.bf16.mxu1 %v2130_v19  ;;  %v2209_v0 = vunpack.c.h.s8.bf16 %v929_v15  ;;  %v2202_v19 = vunpack.c.l.s8.bf16 %v930_v16  ;;  %v2201_v63 = vunpack.c.l.s8.bf16 %v929_v15  ;;  %v921_v31 = vld [vmem:[#allocation2 + $0xfb0] sm:$0xff]  ;;  %v2186_v14 = vunpack.c.l.s8.bf16 %v922_v45  ;;  %v850_v7 = vld [vmem:[#allocation2 + $0xd78] sm:$0xff] }
 0x61b   :  { %v962_v16 = vld [vmem:[#allocation2 + $0x10f8] sm:$0xff]  ;;  %v961_v15 = vld [vmem:[#allocation2 + $0x10f0] sm:$0xff] }
 0x61c   :  { %4450 = vmatpush1.bf16.msra.mxu0 %v2001_v30  ;;  %v2194_v30 = vunpack.c.h.s8.bf16 %v922_v45  ;;  %v954_v45 = vld [vmem:[#allocation2 + $0x10b8] sm:$0xff] }
 0x61d   :  { %4491 = vmatpush1.bf16.msra.mxu1 %v2129_v27  ;;  %4451 = vmatprep.subr.bf16.mxu0 %v1994_v8  ;;  %v857_v27 = vld [vmem:[#allocation2 + $0xdb0] sm:$0xff]  ;;  %v2193_v8 = vunpack.c.h.s8.bf16 %v921_v31 }
 0x61e   :  { %4492 = vmatprep.subr.bf16.mxu1 %v2122_v9  ;;  %v2065_v29 = vunpack.c.h.s8.bf16 %v857_v27  ;;  %v2058_v9 = vunpack.c.l.s8.bf16 %v858_v47 }
 0x620   :  { %4452 = vmatpush1.bf16.msra.mxu0 %v1993_v41  ;;  %v914_v41 = vld [vmem:[#allocation2 + $0xf78] sm:$0xff] }
 0x621   :  { %4493 = vmatpush1.bf16.msra.mxu1 %v2121_v46  ;;  %4453 = vmatprep.subr.bf16.mxu0 %v1986_v53  ;;  %v2057_v46 = vunpack.c.l.s8.bf16 %v857_v27  ;;  %v2185_v53 = vunpack.c.l.s8.bf16 %v921_v31  ;;  %v2178_v33 = vunpack.c.h.s8.bf16 %v914_v41  ;;  %v2170_v61 = vunpack.c.l.s8.bf16 %v914_v41  ;;  %v1017_v41 = vld [vmem:[#allocation2 + $0x12b0] sm:$0xff] }
 0x622   :  { %4494 = vmatprep.subr.bf16.mxu1 %v2114_v55  ;;  %v2050_v55 = vunpack.c.h.s8.bf16 %v850_v7  ;;  %v2265_v27 = vunpack.c.l.s8.bf16 %v961_v15 }
 0x624   :  { %4454 = vmatpush1.bf16.msra.mxu0 %v1985_v32  ;;  %v913_v32 = vld [vmem:[#allocation2 + $0xf70] sm:$0xff] }
 0x625   :  { %4495 = vmatpush1.bf16.msra.mxu1 %v2113_v37  ;;  %4455 = vmatprep.subr.bf16.mxu0 %v1978_v48  ;;  %v2049_v37 = vunpack.c.h.s8.bf16 %v849_v36  ;;  %v2177_v48 = vunpack.c.h.s8.bf16 %v913_v32 }
 0x626   :  { %4496 = vmatprep.subr.bf16.mxu1 %v2106_v51  ;;  %v2042_v51 = vunpack.c.l.s8.bf16 %v850_v7  ;;  %v953_v7 = vld [vmem:[#allocation2 + $0x10b0] sm:$0xff] }
 0x628   :  { %4456 = vmatpush1.bf16.msra.mxu0 %v1977_v38  ;;  %v906_v38 = vld [vmem:[#allocation2 + $0xf38] sm:$0xff] }
 0x629   :  { %4497 = vmatpush1.bf16.msra.mxu1 %v2105_v39  ;;  %4457 = vmatprep.subr.bf16.mxu0 %v1970_v2  ;;  %v2041_v39 = vunpack.c.l.s8.bf16 %v849_v36  ;;  %v2169_v2 = vunpack.c.l.s8.bf16 %v913_v32  ;;  %v2162_v58 = vunpack.c.h.s8.bf16 %v906_v38  ;;  %v2154_v11 = vunpack.c.l.s8.bf16 %v906_v38  ;;  %v945_v38 = vld [vmem:[#allocation2 + $0x1070] sm:$0xff] }
 0x62a   :  { %4498 = vmatprep.subr.bf16.mxu1 %v2098_v56  ;;  %v2034_v56 = vunpack.c.h.s8.bf16 %v842_v52  ;;  %v2250_v32 = vunpack.c.l.s8.bf16 %v954_v45 }
 0x62c   :  { %4458 = vmatpush1.bf16.msra.mxu0 %v1969_v6  ;;  %v905_v6 = vld [vmem:[#allocation2 + $0xf30] sm:$0xff] }
 0x62d   :  { %4499 = vmatpush1.bf16.msra.mxu1 %v2097_v17  ;;  %4459 = vmatprep.subr.bf16.mxu0 %v1962_v43  ;;  %v2033_v17 = vunpack.c.h.s8.bf16 %v841_v59  ;;  %v2161_v43 = vunpack.c.h.s8.bf16 %v905_v6 }
 0x62e   :  { %4500 = vmatprep.subr.bf16.mxu1 %v2090_v34  ;;  %v2026_v34 = vunpack.c.l.s8.bf16 %v842_v52 }
 0x630   :  { %4460 = vmatpush1.bf16.msra.mxu0 %v1961_v18  ;;  %v1026_v18 = vld [vmem:[#allocation2 + $0x12f8] sm:$0xff] }
 0x631   :  { %4501 = vmatpush1.bf16.msra.mxu1 %v2089_v23  ;;  %4461 = vmatprep.subr.bf16.mxu0 %v2082_v24  ;;  %v2025_v23 = vunpack.c.l.s8.bf16 %v841_v59  ;;  %v2153_v24 = vunpack.c.l.s8.bf16 %v905_v6  ;;  %v2402_v5 = vunpack.c.h.s8.bf16 %v1026_v18  ;;  %v2394_v47 = vunpack.c.l.s8.bf16 %v1026_v18  ;;  %v938_v6 = vld [vmem:[#allocation2 + $0x1038] sm:$0xff]  ;;  %v937_v18 = vld [vmem:[#allocation2 + $0x1030] sm:$0xff] }
 0x632   :  { %4502 = vmatprep.subr.bf16.mxu1 %v2210_v4  ;;  %v2274_v4 = vunpack.c.h.s8.bf16 %v962_v16 }
 0x634   :  { %4462 = vmatpush2.bf16.msra.mxu0 %v2081_v22  ;;  %v1025_v22 = vld [vmem:[#allocation2 + $0x12f0] sm:$0xff] }
 0x635   :  { %4503 = vmatpush2.bf16.msra.mxu1 %v2209_v0  ;;  %4463 = vmatprep.subr.bf16.mxu0 %v2074_v1  ;;  %v2273_v0 = vunpack.c.h.s8.bf16 %v961_v15  ;;  %v2401_v1 = vunpack.c.h.s8.bf16 %v1025_v22  ;;  %v2393_v31 = vunpack.c.l.s8.bf16 %v1025_v22  ;;  %v994_v22 = vld [vmem:[#allocation2 + $0x11f8] sm:$0xff] }
 0x636   :  { %4504 = vmatprep.subr.bf16.mxu1 %v2202_v19  ;;  %v2266_v19 = vunpack.c.l.s8.bf16 %v962_v16 }
 0x638   :  { %4464 = vmatpush2.bf16.msra.mxu0 %v2073_v62  ;;  %v1018_v62 = vld [vmem:[#allocation2 + $0x12b8] sm:$0xff] }
 0x639   :  { %4505 = vmatpush2.bf16.msra.mxu1 %v2201_v63  ;;  %4465 = vmatprep.subr.bf16.mxu0 %v2066_v3 }
 0x63a   :  { %4506 = vmatprep.subr.bf16.mxu1 %v2194_v30 }
 0x63c   :  { %4466 = vmatpush2.bf16.msra.mxu0 %v2065_v29 }
 0x63d   :  { %4507 = vmatpush2.bf16.msra.mxu1 %v2193_v8  ;;  %4467 = vmatprep.subr.bf16.mxu0 %v2058_v9  ;;  %v2258_v9 = vunpack.c.h.s8.bf16 %v954_v45 }
 0x63e   :  { %4508 = vmatprep.subr.bf16.mxu1 %v2186_v14  ;;  %v2386_v14 = vunpack.c.h.s8.bf16 %v1018_v62 }
 0x640   :  { %4468 = vmatpush2.bf16.msra.mxu0 %v2057_v46 }
 0x641   :  { %4509 = vmatpush2.bf16.msra.mxu1 %v2185_v53  ;;  %4469 = vmatprep.subr.bf16.mxu0 %v2050_v55  ;;  %v2257_v53 = vunpack.c.h.s8.bf16 %v953_v7  ;;  %v2385_v55 = vunpack.c.h.s8.bf16 %v1017_v41 }
 0x642   :  { %4510 = vmatprep.subr.bf16.mxu1 %v2178_v33 }
 0x644   :  { %4470 = vmatpush2.bf16.msra.mxu0 %v2049_v37  ;;  %v2378_v37 = vunpack.c.l.s8.bf16 %v1018_v62  ;;  %v993_v62 = vld [vmem:[#allocation2 + $0x11f0] sm:$0xff] }
 0x645   :  { %4511 = vmatpush2.bf16.msra.mxu1 %v2177_v48  ;;  %4471 = vmatprep.subr.bf16.mxu0 %v2042_v51  ;;  %v946_v48 = vld [vmem:[#allocation2 + $0x1078] sm:$0xff] }
 0x646   :  { %4512 = vmatprep.subr.bf16.mxu1 %v2170_v61  ;;  %v1010_v51 = vld [vmem:[#allocation2 + $0x1278] sm:$0xff]  ;;  %v2249_v61 = vunpack.c.l.s8.bf16 %v953_v7 }
 0x647   :  { %v2370_v52 = vunpack.c.h.s8.bf16 %v1010_v51  ;;  %v2362_v59 = vunpack.c.l.s8.bf16 %v1010_v51 }
 0x648   :  { %4472 = vmatpush2.bf16.msra.mxu0 %v2041_v39  ;;  %v1009_v39 = vld [vmem:[#allocation2 + $0x1270] sm:$0xff] }
 0x649   :  { %4513 = vmatpush2.bf16.msra.mxu1 %v2169_v2  ;;  %4473 = vmatprep.subr.bf16.mxu0 %v2034_v56  ;;  %v2241_v2 = vunpack.c.h.s8.bf16 %v945_v38  ;;  %v2369_v56 = vunpack.c.h.s8.bf16 %v1009_v39 }
 0x64a   :  { %4514 = vmatprep.subr.bf16.mxu1 %v2162_v58  ;;  %v2234_v58 = vunpack.c.l.s8.bf16 %v946_v48 }
 0x64c   :  { %4474 = vmatpush2.bf16.msra.mxu0 %v2033_v17  ;;  %v1002_v17 = vld [vmem:[#allocation2 + $0x1238] sm:$0xff] }
 0x64d   :  { %4515 = vmatpush2.bf16.msra.mxu1 %v2161_v43  ;;  %4475 = vmatprep.subr.bf16.mxu0 %v2026_v34  ;;  %v2233_v43 = vunpack.c.l.s8.bf16 %v945_v38  ;;  %v2361_v34 = vunpack.c.l.s8.bf16 %v1009_v39  ;;  %v2354_v16 = vunpack.c.h.s8.bf16 %v1002_v17  ;;  %v2346_v15 = vunpack.c.l.s8.bf16 %v1002_v17  ;;  %v1041_v38 = vld [vmem:[#allocation2 + $0x1370] sm:$0xff] }
 0x64e   :  { %4516 = vmatprep.subr.bf16.mxu1 %v2154_v11  ;;  %v2226_v11 = vunpack.c.h.s8.bf16 %v938_v6 }
 0x650   :  { %4476 = vmatpush2.bf16.msra.mxu0 %v2025_v23  ;;  %v1001_v23 = vld [vmem:[#allocation2 + $0x1230] sm:$0xff] }
 0x651   :  { %4517 = vmatpush2.bf16.msra.mxu1 %v2153_v24  ;;  %4527 = vmatprep.subr.bf16.mxu0 %v2274_v4  ;;  %v2225_v24 = vunpack.c.h.s8.bf16 %v937_v18  ;;  %v2353_v4 = vunpack.c.h.s8.bf16 %v1001_v23 }
 0x652   :  { %4568 = vmatprep.subr.bf16.mxu1 %v2402_v5  ;;  %v2218_v5 = vunpack.c.l.s8.bf16 %v938_v6  ;;  %v1034_v6 = vld [vmem:[#allocation2 + $0x1338] sm:$0xff] }
 0x653   :  { %v4233_v63 = vpop.f32.mrf.mxu0  ;;  %4478 = vmatmul.mubr.bf16.vlgmr.msra.gmra.mxu0 %v6859_v12 }
 0x654   :  { %v4274_v3 = vpop.f32.mrf.mxu1  ;;  %4519 = vmatmul.mubr.bf16.vlgmr.msra.gmra.mxu1 %v6863_v13  ;;  %4528 = vmatpush1.bf16.msra.mxu0 %v2273_v0  ;;  %v1058_v0 = vld [vmem:[#allocation2 + $0x13f8] sm:$0xff] }
 0x655   :  { %v7078_v30 = vadd.f32 %v4274_v3, %v4233_v63  ;;  %4569 = vmatpush1.bf16.msra.mxu1 %v2401_v1  ;;  %v4235_v29 = vpop.f32.mrf.mxu0  ;;  %4529 = vmatprep.subr.bf16.mxu0 %v2266_v19  ;;  %v2217_v1 = vunpack.c.l.s8.bf16 %v937_v18  ;;  %v2345_v19 = vunpack.c.l.s8.bf16 %v1001_v23  ;;  %v2466_v45 = vunpack.c.h.s8.bf16 %v1058_v0  ;;  %v1057_v63 = vld [vmem:[#allocation2 + $0x13f0] sm:$0xff] }
 0x656   :  { %v4276_v8 = vpop.f32.mrf.mxu1  ;;  %4570 = vmatprep.subr.bf16.mxu1 %v2394_v47  ;;  %4559 = vmatprep.mubr.bf16.mxu0 %v6865_v20  ;;  %v2377_v20 = vunpack.c.l.s8.bf16 %v1017_v41  ;;  %v2338_v47 = vunpack.c.h.s8.bf16 %v994_v22  ;;  %v2337_v3 = vunpack.c.h.s8.bf16 %v993_v62  ;;  %v2457_v7 = vunpack.c.l.s8.bf16 %v1057_v63  ;;  %v1033_v18 = vld [vmem:[#allocation2 + $0x1330] sm:$0xff] }
 0x657   :  { %v7080_v46 = vadd.f32 %v4276_v8, %v4235_v29  ;;  %4600 = vmatprep.mubr.bf16.mxu1 %v6867_v21  ;;  %v4237_v12 = vpop.f32.mrf.mxu0  ;;  %v2242_v21 = vunpack.c.h.s8.bf16 %v946_v48  ;;  %v2458_v29 = vunpack.c.l.s8.bf16 %v1058_v0  ;;  %v986_v8 = vld [vmem:[#allocation2 + $0x11b8] sm:$0xff] }
 0x658   :  { %v4278_v13 = vpop.f32.mrf.mxu1  ;;  %4530 = vmatpush1.bf16.msra.mxu0 %v2265_v27  ;;  %v2465_v27 = vunpack.c.h.s8.bf16 %v1057_v63  ;;  %v2322_v41 = vunpack.c.h.s8.bf16 %v986_v8  ;;  %v1042_v48 = vld [vmem:[#allocation2 + $0x1378] sm:$0xff] }
 0x659   :  { %4571 = vmatpush1.bf16.msra.mxu1 %v2393_v31  ;;  %v4238_v33 = vpop.f32.mrf.mxu0  ;;  %4531 = vmatprep.subr.bf16.mxu0 %v2258_v9  ;;  %v2330_v31 = vunpack.c.l.s8.bf16 %v994_v22  ;;  %v1050_v9 = vld [vmem:[#allocation2 + $0x13b8] sm:$0xff]  ;;  %v985_v13 = vld [vmem:[#allocation2 + $0x11b0] sm:$0xff] }
 0x65a   :  { %v4279_v36 = vpop.f32.mrf.mxu1  ;;  %4572 = vmatprep.subr.bf16.mxu1 %v2386_v14  ;;  %v2329_v14 = vunpack.c.l.s8.bf16 %v993_v62  ;;  %v2450_v12 = vunpack.c.h.s8.bf16 %v1050_v9  ;;  %v2313_v51 = vunpack.c.l.s8.bf16 %v985_v13  ;;  %v1154_v22 = vld [vmem:[#allocation2 + $0x16f8] sm:$0xff]  ;;  %v1153_v62 = vld [vmem:[#allocation2 + $0x16f0] sm:$0xff] }
 0x65b   :  { %v2314_v36 = vunpack.c.l.s8.bf16 %v986_v8  ;;  %v1146_v8 = vld [vmem:[#allocation2 + $0x16b8] sm:$0xff] }
 0x65c   :  { %4532 = vmatpush1.bf16.msra.mxu0 %v2257_v53  ;;  %v1049_v53 = vld [vmem:[#allocation2 + $0x13b0] sm:$0xff] }
 0x65d   :  { %4573 = vmatpush1.bf16.msra.mxu1 %v2385_v55  ;;  %4533 = vmatprep.subr.bf16.mxu0 %v2250_v32  ;;  %v2321_v55 = vunpack.c.h.s8.bf16 %v985_v13  ;;  %v2449_v33 = vunpack.c.h.s8.bf16 %v1049_v53  ;;  %v2442_v32 = vunpack.c.l.s8.bf16 %v1050_v9 }
 0x65e   :  { %4574 = vmatprep.subr.bf16.mxu1 %v2378_v37  ;;  %v978_v37 = vld [vmem:[#allocation2 + $0x1178] sm:$0xff] }
 0x660   :  { %4534 = vmatpush1.bf16.msra.mxu0 %v2249_v61  ;;  %v2441_v61 = vunpack.c.l.s8.bf16 %v1049_v53 }
 0x661   :  { %4575 = vmatpush1.bf16.msra.mxu1 %v2377_v20  ;;  %4535 = vmatprep.subr.bf16.mxu0 %v2242_v21  ;;  %v2306_v20 = vunpack.c.h.s8.bf16 %v978_v37  ;;  %v2434_v21 = vunpack.c.h.s8.bf16 %v1042_v48 }
 0x662   :  { %4576 = vmatprep.subr.bf16.mxu1 %v2370_v52  ;;  %v977_v52 = vld [vmem:[#allocation2 + $0x1170] sm:$0xff] }
 0x663   :  { %v2305_v39 = vunpack.c.h.s8.bf16 %v977_v52  ;;  %v2297_v17 = vunpack.c.l.s8.bf16 %v977_v52 }
 0x664   :  { %4536 = vmatpush1.bf16.msra.mxu0 %v2241_v2  ;;  %v2433_v2 = vunpack.c.h.s8.bf16 %v1041_v38 }
 0x665   :  { %4577 = vmatpush1.bf16.msra.mxu1 %v2369_v56  ;;  %4537 = vmatprep.subr.bf16.mxu0 %v2234_v58  ;;  %v2298_v56 = vunpack.c.l.s8.bf16 %v978_v37  ;;  %v2426_v58 = vunpack.c.l.s8.bf16 %v1042_v48 }
 0x666   :  { %4578 = vmatprep.subr.bf16.mxu1 %v2362_v59  ;;  %v970_v59 = vld [vmem:[#allocation2 + $0x1138] sm:$0xff] }
 0x668   :  { %4538 = vmatpush1.bf16.msra.mxu0 %v2233_v43  ;;  %v2425_v43 = vunpack.c.l.s8.bf16 %v1041_v38  ;;  %v2634_v38 = vunpack.c.l.s8.bf16 %v1146_v8 }
 0x669   :  { %4579 = vmatpush1.bf16.msra.mxu1 %v2361_v34  ;;  %4539 = vmatprep.subr.bf16.mxu0 %v2226_v11  ;;  %v2290_v34 = vunpack.c.h.s8.bf16 %v970_v59  ;;  %v2418_v11 = vunpack.c.h.s8.bf16 %v1034_v6 }
 0x66a   :  { %4580 = vmatprep.subr.bf16.mxu1 %v2354_v16  ;;  %v969_v16 = vld [vmem:[#allocation2 + $0x1130] sm:$0xff] }
 0x66b   :  { %v2289_v23 = vunpack.c.h.s8.bf16 %v969_v16  ;;  %v2281_v0 = vunpack.c.l.s8.bf16 %v969_v16  ;;  %v1130_v16 = vld [vmem:[#allocation2 + $0x1638] sm:$0xff] }
 0x66c   :  { %4540 = vmatpush1.bf16.msra.mxu0 %v2225_v24  ;;  %v2417_v24 = vunpack.c.h.s8.bf16 %v1033_v18 }
 0x66d   :  { %4581 = vmatpush1.bf16.msra.mxu1 %v2353_v4  ;;  %4541 = vmatprep.subr.bf16.mxu0 %v2218_v5  ;;  %v2282_v4 = vunpack.c.l.s8.bf16 %v970_v59  ;;  %v2410_v5 = vunpack.c.l.s8.bf16 %v1034_v6  ;;  %v1137_v59 = vld [vmem:[#allocation2 + $0x1670] sm:$0xff] }
 0x66e   :  { %4582 = vmatprep.subr.bf16.mxu1 %v2346_v15  ;;  %v1090_v15 = vld [vmem:[#allocation2 + $0x14f8] sm:$0xff] }
 0x670   :  { %4542 = vmatpush1.bf16.msra.mxu0 %v2217_v1  ;;  %v2409_v1 = vunpack.c.l.s8.bf16 %v1033_v18 }
 0x671   :  { %4583 = vmatpush1.bf16.msra.mxu1 %v2345_v19  ;;  %4543 = vmatprep.subr.bf16.mxu0 %v2338_v47  ;;  %v2530_v19 = vunpack.c.h.s8.bf16 %v1090_v15  ;;  %v2658_v47 = vunpack.c.h.s8.bf16 %v1154_v22 }
 0x672   :  { %4584 = vmatprep.subr.bf16.mxu1 %v2466_v45  ;;  %v1089_v45 = vld [vmem:[#allocation2 + $0x14f0] sm:$0xff] }
 0x673   :  { %v2529_v63 = vunpack.c.h.s8.bf16 %v1089_v45 }
 0x674   :  { %4544 = vmatpush2.bf16.msra.mxu0 %v2337_v3  ;;  %v2657_v3 = vunpack.c.h.s8.bf16 %v1153_v62 }
 0x675   :  { %4585 = vmatpush2.bf16.msra.mxu1 %v2465_v27  ;;  %4545 = vmatprep.subr.bf16.mxu0 %v2330_v31  ;;  %v2522_v27 = vunpack.c.l.s8.bf16 %v1090_v15  ;;  %v2650_v31 = vunpack.c.l.s8.bf16 %v1154_v22  ;;  %v1129_v15 = vld [vmem:[#allocation2 + $0x1630] sm:$0xff] }
 0x676   :  { %4586 = vmatprep.subr.bf16.mxu1 %v2458_v29  ;;  %v1082_v29 = vld [vmem:[#allocation2 + $0x14b8] sm:$0xff] }
 0x677   :  { %v2506_v52 = vunpack.c.l.s8.bf16 %v1082_v29 }
 0x678   :  { %4546 = vmatpush2.bf16.msra.mxu0 %v2329_v14 }
 0x679   :  { %4587 = vmatpush2.bf16.msra.mxu1 %v2457_v7  ;;  %4547 = vmatprep.subr.bf16.mxu0 %v2322_v41  ;;  %v2521_v41 = vunpack.c.l.s8.bf16 %v1089_v45  ;;  %v1186_v45 = vld [vmem:[#allocation2 + $0x17f8] sm:$0xff] }
 0x67a   :  { %4588 = vmatprep.subr.bf16.mxu1 %v2450_v12  ;;  %v2649_v12 = vunpack.c.l.s8.bf16 %v1153_v62 }
 0x67c   :  { %4548 = vmatpush2.bf16.msra.mxu0 %v2321_v55  ;;  %v2514_v55 = vunpack.c.h.s8.bf16 %v1082_v29  ;;  %v1185_v29 = vld [vmem:[#allocation2 + $0x17f0] sm:$0xff] }
 0x67d   :  { %4589 = vmatpush2.bf16.msra.mxu1 %v2449_v33  ;;  %4549 = vmatprep.subr.bf16.mxu0 %v2314_v36  ;;  %v2642_v33 = vunpack.c.h.s8.bf16 %v1146_v8  ;;  %v1081_v36 = vld [vmem:[#allocation2 + $0x14b0] sm:$0xff] }
 0x67e   :  { %4590 = vmatprep.subr.bf16.mxu1 %v2442_v32  ;;  %v1145_v32 = vld [vmem:[#allocation2 + $0x16b0] sm:$0xff] }
 0x680   :  { %4550 = vmatpush2.bf16.msra.mxu0 %v2313_v51  ;;  %v2513_v51 = vunpack.c.h.s8.bf16 %v1081_v36 }
 0x681   :  { %4591 = vmatpush2.bf16.msra.mxu1 %v2441_v61  ;;  %4551 = vmatprep.subr.bf16.mxu0 %v2306_v20  ;;  %v2641_v61 = vunpack.c.h.s8.bf16 %v1145_v32 }
 0x682   :  { %4592 = vmatprep.subr.bf16.mxu1 %v2434_v21 }
 0x684   :  { %4552 = vmatpush2.bf16.msra.mxu0 %v2305_v39  ;;  %v1074_v39 = vld [vmem:[#allocation2 + $0x1478] sm:$0xff] }
 0x685   :  { %4593 = vmatpush2.bf16.msra.mxu1 %v2433_v2  ;;  %4553 = vmatprep.subr.bf16.mxu0 %v2298_v56  ;;  %v2498_v2 = vunpack.c.h.s8.bf16 %v1074_v39 }
 0x686   :  { %4594 = vmatprep.subr.bf16.mxu1 %v2426_v58  ;;  %v1073_v58 = vld [vmem:[#allocation2 + $0x1470] sm:$0xff] }
 0x687   :  { %v2497_v6 = vunpack.c.h.s8.bf16 %v1073_v58  ;;  %v2489_v18 = vunpack.c.l.s8.bf16 %v1073_v58 }
 0x688   :  { %4554 = vmatpush2.bf16.msra.mxu0 %v2297_v17  ;;  %v2625_v17 = vunpack.c.h.s8.bf16 %v1137_v59 }
 0x689   :  { %4595 = vmatpush2.bf16.msra.mxu1 %v2425_v43  ;;  %4555 = vmatprep.subr.bf16.mxu0 %v2290_v34  ;;  %v2490_v43 = vunpack.c.l.s8.bf16 %v1074_v39 }
 0x68a   :  { %4596 = vmatprep.subr.bf16.mxu1 %v2418_v11  ;;  %v1066_v11 = vld [vmem:[#allocation2 + $0x1438] sm:$0xff] }
 0x68c   :  { %4556 = vmatpush2.bf16.msra.mxu0 %v2289_v23  ;;  %v2617_v23 = vunpack.c.l.s8.bf16 %v1137_v59  ;;  %v7100_v59 = vld [vmem:[#allocation5] sm:$0xff] }
 0x68d   :  { %4597 = vmatpush2.bf16.msra.mxu1 %v2417_v24  ;;  %4557 = vmatprep.subr.bf16.mxu0 %v2282_v4  ;;  %v2482_v24 = vunpack.c.h.s8.bf16 %v1066_v11  ;;  %v2610_v4 = vunpack.c.h.s8.bf16 %v1130_v16 }
 0x68e   :  { %4598 = vmatprep.subr.bf16.mxu1 %v2410_v5  ;;  %v1065_v5 = vld [vmem:[#allocation2 + $0x1430] sm:$0xff] }
 0x68f   :  { %v2481_v22 = vunpack.c.h.s8.bf16 %v1065_v5  ;;  %v2473_v62 = vunpack.c.l.s8.bf16 %v1065_v5 }
 0x690   :  { %4558 = vmatpush2.bf16.msra.mxu0 %v2281_v0  ;;  %v2609_v0 = vunpack.c.h.s8.bf16 %v1129_v15 }
 0x691   :  { %4599 = vmatpush2.bf16.msra.mxu1 %v2409_v1  ;;  %4609 = vmatprep.subr.bf16.mxu0 %v2530_v19  ;;  %v2474_v1 = vunpack.c.l.s8.bf16 %v1066_v11  ;;  %v2602_v19 = vunpack.c.l.s8.bf16 %v1130_v16  ;;  %v1162_v11 = vld [vmem:[#allocation2 + $0x1738] sm:$0xff] }
 0x692   :  { %4650 = vmatprep.subr.bf16.mxu1 %v2658_v47  ;;  %v1122_v47 = vld [vmem:[#allocation2 + $0x15f8] sm:$0xff]  ;;  %v2674_v5 = vunpack.c.h.s8.bf16 %v1162_v11 }
 0x693   :  { %v4315_v9 = vpop.f32.mrf.mxu0  ;;  %4560 = vmatmul.mubr.bf16.vlgmr.msra.gmra.mxu0 %v6892_v35 }
 0x694   :  { %v4356_v14 = vpop.f32.mrf.mxu1  ;;  %4601 = vmatmul.mubr.bf16.vlgmr.msra.gmra.mxu1 %v6896_v60  ;;  %v4316_v7 = vadd.f32 %v4315_v9, %v7078_v30  ;;  %4610 = vmatpush1.bf16.msra.mxu0 %v2529_v63  ;;  %v2601_v63 = vunpack.c.l.s8.bf16 %v1129_v15  ;;  %v2721_v9 = vunpack.c.h.s8.bf16 %v1185_v29  ;;  %v1097_v15 = vld [vmem:[#allocation2 + $0x1530] sm:$0xff] }
 0x695   :  { %4651 = vmatpush1.bf16.msra.mxu1 %v2657_v3  ;;  %v4317_v13 = vpop.f32.mrf.mxu0  ;;  %4611 = vmatprep.subr.bf16.mxu0 %v2522_v27  ;;  %v2594_v3 = vunpack.c.h.s8.bf16 %v1122_v47  ;;  %v2722_v27 = vunpack.c.h.s8.bf16 %v1186_v45 }
 0x696   :  { %v4358_v53 = vpop.f32.mrf.mxu1  ;;  %4652 = vmatprep.subr.bf16.mxu1 %v2650_v31  ;;  %v7087_v37 = vadd.f32 %v4356_v14, %v4316_v7  ;;  %v4318_v35 = vadd.f32 %v4317_v13, %v7080_v46  ;;  %4641 = vmatprep.mubr.bf16.mxu0 %v6898_v44  ;;  %v1138_v46 = vld [vmem:[#allocation2 + $0x1678] sm:$0xff]  ;;  %v2505_v44 = vunpack.c.l.s8.bf16 %v1081_v36  ;;  %v1121_v31 = vld [vmem:[#allocation2 + $0x15f0] sm:$0xff]  ;;  %v2586_v14 = vunpack.c.l.s8.bf16 %v1122_v47 }
 0x697   :  { %4682 = vmatprep.mubr.bf16.mxu1 %v6900_v10  ;;  %v4319_v60 = vpop.f32.mrf.mxu0  ;;  %v2633_v10 = vunpack.c.l.s8.bf16 %v1145_v32  ;;  %v2626_v56 = vunpack.c.h.s8.bf16 %v1138_v46  ;;  %v2618_v34 = vunpack.c.l.s8.bf16 %v1138_v46  ;;  %v2593_v8 = vunpack.c.h.s8.bf16 %v1121_v31  ;;  %v1113_v36 = vld [vmem:[#allocation2 + $0x15b0] sm:$0xff] }
 0x698   :  { %v4360_v30 = vpop.f32.mrf.mxu1  ;;  %v7092_v48 = vadd.f32 %v4358_v53, %v4318_v35  ;;  %4612 = vmatpush1.bf16.msra.mxu0 %v2521_v41  ;;  %v2714_v7 = vunpack.c.l.s8.bf16 %v1186_v45  ;;  %v1114_v41 = vld [vmem:[#allocation2 + $0x15b8] sm:$0xff]  ;;  %v2585_v13 = vunpack.c.l.s8.bf16 %v1121_v31  ;;  %v2713_v53 = vunpack.c.l.s8.bf16 %v1185_v29  ;;  %v1177_v32 = vld [vmem:[#allocation2 + $0x17b0] sm:$0xff] }
 0x699   :  { %4653 = vmatpush1.bf16.msra.mxu1 %v2649_v12  ;;  %v4320_v20 = vpop.f32.mrf.mxu0  ;;  %4613 = vmatprep.subr.bf16.mxu0 %v2514_v55  ;;  %v1178_v12 = vld [vmem:[#allocation2 + $0x17b8] sm:$0xff]  ;;  %v2578_v55 = vunpack.c.h.s8.bf16 %v1114_v41  ;;  %v2577_v35 = vunpack.c.h.s8.bf16 %v1113_v36  ;;  %v2705_v60 = vunpack.c.h.s8.bf16 %v1177_v32  ;;  %v2570_v30 = vunpack.c.l.s8.bf16 %v1114_v41  ;;  %v1105_v46 = vld [vmem:[#allocation2 + $0x1570] sm:$0xff] }
 0x69a   :  { %v4361_v21 = vpop.f32.mrf.mxu1  ;;  %4654 = vmatprep.subr.bf16.mxu1 %v2642_v33  ;;  %v2706_v33 = vunpack.c.h.s8.bf16 %v1178_v12  ;;  %v1170_v20 = vld [vmem:[#allocation2 + $0x1778] sm:$0xff]  ;;  %v2545_v45 = vunpack.c.h.s8.bf16 %v1097_v15 }
 0x69b   :  { %v2569_v21 = vunpack.c.l.s8.bf16 %v1113_v36  ;;  %v2690_v39 = vunpack.c.h.s8.bf16 %v1170_v20  ;;  %v4820_v31 = vld [vmem:[#allocation8 + $0x68] sm:$0xff] }
 0x69c   :  { %4614 = vmatpush1.bf16.msra.mxu0 %v2513_v51  ;;  %v2698_v51 = vunpack.c.l.s8.bf16 %v1178_v12  ;;  %v4852_v29 = vld [vmem:[#allocation8 + $0x168] sm:$0xff]  ;;  %v4851_v12 = vld [vmem:[#allocation8 + $0x160] sm:$0xff]  ;;  %v4960_v36 = vunpack.c.l.s8.bf16 %v4820_v31 }
 0x69d   :  { %4655 = vmatpush1.bf16.msra.mxu1 %v2641_v61  ;;  %4615 = vmatprep.subr.bf16.mxu0 %v2506_v52  ;;  %v1106_v61 = vld [vmem:[#allocation2 + $0x1578] sm:$0xff]  ;;  %v2697_v52 = vunpack.c.l.s8.bf16 %v1177_v32  ;;  %v5024_v32 = vunpack.c.l.s8.bf16 %v4852_v29 }
 0x69e   :  { %4656 = vmatprep.subr.bf16.mxu1 %v2634_v38  ;;  %v2562_v38 = vunpack.c.h.s8.bf16 %v1106_v61 }
 0x6a0   :  { %4616 = vmatpush1.bf16.msra.mxu0 %v2505_v44  ;;  %v1169_v44 = vld [vmem:[#allocation2 + $0x1770] sm:$0xff] }
 0x6a1   :  { %4657 = vmatpush1.bf16.msra.mxu1 %v2633_v10  ;;  %4617 = vmatprep.subr.bf16.mxu0 %v2498_v2  ;;  %v7095_v10 = vsub.s32 1, %v6733_v26  ;;  %v7098_v2 = vsub.s32 3, %v6733_v26  ;;  %v2689_v58 = vunpack.c.h.s8.bf16 %v1169_v44 }
 0x6a2   :  { %4658 = vmatprep.subr.bf16.mxu1 %v2626_v56  ;;  %v2561_v56 = vunpack.c.h.s8.bf16 %v1105_v46 }
 0x6a3   :  { %v4708_v16 = vrot.slane %v7100_v59, %v7098_v2 }
 0x6a4   :  { %4618 = vmatpush1.bf16.msra.mxu0 %v2497_v6  ;;  %v2554_v6 = vunpack.c.l.s8.bf16 %v1106_v61  ;;  %v4848_v61 = vld [vmem:[#allocation8 + $0x148] sm:$0xff] }
 0x6a5   :  { %4659 = vmatpush1.bf16.msra.mxu1 %v2625_v17  ;;  %4619 = vmatprep.subr.bf16.mxu0 %v2490_v43  ;;  %v2682_v17 = vunpack.c.l.s8.bf16 %v1170_v20  ;;  %v4700_v43 = vrot.slane %v7100_v59, %v7095_v10 }
 0x6a6   :  { %4660 = vmatprep.subr.bf16.mxu1 %v2618_v34  ;;  %v1098_v34 = vld [vmem:[#allocation2 + $0x1538] sm:$0xff] }
 0x6a8   :  { %4620 = vmatpush1.bf16.msra.mxu0 %v2489_v18  ;;  %v2553_v18 = vunpack.c.l.s8.bf16 %v1105_v46 }
 0x6a9   :  { %4661 = vmatpush1.bf16.msra.mxu1 %v2617_v23  ;;  %4621 = vmatprep.subr.bf16.mxu0 %v2482_v24  ;;  %v2681_v23 = vunpack.c.l.s8.bf16 %v1169_v44  ;;  %v7106_v24 = vld [vmem:[#allocation7] sm:$0xff]  ;;  %v4815_v44 = vld [vmem:[#allocation8 + $0x40] sm:$0xff] }
 0x6aa   :  { %4662 = vmatprep.subr.bf16.mxu1 %v2610_v4  ;;  %v2546_v4 = vunpack.c.h.s8.bf16 %v1098_v34  ;;  %v4758_v47 = vrot.slane %v7106_v24, %v7098_v2 }
 0x6ac   :  { %4622 = vmatpush1.bf16.msra.mxu0 %v2481_v22  ;;  %v1161_v22 = vld [vmem:[#allocation2 + $0x1730] sm:$0xff] }
 0x6ad   :  { %4663 = vmatpush1.bf16.msra.mxu1 %v2609_v0  ;;  %4623 = vmatprep.subr.bf16.mxu0 %v2474_v1  ;;  %v4734_v0 = vmul.f32 %v4700_v43, %v6958_v54  ;;  %v4750_v1 = vrot.slane %v7106_v24, %v7095_v10  ;;  %v4955_v43 = vunpack.c.h.s8.bf16 %v4815_v44 }
 0x6ae   :  { %4664 = vmatprep.subr.bf16.mxu1 %v2602_v19  ;;  %v4736_v19 = vmul.f32 %v4708_v16, %v7016_v40  ;;  %v4964_v40 = vunpack.c.h.s8.bf16 %v4820_v31 }
 0x6b0   :  { %4624 = vmatpush1.bf16.msra.mxu0 %v2473_v62  ;;  %v2673_v62 = vunpack.c.h.s8.bf16 %v1161_v22  ;;  %v4786_v54 = vadd.f32 %v4758_v47, %v4736_v19  ;;  %v4843_v19 = vld [vmem:[#allocation8 + $0x120] sm:$0xff] }
 0x6b1   :  { %4665 = vmatpush1.bf16.msra.mxu1 %v2601_v63  ;;  %4625 = vmatprep.subr.bf16.mxu0 %v2594_v3  ;;  %v2538_v63 = vunpack.c.l.s8.bf16 %v1098_v34  ;;  %v2666_v3 = vunpack.c.l.s8.bf16 %v1162_v11 }
 0x6b2   :  { %4666 = vmatprep.subr.bf16.mxu1 %v2722_v27  ;;  %v4784_v27 = vadd.f32 %v4750_v1, %v4734_v0  ;;  %v4811_v0 = vld [vmem:[#allocation8 + $0x20] sm:$0xff] }
 0x6b3   :  { %v4947_v47 = vunpack.c.h.s8.bf16 %v4811_v0  ;;  %v4943_v31 = vunpack.c.l.s8.bf16 %v4811_v0 }
 0x6b4   :  { %4626 = vmatpush2.bf16.msra.mxu0 %v2593_v8  ;;  %v2537_v8 = vunpack.c.l.s8.bf16 %v1097_v15  ;;  %v4792_v41 = vmax.f32 %v4784_v27, 0.0  ;;  %v4840_v27 = vld [vmem:[#allocation8 + $0x108] sm:$0xff] }
 0x6b5   :  { %4667 = vmatpush2.bf16.msra.mxu1 %v2721_v9  ;;  %4627 = vmatprep.subr.bf16.mxu0 %v2586_v14  ;;  %v2665_v9 = vunpack.c.l.s8.bf16 %v1161_v22  ;;  %v5028_v14 = vunpack.c.h.s8.bf16 %v4852_v29  ;;  %v5007_v29 = vunpack.c.l.s8.bf16 %v4843_v19 }
 0x6b6   :  { %4668 = vmatprep.subr.bf16.mxu1 %v2714_v7  ;;  %v4819_v7 = vld [vmem:[#allocation8 + $0x60] sm:$0xff] }
 0x6b8   :  { %4628 = vmatpush2.bf16.msra.mxu0 %v2585_v13  ;;  %v4794_v13 = vmax.f32 %v4786_v54, 0.0 }
 0x6b9   :  { %4669 = vmatpush2.bf16.msra.mxu1 %v2713_v53  ;;  %4629 = vmatprep.subr.bf16.mxu0 %v2578_v55  ;;  %v4963_v53 = vunpack.c.h.s8.bf16 %v4819_v7  ;;  %v5027_v55 = vunpack.c.h.s8.bf16 %v4851_v12 }
 0x6ba   :  { %4670 = vmatprep.subr.bf16.mxu1 %v2706_v33  ;;  %v7114_v33 = vpack.c.bf16 %v4792_v41, %v4792_v41 }
 0x6bc   :  { %4630 = vmatpush2.bf16.msra.mxu0 %v2577_v35  ;;  %v4816_v35 = vld [vmem:[#allocation8 + $0x48] sm:$0xff] }
 0x6bd   :  { %4671 = vmatpush2.bf16.msra.mxu1 %v2705_v60  ;;  %4631 = vmatprep.subr.bf16.mxu0 %v2570_v30  ;;  %v4956_v46 = vunpack.c.h.s8.bf16 %v4816_v35 }
 0x6be   :  { %4672 = vmatprep.subr.bf16.mxu1 %v2698_v51  ;;  %v7118_v51 = vpack.c.bf16 %v4794_v13, %v4794_v13  ;;  %v4836_v13 = vld [vmem:[#allocation8 + $0xe8] sm:$0xff] }
 0x6c0   :  { %4632 = vmatpush2.bf16.msra.mxu0 %v2569_v21  ;;  %v4959_v21 = vunpack.c.l.s8.bf16 %v4819_v7 }
 0x6c1   :  { %4673 = vmatpush2.bf16.msra.mxu1 %v2697_v52  ;;  %4633 = vmatprep.subr.bf16.mxu0 %v2562_v38 }
 0x6c2   :  { %4674 = vmatprep.subr.bf16.mxu1 %v2690_v39  ;;  %v5023_v39 = vunpack.c.l.s8.bf16 %v4851_v12  ;;  %v5000_v12 = vunpack.c.l.s8.bf16 %v4840_v27 }
 0x6c4   :  { %4634 = vmatpush2.bf16.msra.mxu0 %v2561_v56  ;;  %v5020_v56 = vunpack.c.h.s8.bf16 %v4848_v61 }
 0x6c5   :  { %4675 = vmatpush2.bf16.msra.mxu1 %v2689_v58  ;;  %4635 = vmatprep.subr.bf16.mxu0 %v2554_v6 }
 0x6c6   :  { %4676 = vmatprep.subr.bf16.mxu1 %v2682_v17 }
 0x6c8   :  { %4636 = vmatpush2.bf16.msra.mxu0 %v2553_v18  ;;  %v4952_v18 = vunpack.c.l.s8.bf16 %v4816_v35  ;;  %v4835_v35 = vld [vmem:[#allocation8 + $0xe0] sm:$0xff] }
 0x6c9   :  { %4677 = vmatpush2.bf16.msra.mxu1 %v2681_v23  ;;  %4637 = vmatprep.subr.bf16.mxu0 %v2546_v4  ;;  %v5016_v23 = vunpack.c.l.s8.bf16 %v4848_v61  ;;  %v4812_v4 = vld [vmem:[#allocation8 + $0x28] sm:$0xff]  ;;  %v4995_v61 = vunpack.c.h.s8.bf16 %v4835_v35 }
 0x6ca   :  { %4678 = vmatprep.subr.bf16.mxu1 %v2674_v5  ;;  %v4951_v5 = vunpack.c.l.s8.bf16 %v4815_v44  ;;  %v4948_v22 = vunpack.c.h.s8.bf16 %v4812_v4 }
 0x6cc   :  { %4638 = vmatpush2.bf16.msra.mxu0 %v2545_v45  ;;  %v5011_v45 = vunpack.c.h.s8.bf16 %v4843_v19  ;;  %v4715_v19 = vsub.s32 5, %v6733_v26 }
 0x6cd   :  { %4679 = vmatpush2.bf16.msra.mxu1 %v2673_v62  ;;  %4639 = vmatprep.subr.bf16.mxu0 %v2538_v63  ;;  %v4944_v62 = vunpack.c.l.s8.bf16 %v4812_v4  ;;  %v7129_v4 = vsub.s32 0, %v6733_v26 }
 0x6ce   :  { %4680 = vmatprep.subr.bf16.mxu1 %v2666_v3  ;;  %v4808_v3 = vld [vmem:[#allocation8 + $0x8] sm:$0xff] }
 0x6cf   :  { %v4940_v54 = vunpack.c.h.s8.bf16 %v4808_v3  ;;  %v4936_v41 = vunpack.c.l.s8.bf16 %v4808_v3 }
 0x6d0   :  { %4640 = vmatpush2.bf16.msra.mxu0 %v2537_v8  ;;  %v4807_v8 = vld [vmem:[#allocation8] sm:$0xff] }
 0x6d1   :  { %4681 = vmatpush2.bf16.msra.mxu1 %v2665_v9  ;;  %5191 = vmatprep.subr.bf16.mxu0 %v4964_v40  ;;  %v5004_v9 = vunpack.c.h.s8.bf16 %v4840_v27  ;;  %v4839_v40 = vld [vmem:[#allocation8 + $0x100] sm:$0xff] }
 0x6d2   :  { %5232 = vmatprep.subr.bf16.mxu1 %v5028_v14  ;;  %v4939_v14 = vunpack.c.h.s8.bf16 %v4807_v8  ;;  %v5003_v7 = vunpack.c.h.s8.bf16 %v4839_v40 }
 0x6d3   :  { %v4397_v60 = vpop.f32.mrf.mxu0  ;;  %4642 = vmatmul.mubr.bf16.vlgmr.msra.gmra.mxu0 %v6914_v49 }
 0x6d4   :  { %v4438_v30 = vpop.f32.mrf.mxu1  ;;  %4683 = vmatmul.mubr.bf16.vlgmr.msra.gmra.mxu1 %v6918_v50  ;;  %v4398_v20 = vadd.f32 %v4397_v60, %v7087_v37  ;;  %5192 = vmatpush1.bf16.msra.mxu0 %v4963_v53  ;;  %v4847_v37 = vld [vmem:[#allocation8 + $0x140] sm:$0xff]  ;;  %v4868_v53 = vld [vmem:[#allocation8 + $0x1e8] sm:$0xff] }
 0x6d5   :  { %5223 = vmatprep.mubr.bf16.mxu0 %v7114_v33  ;;  %5233 = vmatpush1.bf16.msra.mxu1 %v5027_v55  ;;  %v4399_v52 = vpop.f32.mrf.mxu0  ;;  %v5019_v16 = vunpack.c.h.s8.bf16 %v4847_v37  ;;  %v5015_v15 = vunpack.c.l.s8.bf16 %v4847_v37  ;;  %v4935_v55 = vunpack.c.l.s8.bf16 %v4807_v8  ;;  %v5060_v60 = vunpack.c.h.s8.bf16 %v4868_v53 }
 0x6d6   :  { %5264 = vmatprep.mubr.bf16.mxu1 %v7118_v51  ;;  %v4440_v38 = vpop.f32.mrf.mxu1  ;;  %v7123_v49 = vadd.f32 %v4438_v30, %v4398_v20  ;;  %v4400_v50 = vadd.f32 %v4399_v52, %v7092_v48  ;;  %5193 = vmatprep.subr.bf16.mxu0 %v4960_v36  ;;  %v4844_v48 = vld [vmem:[#allocation8 + $0x128] sm:$0xff]  ;;  %v4999_v36 = vunpack.c.l.s8.bf16 %v4839_v40  ;;  %v4867_v30 = vld [vmem:[#allocation8 + $0x1e0] sm:$0xff]  ;;  %v5056_v52 = vunpack.c.l.s8.bf16 %v4868_v53 }
 0x6d7   :  { %5234 = vmatprep.subr.bf16.mxu1 %v5024_v32  ;;  %v4401_v58 = vpop.f32.mrf.mxu0  ;;  %v5012_v1 = vunpack.c.h.s8.bf16 %v4844_v48  ;;  %v5008_v63 = vunpack.c.l.s8.bf16 %v4844_v48  ;;  %v4996_v32 = vunpack.c.h.s8.bf16 %v4836_v13  ;;  %v5059_v20 = vunpack.c.h.s8.bf16 %v4867_v30 }
 0x6d8   :  { %v4442_v6 = vpop.f32.mrf.mxu1  ;;  %v7126_v17 = vadd.f32 %v4440_v38, %v4400_v50  ;;  %5194 = vmatpush1.bf16.msra.mxu0 %v4959_v21  ;;  %v4992_v21 = vunpack.c.l.s8.bf16 %v4836_v13  ;;  %v4832_v38 = vld [vmem:[#allocation8 + $0xc8] sm:$0xff]  ;;  %v5055_v44 = vunpack.c.l.s8.bf16 %v4867_v30  ;;  %v4863_v58 = vld [vmem:[#allocation8 + $0x1c0] sm:$0xff]  ;;  %v4746_v40 = vrot.slane %v7106_v24, %v7129_v4 }
 0x6d9   :  { %5235 = vmatpush1.bf16.msra.mxu1 %v5023_v39  ;;  %v4402_v34 = vpop.f32.mrf.mxu0  ;;  %5195 = vmatprep.subr.bf16.mxu0 %v4956_v46  ;;  %v4864_v39 = vld [vmem:[#allocation8 + $0x1c8] sm:$0xff]  ;;  %v4991_v46 = vunpack.c.l.s8.bf16 %v4835_v35  ;;  %v4988_v50 = vunpack.c.h.s8.bf16 %v4832_v38  ;;  %v5047_v48 = vunpack.c.l.s8.bf16 %v4863_v58 }
 0x6da   :  { %v4443_v11 = vpop.f32.mrf.mxu1  ;;  %5236 = vmatprep.subr.bf16.mxu1 %v5020_v56  ;;  %v4831_v56 = vld [vmem:[#allocation8 + $0xc0] sm:$0xff]  ;;  %v5052_v37 = vunpack.c.h.s8.bf16 %v4864_v39  ;;  %v4984_v34 = vunpack.c.l.s8.bf16 %v4832_v38 }
 0x6db   :  { %v4987_v6 = vunpack.c.h.s8.bf16 %v4831_v56  ;;  %v5048_v11 = vunpack.c.l.s8.bf16 %v4864_v39 }
 0x6dc   :  { %5196 = vmatpush1.bf16.msra.mxu0 %v4955_v43  ;;  %v5051_v43 = vunpack.c.h.s8.bf16 %v4863_v58  ;;  %v4915_v58 = vld [vmem:[#allocation8 + $0x360] sm:$0xff] }
 0x6dd   :  { %5237 = vmatpush1.bf16.msra.mxu1 %v5019_v16  ;;  %5197 = vmatprep.subr.bf16.mxu0 %v4952_v18  ;;  %v4828_v16 = vld [vmem:[#allocation8 + $0xa8] sm:$0xff] }
 0x6de   :  { %5238 = vmatprep.subr.bf16.mxu1 %v5016_v23  ;;  %v4860_v18 = vld [vmem:[#allocation8 + $0x1a8] sm:$0xff]  ;;  %v4983_v23 = vunpack.c.l.s8.bf16 %v4831_v56 }
 0x6df   :  { %v5044_v0 = vunpack.c.h.s8.bf16 %v4860_v18  ;;  %v5040_v27 = vunpack.c.l.s8.bf16 %v4860_v18  ;;  %v5155_v18 = vunpack.c.h.s8.bf16 %v4915_v58 }
 0x6e0   :  { %5198 = vmatpush1.bf16.msra.mxu0 %v4951_v5  ;;  %v4980_v5 = vunpack.c.h.s8.bf16 %v4828_v16 }
 0x6e1   :  { %5239 = vmatpush1.bf16.msra.mxu1 %v5015_v15  ;;  %5199 = vmatprep.subr.bf16.mxu0 %v4948_v22  ;;  %v4827_v15 = vld [vmem:[#allocation8 + $0xa0] sm:$0xff]  ;;  %v7132_v22 = vsub.s32 2, %v6733_v26 }
 0x6e2   :  { %5240 = vmatprep.subr.bf16.mxu1 %v5012_v1  ;;  %v4859_v1 = vld [vmem:[#allocation8 + $0x1a0] sm:$0xff]  ;;  %v4975_v8 = vunpack.c.l.s8.bf16 %v4827_v15 }
 0x6e3   :  { %v4704_v3 = vrot.slane %v7100_v59, %v7132_v22  ;;  %v4754_v13 = vrot.slane %v7106_v24, %v7132_v22 }
 0x6e4   :  { %5200 = vmatpush1.bf16.msra.mxu0 %v4947_v47  ;;  %v4979_v47 = vunpack.c.h.s8.bf16 %v4827_v15 }
 0x6e5   :  { %5241 = vmatpush1.bf16.msra.mxu1 %v5011_v45  ;;  %5201 = vmatprep.subr.bf16.mxu0 %v4944_v62  ;;  %v4696_v45 = vrot.slane %v7100_v59, %v7129_v4  ;;  %v5043_v62 = vunpack.c.h.s8.bf16 %v4859_v1 }
 0x6e6   :  { %5242 = vmatprep.subr.bf16.mxu1 %v5008_v63  ;;  %v4976_v63 = vunpack.c.l.s8.bf16 %v4828_v16  ;;  %v4880_v16 = vld [vmem:[#allocation8 + $0x248] sm:$0xff] }
 0x6e8   :  { %5202 = vmatpush1.bf16.msra.mxu0 %v4943_v31  ;;  %v4824_v31 = vld [vmem:[#allocation8 + $0x88] sm:$0xff] }
 0x6e9   :  { %5243 = vmatpush1.bf16.msra.mxu1 %v5007_v29  ;;  %5203 = vmatprep.subr.bf16.mxu0 %v4940_v54  ;;  %v4716_v29 = vrot.slane %v7100_v59, %v4715_v19  ;;  %v4856_v54 = vld [vmem:[#allocation8 + $0x188] sm:$0xff]  ;;  %v4968_v30 = vunpack.c.l.s8.bf16 %v4824_v31 }
 0x6ea   :  { %5244 = vmatprep.subr.bf16.mxu1 %v5004_v9  ;;  %v4733_v9 = vmul.f32 %v4696_v45, %v6953_v57  ;;  %v5036_v53 = vunpack.c.h.s8.bf16 %v4856_v54  ;;  %v4766_v57 = vrot.slane %v7106_v24, %v4715_v19  ;;  %v4912_v19 = vld [vmem:[#allocation8 + $0x348] sm:$0xff] }
 0x6ec   :  { %5204 = vmatpush1.bf16.msra.mxu0 %v4939_v14  ;;  %v5039_v14 = vunpack.c.l.s8.bf16 %v4859_v1  ;;  %v4783_v35 = vadd.f32 %v4746_v40, %v4733_v9 }
 0x6ed   :  { %5245 = vmatpush1.bf16.msra.mxu1 %v5003_v7  ;;  %5205 = vmatprep.subr.bf16.mxu0 %v4936_v41  ;;  %v4972_v7 = vunpack.c.h.s8.bf16 %v4824_v31  ;;  %v4823_v41 = vld [vmem:[#allocation8 + $0x80] sm:$0xff]  ;;  %v5151_v31 = vunpack.c.l.s8.bf16 %v4915_v58  ;;  %v4900_v58 = vld [vmem:[#allocation8 + $0x2e8] sm:$0xff] }
 0x6ee   :  { %5246 = vmatprep.subr.bf16.mxu1 %v5000_v12  ;;  %v4735_v12 = vmul.f32 %v4704_v3, %v7011_v42  ;;  %v5032_v42 = vunpack.c.l.s8.bf16 %v4856_v54  ;;  %v4967_v38 = vunpack.c.l.s8.bf16 %v4823_v41  ;;  %v4791_v39 = vmax.f32 %v4783_v35, 0.0 }
 0x6ef   :  { %v5148_v54 = vunpack.c.h.s8.bf16 %v4912_v19 }
 0x6f0   :  { %5206 = vmatpush1.bf16.msra.mxu0 %v4935_v55  ;;  %v4855_v55 = vld [vmem:[#allocation8 + $0x180] sm:$0xff] }
 0x6f1   :  { %5247 = vmatpush1.bf16.msra.mxu1 %v4999_v36  ;;  %5207 = vmatprep.subr.bf16.mxu0 %v4996_v32  ;;  %v4738_v36 = vmul.f32 %v4716_v29, %v7074_v28  ;;  %v4971_v32 = vunpack.c.h.s8.bf16 %v4823_v41  ;;  %v5031_v28 = vunpack.c.l.s8.bf16 %v4855_v55  ;;  %v5080_v41 = vunpack.c.l.s8.bf16 %v4880_v16 }
 0x6f2   :  { %5248 = vmatprep.subr.bf16.mxu1 %v5060_v60  ;;  %v5035_v60 = vunpack.c.h.s8.bf16 %v4855_v55  ;;  %v4908_v55 = vld [vmem:[#allocation8 + $0x328] sm:$0xff] }
 0x6f3   :  { %v5140_v35 = vunpack.c.h.s8.bf16 %v4908_v55 }
 0x6f4   :  { %5208 = vmatpush2.bf16.msra.mxu0 %v4995_v61  ;;  %v4785_v61 = vadd.f32 %v4754_v13, %v4735_v12  ;;  %v4876_v12 = vld [vmem:[#allocation8 + $0x228] sm:$0xff] }
 0x6f5   :  { %5249 = vmatpush2.bf16.msra.mxu1 %v5059_v20  ;;  %5209 = vmatprep.subr.bf16.mxu0 %v4992_v21  ;;  %v4884_v20 = vld [vmem:[#allocation8 + $0x268] sm:$0xff]  ;;  %v4788_v21 = vadd.f32 %v4766_v57, %v4738_v36  ;;  %v5076_v36 = vunpack.c.h.s8.bf16 %v4876_v12  ;;  %v4875_v57 = vld [vmem:[#allocation8 + $0x220] sm:$0xff] }
 0x6f6   :  { %5250 = vmatprep.subr.bf16.mxu1 %v5056_v52  ;;  %v4916_v52 = vld [vmem:[#allocation8 + $0x368] sm:$0xff] }
 0x6f7   :  { %v5156_v56 = vunpack.c.h.s8.bf16 %v4916_v52  ;;  %v5152_v15 = vunpack.c.l.s8.bf16 %v4916_v52  ;;  %v5071_v52 = vunpack.c.l.s8.bf16 %v4875_v57 }
 0x6f8   :  { %5210 = vmatpush2.bf16.msra.mxu0 %v4991_v46  ;;  %v5092_v46 = vunpack.c.h.s8.bf16 %v4884_v20 }
 0x6f9   :  { %5251 = vmatpush2.bf16.msra.mxu1 %v5055_v44  ;;  %5211 = vmatprep.subr.bf16.mxu0 %v4988_v50  ;;  %v4883_v44 = vld [vmem:[#allocation8 + $0x260] sm:$0xff]  ;;  %v4793_v50 = vmax.f32 %v4785_v61, 0.0  ;;  %v5072_v61 = vunpack.c.l.s8.bf16 %v4876_v12 }
 0x6fa   :  { %5252 = vmatprep.subr.bf16.mxu1 %v5052_v37  ;;  %v4796_v37 = vmax.f32 %v4788_v21, 0.0  ;;  %v5087_v1 = vunpack.c.l.s8.bf16 %v4883_v44  ;;  %v5136_v21 = vunpack.c.l.s8.bf16 %v4908_v55  ;;  %v4711_v55 = vsub.s32 4, %v6733_v26 }
 0x6fc   :  { %5212 = vmatpush2.bf16.msra.mxu0 %v4987_v6  ;;  %v5091_v6 = vunpack.c.h.s8.bf16 %v4883_v44 }
 0x6fd   :  { %5253 = vmatpush2.bf16.msra.mxu1 %v5051_v43  ;;  %5213 = vmatprep.subr.bf16.mxu0 %v4984_v34  ;;  %v7148_v43 = vpack.c.bf16 %v4791_v39, %v4791_v39  ;;  %v5088_v34 = vunpack.c.l.s8.bf16 %v4884_v20 }
 0x6fe   :  { %5254 = vmatprep.subr.bf16.mxu1 %v5048_v11  ;;  %v7150_v11 = vpack.c.bf16 %v4793_v50, %v4793_v50  ;;  %v4903_v50 = vld [vmem:[#allocation8 + $0x300] sm:$0xff] }
 0x700   :  { %5214 = vmatpush2.bf16.msra.mxu0 %v4983_v23 }
 0x701   :  { %5255 = vmatpush2.bf16.msra.mxu1 %v5047_v48  ;;  %5215 = vmatprep.subr.bf16.mxu0 %v4980_v5  ;;  %v7153_v5 = vpack.c.bf16 %v4796_v37, %v4796_v37 }
 0x702   :  { %5256 = vmatprep.subr.bf16.mxu1 %v5044_v0 }
 0x704   :  { %5216 = vmatpush2.bf16.msra.mxu0 %v4979_v47 }
 0x705   :  { %5257 = vmatpush2.bf16.msra.mxu1 %v5043_v62  ;;  %5217 = vmatprep.subr.bf16.mxu0 %v4976_v63  ;;  %v5084_v62 = vunpack.c.h.s8.bf16 %v4880_v16  ;;  %v4879_v63 = vld [vmem:[#allocation8 + $0x240] sm:$0xff] }
 0x706   :  { %5258 = vmatprep.subr.bf16.mxu1 %v5040_v27  ;;  %v5083_v40 = vunpack.c.h.s8.bf16 %v4879_v63 }
 0x708   :  { %5218 = vmatpush2.bf16.msra.mxu0 %v4975_v8  ;;  %v4911_v8 = vld [vmem:[#allocation8 + $0x340] sm:$0xff] }
 0x709   :  { %5259 = vmatpush2.bf16.msra.mxu1 %v5039_v14  ;;  %5219 = vmatprep.subr.bf16.mxu0 %v4972_v7  ;;  %v5147_v13 = vunpack.c.h.s8.bf16 %v4911_v8 }
 0x70a   :  { %5260 = vmatprep.subr.bf16.mxu1 %v5036_v53  ;;  %v5079_v53 = vunpack.c.l.s8.bf16 %v4879_v63 }
 0x70c   :  { %5220 = vmatpush2.bf16.msra.mxu0 %v4971_v32  ;;  %v5143_v32 = vunpack.c.l.s8.bf16 %v4911_v8 }
 0x70d   :  { %5261 = vmatpush2.bf16.msra.mxu1 %v5035_v60  ;;  %5221 = vmatprep.subr.bf16.mxu0 %v4968_v30  ;;  %v4907_v60 = vld [vmem:[#allocation8 + $0x320] sm:$0xff]  ;;  %v5075_v30 = vunpack.c.h.s8.bf16 %v4875_v57 }
 0x70e   :  { %5262 = vmatprep.subr.bf16.mxu1 %v5032_v42  ;;  %v4872_v42 = vld [vmem:[#allocation8 + $0x208] sm:$0xff]  ;;  %v5139_v20 = vunpack.c.h.s8.bf16 %v4907_v60  ;;  %v4891_v57 = vld [vmem:[#allocation8 + $0x2a0] sm:$0xff] }
 0x70f   :  { %v5068_v39 = vunpack.c.h.s8.bf16 %v4872_v42  ;;  %v5064_v37 = vunpack.c.l.s8.bf16 %v4872_v42 }
 0x710   :  { %5222 = vmatpush2.bf16.msra.mxu0 %v4967_v38  ;;  %v4904_v38 = vld [vmem:[#allocation8 + $0x308] sm:$0xff] }
 0x711   :  { %5263 = vmatpush2.bf16.msra.mxu1 %v5031_v28  ;;  %5273 = vmatprep.subr.bf16.mxu0 %v5092_v46  ;;  %v4871_v28 = vld [vmem:[#allocation8 + $0x200] sm:$0xff]  ;;  %v5135_v46 = vunpack.c.l.s8.bf16 %v4907_v60  ;;  %v5132_v44 = vunpack.c.h.s8.bf16 %v4904_v38 }
 0x712   :  { %5314 = vmatprep.subr.bf16.mxu1 %v5156_v56  ;;  %v5067_v56 = vunpack.c.h.s8.bf16 %v4871_v28  ;;  %v5063_v16 = vunpack.c.l.s8.bf16 %v4871_v28  ;;  %v4923_v60 = vld [vmem:[#allocation8 + $0x3a0] sm:$0xff] }
 0x713   :  { %v4479_v23 = vpop.f32.mrf.mxu0  ;;  %5224 = vmatmul.mubr.bf16.vlgmr.msra.gmra.mxu0 %v7148_v43 }
 0x714   :  { %v4520_v48 = vpop.f32.mrf.mxu1  ;;  %v4480_v0 = vadd.f32 %v4479_v23, %v7123_v49  ;;  %5265 = vmatmul.mubr.bf16.vlgmr.msra.gmra.mxu1 %v7150_v11  ;;  %5274 = vmatpush1.bf16.msra.mxu0 %v5091_v6  ;;  %v5131_v6 = vunpack.c.h.s8.bf16 %v4903_v50  ;;  %v5124_v23 = vunpack.c.h.s8.bf16 %v4900_v58 }
 0x715   :  { %5305 = vmatprep.mubr.bf16.mxu0 %v7153_v5  ;;  %v4481_v47 = vpop.f32.mrf.mxu0  ;;  %5275 = vmatprep.subr.bf16.mxu0 %v5088_v34  ;;  %v5128_v34 = vunpack.c.l.s8.bf16 %v4904_v38  ;;  %v5103_v38 = vunpack.c.l.s8.bf16 %v4891_v57 }
 0x716   :  { %v4522_v45 = vpop.f32.mrf.mxu1  ;;  %v7158_v3 = vadd.f32 %v4520_v48, %v4480_v0  ;;  %v4482_v27 = vadd.f32 %v4481_v47, %v7126_v17  ;;  %5315 = vmatpush1.bf16.msra.mxu1 %v5155_v18  ;;  %v5144_v17 = vunpack.c.l.s8.bf16 %v4912_v19  ;;  %v4932_v18 = vld [vmem:[#allocation8 + $0x3e8] sm:$0xff]  ;;  %v4899_v48 = vld [vmem:[#allocation8 + $0x2e0] sm:$0xff]  ;;  %v5120_v47 = vunpack.c.l.s8.bf16 %v4900_v58 }
 0x717   :  { %v4483_v29 = vpop.f32.mrf.mxu0  ;;  %5316 = vmatprep.subr.bf16.mxu1 %v5152_v15  ;;  %v5127_v15 = vunpack.c.l.s8.bf16 %v4903_v50  ;;  %v5188_v0 = vunpack.c.h.s8.bf16 %v4932_v18  ;;  %v5123_v19 = vunpack.c.h.s8.bf16 %v4899_v48  ;;  %v5184_v63 = vunpack.c.l.s8.bf16 %v4932_v18  ;;  %v4887_v50 = vld [vmem:[#allocation8 + $0x280] sm:$0xff] }
 0x718   :  { %v4524_v49 = vpop.f32.mrf.mxu1  ;;  %v7161_v9 = vadd.f32 %v4522_v45, %v4482_v27  ;;  %5276 = vmatpush1.bf16.msra.mxu0 %v5087_v1  ;;  %v4931_v1 = vld [vmem:[#allocation8 + $0x3e0] sm:$0xff]  ;;  %v4896_v45 = vld [vmem:[#allocation8 + $0x2c8] sm:$0xff]  ;;  %v5119_v27 = vunpack.c.l.s8.bf16 %v4899_v48  ;;  %v5099_v58 = vunpack.c.h.s8.bf16 %v4887_v50 }
 0x719   :  { %v4484_v14 = vpop.f32.mrf.mxu0  ;;  %5277 = vmatprep.subr.bf16.mxu0 %v5084_v62  ;;  %v5187_v62 = vunpack.c.h.s8.bf16 %v4931_v1  ;;  %v5116_v29 = vunpack.c.h.s8.bf16 %v4896_v45  ;;  %v4895_v49 = vld [vmem:[#allocation8 + $0x2c0] sm:$0xff] }
 0x71a   :  { %v4525_v7 = vpop.f32.mrf.mxu1  ;;  %5317 = vmatpush1.bf16.msra.mxu1 %v5151_v31  ;;  %v4928_v31 = vld [vmem:[#allocation8 + $0x3c8] sm:$0xff]  ;;  %v5115_v14 = vunpack.c.h.s8.bf16 %v4895_v49 }
 0x71b   :  { %5318 = vmatprep.subr.bf16.mxu1 %v5148_v54  ;;  %v5183_v54 = vunpack.c.l.s8.bf16 %v4931_v1  ;;  %v5180_v8 = vunpack.c.h.s8.bf16 %v4928_v31  ;;  %v5112_v7 = vunpack.c.l.s8.bf16 %v4896_v45 }
 0x71c   :  { %5278 = vmatpush1.bf16.msra.mxu0 %v5083_v40  ;;  %v4927_v40 = vld [vmem:[#allocation8 + $0x3c0] sm:$0xff] }
 0x71d   :  { %5279 = vmatprep.subr.bf16.mxu0 %v5080_v41  ;;  %v4892_v41 = vld [vmem:[#allocation8 + $0x2a8] sm:$0xff]  ;;  %v5179_v12 = vunpack.c.h.s8.bf16 %v4927_v40 }
 0x71e   :  { %5319 = vmatpush1.bf16.msra.mxu1 %v5147_v13  ;;  %v5176_v13 = vunpack.c.l.s8.bf16 %v4928_v31  ;;  %v5104_v42 = vunpack.c.l.s8.bf16 %v4892_v41 }
 0x71f   :  { %5320 = vmatprep.subr.bf16.mxu1 %v5144_v17  ;;  %v5111_v17 = vunpack.c.l.s8.bf16 %v4895_v49 }
 0x720   :  { %5280 = vmatpush1.bf16.msra.mxu0 %v5079_v53  ;;  %v4924_v53 = vld [vmem:[#allocation8 + $0x3a8] sm:$0xff] }
 0x721   :  { %5281 = vmatprep.subr.bf16.mxu0 %v5076_v36  ;;  %v5108_v36 = vunpack.c.h.s8.bf16 %v4892_v41 }
 0x722   :  { %5321 = vmatpush1.bf16.msra.mxu1 %v5143_v32  ;;  %v5175_v32 = vunpack.c.l.s8.bf16 %v4927_v40 }
 0x723   :  { %5322 = vmatprep.subr.bf16.mxu1 %v5140_v35  ;;  %v5172_v35 = vunpack.c.h.s8.bf16 %v4924_v53 }
 0x724   :  { %5282 = vmatpush1.bf16.msra.mxu0 %v5075_v30  ;;  %v5107_v30 = vunpack.c.h.s8.bf16 %v4891_v57  ;;  %v4813_v57 = vld [vmem:[#allocation8 + $0x30] sm:$0xff] }
 0x725   :  { %5283 = vmatprep.subr.bf16.mxu0 %v5072_v61  ;;  %v4712_v61 = vrot.slane %v7100_v59, %v4711_v55 }
 0x726   :  { %5323 = vmatpush1.bf16.msra.mxu1 %v5139_v20  ;;  %v4888_v20 = vld [vmem:[#allocation8 + $0x288] sm:$0xff] }
 0x727   :  { %5324 = vmatprep.subr.bf16.mxu1 %v5136_v21  ;;  %v5171_v21 = vunpack.c.h.s8.bf16 %v4923_v60  ;;  %v4737_v28 = vmul.f32 %v4712_v61, %v7069_v25 }
 0x728   :  { %5284 = vmatpush1.bf16.msra.mxu0 %v5071_v52  ;;  %v5168_v52 = vunpack.c.l.s8.bf16 %v4924_v53 }
 0x729   :  { %5285 = vmatprep.subr.bf16.mxu0 %v5068_v39  ;;  %v4920_v39 = vld [vmem:[#allocation8 + $0x388] sm:$0xff] }
 0x72a   :  { %5325 = vmatpush1.bf16.msra.mxu1 %v5135_v46  ;;  %v4762_v46 = vrot.slane %v7106_v24, %v4711_v55  ;;  %v5164_v59 = vunpack.c.h.s8.bf16 %v4920_v39  ;;  %v5160_v25 = vunpack.c.l.s8.bf16 %v4920_v39  ;;  %v5095_v24 = vunpack.c.l.s8.bf16 %v4887_v50  ;;  %v4814_v55 = vld [vmem:[#allocation8 + $0x38] sm:$0xff] }
 0x72b   :  { %5326 = vmatprep.subr.bf16.mxu1 %v5132_v44  ;;  %v5100_v44 = vunpack.c.h.s8.bf16 %v4888_v20  ;;  %v4834_v50 = vld [vmem:[#allocation8 + $0xd8] sm:$0xff] }
 0x72c   :  { %5286 = vmatpush1.bf16.msra.mxu0 %v5067_v56  ;;  %v5167_v56 = vunpack.c.l.s8.bf16 %v4923_v60  ;;  %v4810_v60 = vld [vmem:[#allocation8 + $0x18] sm:$0xff] }
 0x72d   :  { %5287 = vmatprep.subr.bf16.mxu0 %v5064_v37  ;;  %v4919_v37 = vld [vmem:[#allocation8 + $0x380] sm:$0xff]  ;;  %v4942_v61 = vunpack.c.h.s8.bf16 %v4810_v60 }
 0x72e   :  { %5327 = vmatpush1.bf16.msra.mxu1 %v5131_v6  ;;  %v4787_v6 = vadd.f32 %v4762_v46, %v4737_v28  ;;  %v5163_v18 = vunpack.c.h.s8.bf16 %v4919_v37  ;;  %v5159_v1 = vunpack.c.l.s8.bf16 %v4919_v37  ;;  %v4837_v28 = vld [vmem:[#allocation8 + $0xf0] sm:$0xff] }
 0x72f   :  { %5328 = vmatprep.subr.bf16.mxu1 %v5128_v34  ;;  %v5096_v34 = vunpack.c.l.s8.bf16 %v4888_v20  ;;  %v4997_v46 = vunpack.c.h.s8.bf16 %v4837_v28  ;;  %v4833_v37 = vld [vmem:[#allocation8 + $0xd0] sm:$0xff] }
 0x730   :  { %5288 = vmatpush1.bf16.msra.mxu0 %v5063_v16  ;;  %v4822_v16 = vld [vmem:[#allocation8 + $0x78] sm:$0xff]  ;;  %v4795_v48 = vmax.f32 %v4787_v6, 0.0  ;;  %v4986_v6 = vunpack.c.l.s8.bf16 %v4834_v50 }
 0x731   :  { %5289 = vmatprep.subr.bf16.mxu0 %v5124_v23  ;;  %v7167_v23 = vld [vmem:[#allocation8 + $0x178] sm:$0xff] }
 0x732   :  { %5329 = vmatpush1.bf16.msra.mxu1 %v5127_v15  ;;  %v4966_v15 = vunpack.c.h.s8.bf16 %v4822_v16  ;;  %v7170_v45 = vpack.c.bf16 %v4795_v48, %v4795_v48 }
 0x733   :  { %5330 = vmatprep.subr.bf16.mxu1 %v5188_v0  ;;  %v4821_v0 = vld [vmem:[#allocation8 + $0x70] sm:$0xff] }
 0x734   :  { %5290 = vmatpush2.bf16.msra.mxu0 %v5123_v19  ;;  %v5030_v19 = vunpack.c.h.s8.bf16 %v7167_v23  ;;  %v4961_v49 = vunpack.c.l.s8.bf16 %v4821_v0 }
 0x735   :  { %5291 = vmatprep.subr.bf16.mxu0 %v5120_v47  ;;  %v4965_v47 = vunpack.c.h.s8.bf16 %v4821_v0 }
 0x736   :  { %5331 = vmatpush2.bf16.msra.mxu1 %v5187_v62  ;;  %v4962_v62 = vunpack.c.l.s8.bf16 %v4822_v16  ;;  %v4985_v16 = vunpack.c.l.s8.bf16 %v4833_v37 }
 0x737   :  { %5332 = vmatprep.subr.bf16.mxu1 %v5184_v63  ;;  %v4818_v63 = vld [vmem:[#allocation8 + $0x58] sm:$0xff] }
 0x738   :  { %5292 = vmatpush2.bf16.msra.mxu0 %v5119_v27  ;;  %v4958_v40 = vunpack.c.h.s8.bf16 %v4818_v63 }
 0x739   :  { %5293 = vmatprep.subr.bf16.mxu0 %v5116_v29 }
 0x73a   :  { %5333 = vmatpush2.bf16.msra.mxu1 %v5183_v54 }
 0x73b   :  { %5334 = vmatprep.subr.bf16.mxu1 %v5180_v8 }
 0x73c   :  { %5294 = vmatpush2.bf16.msra.mxu0 %v5115_v14  ;;  %v4817_v14 = vld [vmem:[#allocation8 + $0x50] sm:$0xff] }
 0x73d   :  { %5295 = vmatprep.subr.bf16.mxu0 %v5112_v7 }
 0x73e   :  { %5335 = vmatpush2.bf16.msra.mxu1 %v5179_v12 }
 0x73f   :  { %5336 = vmatprep.subr.bf16.mxu1 %v5176_v13  ;;  %v4957_v13 = vunpack.c.h.s8.bf16 %v4817_v14 }
 0x740   :  { %5296 = vmatpush2.bf16.msra.mxu0 %v5111_v17 }
 0x741   :  { %5297 = vmatprep.subr.bf16.mxu0 %v5108_v36  ;;  %v4950_v36 = vunpack.c.h.s8.bf16 %v4814_v55 }
 0x742   :  { %5337 = vmatpush2.bf16.msra.mxu1 %v5175_v32  ;;  %v4949_v32 = vunpack.c.h.s8.bf16 %v4813_v57 }
 0x743   :  { %5338 = vmatprep.subr.bf16.mxu1 %v5172_v35  ;;  %v4946_v35 = vunpack.c.l.s8.bf16 %v4814_v55 }
 0x744   :  { %5298 = vmatpush2.bf16.msra.mxu0 %v5107_v30  ;;  %v4945_v30 = vunpack.c.l.s8.bf16 %v4813_v57 }
 0x745   :  { %5299 = vmatprep.subr.bf16.mxu0 %v5104_v42  ;;  %v4809_v42 = vld [vmem:[#allocation8 + $0x10] sm:$0xff] }
 0x746   :  { %5339 = vmatpush2.bf16.msra.mxu1 %v5171_v21  ;;  %v4941_v20 = vunpack.c.h.s8.bf16 %v4809_v42  ;;  %v4938_v21 = vunpack.c.l.s8.bf16 %v4810_v60  ;;  %v6196_v60 = vld [vmem:[#allocation7] sm:$0xff] }
 0x747   :  { %5340 = vmatprep.subr.bf16.mxu1 %v5168_v52  ;;  %v4838_v52 = vld [vmem:[#allocation8 + $0xf8] sm:$0xff] }
 0x748   :  { %5300 = vmatpush2.bf16.msra.mxu0 %v5103_v38  ;;  %v4937_v38 = vunpack.c.l.s8.bf16 %v4809_v42  ;;  %v4998_v39 = vunpack.c.h.s8.bf16 %v4838_v52 }
 0x749   :  { %5301 = vmatprep.subr.bf16.mxu0 %v5100_v44  ;;  %v4994_v44 = vunpack.c.l.s8.bf16 %v4838_v52 }
 0x74a   :  { %5341 = vmatpush2.bf16.msra.mxu1 %v5167_v56  ;;  %v4993_v56 = vunpack.c.l.s8.bf16 %v4837_v28 }
 0x74b   :  { %5342 = vmatprep.subr.bf16.mxu1 %v5164_v59  ;;  %v4990_v59 = vunpack.c.h.s8.bf16 %v4834_v50 }
 0x74c   :  { %5302 = vmatpush2.bf16.msra.mxu0 %v5099_v58  ;;  %v4989_v58 = vunpack.c.h.s8.bf16 %v4833_v37  ;;  %v4853_v37 = vld [vmem:[#allocation8 + $0x170] sm:$0xff] }
 0x74d   :  { %5303 = vmatprep.subr.bf16.mxu0 %v5096_v34  ;;  %v4830_v34 = vld [vmem:[#allocation8 + $0xb8] sm:$0xff] }
 0x74e   :  { %5343 = vmatpush2.bf16.msra.mxu1 %v5163_v18  ;;  %v4982_v18 = vunpack.c.h.s8.bf16 %v4830_v34  ;;  %v4978_v48 = vunpack.c.l.s8.bf16 %v4830_v34  ;;  %v4877_v34 = vld [vmem:[#allocation8 + $0x230] sm:$0xff] }
 0x74f   :  { %5344 = vmatprep.subr.bf16.mxu1 %v5160_v25  ;;  %v4829_v25 = vld [vmem:[#allocation8 + $0xb0] sm:$0xff] }
 0x750   :  { %5304 = vmatpush2.bf16.msra.mxu0 %v5095_v24  ;;  %v4981_v24 = vunpack.c.h.s8.bf16 %v4829_v25  ;;  %v4977_v0 = vunpack.c.l.s8.bf16 %v4829_v25 }
 0x751   :  { %5355 = vmatprep.subr.bf16.mxu0 %v4966_v15  ;;  %v4826_v15 = vld [vmem:[#allocation8 + $0x98] sm:$0xff] }
 0x752   :  { %5345 = vmatpush2.bf16.msra.mxu1 %v5159_v1  ;;  %v4974_v1 = vunpack.c.h.s8.bf16 %v4826_v15 }
 0x753   :  { %v4561_v27 = vpop.f32.mrf.mxu0  ;;  %5306 = vmatmul.mubr.bf16.vlgmr.msra.gmra.mxu0 %v7170_v45  ;;  %5396 = vmatprep.subr.bf16.mxu1 %v5030_v19  ;;  %v4825_v19 = vld [vmem:[#allocation8 + $0x90] sm:$0xff] }
 0x754   :  { %v4602_v31 = vpop.f32.mrf.mxu1  ;;  %v4562_v29 = vadd.f32 %v4561_v27, %v7158_v3  ;;  %5356 = vmatpush1.bf16.msra.mxu0 %v4965_v47  ;;  %5387 = vmatprep.mubr.bf16.mxu0 %v7114_v33  ;;  %v4954_v3 = vunpack.c.l.s8.bf16 %v4818_v63  ;;  %v4953_v33 = vunpack.c.l.s8.bf16 %v4817_v14  ;;  %v4973_v47 = vunpack.c.h.s8.bf16 %v4825_v19  ;;  %v4886_v63 = vld [vmem:[#allocation8 + $0x278] sm:$0xff] }
 0x755   :  { %v7175_v54 = vpop.f32.mrf.mxu0  ;;  %5357 = vmatprep.subr.bf16.mxu0 %v4962_v62  ;;  %v4970_v62 = vunpack.c.l.s8.bf16 %v4826_v15  ;;  %v4969_v27 = vunpack.c.l.s8.bf16 %v4825_v19  ;;  %v5025_v19 = vunpack.c.l.s8.bf16 %v4853_v37 }
 0x756   :  { %v7177_v8 = vpop.f32.mrf.mxu1  ;;  %v7179_v7 = vadd.f32 %v4602_v31, %v4562_v29  ;;  %v5094_v31 = vunpack.c.h.s8.bf16 %v4886_v63  ;;  %v4885_v29 = vld [vmem:[#allocation8 + $0x270] sm:$0xff] }
 0x757   :  { %v4565_v41 = vpop.f32.mrf.mxu0  ;;  %v5093_v14 = vunpack.c.h.s8.bf16 %v4885_v29 }
 0x758   :  { %v4606_v12 = vpop.f32.mrf.mxu1  ;;  %5358 = vmatpush1.bf16.msra.mxu0 %v4961_v49  ;;  %v4564_v49 = vadd.f32 %v7175_v54, %v7161_v9  ;;  %v5090_v41 = vunpack.c.l.s8.bf16 %v4886_v63  ;;  %v5089_v9 = vunpack.c.l.s8.bf16 %v4885_v29  ;;  %v4849_v63 = vld [vmem:[#allocation8 + $0x150] sm:$0xff] }
 0x759   :  { %v4566_v17 = vpop.f32.mrf.mxu0  ;;  %5359 = vmatprep.subr.bf16.mxu0 %v4958_v40  ;;  %v4719_v40 = vsub.s32 6, %v6733_v26  ;;  %v4723_v12 = vsub.s32 7, %v6733_v26  ;;  %v4881_v26 = vld [vmem:[#allocation8 + $0x250] sm:$0xff] }
 0x75a   :  { %v4607_v53 = vpop.f32.mrf.mxu1  ;;  %v5085_v52 = vunpack.c.h.s8.bf16 %v4881_v26 }
 0x75c   :  { %5360 = vmatpush1.bf16.msra.mxu0 %v4957_v13  ;;  %v4882_v13 = vld [vmem:[#allocation8 + $0x258] sm:$0xff] }
 0x75d   :  { %5361 = vmatprep.subr.bf16.mxu0 %v4954_v3  ;;  %v4605_v3 = vadd.f32 %v7177_v8, %v4564_v49 }
 0x760   :  { %5362 = vmatpush1.bf16.msra.mxu0 %v4953_v33  ;;  %v6195_v33 = vld [vmem:[#allocation5] sm:$0xff] }
 0x761   :  { %5363 = vmatprep.subr.bf16.mxu0 %v4950_v36  ;;  %v4720_v36 = vrot.slane %v6195_v33, %v4719_v40 }
 0x764   :  { %5364 = vmatpush1.bf16.msra.mxu0 %v4949_v32  ;;  %v5086_v32 = vunpack.c.h.s8.bf16 %v4882_v13 }
 0x765   :  { %5365 = vmatprep.subr.bf16.mxu0 %v4946_v35 }
 0x768   :  { %5366 = vmatpush1.bf16.msra.mxu0 %v4945_v30  ;;  %v4770_v30 = vrot.slane %v6196_v60, %v4719_v40 }
 0x769   :  { %5367 = vmatprep.subr.bf16.mxu0 %v4942_v61 }
 0x76c   :  { %5368 = vmatpush1.bf16.msra.mxu0 %v4941_v20 }
 0x76d   :  { %5369 = vmatprep.subr.bf16.mxu0 %v4938_v21  ;;  %v4774_v21 = vrot.slane %v6196_v60, %v4723_v12  ;;  %v4841_v60 = vld [vmem:[#allocation8 + $0x110] sm:$0xff] }
 0x770   :  { %5370 = vmatpush1.bf16.msra.mxu0 %v4937_v38 }
 0x771   :  { %5371 = vmatprep.subr.bf16.mxu0 %v4998_v39  ;;  %v5082_v39 = vunpack.c.l.s8.bf16 %v4882_v13 }
 0x774   :  { %5372 = vmatpush2.bf16.msra.mxu0 %v4997_v46 }
 0x775   :  { %5373 = vmatprep.subr.bf16.mxu0 %v4994_v44  ;;  %v4878_v44 = vld [vmem:[#allocation8 + $0x238] sm:$0xff] }
 0x776   :  { %v5074_v15 = vunpack.c.l.s8.bf16 %v4878_v44 }
 0x778   :  { %5374 = vmatpush2.bf16.msra.mxu0 %v4993_v56  ;;  %v5081_v56 = vunpack.c.l.s8.bf16 %v4881_v26 }
 0x779   :  { %5375 = vmatprep.subr.bf16.mxu0 %v4990_v59 }
 0x77c   :  { %5376 = vmatpush2.bf16.msra.mxu0 %v4989_v58  ;;  %v5078_v58 = vunpack.c.h.s8.bf16 %v4878_v44 }
 0x77d   :  { %5377 = vmatprep.subr.bf16.mxu0 %v4986_v6 }
 0x780   :  { %5378 = vmatpush2.bf16.msra.mxu0 %v4985_v16 }
 0x781   :  { %5379 = vmatprep.subr.bf16.mxu0 %v4982_v18  ;;  %v5029_v18 = vunpack.c.h.s8.bf16 %v4853_v37  ;;  %v4866_v37 = vld [vmem:[#allocation8 + $0x1d8] sm:$0xff] }
 0x784   :  { %5380 = vmatpush2.bf16.msra.mxu0 %v4981_v24  ;;  %v5077_v24 = vunpack.c.h.s8.bf16 %v4877_v34 }
 0x785   :  { %5381 = vmatprep.subr.bf16.mxu0 %v4978_v48  ;;  %v5026_v48 = vunpack.c.l.s8.bf16 %v7167_v23  ;;  %v5021_v23 = vunpack.c.h.s8.bf16 %v4849_v63 }
 0x788   :  { %5382 = vmatpush2.bf16.msra.mxu0 %v4977_v0  ;;  %v4850_v0 = vld [vmem:[#allocation8 + $0x158] sm:$0xff] }
 0x789   :  { %5383 = vmatprep.subr.bf16.mxu0 %v4974_v1  ;;  %v4874_v1 = vld [vmem:[#allocation8 + $0x218] sm:$0xff]  ;;  %v5018_v49 = vunpack.c.l.s8.bf16 %v4850_v0 }
 0x78a   :  { %v5066_v40 = vunpack.c.l.s8.bf16 %v4874_v1 }
 0x78c   :  { %5384 = vmatpush2.bf16.msra.mxu0 %v4973_v47  ;;  %v5073_v47 = vunpack.c.l.s8.bf16 %v4877_v34 }
 0x78d   :  { %5385 = vmatprep.subr.bf16.mxu0 %v4970_v62  ;;  %v5022_v62 = vunpack.c.h.s8.bf16 %v4850_v0 }
 0x790   :  { %5386 = vmatpush2.bf16.msra.mxu0 %v4969_v27  ;;  %v5070_v27 = vunpack.c.h.s8.bf16 %v4874_v1 }
 0x791   :  { %5437 = vmatprep.subr.bf16.mxu0 %v5094_v31  ;;  %v4873_v31 = vld [vmem:[#allocation8 + $0x210] sm:$0xff] }
 0x792   :  { %v5069_v29 = vunpack.c.h.s8.bf16 %v4873_v31 }
 0x793   :  { %v4643_v17 = vpop.f32.mrf.mxu0  ;;  %5388 = vmatmul.mubr.bf16.vlgmr.msra.gmra.mxu0 %v7148_v43  ;;  %v4724_v43 = vrot.slane %v6195_v33, %v4723_v12  ;;  %v5065_v12 = vunpack.c.l.s8.bf16 %v4873_v31 }
 0x794   :  { %v4684_v53 = vpop.f32.mrf.mxu1  ;;  %v4644_v55 = vadd.f32 %v4643_v17, %v7179_v7  ;;  %5438 = vmatpush1.bf16.msra.mxu0 %v5093_v14  ;;  %5469 = vmatprep.mubr.bf16.mxu0 %v7153_v5  ;;  %v4846_v14 = vld [vmem:[#allocation8 + $0x138] sm:$0xff]  ;;  %v4845_v17 = vld [vmem:[#allocation8 + $0x130] sm:$0xff] }
 0x795   :  { %v4645_v54 = vpop.f32.mrf.mxu0  ;;  %5439 = vmatprep.subr.bf16.mxu0 %v5090_v41  ;;  %v4902_v41 = vld [vmem:[#allocation8 + $0x2f8] sm:$0xff]  ;;  %v5014_v13 = vunpack.c.h.s8.bf16 %v4846_v14 }
 0x796   :  { %v4686_v57 = vpop.f32.mrf.mxu1  ;;  %v4685_v35 = vadd.f32 %v4684_v53, %v4644_v55  ;;  %v4646_v61 = vadd.f32 %v4645_v54, %v4605_v3  ;;  %v5126_v53 = vunpack.c.h.s8.bf16 %v4902_v41  ;;  %v4901_v3 = vld [vmem:[#allocation8 + $0x2f0] sm:$0xff]  ;;  %v5013_v55 = vunpack.c.h.s8.bf16 %v4845_v17  ;;  %v4842_v54 = vld [vmem:[#allocation8 + $0x118] sm:$0xff] }
 0x797   :  { %v4647_v42 = vpop.f32.mrf.mxu0  ;;  %v5125_v33 = vunpack.c.h.s8.bf16 %v4901_v3  ;;  %v5121_v26 = vunpack.c.l.s8.bf16 %v4901_v3 }
 0x798   :  { %v4688_v8 = vpop.f32.mrf.mxu1  ;;  %v4739_v20 = vmul.f32 %v4720_v36, %v4685_v35  ;;  %v4687_v7 = vadd.f32 %v4686_v57, %v4646_v61  ;;  %5440 = vmatpush1.bf16.msra.mxu0 %v5089_v9  ;;  %v5010_v36 = vunpack.c.l.s8.bf16 %v4846_v14  ;;  %v5122_v9 = vunpack.c.l.s8.bf16 %v4902_v41  ;;  %v4898_v57 = vld [vmem:[#allocation8 + $0x2d8] sm:$0xff]  ;;  %v4897_v61 = vld [vmem:[#allocation8 + $0x2d0] sm:$0xff] }
 0x799   :  { %v4648_v38 = vpop.f32.mrf.mxu0  ;;  %5441 = vmatprep.subr.bf16.mxu0 %v5086_v32  ;;  %v5009_v32 = vunpack.c.l.s8.bf16 %v4845_v17  ;;  %v5006_v35 = vunpack.c.h.s8.bf16 %v4842_v54  ;;  %v5117_v42 = vunpack.c.h.s8.bf16 %v4897_v61  ;;  %v5002_v8 = vunpack.c.l.s8.bf16 %v4842_v54  ;;  %v4857_v54 = vld [vmem:[#allocation8 + $0x190] sm:$0xff] }
 0x79a   :  { %v4689_v5 = vpop.f32.mrf.mxu1  ;;  %v4789_v28 = vadd.f32 %v4770_v30, %v4739_v20  ;;  %v4740_v46 = vmul.f32 %v4724_v43, %v4687_v7  ;;  %v5118_v30 = vunpack.c.h.s8.bf16 %v4898_v57  ;;  %v5005_v43 = vunpack.c.h.s8.bf16 %v4841_v60  ;;  %v4870_v7 = vld [vmem:[#allocation8 + $0x1f8] sm:$0xff] }
 0x79b   :  { %v5114_v20 = vunpack.c.l.s8.bf16 %v4898_v57  ;;  %v5113_v38 = vunpack.c.l.s8.bf16 %v4897_v61  ;;  %v5062_v5 = vunpack.c.h.s8.bf16 %v4870_v7 }
 0x79c   :  { %v4790_v50 = vadd.f32 %v4774_v21, %v4740_v46  ;;  %5442 = vmatpush1.bf16.msra.mxu0 %v5085_v52  ;;  %v4797_v59 = vmax.f32 %v4789_v28, 0.0  ;;  %v4894_v21 = vld [vmem:[#allocation8 + $0x2b8] sm:$0xff]  ;;  %v5001_v52 = vunpack.c.l.s8.bf16 %v4841_v60  ;;  %v4893_v46 = vld [vmem:[#allocation8 + $0x2b0] sm:$0xff] }
 0x79d   :  { %5443 = vmatprep.subr.bf16.mxu0 %v5082_v39  ;;  %v4869_v39 = vld [vmem:[#allocation8 + $0x1f0] sm:$0xff]  ;;  %v5110_v28 = vunpack.c.h.s8.bf16 %v4894_v21  ;;  %v5105_v34 = vunpack.c.l.s8.bf16 %v4893_v46 }
 0x79e   :  { %v4798_v6 = vmax.f32 %v4790_v50, 0.0  ;;  %v7191_v25 = vpack.c.bf16 %v4797_v59, %v4797_v59  ;;  %v5061_v44 = vunpack.c.h.s8.bf16 %v4869_v39  ;;  %v5109_v50 = vunpack.c.h.s8.bf16 %v4893_v46 }
 0x79f   :  { %v5106_v59 = vunpack.c.l.s8.bf16 %v4894_v21 }
 0x7a0   :  { %5444 = vmatpush1.bf16.msra.mxu0 %v5081_v56  ;;  %v7189_v16 = vpack.c.bf16 %v4798_v6, %v4798_v6  ;;  %v5058_v56 = vunpack.c.l.s8.bf16 %v4870_v7  ;;  %v5057_v6 = vunpack.c.l.s8.bf16 %v4869_v39  ;;  %v4918_v7 = vld [vmem:[#allocation8 + $0x378] sm:$0xff]  ;;  %v4917_v39 = vld [vmem:[#allocation8 + $0x370] sm:$0xff] }
 0x7a1   :  { %5445 = vmatprep.subr.bf16.mxu0 %v5078_v58  ;;  %v4890_v58 = vld [vmem:[#allocation8 + $0x298] sm:$0xff] }
 0x7a2   :  { %5346 = vmatprep.mubr.bf16.mxu1 %v7189_v16 }
 0x7a3   :  { %5347 = vmatmul.mubr.bf16.vlgmr.msra.gmra.mxu1 %v7191_v25 }
 0x7a4   :  { %5397 = vmatpush1.bf16.msra.mxu1 %v5029_v18  ;;  %5428 = vmatprep.mubr.bf16.mxu1 %v7118_v51  ;;  %v5017_v51 = vunpack.c.l.s8.bf16 %v4849_v63  ;;  %v5054_v18 = vunpack.c.h.s8.bf16 %v4866_v37  ;;  %v5586_v63 = vld [vmem:[#allocation13 + $0x38] sm:$0xff] }
 0x7a5   :  { %5446 = vmatpush1.bf16.msra.mxu0 %v5077_v24  ;;  %5398 = vmatprep.subr.bf16.mxu1 %v5026_v48  ;;  %v4865_v24 = vld [vmem:[#allocation8 + $0x1d0] sm:$0xff]  ;;  %v5102_v48 = vunpack.c.h.s8.bf16 %v4890_v58 }
 0x7a6   :  { %5447 = vmatprep.subr.bf16.mxu0 %v5074_v15  ;;  %v4889_v15 = vld [vmem:[#allocation8 + $0x290] sm:$0xff]  ;;  %v5053_v0 = vunpack.c.h.s8.bf16 %v4865_v24 }
 0x7a7   :  { %v5101_v1 = vunpack.c.h.s8.bf16 %v4889_v15  ;;  %v5097_v31 = vunpack.c.l.s8.bf16 %v4889_v15 }
 0x7a8   :  { %5399 = vmatpush1.bf16.msra.mxu1 %v5025_v19  ;;  %v5050_v19 = vunpack.c.l.s8.bf16 %v4866_v37  ;;  %v4914_v37 = vld [vmem:[#allocation8 + $0x358] sm:$0xff] }
 0x7a9   :  { %5448 = vmatpush1.bf16.msra.mxu0 %v5073_v47  ;;  %5400 = vmatprep.subr.bf16.mxu1 %v5022_v62  ;;  %v5098_v47 = vunpack.c.l.s8.bf16 %v4890_v58  ;;  %v4862_v62 = vld [vmem:[#allocation8 + $0x1b8] sm:$0xff] }
 0x7aa   :  { %5449 = vmatprep.subr.bf16.mxu0 %v5070_v27  ;;  %v5049_v27 = vunpack.c.l.s8.bf16 %v4865_v24  ;;  %v5042_v41 = vunpack.c.l.s8.bf16 %v4862_v62  ;;  %v4913_v24 = vld [vmem:[#allocation8 + $0x350] sm:$0xff] }
 0x7ac   :  { %5401 = vmatpush1.bf16.msra.mxu1 %v5021_v23  ;;  %v5046_v23 = vunpack.c.h.s8.bf16 %v4862_v62 }
 0x7ad   :  { %5450 = vmatpush1.bf16.msra.mxu0 %v5069_v29  ;;  %5402 = vmatprep.subr.bf16.mxu1 %v5018_v49  ;;  %v4861_v29 = vld [vmem:[#allocation8 + $0x1b0] sm:$0xff]  ;;  %v5626_v49 = vunpack.c.h.s8.bf16 %v5586_v63 }
 0x7ae   :  { %5451 = vmatprep.subr.bf16.mxu0 %v5066_v40  ;;  %v5585_v40 = vld [vmem:[#allocation13 + $0x30] sm:$0xff]  ;;  %v5045_v14 = vunpack.c.h.s8.bf16 %v4861_v29 }
 0x7af   :  { %v5623_v57 = vunpack.c.l.s8.bf16 %v5585_v40 }
 0x7b0   :  { %5403 = vmatpush1.bf16.msra.mxu1 %v5017_v51  ;;  %v5625_v51 = vunpack.c.h.s8.bf16 %v5585_v40 }
 0x7b1   :  { %5452 = vmatpush1.bf16.msra.mxu0 %v5065_v12  ;;  %5404 = vmatprep.subr.bf16.mxu1 %v5014_v13  ;;  %v4858_v12 = vld [vmem:[#allocation8 + $0x198] sm:$0xff]  ;;  %v5624_v13 = vunpack.c.l.s8.bf16 %v5586_v63  ;;  %v5594_v63 = vld [vmem:[#allocation13 + $0x78] sm:$0xff] }
 0x7b2   :  { %5453 = vmatprep.subr.bf16.mxu0 %v5126_v53  ;;  %v5584_v53 = vld [vmem:[#allocation13 + $0x28] sm:$0xff] }
 0x7b3   :  { %v5620_v21 = vunpack.c.l.s8.bf16 %v5584_v53 }
 0x7b4   :  { %5405 = vmatpush1.bf16.msra.mxu1 %v5013_v55  ;;  %v5041_v55 = vunpack.c.l.s8.bf16 %v4861_v29  ;;  %v5642_v29 = vunpack.c.h.s8.bf16 %v5594_v63 }
 0x7b5   :  { %5454 = vmatpush2.bf16.msra.mxu0 %v5125_v33  ;;  %5406 = vmatprep.subr.bf16.mxu1 %v5010_v36 }
 0x7b6   :  { %5455 = vmatprep.subr.bf16.mxu0 %v5122_v9  ;;  %v5038_v9 = vunpack.c.h.s8.bf16 %v4858_v12 }
 0x7b8   :  { %5407 = vmatpush1.bf16.msra.mxu1 %v5009_v32 }
 0x7b9   :  { %5456 = vmatpush2.bf16.msra.mxu0 %v5121_v26  ;;  %5408 = vmatprep.subr.bf16.mxu1 %v5006_v35  ;;  %v5622_v26 = vunpack.c.h.s8.bf16 %v5584_v53  ;;  %v5583_v35 = vld [vmem:[#allocation13 + $0x20] sm:$0xff] }
 0x7ba   :  { %5457 = vmatprep.subr.bf16.mxu0 %v5118_v30 }
 0x7bc   :  { %5409 = vmatpush1.bf16.msra.mxu1 %v5005_v43  ;;  %v5037_v43 = vunpack.c.h.s8.bf16 %v4857_v54 }
 0x7bd   :  { %5458 = vmatpush2.bf16.msra.mxu0 %v5117_v42  ;;  %5410 = vmatprep.subr.bf16.mxu1 %v5002_v8  ;;  %v5034_v42 = vunpack.c.l.s8.bf16 %v4858_v12  ;;  %v5621_v8 = vunpack.c.h.s8.bf16 %v5583_v35  ;;  %v5640_v12 = vunpack.c.l.s8.bf16 %v5594_v63 }
 0x7be   :  { %5459 = vmatprep.subr.bf16.mxu0 %v5114_v20 }
 0x7c0   :  { %5411 = vmatpush1.bf16.msra.mxu1 %v5001_v52  ;;  %v5582_v52 = vld [vmem:[#allocation13 + $0x18] sm:$0xff] }
 0x7c1   :  { %5460 = vmatpush2.bf16.msra.mxu0 %v5113_v38  ;;  %5412 = vmatprep.subr.bf16.mxu1 %v5062_v5  ;;  %v5033_v38 = vunpack.c.l.s8.bf16 %v4857_v54  ;;  %v5158_v5 = vunpack.c.h.s8.bf16 %v4918_v7  ;;  %v5618_v46 = vunpack.c.h.s8.bf16 %v5582_v52  ;;  %v5616_v58 = vunpack.c.l.s8.bf16 %v5582_v52 }
 0x7c2   :  { %5461 = vmatprep.subr.bf16.mxu0 %v5110_v28  ;;  %v5619_v28 = vunpack.c.l.s8.bf16 %v5583_v35 }
 0x7c4   :  { %5413 = vmatpush2.bf16.msra.mxu1 %v5061_v44  ;;  %v5581_v44 = vld [vmem:[#allocation13 + $0x10] sm:$0xff] }
 0x7c5   :  { %5462 = vmatpush2.bf16.msra.mxu0 %v5109_v50  ;;  %5414 = vmatprep.subr.bf16.mxu1 %v5058_v56  ;;  %v5157_v50 = vunpack.c.h.s8.bf16 %v4917_v39  ;;  %v5154_v56 = vunpack.c.l.s8.bf16 %v4918_v7 }
 0x7c6   :  { %5463 = vmatprep.subr.bf16.mxu0 %v5106_v59  ;;  %v5617_v59 = vunpack.c.h.s8.bf16 %v5581_v44 }
 0x7c8   :  { %5415 = vmatpush2.bf16.msra.mxu1 %v5057_v6  ;;  %v5580_v6 = vld [vmem:[#allocation13 + $0x8] sm:$0xff] }
 0x7c9   :  { %5464 = vmatpush2.bf16.msra.mxu0 %v5105_v34  ;;  %5416 = vmatprep.subr.bf16.mxu1 %v5054_v18  ;;  %v5153_v34 = vunpack.c.l.s8.bf16 %v4917_v39  ;;  %v5150_v18 = vunpack.c.h.s8.bf16 %v4914_v37  ;;  %v5614_v15 = vunpack.c.h.s8.bf16 %v5580_v6  ;;  %v5612_v62 = vunpack.c.l.s8.bf16 %v5580_v6  ;;  %v5588_v39 = vld [vmem:[#allocation13 + $0x48] sm:$0xff] }
 0x7ca   :  { %5465 = vmatprep.subr.bf16.mxu0 %v5102_v48  ;;  %v5615_v48 = vunpack.c.l.s8.bf16 %v5581_v44  ;;  %v4929_v44 = vld [vmem:[#allocation8 + $0x3d0] sm:$0xff] }
 0x7cc   :  { %5417 = vmatpush2.bf16.msra.mxu1 %v5053_v0  ;;  %v5579_v0 = vld [vmem:[#allocation13] sm:$0xff] }
 0x7cd   :  { %5466 = vmatpush2.bf16.msra.mxu0 %v5101_v1  ;;  %5418 = vmatprep.subr.bf16.mxu1 %v5050_v19  ;;  %v5149_v1 = vunpack.c.h.s8.bf16 %v4913_v24  ;;  %v5146_v19 = vunpack.c.l.s8.bf16 %v4914_v37  ;;  %v5181_v37 = vunpack.c.h.s8.bf16 %v4929_v44 }
 0x7ce   :  { %5467 = vmatprep.subr.bf16.mxu0 %v5098_v47  ;;  %v5613_v47 = vunpack.c.h.s8.bf16 %v5579_v0 }
 0x7d0   :  { %5419 = vmatpush2.bf16.msra.mxu1 %v5049_v27 }
 0x7d1   :  { %5468 = vmatpush2.bf16.msra.mxu0 %v5097_v31  ;;  %5420 = vmatprep.subr.bf16.mxu1 %v5046_v23  ;;  %v4909_v31 = vld [vmem:[#allocation8 + $0x330] sm:$0xff]  ;;  %v5611_v23 = vunpack.c.l.s8.bf16 %v5579_v0 }
 0x7d2   :  { %5675 = vmatprep.subr.bf16.mxu0 %v5626_v49  ;;  %v5593_v49 = vld [vmem:[#allocation13 + $0x70] sm:$0xff]  ;;  %v5141_v40 = vunpack.c.h.s8.bf16 %v4909_v31 }
 0x7d3   :  { %v5225_v17 = vpop.f32.mrf.mxu0 }
 0x7d4   :  { %v5266_v3 = vpop.f32.mrf.mxu1  ;;  %5421 = vmatpush2.bf16.msra.mxu1 %v5045_v14  ;;  %5470 = vmatmul.mubr.bf16.vlgmr.msra.gmra.mxu0 %v7170_v45 }
 0x7d5   :  { %v7198_v33 = vadd.f32 %v5266_v3, %v5225_v17  ;;  %v5227_v36 = vpop.f32.mrf.mxu0  ;;  %5422 = vmatprep.subr.bf16.mxu1 %v5042_v41  ;;  %5676 = vmatpush1.bf16.msra.mxu0 %v5625_v51  ;;  %v5641_v41 = vunpack.c.h.s8.bf16 %v5593_v49  ;;  %v4906_v51 = vld [vmem:[#allocation8 + $0x318] sm:$0xff]  ;;  %v5137_v17 = vunpack.c.l.s8.bf16 %v4909_v31  ;;  %v4905_v3 = vld [vmem:[#allocation8 + $0x310] sm:$0xff] }
 0x7d6   :  { %v5268_v32 = vpop.f32.mrf.mxu1  ;;  %5677 = vmatprep.subr.bf16.mxu0 %v5624_v13  ;;  %v5592_v13 = vld [vmem:[#allocation13 + $0x68] sm:$0xff]  ;;  %v5134_v53 = vunpack.c.h.s8.bf16 %v4906_v51  ;;  %v5133_v54 = vunpack.c.h.s8.bf16 %v4905_v3 }
 0x7d7   :  { %v7200_v60 = vadd.f32 %v5268_v32, %v5227_v36  ;;  %v5229_v30 = vpop.f32.mrf.mxu0  ;;  %v5638_v36 = vunpack.c.h.s8.bf16 %v5592_v13  ;;  %v5636_v35 = vunpack.c.l.s8.bf16 %v5592_v13  ;;  %v4921_v31 = vld [vmem:[#allocation8 + $0x390] sm:$0xff] }
 0x7d8   :  { %v5270_v61 = vpop.f32.mrf.mxu1  ;;  %5423 = vmatpush2.bf16.msra.mxu1 %v5041_v55  ;;  %v5639_v55 = vunpack.c.l.s8.bf16 %v5593_v49  ;;  %v5590_v30 = vld [vmem:[#allocation13 + $0x58] sm:$0xff]  ;;  %v5165_v49 = vunpack.c.h.s8.bf16 %v4921_v31 }
 0x7d9   :  { %v5230_v45 = vpop.f32.mrf.mxu0  ;;  %5424 = vmatprep.subr.bf16.mxu1 %v5038_v9  ;;  %5678 = vmatpush1.bf16.msra.mxu0 %v5623_v57  ;;  %v5591_v9 = vld [vmem:[#allocation13 + $0x60] sm:$0xff]  ;;  %v5130_v57 = vunpack.c.l.s8.bf16 %v4906_v51  ;;  %v5129_v61 = vunpack.c.l.s8.bf16 %v4905_v3  ;;  %v5601_v51 = vld [vmem:[#allocation13 + $0xb0] sm:$0xff] }
 0x7da   :  { %v5271_v20 = vpop.f32.mrf.mxu1  ;;  %5679 = vmatprep.subr.bf16.mxu0 %v5622_v26  ;;  %v5637_v32 = vunpack.c.h.s8.bf16 %v5591_v9  ;;  %v4934_v26 = vld [vmem:[#allocation8 + $0x3f8] sm:$0xff]  ;;  %v4933_v45 = vld [vmem:[#allocation8 + $0x3f0] sm:$0xff]  ;;  %v5657_v13 = vunpack.c.h.s8.bf16 %v5601_v51 }
 0x7db   :  { %v5589_v20 = vld [vmem:[#allocation13 + $0x50] sm:$0xff]  ;;  %v5189_v7 = vunpack.c.h.s8.bf16 %v4933_v45 }
 0x7dc   :  { %5425 = vmatpush2.bf16.msra.mxu1 %v5037_v43  ;;  %v5190_v43 = vunpack.c.h.s8.bf16 %v4934_v26  ;;  %v5633_v52 = vunpack.c.h.s8.bf16 %v5589_v20 }
 0x7dd   :  { %5426 = vmatprep.subr.bf16.mxu1 %v5034_v42  ;;  %5680 = vmatpush1.bf16.msra.mxu0 %v5621_v8  ;;  %v5635_v42 = vunpack.c.l.s8.bf16 %v5591_v9  ;;  %v5634_v8 = vunpack.c.h.s8.bf16 %v5590_v30 }
 0x7de   :  { %5681 = vmatprep.subr.bf16.mxu0 %v5620_v21  ;;  %v5186_v21 = vunpack.c.l.s8.bf16 %v4934_v26 }
 0x7e0   :  { %5427 = vmatpush2.bf16.msra.mxu1 %v5033_v38  ;;  %v4930_v38 = vld [vmem:[#allocation8 + $0x3d8] sm:$0xff] }
 0x7e1   :  { %5478 = vmatprep.subr.bf16.mxu1 %v5158_v5  ;;  %5682 = vmatpush1.bf16.msra.mxu0 %v5619_v28  ;;  %v5632_v5 = vunpack.c.l.s8.bf16 %v5590_v30  ;;  %v5185_v28 = vunpack.c.l.s8.bf16 %v4933_v45  ;;  %v5596_v30 = vld [vmem:[#allocation13 + $0x88] sm:$0xff]  ;;  %v5595_v45 = vld [vmem:[#allocation13 + $0x80] sm:$0xff] }
 0x7e2   :  { %5683 = vmatprep.subr.bf16.mxu0 %v5618_v46  ;;  %v5182_v46 = vunpack.c.h.s8.bf16 %v4930_v38 }
 0x7e3   :  { %5429 = vmatmul.mubr.bf16.vlgmr.msra.gmra.mxu1 %v7150_v11  ;;  %v4910_v11 = vld [vmem:[#allocation8 + $0x338] sm:$0xff] }
 0x7e4   :  { %5479 = vmatpush1.bf16.msra.mxu1 %v5157_v50  ;;  %5510 = vmatprep.mubr.bf16.mxu1 %v7189_v16  ;;  %v5145_v16 = vunpack.c.l.s8.bf16 %v4913_v24  ;;  %v5142_v27 = vunpack.c.h.s8.bf16 %v4910_v11  ;;  %v5138_v14 = vunpack.c.l.s8.bf16 %v4910_v11  ;;  %v5631_v50 = vunpack.c.l.s8.bf16 %v5589_v20  ;;  %v5610_v20 = vld [vmem:[#allocation13 + $0xf8] sm:$0xff] }
 0x7e5   :  { %5480 = vmatprep.subr.bf16.mxu1 %v5154_v56  ;;  %5684 = vmatpush1.bf16.msra.mxu0 %v5617_v59  ;;  %v5630_v56 = vunpack.c.h.s8.bf16 %v5588_v39  ;;  %v5587_v59 = vld [vmem:[#allocation13 + $0x40] sm:$0xff]  ;;  %v5177_v24 = vunpack.c.l.s8.bf16 %v4929_v44 }
 0x7e6   :  { %5685 = vmatprep.subr.bf16.mxu0 %v5616_v58  ;;  %v5178_v58 = vunpack.c.l.s8.bf16 %v4930_v38  ;;  %v5629_v6 = vunpack.c.h.s8.bf16 %v5587_v59  ;;  %v5627_v0 = vunpack.c.l.s8.bf16 %v5587_v59  ;;  %v5607_v44 = vld [vmem:[#allocation13 + $0xe0] sm:$0xff] }
 0x7e8   :  { %5481 = vmatpush1.bf16.msra.mxu1 %v5153_v34  ;;  %v4926_v34 = vld [vmem:[#allocation8 + $0x3b8] sm:$0xff] }
 0x7e9   :  { %5482 = vmatprep.subr.bf16.mxu1 %v5150_v18  ;;  %5686 = vmatpush1.bf16.msra.mxu0 %v5615_v48  ;;  %v5628_v18 = vunpack.c.l.s8.bf16 %v5588_v39  ;;  %v5174_v48 = vunpack.c.h.s8.bf16 %v4926_v34  ;;  %v5608_v39 = vld [vmem:[#allocation13 + $0xe8] sm:$0xff] }
 0x7ea   :  { %5687 = vmatprep.subr.bf16.mxu0 %v5614_v15  ;;  %v4925_v15 = vld [vmem:[#allocation8 + $0x3b0] sm:$0xff] }
 0x7eb   :  { %v5169_v63 = vunpack.c.l.s8.bf16 %v4925_v15 }
 0x7ec   :  { %5483 = vmatpush1.bf16.msra.mxu1 %v5149_v1  ;;  %v5173_v1 = vunpack.c.h.s8.bf16 %v4925_v15 }
 0x7ed   :  { %5484 = vmatprep.subr.bf16.mxu1 %v5146_v19  ;;  %5688 = vmatpush1.bf16.msra.mxu0 %v5613_v47  ;;  %v5170_v19 = vunpack.c.l.s8.bf16 %v4926_v34  ;;  %v4922_v47 = vld [vmem:[#allocation8 + $0x398] sm:$0xff] }
 0x7ee   :  { %5689 = vmatprep.subr.bf16.mxu0 %v5612_v62 }
 0x7f0   :  { %5485 = vmatpush1.bf16.msra.mxu1 %v5145_v16 }
 0x7f1   :  { %5486 = vmatprep.subr.bf16.mxu1 %v5142_v27  ;;  %5690 = vmatpush1.bf16.msra.mxu0 %v5611_v23  ;;  %v5166_v27 = vunpack.c.h.s8.bf16 %v4922_v47 }
 0x7f2   :  { %5691 = vmatprep.subr.bf16.mxu0 %v5642_v29 }
 0x7f4   :  { %5487 = vmatpush1.bf16.msra.mxu1 %v5141_v40 }
 0x7f5   :  { %5488 = vmatprep.subr.bf16.mxu1 %v5138_v14  ;;  %5692 = vmatpush2.bf16.msra.mxu0 %v5641_v41  ;;  %v5162_v14 = vunpack.c.l.s8.bf16 %v4922_v47  ;;  %v5161_v41 = vunpack.c.l.s8.bf16 %v4921_v31 }
 0x7f6   :  { %5693 = vmatprep.subr.bf16.mxu0 %v5640_v12 }
 0x7f8   :  { %5489 = vmatpush1.bf16.msra.mxu1 %v5137_v17 }
 0x7f9   :  { %5490 = vmatprep.subr.bf16.mxu1 %v5134_v53  ;;  %5694 = vmatpush2.bf16.msra.mxu0 %v5639_v55  ;;  %v5600_v53 = vld [vmem:[#allocation13 + $0xa8] sm:$0xff]  ;;  %v5599_v55 = vld [vmem:[#allocation13 + $0xa0] sm:$0xff] }
 0x7fa   :  { %5695 = vmatprep.subr.bf16.mxu0 %v5638_v36  ;;  %v5654_v3 = vunpack.c.h.s8.bf16 %v5600_v53  ;;  %v5653_v36 = vunpack.c.h.s8.bf16 %v5599_v55  ;;  %v5652_v9 = vunpack.c.l.s8.bf16 %v5600_v53 }
 0x7fc   :  { %5491 = vmatpush1.bf16.msra.mxu1 %v5133_v54  ;;  %v5598_v54 = vld [vmem:[#allocation13 + $0x98] sm:$0xff] }
 0x7fd   :  { %5492 = vmatprep.subr.bf16.mxu1 %v5130_v57  ;;  %5696 = vmatpush2.bf16.msra.mxu0 %v5637_v32  ;;  %v5651_v57 = vunpack.c.l.s8.bf16 %v5599_v55  ;;  %v5597_v32 = vld [vmem:[#allocation13 + $0x90] sm:$0xff] }
 0x7fe   :  { %5697 = vmatprep.subr.bf16.mxu0 %v5636_v35  ;;  %v5649_v26 = vunpack.c.h.s8.bf16 %v5597_v32  ;;  %v5648_v35 = vunpack.c.l.s8.bf16 %v5598_v54 }
 0x800   :  { %5493 = vmatpush1.bf16.msra.mxu1 %v5129_v61  ;;  %v5647_v61 = vunpack.c.l.s8.bf16 %v5597_v32 }
 0x801   :  { %5494 = vmatprep.subr.bf16.mxu1 %v5190_v43  ;;  %5698 = vmatpush2.bf16.msra.mxu0 %v5635_v42  ;;  %v5646_v43 = vunpack.c.h.s8.bf16 %v5596_v30  ;;  %v5645_v42 = vunpack.c.h.s8.bf16 %v5595_v45 }
 0x802   :  { %5699 = vmatprep.subr.bf16.mxu0 %v5634_v8  ;;  %v5644_v8 = vunpack.c.l.s8.bf16 %v5596_v30 }
 0x804   :  { %5495 = vmatpush2.bf16.msra.mxu1 %v5189_v7  ;;  %v5643_v7 = vunpack.c.l.s8.bf16 %v5595_v45  ;;  %v5796_v45 = vld [vmem:[#allocation17 + $0x38] sm:$0xff] }
 0x805   :  { %5496 = vmatprep.subr.bf16.mxu1 %v5186_v21  ;;  %5700 = vmatpush2.bf16.msra.mxu0 %v5633_v52  ;;  %v5674_v21 = vunpack.c.h.s8.bf16 %v5610_v20  ;;  %v5609_v52 = vld [vmem:[#allocation13 + $0xf0] sm:$0xff] }
 0x806   :  { %5701 = vmatprep.subr.bf16.mxu0 %v5632_v5  ;;  %v5673_v38 = vunpack.c.h.s8.bf16 %v5609_v52  ;;  %v5672_v5 = vunpack.c.l.s8.bf16 %v5610_v20 }
 0x808   :  { %5497 = vmatpush2.bf16.msra.mxu1 %v5185_v28  ;;  %v5671_v28 = vunpack.c.l.s8.bf16 %v5609_v52 }
 0x809   :  { %5498 = vmatprep.subr.bf16.mxu1 %v5182_v46  ;;  %5702 = vmatpush2.bf16.msra.mxu0 %v5631_v50  ;;  %v5670_v46 = vunpack.c.h.s8.bf16 %v5608_v39  ;;  %v5669_v50 = vunpack.c.h.s8.bf16 %v5607_v44 }
 0x80a   :  { %5703 = vmatprep.subr.bf16.mxu0 %v5630_v56  ;;  %v5668_v56 = vunpack.c.l.s8.bf16 %v5608_v39 }
 0x80c   :  { %5499 = vmatpush2.bf16.msra.mxu1 %v5181_v37  ;;  %v5606_v37 = vld [vmem:[#allocation13 + $0xd8] sm:$0xff] }
 0x80d   :  { %5500 = vmatprep.subr.bf16.mxu1 %v5178_v58  ;;  %5704 = vmatpush2.bf16.msra.mxu0 %v5629_v6  ;;  %v5667_v6 = vunpack.c.l.s8.bf16 %v5607_v44  ;;  %v5666_v34 = vunpack.c.h.s8.bf16 %v5606_v37 }
 0x80e   :  { %5705 = vmatprep.subr.bf16.mxu0 %v5628_v18  ;;  %v5605_v18 = vld [vmem:[#allocation13 + $0xd0] sm:$0xff] }
 0x80f   :  { %v5665_v15 = vunpack.c.h.s8.bf16 %v5605_v18  ;;  %v5663_v31 = vunpack.c.l.s8.bf16 %v5605_v18 }
 0x810   :  { %5501 = vmatpush2.bf16.msra.mxu1 %v5177_v24 }
 0x811   :  { %5502 = vmatprep.subr.bf16.mxu1 %v5174_v48  ;;  %5706 = vmatpush2.bf16.msra.mxu0 %v5627_v0  ;;  %v7215_v0 = vld [vmem:[#allocation10] sm:$0xf] }
 0x813   :  { %v5307_v11 = vpop.f32.mrf.mxu0 }
 0x814   :  { %v7205_v62 = vadd.f32 %v5307_v11, %v7198_v33  ;;  %5503 = vmatpush2.bf16.msra.mxu1 %v5173_v1  ;;  %v5602_v33 = vld [vmem:[#allocation13 + $0xb8] sm:$0xff]  ;;  %v5664_v11 = vunpack.c.l.s8.bf16 %v5606_v37 }
 0x815   :  { %v5309_v16 = vpop.f32.mrf.mxu0  ;;  %5504 = vmatprep.subr.bf16.mxu1 %v5170_v19  ;;  %v5658_v12 = vunpack.c.h.s8.bf16 %v5602_v33  ;;  %v5656_v17 = vunpack.c.l.s8.bf16 %v5602_v33  ;;  %v7217_v1 = vld [vmem:[#allocation11] sm:$0xf]  ;;  %v5524_v19 = vrot.slane %v7215_v0, %v7129_v4 }
 0x816   :  { %v7208_v23 = vadd.f32 %v5309_v16, %v7200_v60  ;;  %v5655_v60 = vunpack.c.l.s8.bf16 %v5601_v51  ;;  %v5550_v16 = vrot.slane %v7217_v1, %v7129_v4 }
 0x817   :  { %v5311_v29 = vpop.f32.mrf.mxu0 }
 0x818   :  { %5505 = vmatpush2.bf16.msra.mxu1 %v5169_v63 }
 0x819   :  { %v5312_v40 = vpop.f32.mrf.mxu0  ;;  %5506 = vmatprep.subr.bf16.mxu1 %v5166_v27  ;;  %v5528_v27 = vrot.slane %v7215_v0, %v7095_v10 }
 0x81c   :  { %5507 = vmatpush2.bf16.msra.mxu1 %v5165_v49 }
 0x81d   :  { %5508 = vmatprep.subr.bf16.mxu1 %v5162_v14  ;;  %v5554_v14 = vrot.slane %v7217_v1, %v7095_v10 }
 0x820   :  { %5509 = vmatpush2.bf16.msra.mxu1 %v5161_v41  ;;  %v5604_v41 = vld [vmem:[#allocation13 + $0xc8] sm:$0xff] }
 0x821   :  { %5716 = vmatprep.subr.bf16.mxu1 %v5658_v12  ;;  %v5662_v51 = vunpack.c.h.s8.bf16 %v5604_v41  ;;  %v5660_v55 = vunpack.c.l.s8.bf16 %v5604_v41 }
 0x823   :  { %5511 = vmatmul.mubr.bf16.vlgmr.msra.gmra.mxu1 %v7191_v25  ;;  %v5650_v25 = vunpack.c.h.s8.bf16 %v5598_v54 }
 0x824   :  { %5717 = vmatpush1.bf16.msra.mxu1 %v5657_v13 }
 0x825   :  { %5718 = vmatprep.subr.bf16.mxu1 %v5656_v17 }
 0x828   :  { %5719 = vmatpush1.bf16.msra.mxu1 %v5655_v60 }
 0x829   :  { %5720 = vmatprep.subr.bf16.mxu1 %v5654_v3 }
 0x82c   :  { %5721 = vmatpush1.bf16.msra.mxu1 %v5653_v36 }
 0x82d   :  { %5722 = vmatprep.subr.bf16.mxu1 %v5652_v9 }
 0x830   :  { %5723 = vmatpush1.bf16.msra.mxu1 %v5651_v57 }
 0x831   :  { %5724 = vmatprep.subr.bf16.mxu1 %v5650_v25 }
 0x834   :  { %5725 = vmatpush1.bf16.msra.mxu1 %v5649_v26 }
 0x835   :  { %5726 = vmatprep.subr.bf16.mxu1 %v5648_v35 }
 0x838   :  { %5727 = vmatpush1.bf16.msra.mxu1 %v5647_v61 }
 0x839   :  { %5728 = vmatprep.subr.bf16.mxu1 %v5646_v43 }
 0x83c   :  { %5729 = vmatpush1.bf16.msra.mxu1 %v5645_v42  ;;  %v5792_v42 = vld [vmem:[#allocation17 + $0x18] sm:$0xff] }
 0x83d   :  { %5730 = vmatprep.subr.bf16.mxu1 %v5644_v8  ;;  %v5812_v8 = vunpack.c.h.s8.bf16 %v5796_v45  ;;  %v5804_v20 = vunpack.c.h.s8.bf16 %v5792_v42  ;;  %v5803_v52 = vunpack.c.l.s8.bf16 %v5792_v42 }
 0x83f   :  { %6089 = vmatprep.subr.bf16.mxu0 %v5812_v8 }
 0x840   :  { %5731 = vmatpush1.bf16.msra.mxu1 %v5643_v7  ;;  %v5811_v7 = vunpack.c.l.s8.bf16 %v5796_v45 }
 0x841   :  { %5732 = vmatprep.subr.bf16.mxu1 %v5674_v21  ;;  %v5795_v21 = vld [vmem:[#allocation17 + $0x30] sm:$0xff] }
 0x844   :  { %5733 = vmatpush2.bf16.msra.mxu1 %v5673_v38  ;;  %v5810_v38 = vunpack.c.h.s8.bf16 %v5795_v21 }
 0x845   :  { %5734 = vmatprep.subr.bf16.mxu1 %v5672_v5  ;;  %v5791_v5 = vld [vmem:[#allocation17 + $0x10] sm:$0xff] }
 0x846   :  { %v5802_v39 = vunpack.c.h.s8.bf16 %v5791_v5  ;;  %v5801_v44 = vunpack.c.l.s8.bf16 %v5791_v5 }
 0x848   :  { %5735 = vmatpush2.bf16.msra.mxu1 %v5671_v28  ;;  %v5809_v28 = vunpack.c.l.s8.bf16 %v5795_v21 }
 0x849   :  { %5736 = vmatprep.subr.bf16.mxu1 %v5670_v46  ;;  %v5794_v46 = vld [vmem:[#allocation17 + $0x28] sm:$0xff] }
 0x84c   :  { %5737 = vmatpush2.bf16.msra.mxu1 %v5669_v50  ;;  %v5808_v50 = vunpack.c.h.s8.bf16 %v5794_v46 }
 0x84d   :  { %5738 = vmatprep.subr.bf16.mxu1 %v5668_v56  ;;  %v5790_v56 = vld [vmem:[#allocation17 + $0x8] sm:$0xff] }
 0x84e   :  { %v5800_v37 = vunpack.c.h.s8.bf16 %v5790_v56 }
 0x850   :  { %5739 = vmatpush2.bf16.msra.mxu1 %v5667_v6 }
 0x851   :  { %5740 = vmatprep.subr.bf16.mxu1 %v5666_v34 }
 0x853   :  { %v7211_v59 = vpop.f32.mrf.mxu0 }
 0x854   :  { %5741 = vmatpush2.bf16.msra.mxu1 %v5665_v15 }
 0x855   :  { %v7213_v58 = vpop.f32.mrf.mxu0  ;;  %5742 = vmatprep.subr.bf16.mxu1 %v5664_v11  ;;  %v5536_v11 = vrot.slane %v7215_v0, %v7098_v2 }
 0x857   :  { %v5393_v24 = vpop.f32.mrf.mxu0 }
 0x858   :  { %5743 = vmatpush2.bf16.msra.mxu1 %v5663_v31  ;;  %v5532_v24 = vrot.slane %v7215_v0, %v7132_v22  ;;  %v5799_v0 = vunpack.c.l.s8.bf16 %v5790_v56 }
 0x859   :  { %v5394_v48 = vpop.f32.mrf.mxu0  ;;  %5744 = vmatprep.subr.bf16.mxu1 %v5662_v51 }
 0x863   :  { %v5348_v47 = vpop.f32.mrf.mxu1 }
 0x864   :  { %v5349_v63 = vadd.f32 %v5348_v47, %v7205_v62  ;;  %v5603_v62 = vld [vmem:[#allocation13 + $0xc0] sm:$0xff] }
 0x865   :  { %v5350_v29 = vpop.f32.mrf.mxu1  ;;  %v5661_v17 = vunpack.c.h.s8.bf16 %v5603_v62  ;;  %v5659_v9 = vunpack.c.l.s8.bf16 %v5603_v62  ;;  %v5807_v62 = vunpack.c.l.s8.bf16 %v5794_v46 }
 0x866   :  { %v5541_v49 = vmul.f32 %v5524_v19, %v5349_v63  ;;  %v5351_v40 = vadd.f32 %v5350_v29, %v7208_v23  ;;  %v5558_v19 = vrot.slane %v7217_v1, %v7132_v22 }
 0x867   :  { %v5352_v33 = vpop.f32.mrf.mxu1  ;;  %5745 = vmatpush2.bf16.msra.mxu1 %v5661_v17 }
 0x868   :  { %v5567_v12 = vadd.f32 %v5550_v16, %v5541_v49  ;;  %v5542_v13 = vmul.f32 %v5528_v27, %v5351_v40  ;;  %5746 = vmatprep.subr.bf16.mxu1 %v5660_v55 }
 0x869   :  { %v5353_v53 = vpop.f32.mrf.mxu1 }
 0x86a   :  { %v5568_v60 = vadd.f32 %v5554_v14, %v5542_v13  ;;  %v5571_v3 = vmax.f32 %v5567_v12, 0.0  ;;  %v5793_v13 = vld [vmem:[#allocation17 + $0x20] sm:$0xff] }
 0x86b   :  { %5747 = vmatpush2.bf16.msra.mxu1 %v5659_v9  ;;  %v6582_v9 = vmov 0.0  }
 0x86c   :  { %v5572_v36 = vmax.f32 %v5568_v60, 0.0  ;;  %v5575_v54 = vpack.c.bf16 %v5571_v3, %v5571_v3  ;;  %v5805_v3 = vunpack.c.l.s8.bf16 %v5793_v13  ;;  %6125 = vmatprep.subr.bf16.mxu1 %v6582_v9 }
 0x86e   :  { %v5576_v23 = vpack.c.bf16 %v5572_v36, %v5572_v36  ;;  %v5874_v36 = vld [vmem:[%s7312_s13 + $0x18] sm:$0xff] }
 0x870   :  { %5707 = vmatprep.mubr.bf16.mxu0 %v5576_v23  ;;  %v5882_v23 = vunpack.c.h.s8.bf16 %v5874_v36 }
 0x871   :  { %5708 = vmatmul.mubr.bf16.vlgmr.msra.gmra.mxu0 %v5575_v54  ;;  %v5881_v54 = vunpack.c.l.s8.bf16 %v5874_v36  ;;  %v6080_v36 = vld [vmem:[#allocation22] ss:$0 sm:$0xff] }
 0x872   :  { %6090 = vmatpush3.bf16.msra.mxu0 %v5804_v20 }
 0x873   :  { %6091 = vmatprep.subr.bf16.mxu0 %v5811_v7 }
 0x876   :  { %6092 = vmatpush3.bf16.msra.mxu0 %v5803_v52 }
 0x877   :  { %6093 = vmatprep.subr.bf16.mxu0 %v5810_v38 }
 0x87a   :  { %6094 = vmatpush3.bf16.msra.mxu0 %v5802_v39 }
 0x87b   :  { %6095 = vmatprep.subr.bf16.mxu0 %v5809_v28 }
 0x87e   :  { %6096 = vmatpush3.bf16.msra.mxu0 %v5801_v44 }
 0x87f   :  { %6097 = vmatprep.subr.bf16.mxu0 %v5808_v50 }
 0x882   :  { %6098 = vmatpush3.bf16.msra.mxu0 %v5800_v37 }
 0x883   :  { %6099 = vmatprep.subr.bf16.mxu0 %v5807_v62 }
 0x886   :  { %6100 = vmatpush3.bf16.msra.mxu0 %v5799_v0  ;;  %v5943_v0 = vld [vmem:[%s7315_s16 + $0x4] sm:$0x3] }
 0x894   :  { %v5471_v57 = vpop.f32.mrf.mxu0 }
 0x896   :  { %v5473_v25 = vpop.f32.mrf.mxu0 }
 0x898   :  { %v5475_v32 = vpop.f32.mrf.mxu0 }
 0x89a   :  { %v5476_v26 = vpop.f32.mrf.mxu0 }
 0x89b   :  { %v5872_v26 = vld [vmem:[%s7312_s13 + $0x8] sm:$0xff] }
 0x8a3   :  { %v5430_v35 = vpop.f32.mrf.mxu1 }
 0x8a4   :  { %v5431_v6 = vadd.f32 %v5430_v35, %v7211_v59  ;;  %v5562_v59 = vrot.slane %v7217_v1, %v7098_v2  ;;  %v5806_v2 = vunpack.c.h.s8.bf16 %v5793_v13  ;;  %v5789_v1 = vld [vmem:[#allocation17] sm:$0xff]  ;;  %v5878_v35 = vunpack.c.h.s8.bf16 %v5872_v26 }
 0x8a5   :  { %v5432_v30 = vpop.f32.mrf.mxu1  ;;  %v5798_v53 = vunpack.c.h.s8.bf16 %v5789_v1  ;;  %v5797_v55 = vunpack.c.l.s8.bf16 %v5789_v1  ;;  %v5951_v13 = vunpack.c.l.s8.bf16 %v5943_v0  ;;  %v5941_v1 = vld [vmem:[%s7315_s16] sm:$0x3] }
 0x8a6   :  { %v5433_v34 = vadd.f32 %v5432_v30, %v7213_v58  ;;  %v5472_v18 = vadd.f32 %v5471_v57, %v5431_v6  ;;  %6101 = vmatprep.subr.bf16.mxu0 %v5806_v2  ;;  %v5873_v57 = vld [vmem:[%s7312_s13 + $0x10] sm:$0xff]  ;;  %v5757_v30 = vld [vmem:[#allocation14] sm:$0x3] }
 0x8a7   :  { %v5434_v61 = vpop.f32.mrf.mxu1  ;;  %6102 = vmatpush3.bf16.msra.mxu0 %v5798_v53  ;;  %v5879_v32 = vunpack.c.l.s8.bf16 %v5873_v57  ;;  %v5766_v20 = vrot.slane %v5757_v30, %v7095_v10  ;;  %v5942_v53 = vld [vmem:[%s7315_s16 + $0x2] sm:$0x3] }
 0x8a8   :  { %v5474_v47 = vadd.f32 %v5473_v25, %v5433_v34  ;;  %6103 = vmatprep.subr.bf16.mxu0 %v5805_v3  ;;  %v5880_v25 = vunpack.c.h.s8.bf16 %v5873_v57  ;;  %v5771_v61 = vld [vmem:[#allocation16] sm:$0x3]  ;;  %v5877_v34 = vunpack.c.l.s8.bf16 %v5872_v26  ;;  %v5950_v3 = vunpack.c.l.s8.bf16 %v5942_v53 }
 0x8a9   :  { %v5435_v43 = vpop.f32.mrf.mxu1  ;;  %v5776_v8 = vrot.slane %v5771_v61, %v7129_v4  ;;  %v5780_v38 = vrot.slane %v5771_v61, %v7095_v10 }
 0x8aa   :  { %v5762_v43 = vrot.slane %v5757_v30, %v7129_v4  ;;  %v5871_v4 = vld [vmem:[%s7312_s13] sm:$0xff] }
 0x8ab   :  { %6104 = vmatpush3.bf16.msra.mxu0 %v5797_v55  ;;  %v5876_v10 = vunpack.c.h.s8.bf16 %v5871_v4 }
 0x8ac   :  { %6145 = vmatprep.subr.bf16.mxu0 %v6582_v9 }
 0x8e3   :  { %v5512_v48 = vpop.f32.mrf.mxu1 }
 0x8e4   :  { %v5513_v15 = vadd.f32 %v5512_v48, %v5472_v18  ;;  %v5875_v18 = vunpack.c.l.s8.bf16 %v5871_v4  ;;  %v5948_v48 = vld [vmem:[%s7315_s16 + $0xe] sm:$0x3] }
 0x8e5   :  { %v5514_v63 = vpop.f32.mrf.mxu1 }
 0x8e6   :  { %v5543_v16 = vmul.f32 %v5532_v24, %v5513_v15  ;;  %v5515_v27 = vadd.f32 %v5514_v63, %v5474_v47  ;;  %v5947_v24 = vld [vmem:[%s7315_s16 + $0xc] sm:$0x3]  ;;  %v5945_v15 = vld [vmem:[%s7315_s16 + $0x8] sm:$0x3]  ;;  %v5956_v47 = vunpack.c.l.s8.bf16 %v5948_v48 }
 0x8e7   :  { %v5516_v58 = vpop.f32.mrf.mxu1  ;;  %v5953_v63 = vunpack.c.l.s8.bf16 %v5945_v15 }
 0x8e8   :  { %v5569_v31 = vadd.f32 %v5558_v19, %v5543_v16  ;;  %v5544_v29 = vmul.f32 %v5536_v11, %v5515_v27  ;;  %v5955_v19 = vunpack.c.l.s8.bf16 %v5947_v24  ;;  %v5946_v11 = vld [vmem:[%s7315_s16 + $0xa] sm:$0x3] }
 0x8e9   :  { %v5517_v49 = vpop.f32.mrf.mxu1  ;;  %v5954_v16 = vunpack.c.l.s8.bf16 %v5946_v11 }
 0x8ea   :  { %v5570_v40 = vadd.f32 %v5562_v59, %v5544_v29  ;;  %v5573_v14 = vmax.f32 %v5569_v31, 0.0  ;;  %v6085_v27 = vcombine.low %v5955_v19, %v5956_v47  ;;  %v6078_v29 = vld [vmem:[#allocation19] ss:$0 sm:$0xff] }
 0x8eb   :  { %v6084_v59 = vcombine.low %v5953_v63, %v5954_v16 }
 0x8ec   :  { %v5574_v41 = vmax.f32 %v5570_v40, 0.0  ;;  %v5577_v51 = vpack.c.bf16 %v5573_v14, %v5573_v14  ;;  %v6079_v40 = vld [vmem:[#allocation20] ss:$0 sm:$0xff] }
 0x8ee   :  { %v5578_v33 = vpack.c.bf16 %v5574_v41, %v5574_v41 }
 0x8f0   :  { %5748 = vmatprep.mubr.bf16.mxu1 %v5578_v33 }
 0x8f1   :  { %5749 = vmatmul.mubr.bf16.vlgmr.msra.gmra.mxu1 %v5577_v51 }
 0x8f2   :  { %6126 = vmatpush3.bf16.msra.mxu1 %v5882_v23  ;;  %6141 = vmatprep.mubr.msk.bf16.mxu1 %vm6583_vm0, %v6582_v9 }
 0x8f3   :  { %6127 = vmatprep.subr.bf16.mxu1 %v6582_v9 }
 0x8f6   :  { %6128 = vmatpush3.bf16.msra.mxu1 %v5881_v54  ;;  %v6081_v54 = vld [vmem:[#allocation23] ss:$0 sm:$0xff] }
 0x8f7   :  { %6129 = vmatprep.subr.bf16.mxu1 %v6582_v9 }
 0x8fa   :  { %6130 = vmatpush3.bf16.msra.mxu1 %v5880_v25 }
 0x8fb   :  { %6131 = vmatprep.subr.bf16.mxu1 %v6582_v9 }
 0x8fe   :  { %6132 = vmatpush3.bf16.msra.mxu1 %v5879_v32 }
 0x8ff   :  { %6133 = vmatprep.subr.bf16.mxu1 %v6582_v9 }
 0x902   :  { %6134 = vmatpush3.bf16.msra.mxu1 %v5878_v35 }
 0x903   :  { %6135 = vmatprep.subr.bf16.mxu1 %v6582_v9 }
 0x906   :  { %6136 = vmatpush3.bf16.msra.mxu1 %v5877_v34 }
 0x907   :  { %6137 = vmatprep.subr.bf16.mxu1 %v6582_v9 }
 0x90a   :  { %6138 = vmatpush3.bf16.msra.mxu1 %v5876_v10 }
 0x90b   :  { %6139 = vmatprep.subr.bf16.mxu1 %v6582_v9 }
 0x90e   :  { %6140 = vmatpush3.bf16.msra.mxu1 %v5875_v18 }
 0x931   :  { %v5709_v22 = vpop.f32.mrf.mxu0 }
 0x933   :  { %v5711_v12 = vpop.f32.mrf.mxu0 }
 0x935   :  { %v5713_v17 = vpop.f32.mrf.mxu0 }
 0x937   :  { %v5714_v60 = vpop.f32.mrf.mxu0 }
 0x938   :  { %v5949_v60 = vunpack.c.l.s8.bf16 %v5941_v1 }
 0x93a   :  { %v6082_v55 = vcombine.low %v5949_v60, %v5950_v3 }
 0x9b1   :  { %v5750_v45 = vpop.f32.mrf.mxu1 }
 0x9b2   :  { %v5751_v42 = vadd.f32 %v5750_v45, %v5709_v22 }
 0x9b3   :  { %v5752_v7 = vpop.f32.mrf.mxu1 }
 0x9b4   :  { %v5769_v21 = vmul.f32 %v5762_v43, %v5751_v42  ;;  %v5753_v52 = vadd.f32 %v5752_v7, %v5711_v12  ;;  %v5944_v12 = vld [vmem:[%s7315_s16 + $0x6] sm:$0x3]  ;;  %v6087_v43 = vld [vmem:[#allocation25] ss:$0 sm:$0xff]  ;;  %s6584_s16 = smov [#allocation28]  }
 0x9b5   :  { %v5754_v5 = vpop.f32.mrf.mxu1  ;;  %v5952_v17 = vunpack.c.l.s8.bf16 %v5944_v12  ;;  %v6088_v42 = vld [vmem:[#allocation26] ss:$0 sm:$0xff]  ;;  %s6061_s0 = sshll.u32 %s6584_s16, 4  ;;  %s6062_s0 = int_to_ptr.vmem [resolvable:$true] %s6061_s0 }
 0x9b6   :  { %v5783_v39 = vadd.f32 %v5776_v8, %v5769_v21  ;;  %v5770_v28 = vmul.f32 %v5766_v20, %v5753_v52  ;;  %s6517_s20 = scalar_lea.vmem %s6062_s0, 32  ;;  %p6522_p11 = scmp.lt.s32.totalorder %s6062_s0, %s6062_s0 }
 0x9b7   :  { %v5755_v46 = vpop.f32.mrf.mxu1  ;;  %v6083_v2 = vcombine.low %v5951_v13, %v5952_v17  ;;  %p6518_p10 = scmp.ne.s32.totalorder %s6062_s0, %s6517_s20  ;;  %p6523_p12 = scmp.lt.s32.totalorder %s6517_s20, %s6517_s20 }
 0x9b8   :  { %v5784_v44 = vadd.f32 %v5780_v38, %v5770_v28  ;;  %v5785_v50 = vmax.f32 %v5783_v39, 0.0 }
 0x9b9   :  { %p6524_p13 = por %p6523_p12, %p6522_p11 }
 0x9ba   :  { %v5786_v56 = vmax.f32 %v5784_v44, 0.0  ;;  %v5787_v6 = vpack.c.bf16 %v5785_v50, %v5785_v50 }
 0x9bb   :  { %p6525_p0 = pnand %p6524_p13, %p6518_p10 }
 0x9bc   :  { %v5788_v37 = vpack.c.bf16 %v5786_v56, %v5786_v56 }
 0x9be   :  { %5845 = vmatprep.mubr.bf16.mxu0 %v5788_v37 }
 0x9bf   :  { %5846 = vmatmul.mubr.bf16.vlgmr.msra.gmra.mxu0 %v5787_v6 }
 0x9c0   :  { %6153 = vmatprep.mubr.msk.bf16.mxu0 %vm6583_vm0, %v6582_v9  ;;  %6146 = vmatpush3.bf16.msra.mxu0 %v6085_v27 }
 0x9c1   :  { %6147 = vmatprep.subr.bf16.mxu0 %v6582_v9 }
 0x9c4   :  { %6148 = vmatpush3.bf16.msra.mxu0 %v6084_v59 }
 0x9c5   :  { %6149 = vmatprep.subr.bf16.mxu0 %v6582_v9 }
 0x9c8   :  { %6150 = vmatpush3.bf16.msra.mxu0 %v6083_v2 }
 0x9c9   :  { %6151 = vmatprep.subr.bf16.mxu0 %v6582_v9 }
 0x9cc   :  { %6152 = vmatpush3.bf16.msra.mxu0 %v6082_v55 }
 0xa7f   :  { %v6105_v58 = vpop.f32.mrf.mxu0 }
 0xa81   :  { %v6106_v31 = vpop.f32.mrf.mxu0 }
 0xa82   :  { %v6107_v49 = vadd.f32 %v6106_v31, %v6105_v58 }
 0xa83   :  { %v6108_v14 = vpop.f32.mrf.mxu0 }
 0xa84   :  { %v5860_v41 = vmul.f32 %v6107_v49, %v6078_v29 }
 0xa85   :  { %v6109_v33 = vpop.f32.mrf.mxu0 }
 0xa86   :  { %v5868_v51 = vadd.f32 %v6079_v40, %v5860_v41 }
 0xa88   :  { %v5869_v22 = vmax.f32 %v5868_v51, 0.0 }
 0xa8a   :  { %v5870_v62 = vpack.c.bf16 %v5869_v22, %v5869_v22 }
 0xa8c   :  { %6142 = vmatmul.mubr.bf16.vlgmr.msra.gmra.mxu1 %v5870_v62 }
 0xb4c   :  { %v5917_v23 = vpop.f32.mrf.mxu1 }
 0xb4d   :  { %v5930_v57 = vmul.f32 %v6080_v36, %v5917_v23 }
 0xb4e   :  { %v6143_v25 = vpop.f32.mrf.mxu1 }
 0xb4f   :  { %v5938_v32 = vadd.f32 %v6081_v54, %v5930_v57 }
 0xb50   :  { %v5920_v26 = vpop.f32.mrf.mxu1 }
 0xb51   :  { %v5939_v35 = vmax.f32 %v5938_v32, 0.0 }
 0xb52   :  { %v6144_v30 = vpop.f32.mrf.mxu1 }
 0xb53   :  { %v5940_v61 = vpack.c.bf16 %v5939_v35, %v5939_v35 }
 0xb55   :  { %6154 = vmatmul.mubr.msk.bf16.vlgmr.msra.gmra.mxu0 %vm5981_vm1, %v5940_v61 }
 0xc15   :  { %v6019_v45 = vpop.f32.mrf.mxu0 }
 0xc16   :  { %v6032_v8 = vmul.f32 %v6087_v43, %v6019_v45 }
 0xc17   :  { %v6155_v20 = vpop.f32.mrf.mxu0 }
 0xc18   :  { %v6040_v9 = vadd.f32 %v6088_v42, %v6032_v8 }
 0xc19   :  { %v6022_v7 = vpop.f32.mrf.mxu0 }
 0xc1a   :  { %v6042_v21 = vsel %vm6041_vm2, %v6040_v9, -inf }
 0xc1b   :  { %6043 = vmax.xlane.f32.xlu0 %v6042_v21  ;;  %v6156_v52 = vpop.f32.mrf.mxu0 }
 0xca4   :  { %v6044_v38 = vpop.xlane.xlu0 %6043 }
 0xca5   :  { %v6045_v5 = vsub.f32 %v6040_v9, %v6044_v38 }
 0xca7   :  { %v6046_v39 = vmul.f32 1.442695, %v6045_v5 }
 0xca9   :  { %6191 = vpow2.f32 %v6046_v39 }
 0xcb6   :  { %v6192_v28 = vpop.eup %6191 }
 0xcb7   :  { %v6048_v46 = vsel %vm6041_vm2, %v6192_v28, 0.0 }
 0xcb8   :  { %6049 = vadd.xlane.f32.xlu0 %v6048_v46 }
 0xd41   :  { %v6050_v44 = vpop.xlane.xlu0 %6049 }
 0xd42   :  { %6193 = vlog2.f32 %v6050_v44 }
 0xd4f   :  { %v6194_v50 = vpop.eup %6193 }
 0xd50   :  { %v6052_v56 = vmul.f32 0.6931472, %v6194_v50 }
 0xd52   :  { %v6053_v37 = vsub.f32 %v6045_v5, %v6052_v56 }
 0xd54   :  { %6054 = vst.msk [vmem:[#allocation28] sm:$0x3] %vm6041_vm2, %v6053_v37 }
 0xd55   :  { %6528 = shalt.err (!%p6525_p0)
}
 0xd56   :  { %6064 = dma.vmem_to_hbm [thread:$0]  %s6062_s0, 32, %s7318_s19, [#allocation4]  }
 0xd57   :  { %6555 = dma.done.wait [#allocation4], 32  }
 0xd58   :  { %6556 = vsyncadd [#allocation4], 4294967264 }
 0xd59   :  { %6068 = vsyncpa [#allocation3], 1 }
 0xd5a   :  { %6069 = vsyncpa [#allocation6], 1 }
 0xd5b   :  { %6070 = vsyncpa [#allocation9], 1 }
 0xd5c   :  { %6071 = vsyncpa [#allocation12], 1 }
 0xd5d   :  { %6072 = vsyncpa [#allocation15], 1 }
 0xd5e   :  { %6073 = vsyncpa [#allocation18], 1 }
 0xd5f   :  { %6074 = vsyncpa [#allocation21], 1 }
 0xd60   :  { %6075 = vsyncpa [#allocation24], 1 }
 0xd61   :  { %6076 = vsyncpa [#allocation27], 1 }
 0xd62   :  { %6077 = vsyncpa [#allocation4], 1 }

</bundles_post_ra>
